<compile_context>
chip_gen: v5e
topology: v5e:2x2
jax: 0.10.0
libtpu: 0.0.40
codegen_flags: <defaults>
</compile_context>

<pallas_src>
import functools

import numpy as np
import jax
import jax.numpy as jnp
from jax import lax
from jax.experimental import pallas as pl
from jax.experimental.pallas import tpu as pltpu


# ----------------------------------------------------------------------------
# Tiling helpers
# ----------------------------------------------------------------------------
def _round_up(x, m):
    return ((x + m - 1) // m) * m


def _tile_and_pad(dim, max_tile, quantum):
    """Pick a tile (multiple of `quantum`, <= max_tile) and the padded dim it divides."""
    dp = _round_up(dim, quantum)
    if dp <= max_tile:
        return dp, dp
    t = (max_tile // quantum) * quantum
    while t >= quantum:
        if dp % t == 0 and t * 4 >= max_tile:
            return t, dp
        t -= quantum
    t = (max_tile // quantum) * quantum
    return t, _round_up(dp, t)


# ----------------------------------------------------------------------------
# Fused (BN+ReLU prologue) -> matmul -> (BN+ReLU epilogue) kernel
# ----------------------------------------------------------------------------
def _conv_mm_kernel(a_ref, w_ref, si_ref, bi_ref, so_ref, bo_ref, o_ref, acc_ref,
                    *, fuse_in, fuse_out):
    k = pl.program_id(2)

    @pl.when(k == 0)
    def _init():
        acc_ref[...] = jnp.zeros_like(acc_ref)

    if fuse_in:
        a = a_ref[...].astype(jnp.float32) * si_ref[...] + bi_ref[...]
        a = jnp.maximum(a, 0.0).astype(jnp.bfloat16)
    else:
        a = a_ref[...]
    acc_ref[...] += jnp.dot(a, w_ref[...], preferred_element_type=jnp.float32)

    @pl.when(k == pl.num_programs(2) - 1)
    def _finalize():
        y = acc_ref[...]
        if fuse_out:
            y = jnp.maximum(y * so_ref[...] + bo_ref[...], 0.0)
        o_ref[...] = y.astype(o_ref.dtype)


def fused_matmul(a, w, *, in_scale=None, in_bias=None, out_scale=None, out_bias=None,
                 out_dtype=jnp.bfloat16):
    """y = epilogue( prologue(a) @ w ); a:(M,K) bf16, w:(K,N) bf16, scales/biases f32 rows."""
    m, k = a.shape
    k2, n = w.shape
    assert k == k2
    fuse_in = in_scale is not None
    fuse_out = out_scale is not None

    tm, mp = _tile_and_pad(m, 256, 8)
    tn, np_ = _tile_and_pad(n, 256, 128)
    tk, kp = _tile_and_pad(k, 512, 128)

    a_p = a if (mp == m and kp == k) else jnp.pad(a, ((0, mp - m), (0, kp - k)))
    w_p = w if (kp == k and np_ == n) else jnp.pad(w, ((0, kp - k), (0, np_ - n)))

    def vec(v, dim_p, dim):
        if v is None:
            return jnp.zeros((1, dim_p), jnp.float32)
        v = v.astype(jnp.float32)
        return v if dim_p == dim else jnp.pad(v, ((0, 0), (0, dim_p - dim)))

    si = vec(in_scale, kp, k)
    bi = vec(in_bias, kp, k)
    so = vec(out_scale, np_, n)
    bo = vec(out_bias, np_, n)

    grid = (mp // tm, np_ // tn, kp // tk)
    kernel = functools.partial(_conv_mm_kernel, fuse_in=fuse_in, fuse_out=fuse_out)

    out = pl.pallas_call(
        kernel,
        out_shape=jax.ShapeDtypeStruct((mp, np_), out_dtype),
        grid_spec=pltpu.PrefetchScalarGridSpec(
            num_scalar_prefetch=0,
            grid=grid,
            in_specs=[
                pl.BlockSpec((tm, tk), lambda i, j, kk: (i, kk)),
                pl.BlockSpec((tk, tn), lambda i, j, kk: (kk, j)),
                pl.BlockSpec((1, tk), lambda i, j, kk: (0, kk)),
                pl.BlockSpec((1, tk), lambda i, j, kk: (0, kk)),
                pl.BlockSpec((1, tn), lambda i, j, kk: (0, j)),
                pl.BlockSpec((1, tn), lambda i, j, kk: (0, j)),
            ],
            out_specs=pl.BlockSpec((tm, tn), lambda i, j, kk: (i, j)),
            scratch_shapes=[pltpu.VMEM((tm, tn), jnp.float32)],
        ),
        compiler_params=pltpu.CompilerParams(
            dimension_semantics=("parallel", "parallel", "arbitrary"),
            vmem_limit_bytes=32 * 1024 * 1024,
        ),
    )(a_p, w_p, si, bi, so, bo)

    if mp != m or np_ != n:
        out = out[:m, :n]
    return out


# ----------------------------------------------------------------------------
# Fused head: norm5 + ReLU + global-avg-pool + Linear-ReLU-[Dropout]-Linear-LogSoftmax
# ----------------------------------------------------------------------------
_NUM_CLASSES = 6
_HEAD_PAD = 128  # lane-dense staging width for the (B, 6) output


def _head_kernel(x_ref, s_ref, b_ref, w1_ref, b1_ref, w2_ref, b2_ref, o_ref):
    # x: (B, H*W, 1024) bf16; s,b: (1,1024) f32 (folded norm5);
    # w1: (1024,256) bf16; b1: (1,256) f32; w2: (256,128) bf16 (cols>=6 zero);
    # b2: (1,128) f32 with -1e30 on padded columns so log-softmax ignores them.
    x = x_ref[...].astype(jnp.float32)
    x = jnp.maximum(x * s_ref[...] + b_ref[...], 0.0)
    feat = jnp.mean(x, axis=1)                                   # global average pool
    h = jnp.dot(feat.astype(jnp.bfloat16), w1_ref[...],
                preferred_element_type=jnp.float32) + b1_ref[...]
    h = jnp.maximum(h, 0.0)                                      # TODO(synk): Dropout(0.2) == identity
    logits = jnp.dot(h.astype(jnp.bfloat16), w2_ref[...],
                     preferred_element_type=jnp.float32) + b2_ref[...]
    m = jnp.max(logits, axis=-1, keepdims=True)
    lse = jnp.log(jnp.sum(jnp.exp(logits - m), axis=-1, keepdims=True)) + m
    o_ref[...] = logits - lse


def pallas_head(x, params):
    b, h, w, c = x.shape
    x3 = x.reshape(b, h * w, c)
    out = pl.pallas_call(
        _head_kernel,
        out_shape=jax.ShapeDtypeStruct((b, _HEAD_PAD), jnp.float32),
    )(x3, params["norm5_s"], params["norm5_b"],
      params["fc1_w"], params["fc1_b"], params["fc2_w"], params["fc2_b"])
    return out[:, :_NUM_CLASSES]


# ----------------------------------------------------------------------------
# Glue: im2col patches, conv wrapper, pooling (reduce_window, reviewer-sanctioned)
# ----------------------------------------------------------------------------
def _extract_patches(x, kh, kw, stride, pad):
    """x: (B,H,W,C) -> (B,Ho,Wo,kh*kw,C) window patches (bf16)."""
    b, h, w, c = x.shape
    if pad > 0:
        x = jnp.pad(x, ((0, 0), (pad, pad), (pad, pad), (0, 0)))
    ho = (h + 2 * pad - kh) // stride + 1
    wo = (w + 2 * pad - kw) // stride + 1
    cols = []
    for i in range(kh):
        for j in range(kw):
            cols.append(x[:, i:i + stride * ho:stride, j:j + stride * wo:stride, :])
    p = jnp.stack(cols, axis=3)
    return p, ho, wo


def conv2d(x, w_mat, *, kh, kw, stride, pad,
           in_scale=None, in_bias=None, out_scale=None, out_bias=None):
    """x: (B,H,W,C) bf16; w_mat: (kh*kw*C, Cout) bf16.  Optional fused BN+ReLU pro/epilogue."""
    b, h, w, c = x.shape
    if kh == 1 and kw == 1:
        a = x.reshape(b * h * w, c)
        ho, wo = h, w
    else:
        patches, ho, wo = _extract_patches(x, kh, kw, stride, pad)
        a = patches.reshape(b * ho * wo, kh * kw * c)
    n = w_mat.shape[1]
    y = fused_matmul(a, w_mat,
                     in_scale=in_scale, in_bias=in_bias,
                     out_scale=out_scale, out_bias=out_bias)
    return y.reshape(b, ho, wo, n)


def maxpool_3x3_s2_p1(x):
    init = jnp.array(-jnp.inf, dtype=x.dtype)
    return lax.reduce_window(x, init, lax.max,
                             window_dimensions=(1, 3, 3, 1),
                             window_strides=(1, 2, 2, 1),
                             padding=((0, 0), (1, 1), (1, 1), (0, 0)))


def avgpool_2x2(x):
    init = jnp.array(0, dtype=x.dtype)
    s = lax.reduce_window(x, init, lax.add,
                          window_dimensions=(1, 2, 2, 1),
                          window_strides=(1, 2, 2, 1),
                          padding="VALID")
    return s * jnp.array(0.25, dtype=x.dtype)


# ----------------------------------------------------------------------------
# Deterministic parameter initialization (pre-folded BN, pre-reshaped bf16 weights)
# ----------------------------------------------------------------------------
def init_params(seed=0):
    rng = np.random.RandomState(seed)
    growth, bn_size = 32, 4
    block_config = (6, 12, 24, 16)

    def conv_mat(k_in, n_out):
        w = rng.normal(0.0, np.sqrt(2.0 / k_in), (k_in, n_out)).astype(np.float32)
        return jnp.asarray(w, dtype=jnp.bfloat16)

    def bn_fold(c):
        gamma = np.ones((c,), np.float32)
        beta = np.zeros((c,), np.float32)
        mean = rng.normal(0.0, 0.01, (c,)).astype(np.float32)
        var = np.ones((c,), np.float32)
        scale = gamma / np.sqrt(var + 1e-5)
        bias = beta - mean * scale
        return (jnp.asarray(scale.reshape(1, c)), jnp.asarray(bias.reshape(1, c)))

    p = {"conv0_w": conv_mat(7 * 7 * 3, 64)}
    p["norm0_s"], p["norm0_b"] = bn_fold(64)
    p["blocks"], p["transitions"] = [], []

    nf = 64
    for bi, n_layers in enumerate(block_config):
        layers = []
        for li in range(n_layers):
            cin = nf + li * growth
            s1, b1 = bn_fold(cin)
            s2, b2 = bn_fold(bn_size * growth)
            layers.append({
                "bn1_s": s1, "bn1_b": b1,
                "conv1_w": conv_mat(cin, bn_size * growth),
                "bn2_s": s2, "bn2_b": b2,
                "conv2_w": conv_mat(3 * 3 * bn_size * growth, growth),
            })
        p["blocks"].append(layers)
        nf = nf + n_layers * growth
        if bi != len(block_config) - 1:
            st, bt = bn_fold(nf)
            p["transitions"].append({
                "bn_s": st, "bn_b": bt,
                "conv_w": conv_mat(nf, nf // 2),
            })
            nf //= 2
    p["norm5_s"], p["norm5_b"] = bn_fold(nf)  # nf == 1024

    # classifier: Linear(1024,256) -> ReLU -> Dropout(0.2) -> Linear(256,6) -> LogSoftmax
    w1 = rng.normal(0.0, np.sqrt(2.0 / 1024), (1024, 256)).astype(np.float32)
    p["fc1_w"] = jnp.asarray(w1, dtype=jnp.bfloat16)
    p["fc1_b"] = jnp.zeros((1, 256), jnp.float32)
    w2 = rng.normal(0.0, np.sqrt(2.0 / 256), (256, _NUM_CLASSES)).astype(np.float32)
    w2p = np.zeros((256, _HEAD_PAD), np.float32)
    w2p[:, :_NUM_CLASSES] = w2
    p["fc2_w"] = jnp.asarray(w2p, dtype=jnp.bfloat16)
    b2p = np.full((1, _HEAD_PAD), -1e30, np.float32)
    b2p[:, :_NUM_CLASSES] = 0.0
    p["fc2_b"] = jnp.asarray(b2p)
    return p


# ----------------------------------------------------------------------------
# Forward pass (torchvision densenet121 + replaced classifier, inference mode)
# ----------------------------------------------------------------------------
def forward(params, x_nchw):
    x = jnp.transpose(x_nchw, (0, 2, 3, 1)).astype(jnp.bfloat16)   # NCHW -> NHWC, bf16

    # stem: conv0(7x7,s2,p3) fused with norm0+relu, then maxpool(3,2,1)
    x = conv2d(x, params["conv0_w"], kh=7, kw=7, stride=2, pad=3,
               out_scale=params["norm0_s"], out_bias=params["norm0_b"])
    x = maxpool_3x3_s2_p1(x)

    # dense blocks + transitions
    for bi, layers in enumerate(params["blocks"]):
        for lp in layers:
            # bn1+relu (prologue) -> conv1(1x1) -> bn2+relu (epilogue)
            h = conv2d(x, lp["conv1_w"], kh=1, kw=1, stride=1, pad=0,
                       in_scale=lp["bn1_s"], in_bias=lp["bn1_b"],
                       out_scale=lp["bn2_s"], out_bias=lp["bn2_b"])
            # conv2(3x3, p1), raw output (next layer's bn1 applies after concat)
            h = conv2d(h, lp["conv2_w"], kh=3, kw=3, stride=1, pad=1)
            x = jnp.concatenate([x, h], axis=-1)
        if bi < len(params["transitions"]):
            tp = params["transitions"][bi]
            # bn+relu (prologue) -> conv(1x1) -> avgpool(2,2)
            x = conv2d(x, tp["conv_w"], kh=1, kw=1, stride=1, pad=0,
                       in_scale=tp["bn_s"], in_bias=tp["bn_b"])
            x = avgpool_2x2(x)

    # norm5 + relu + global-avg-pool + classifier, all in one Pallas kernel
    return pallas_head(x, params)   # (B, 6) log-probabilities, f32


# ----------------------------------------------------------------------------
if __name__ == "__main__":
    key = jax.random.PRNGKey(0)
    # small-but-valid DenseNet input: batch=2, 3 channels, 32x32 spatial
    x = jax.random.normal(key, (2, 3, 32, 32), dtype=jnp.float32)

    params = init_params(seed=0)
    fwd = jax.jit(forward)
    out = fwd(params, x)
    out = jax.block_until_ready(out)

    assert out.shape == (2, _NUM_CLASSES), out.shape
    assert bool(jnp.all(jnp.isfinite(out)))
    print("KERNEL_OK")
</pallas_src>

<mosaic_0001>
module attributes {stable_mosaic.version = 11 : i64} {
  func.func @_conv_mm_kernel(%arg0: i32, %arg1: i32, %arg2: i32, %arg3: memref<256x256xbf16, #tpu.memory_space<vmem>>, %arg4: memref<256x128xbf16, #tpu.memory_space<vmem>>, %arg5: memref<1x256xf32, #tpu.memory_space<vmem>>, %arg6: memref<1x256xf32, #tpu.memory_space<vmem>>, %arg7: memref<1x128xf32, #tpu.memory_space<vmem>>, %arg8: memref<1x128xf32, #tpu.memory_space<vmem>>, %arg9: memref<256x128xbf16, #tpu.memory_space<vmem>>, %arg10: memref<256x128xf32, #tpu.memory_space<vmem>>) attributes {dimension_semantics = [#tpu.dimension_semantics<parallel>, #tpu.dimension_semantics<parallel>, #tpu.dimension_semantics<arbitrary>], iteration_bounds = array<i64: 2, 1, 1>, scalar_prefetch = 0 : i64, scratch_operands = 1 : i64, tpu.core_type = #tpu.core_type<tc>, window_params = [{transform_indices = @transform_0, window_bounds = array<i64: 256, 256>}, {transform_indices = @transform_1, window_bounds = array<i64: 256, 128>}, {transform_indices = @transform_2, window_bounds = array<i64: 1, 256>}, {transform_indices = @transform_3, window_bounds = array<i64: 1, 256>}, {transform_indices = @transform_4, window_bounds = array<i64: 1, 128>}, {transform_indices = @transform_5, window_bounds = array<i64: 1, 128>}, {transform_indices = @transform_6, window_bounds = array<i64: 256, 128>}]} {
    %c0_i32 = arith.constant 0 : i32
    %0 = arith.cmpi eq, %arg2, %c0_i32 : i32
    %1 = arith.extui %0 : i1 to i32
    %c0_i32_0 = arith.constant 0 : i32
    %2 = arith.cmpi ne, %1, %c0_i32_0 : i32
    scf.if %2 {
      %cst_10 = arith.constant 0.000000e+00 : f32
      %12 = vector.broadcast %cst_10 : f32 to vector<256x128xf32>
      %c0_11 = arith.constant 0 : index
      %c0_12 = arith.constant 0 : index
      %13 = vector.load %arg10[%c0_11, %c0_12] : memref<256x128xf32, #tpu.memory_space<vmem>>, vector<256x128xf32>
      tpu.vector_store %arg10[%c0_11, %c0_12], %12 {strides = array<i32>} : memref<256x128xf32, #tpu.memory_space<vmem>>, vector<256x128xf32>,
    } else {
    }
    %c0 = arith.constant 0 : index
    %c0_1 = arith.constant 0 : index
    %3 = vector.load %arg3[%c0, %c0_1] : memref<256x256xbf16, #tpu.memory_space<vmem>>, vector<256x256xbf16>
    %c0_2 = arith.constant 0 : index
    %c0_3 = arith.constant 0 : index
    %4 = vector.load %arg10[%c0_2, %c0_3] : memref<256x128xf32, #tpu.memory_space<vmem>>, vector<256x128xf32>
    %c0_4 = arith.constant 0 : index
    %c0_5 = arith.constant 0 : index
    %5 = vector.load %arg4[%c0_4, %c0_5] : memref<256x128xbf16, #tpu.memory_space<vmem>>, vector<256x128xbf16>
    %cst = arith.constant dense<0.000000e+00> : vector<256x128xf32>
    %6 = tpu.matmul %3, %5, %cst {dimension_numbers = #tpu.dot_dimension_numbers<[1], [0], [0], [1], [0, 0, 1, 1], [], []>} : vector<256x256xbf16>, vector<256x128xbf16>, vector<256x128xf32> -> vector<256x128xf32>
    %7 = arith.addf %4, %6 : vector<256x128xf32>
    %c0_6 = arith.constant 0 : index
    %c0_7 = arith.constant 0 : index
    %8 = vector.load %arg10[%c0_6, %c0_7] : memref<256x128xf32, #tpu.memory_space<vmem>>, vector<256x128xf32>
    tpu.vector_store %arg10[%c0_6, %c0_7], %7 {strides = array<i32>} : memref<256x128xf32, #tpu.memory_space<vmem>>, vector<256x128xf32>,
    %c0_i32_8 = arith.constant 0 : i32
    %9 = arith.cmpi eq, %arg2, %c0_i32_8 : i32
    %10 = arith.extui %9 : i1 to i32
    %c0_i32_9 = arith.constant 0 : i32
    %11 = arith.cmpi ne, %10, %c0_i32_9 : i32
    scf.if %11 {
      %c0_10 = arith.constant 0 : index
      %c0_11 = arith.constant 0 : index
      %12 = vector.load %arg10[%c0_10, %c0_11] : memref<256x128xf32, #tpu.memory_space<vmem>>, vector<256x128xf32>
      %c0_12 = arith.constant 0 : index
      %c0_13 = arith.constant 0 : index
      %13 = vector.load %arg7[%c0_12, %c0_13] : memref<1x128xf32, #tpu.memory_space<vmem>>, vector<1x128xf32>
      %14 = vector.broadcast %13 : vector<1x128xf32> to vector<256x128xf32>
      %15 = arith.mulf %12, %14 : vector<256x128xf32>
      %c0_14 = arith.constant 0 : index
      %c0_15 = arith.constant 0 : index
      %16 = vector.load %arg8[%c0_14, %c0_15] : memref<1x128xf32, #tpu.memory_space<vmem>>, vector<1x128xf32>
      %17 = vector.broadcast %16 : vector<1x128xf32> to vector<256x128xf32>
      %18 = arith.addf %15, %17 : vector<256x128xf32>
      %cst_16 = arith.constant 0.000000e+00 : f32
      %19 = vector.broadcast %cst_16 : f32 to vector<256x128xf32>
      %20 = arith.maximumf %18, %19 : vector<256x128xf32>
      %21 = arith.truncf %20 : vector<256x128xf32> to vector<256x128xbf16>
      %c0_17 = arith.constant 0 : index
      %c0_18 = arith.constant 0 : index
      %22 = vector.load %arg9[%c0_17, %c0_18] : memref<256x128xbf16, #tpu.memory_space<vmem>>, vector<256x128xbf16>
      tpu.vector_store %arg9[%c0_17, %c0_18], %21 {strides = array<i32>} : memref<256x128xbf16, #tpu.memory_space<vmem>>, vector<256x128xbf16>,
    } else {
    }
    return
  }
  func.func @transform_0(%arg0: i32, %arg1: i32, %arg2: i32) -> (i32, i32) {
    %c0_i32 = arith.constant 0 : i32
    return %arg0, %arg2 : i32, i32
  }
  func.func @transform_1(%arg0: i32, %arg1: i32, %arg2: i32) -> (i32, i32) {
    %c0_i32 = arith.constant 0 : i32
    return %arg2, %arg1 : i32, i32
  }
  func.func @transform_2(%arg0: i32, %arg1: i32, %arg2: i32) -> (i32, i32) {
    %c0_i32 = arith.constant 0 : i32
    %c0_i32_0 = arith.constant 0 : i32
    return %c0_i32, %arg2 : i32, i32
  }
  func.func @transform_3(%arg0: i32, %arg1: i32, %arg2: i32) -> (i32, i32) {
    %c0_i32 = arith.constant 0 : i32
    %c0_i32_0 = arith.constant 0 : i32
    return %c0_i32, %arg2 : i32, i32
  }
  func.func @transform_4(%arg0: i32, %arg1: i32, %arg2: i32) -> (i32, i32) {
    %c0_i32 = arith.constant 0 : i32
    %c0_i32_0 = arith.constant 0 : i32
    return %c0_i32, %arg1 : i32, i32
  }
  func.func @transform_5(%arg0: i32, %arg1: i32, %arg2: i32) -> (i32, i32) {
    %c0_i32 = arith.constant 0 : i32
    %c0_i32_0 = arith.constant 0 : i32
    return %c0_i32, %arg1 : i32, i32
  }
  func.func @transform_6(%arg0: i32, %arg1: i32, %arg2: i32) -> (i32, i32) {
    %c0_i32 = arith.constant 0 : i32
    return %arg0, %arg1 : i32, i32
  }
}

module attributes {stable_mosaic.version = 11 : i64} {
  func.func @_conv_mm_kernel(%arg0: i32, %arg1: i32, %arg2: i32, %arg3: memref<128x128xbf16, #tpu.memory_space<vmem>>, %arg4: memref<128x128xbf16, #tpu.memory_space<vmem>>, %arg5: memref<1x128xf32, #tpu.memory_space<vmem>>, %arg6: memref<1x128xf32, #tpu.memory_space<vmem>>, %arg7: memref<1x128xf32, #tpu.memory_space<vmem>>, %arg8: memref<1x128xf32, #tpu.memory_space<vmem>>, %arg9: memref<128x128xbf16, #tpu.memory_space<vmem>>, %arg10: memref<128x128xf32, #tpu.memory_space<vmem>>) attributes {dimension_semantics = [#tpu.dimension_semantics<parallel>, #tpu.dimension_semantics<parallel>, #tpu.dimension_semantics<arbitrary>], iteration_bounds = array<i64: 1, 1, 1>, scalar_prefetch = 0 : i64, scratch_operands = 1 : i64, tpu.core_type = #tpu.core_type<tc>, window_params = [{transform_indices = @transform_0, window_bounds = array<i64: 128, 128>}, {transform_indices = @transform_1, window_bounds = array<i64: 128, 128>}, {transform_indices = @transform_2, window_bounds = array<i64: 1, 128>}, {transform_indices = @transform_3, window_bounds = array<i64: 1, 128>}, {transform_indices = @transform_4, window_bounds = array<i64: 1, 128>}, {transform_indices = @transform_5, window_bounds = array<i64: 1, 128>}, {transform_indices = @transform_6, window_bounds = array<i64: 128, 128>}]} {
    %c0_i32 = arith.constant 0 : i32
    %0 = arith.cmpi eq, %arg2, %c0_i32 : i32
    %1 = arith.extui %0 : i1 to i32
    %c0_i32_0 = arith.constant 0 : i32
    %2 = arith.cmpi ne, %1, %c0_i32_0 : i32
    scf.if %2 {
      %cst_15 = arith.constant 0.000000e+00 : f32
      %22 = vector.broadcast %cst_15 : f32 to vector<128x128xf32>
      %c0_16 = arith.constant 0 : index
      %c0_17 = arith.constant 0 : index
      %23 = vector.load %arg10[%c0_16, %c0_17] : memref<128x128xf32, #tpu.memory_space<vmem>>, vector<128x128xf32>
      tpu.vector_store %arg10[%c0_16, %c0_17], %22 {strides = array<i32>} : memref<128x128xf32, #tpu.memory_space<vmem>>, vector<128x128xf32>,
    } else {
    }
    %c0 = arith.constant 0 : index
    %c0_1 = arith.constant 0 : index
    %3 = vector.load %arg3[%c0, %c0_1] : memref<128x128xbf16, #tpu.memory_space<vmem>>, vector<128x128xbf16>
    %4 = arith.extf %3 : vector<128x128xbf16> to vector<128x128xf32>
    %c0_2 = arith.constant 0 : index
    %c0_3 = arith.constant 0 : index
    %5 = vector.load %arg5[%c0_2, %c0_3] : memref<1x128xf32, #tpu.memory_space<vmem>>, vector<1x128xf32>
    %6 = vector.broadcast %5 : vector<1x128xf32> to vector<128x128xf32>
    %7 = arith.mulf %4, %6 : vector<128x128xf32>
    %c0_4 = arith.constant 0 : index
    %c0_5 = arith.constant 0 : index
    %8 = vector.load %arg6[%c0_4, %c0_5] : memref<1x128xf32, #tpu.memory_space<vmem>>, vector<1x128xf32>
    %9 = vector.broadcast %8 : vector<1x128xf32> to vector<128x128xf32>
    %10 = arith.addf %7, %9 : vector<128x128xf32>
    %cst = arith.constant 0.000000e+00 : f32
    %11 = vector.broadcast %cst : f32 to vector<128x128xf32>
    %12 = arith.maximumf %10, %11 : vector<128x128xf32>
    %13 = arith.truncf %12 : vector<128x128xf32> to vector<128x128xbf16>
    %c0_6 = arith.constant 0 : index
    %c0_7 = arith.constant 0 : index
    %14 = vector.load %arg10[%c0_6, %c0_7] : memref<128x128xf32, #tpu.memory_space<vmem>>, vector<128x128xf32>
    %c0_8 = arith.constant 0 : index
    %c0_9 = arith.constant 0 : index
    %15 = vector.load %arg4[%c0_8, %c0_9] : memref<128x128xbf16, #tpu.memory_space<vmem>>, vector<128x128xbf16>
    %cst_10 = arith.constant dense<0.000000e+00> : vector<128x128xf32>
    %16 = tpu.matmul %13, %15, %cst_10 {dimension_numbers = #tpu.dot_dimension_numbers<[1], [0], [0], [1], [0, 0, 1, 1], [], []>} : vector<128x128xbf16>, vector<128x128xbf16>, vector<128x128xf32> -> vector<128x128xf32>
    %17 = arith.addf %14, %16 : vector<128x128xf32>
    %c0_11 = arith.constant 0 : index
    %c0_12 = arith.constant 0 : index
    %18 = vector.load %arg10[%c0_11, %c0_12] : memref<128x128xf32, #tpu.memory_space<vmem>>, vector<128x128xf32>
    tpu.vector_store %arg10[%c0_11, %c0_12], %17 {strides = array<i32>} : memref<128x128xf32, #tpu.memory_space<vmem>>, vector<128x128xf32>,
    %c0_i32_13 = arith.constant 0 : i32
    %19 = arith.cmpi eq, %arg2, %c0_i32_13 : i32
    %20 = arith.extui %19 : i1 to i32
    %c0_i32_14 = arith.constant 0 : i32
    %21 = arith.cmpi ne, %20, %c0_i32_14 : i32
    scf.if %21 {
      %c0_15 = arith.constant 0 : index
      %c0_16 = arith.constant 0 : index
      %22 = vector.load %arg10[%c0_15, %c0_16] : memref<128x128xf32, #tpu.memory_space<vmem>>, vector<128x128xf32>
      %c0_17 = arith.constant 0 : index
      %c0_18 = arith.constant 0 : index
      %23 = vector.load %arg7[%c0_17, %c0_18] : memref<1x128xf32, #tpu.memory_space<vmem>>, vector<1x128xf32>
      %24 = vector.broadcast %23 : vector<1x128xf32> to vector<128x128xf32>
      %25 = arith.mulf %22, %24 : vector<128x128xf32>
      %c0_19 = arith.constant 0 : index
      %c0_20 = arith.constant 0 : index
      %26 = vector.load %arg8[%c0_19, %c0_20] : memref<1x128xf32, #tpu.memory_space<vmem>>, vector<1x128xf32>
      %27 = vector.broadcast %26 : vector<1x128xf32> to vector<128x128xf32>
      %28 = arith.addf %25, %27 : vector<128x128xf32>
      %cst_21 = arith.constant 0.000000e+00 : f32
      %29 = vector.broadcast %cst_21 : f32 to vector<128x128xf32>
      %30 = arith.maximumf %28, %29 : vector<128x128xf32>
      %31 = arith.truncf %30 : vector<128x128xf32> to vector<128x128xbf16>
      %c0_22 = arith.constant 0 : index
      %c0_23 = arith.constant 0 : index
      %32 = vector.load %arg9[%c0_22, %c0_23] : memref<128x128xbf16, #tpu.memory_space<vmem>>, vector<128x128xbf16>
      tpu.vector_store %arg9[%c0_22, %c0_23], %31 {strides = array<i32>} : memref<128x128xbf16, #tpu.memory_space<vmem>>, vector<128x128xbf16>,
    } else {
    }
    return
  }
  func.func @transform_0(%arg0: i32, %arg1: i32, %arg2: i32) -> (i32, i32) {
    %c0_i32 = arith.constant 0 : i32
    return %arg0, %arg2 : i32, i32
  }
  func.func @transform_1(%arg0: i32, %arg1: i32, %arg2: i32) -> (i32, i32) {
    %c0_i32 = arith.constant 0 : i32
    return %arg2, %arg1 : i32, i32
  }
  func.func @transform_2(%arg0: i32, %arg1: i32, %arg2: i32) -> (i32, i32) {
    %c0_i32 = arith.constant 0 : i32
    %c0_i32_0 = arith.constant 0 : i32
    return %c0_i32, %arg2 : i32, i32
  }
  func.func @transform_3(%arg0: i32, %arg1: i32, %arg2: i32) -> (i32, i32) {
    %c0_i32 = arith.constant 0 : i32
    %c0_i32_0 = arith.constant 0 : i32
    return %c0_i32, %arg2 : i32, i32
  }
  func.func @transform_4(%arg0: i32, %arg1: i32, %arg2: i32) -> (i32, i32) {
    %c0_i32 = arith.constant 0 : i32
    %c0_i32_0 = arith.constant 0 : i32
    return %c0_i32, %arg1 : i32, i32
  }
  func.func @transform_5(%arg0: i32, %arg1: i32, %arg2: i32) -> (i32, i32) {
    %c0_i32 = arith.constant 0 : i32
    %c0_i32_0 = arith.constant 0 : i32
    return %c0_i32, %arg1 : i32, i32
  }
  func.func @transform_6(%arg0: i32, %arg1: i32, %arg2: i32) -> (i32, i32) {
    %c0_i32 = arith.constant 0 : i32
    return %arg0, %arg1 : i32, i32
  }
}

module attributes {stable_mosaic.version = 11 : i64} {
  func.func @_conv_mm_kernel(%arg0: i32, %arg1: i32, %arg2: i32, %arg3: memref<128x384xbf16, #tpu.memory_space<vmem>>, %arg4: memref<384x128xbf16, #tpu.memory_space<vmem>>, %arg5: memref<1x384xf32, #tpu.memory_space<vmem>>, %arg6: memref<1x384xf32, #tpu.memory_space<vmem>>, %arg7: memref<1x128xf32, #tpu.memory_space<vmem>>, %arg8: memref<1x128xf32, #tpu.memory_space<vmem>>, %arg9: memref<128x128xbf16, #tpu.memory_space<vmem>>, %arg10: memref<128x128xf32, #tpu.memory_space<vmem>>) attributes {dimension_semantics = [#tpu.dimension_semantics<parallel>, #tpu.dimension_semantics<parallel>, #tpu.dimension_semantics<arbitrary>], iteration_bounds = array<i64: 1, 1, 3>, scalar_prefetch = 0 : i64, scratch_operands = 1 : i64, tpu.core_type = #tpu.core_type<tc>, window_params = [{transform_indices = @transform_0, window_bounds = array<i64: 128, 384>}, {transform_indices = @transform_1, window_bounds = array<i64: 384, 128>}, {transform_indices = @transform_2, window_bounds = array<i64: 1, 384>}, {transform_indices = @transform_3, window_bounds = array<i64: 1, 384>}, {transform_indices = @transform_4, window_bounds = array<i64: 1, 128>}, {transform_indices = @transform_5, window_bounds = array<i64: 1, 128>}, {transform_indices = @transform_6, window_bounds = array<i64: 128, 128>}]} {
    %c0_i32 = arith.constant 0 : i32
    %0 = arith.cmpi eq, %arg2, %c0_i32 : i32
    %1 = arith.extui %0 : i1 to i32
    %c0_i32_0 = arith.constant 0 : i32
    %2 = arith.cmpi ne, %1, %c0_i32_0 : i32
    scf.if %2 {
      %cst_9 = arith.constant 0.000000e+00 : f32
      %12 = vector.broadcast %cst_9 : f32 to vector<128x128xf32>
      %c0_10 = arith.constant 0 : index
      %c0_11 = arith.constant 0 : index
      %13 = vector.load %arg10[%c0_10, %c0_11] : memref<128x128xf32, #tpu.memory_space<vmem>>, vector<128x128xf32>
      tpu.vector_store %arg10[%c0_10, %c0_11], %12 {strides = array<i32>} : memref<128x128xf32, #tpu.memory_space<vmem>>, vector<128x128xf32>,
    } else {
    }
    %c0 = arith.constant 0 : index
    %c0_1 = arith.constant 0 : index
    %3 = vector.load %arg3[%c0, %c0_1] : memref<128x384xbf16, #tpu.memory_space<vmem>>, vector<128x384xbf16>
    %c0_2 = arith.constant 0 : index
    %c0_3 = arith.constant 0 : index
    %4 = vector.load %arg10[%c0_2, %c0_3] : memref<128x128xf32, #tpu.memory_space<vmem>>, vector<128x128xf32>
    %c0_4 = arith.constant 0 : index
    %c0_5 = arith.constant 0 : index
    %5 = vector.load %arg4[%c0_4, %c0_5] : memref<384x128xbf16, #tpu.memory_space<vmem>>, vector<384x128xbf16>
    %cst = arith.constant dense<0.000000e+00> : vector<128x128xf32>
    %6 = tpu.matmul %3, %5, %cst {dimension_numbers = #tpu.dot_dimension_numbers<[1], [0], [0], [1], [0, 0, 1, 1], [], []>} : vector<128x384xbf16>, vector<384x128xbf16>, vector<128x128xf32> -> vector<128x128xf32>
    %7 = arith.addf %4, %6 : vector<128x128xf32>
    %c0_6 = arith.constant 0 : index
    %c0_7 = arith.constant 0 : index
    %8 = vector.load %arg10[%c0_6, %c0_7] : memref<128x128xf32, #tpu.memory_space<vmem>>, vector<128x128xf32>
    tpu.vector_store %arg10[%c0_6, %c0_7], %7 {strides = array<i32>} : memref<128x128xf32, #tpu.memory_space<vmem>>, vector<128x128xf32>,
    %c2_i32 = arith.constant 2 : i32
    %9 = arith.cmpi eq, %arg2, %c2_i32 : i32
    %10 = arith.extui %9 : i1 to i32
    %c0_i32_8 = arith.constant 0 : i32
    %11 = arith.cmpi ne, %10, %c0_i32_8 : i32
    scf.if %11 {
      %c0_9 = arith.constant 0 : index
      %c0_10 = arith.constant 0 : index
      %12 = vector.load %arg10[%c0_9, %c0_10] : memref<128x128xf32, #tpu.memory_space<vmem>>, vector<128x128xf32>
      %13 = arith.truncf %12 : vector<128x128xf32> to vector<128x128xbf16>
      %c0_11 = arith.constant 0 : index
      %c0_12 = arith.constant 0 : index
      %14 = vector.load %arg9[%c0_11, %c0_12] : memref<128x128xbf16, #tpu.memory_space<vmem>>, vector<128x128xbf16>
      tpu.vector_store %arg9[%c0_11, %c0_12], %13 {strides = array<i32>} : memref<128x128xbf16, #tpu.memory_space<vmem>>, vector<128x128xbf16>,
    } else {
    }
    return
  }
  func.func @transform_0(%arg0: i32, %arg1: i32, %arg2: i32) -> (i32, i32) {
    %c0_i32 = arith.constant 0 : i32
    return %arg0, %arg2 : i32, i32
  }
  func.func @transform_1(%arg0: i32, %arg1: i32, %arg2: i32) -> (i32, i32) {
    %c0_i32 = arith.constant 0 : i32
    return %arg2, %arg1 : i32, i32
  }
  func.func @transform_2(%arg0: i32, %arg1: i32, %arg2: i32) -> (i32, i32) {
    %c0_i32 = arith.constant 0 : i32
    %c0_i32_0 = arith.constant 0 : i32
    return %c0_i32, %arg2 : i32, i32
  }
  func.func @transform_3(%arg0: i32, %arg1: i32, %arg2: i32) -> (i32, i32) {
    %c0_i32 = arith.constant 0 : i32
    %c0_i32_0 = arith.constant 0 : i32
    return %c0_i32, %arg2 : i32, i32
  }
  func.func @transform_4(%arg0: i32, %arg1: i32, %arg2: i32) -> (i32, i32) {
    %c0_i32 = arith.constant 0 : i32
    %c0_i32_0 = arith.constant 0 : i32
    return %c0_i32, %arg1 : i32, i32
  }
  func.func @transform_5(%arg0: i32, %arg1: i32, %arg2: i32) -> (i32, i32) {
    %c0_i32 = arith.constant 0 : i32
    %c0_i32_0 = arith.constant 0 : i32
    return %c0_i32, %arg1 : i32, i32
  }
  func.func @transform_6(%arg0: i32, %arg1: i32, %arg2: i32) -> (i32, i32) {
    %c0_i32 = arith.constant 0 : i32
    return %arg0, %arg1 : i32, i32
  }
}

module attributes {stable_mosaic.version = 11 : i64} {
  func.func @_conv_mm_kernel(%arg0: i32, %arg1: i32, %arg2: i32, %arg3: memref<128x256xbf16, #tpu.memory_space<vmem>>, %arg4: memref<256x128xbf16, #tpu.memory_space<vmem>>, %arg5: memref<1x256xf32, #tpu.memory_space<vmem>>, %arg6: memref<1x256xf32, #tpu.memory_space<vmem>>, %arg7: memref<1x128xf32, #tpu.memory_space<vmem>>, %arg8: memref<1x128xf32, #tpu.memory_space<vmem>>, %arg9: memref<128x128xbf16, #tpu.memory_space<vmem>>, %arg10: memref<128x128xf32, #tpu.memory_space<vmem>>) attributes {dimension_semantics = [#tpu.dimension_semantics<parallel>, #tpu.dimension_semantics<parallel>, #tpu.dimension_semantics<arbitrary>], iteration_bounds = array<i64: 1, 1, 1>, scalar_prefetch = 0 : i64, scratch_operands = 1 : i64, tpu.core_type = #tpu.core_type<tc>, window_params = [{transform_indices = @transform_0, window_bounds = array<i64: 128, 256>}, {transform_indices = @transform_1, window_bounds = array<i64: 256, 128>}, {transform_indices = @transform_2, window_bounds = array<i64: 1, 256>}, {transform_indices = @transform_3, window_bounds = array<i64: 1, 256>}, {transform_indices = @transform_4, window_bounds = array<i64: 1, 128>}, {transform_indices = @transform_5, window_bounds = array<i64: 1, 128>}, {transform_indices = @transform_6, window_bounds = array<i64: 128, 128>}]} {
    %c0_i32 = arith.constant 0 : i32
    %0 = arith.cmpi eq, %arg2, %c0_i32 : i32
    %1 = arith.extui %0 : i1 to i32
    %c0_i32_0 = arith.constant 0 : i32
    %2 = arith.cmpi ne, %1, %c0_i32_0 : i32
    scf.if %2 {
      %cst_15 = arith.constant 0.000000e+00 : f32
      %22 = vector.broadcast %cst_15 : f32 to vector<128x128xf32>
      %c0_16 = arith.constant 0 : index
      %c0_17 = arith.constant 0 : index
      %23 = vector.load %arg10[%c0_16, %c0_17] : memref<128x128xf32, #tpu.memory_space<vmem>>, vector<128x128xf32>
      tpu.vector_store %arg10[%c0_16, %c0_17], %22 {strides = array<i32>} : memref<128x128xf32, #tpu.memory_space<vmem>>, vector<128x128xf32>,
    } else {
    }
    %c0 = arith.constant 0 : index
    %c0_1 = arith.constant 0 : index
    %3 = vector.load %arg3[%c0, %c0_1] : memref<128x256xbf16, #tpu.memory_space<vmem>>, vector<128x256xbf16>
    %4 = arith.extf %3 : vector<128x256xbf16> to vector<128x256xf32>
    %c0_2 = arith.constant 0 : index
    %c0_3 = arith.constant 0 : index
    %5 = vector.load %arg5[%c0_2, %c0_3] : memref<1x256xf32, #tpu.memory_space<vmem>>, vector<1x256xf32>
    %6 = vector.broadcast %5 : vector<1x256xf32> to vector<128x256xf32>
    %7 = arith.mulf %4, %6 : vector<128x256xf32>
    %c0_4 = arith.constant 0 : index
    %c0_5 = arith.constant 0 : index
    %8 = vector.load %arg6[%c0_4, %c0_5] : memref<1x256xf32, #tpu.memory_space<vmem>>, vector<1x256xf32>
    %9 = vector.broadcast %8 : vector<1x256xf32> to vector<128x256xf32>
    %10 = arith.addf %7, %9 : vector<128x256xf32>
    %cst = arith.constant 0.000000e+00 : f32
    %11 = vector.broadcast %cst : f32 to vector<128x256xf32>
    %12 = arith.maximumf %10, %11 : vector<128x256xf32>
    %13 = arith.truncf %12 : vector<128x256xf32> to vector<128x256xbf16>
    %c0_6 = arith.constant 0 : index
    %c0_7 = arith.constant 0 : index
    %14 = vector.load %arg10[%c0_6, %c0_7] : memref<128x128xf32, #tpu.memory_space<vmem>>, vector<128x128xf32>
    %c0_8 = arith.constant 0 : index
    %c0_9 = arith.constant 0 : index
    %15 = vector.load %arg4[%c0_8, %c0_9] : memref<256x128xbf16, #tpu.memory_space<vmem>>, vector<256x128xbf16>
    %cst_10 = arith.constant dense<0.000000e+00> : vector<128x128xf32>
    %16 = tpu.matmul %13, %15, %cst_10 {dimension_numbers = #tpu.dot_dimension_numbers<[1], [0], [0], [1], [0, 0, 1, 1], [], []>} : vector<128x256xbf16>, vector<256x128xbf16>, vector<128x128xf32> -> vector<128x128xf32>
    %17 = arith.addf %14, %16 : vector<128x128xf32>
    %c0_11 = arith.constant 0 : index
    %c0_12 = arith.constant 0 : index
    %18 = vector.load %arg10[%c0_11, %c0_12] : memref<128x128xf32, #tpu.memory_space<vmem>>, vector<128x128xf32>
    tpu.vector_store %arg10[%c0_11, %c0_12], %17 {strides = array<i32>} : memref<128x128xf32, #tpu.memory_space<vmem>>, vector<128x128xf32>,
    %c0_i32_13 = arith.constant 0 : i32
    %19 = arith.cmpi eq, %arg2, %c0_i32_13 : i32
    %20 = arith.extui %19 : i1 to i32
    %c0_i32_14 = arith.constant 0 : i32
    %21 = arith.cmpi ne, %20, %c0_i32_14 : i32
    scf.if %21 {
      %c0_15 = arith.constant 0 : index
      %c0_16 = arith.constant 0 : index
      %22 = vector.load %arg10[%c0_15, %c0_16] : memref<128x128xf32, #tpu.memory_space<vmem>>, vector<128x128xf32>
      %c0_17 = arith.constant 0 : index
      %c0_18 = arith.constant 0 : index
      %23 = vector.load %arg7[%c0_17, %c0_18] : memref<1x128xf32, #tpu.memory_space<vmem>>, vector<1x128xf32>
      %24 = vector.broadcast %23 : vector<1x128xf32> to vector<128x128xf32>
      %25 = arith.mulf %22, %24 : vector<128x128xf32>
      %c0_19 = arith.constant 0 : index
      %c0_20 = arith.constant 0 : index
      %26 = vector.load %arg8[%c0_19, %c0_20] : memref<1x128xf32, #tpu.memory_space<vmem>>, vector<1x128xf32>
      %27 = vector.broadcast %26 : vector<1x128xf32> to vector<128x128xf32>
      %28 = arith.addf %25, %27 : vector<128x128xf32>
      %cst_21 = arith.constant 0.000000e+00 : f32
      %29 = vector.broadcast %cst_21 : f32 to vector<128x128xf32>
      %30 = arith.maximumf %28, %29 : vector<128x128xf32>
      %31 = arith.truncf %30 : vector<128x128xf32> to vector<128x128xbf16>
      %c0_22 = arith.constant 0 : index
      %c0_23 = arith.constant 0 : index
      %32 = vector.load %arg9[%c0_22, %c0_23] : memref<128x128xbf16, #tpu.memory_space<vmem>>, vector<128x128xbf16>
      tpu.vector_store %arg9[%c0_22, %c0_23], %31 {strides = array<i32>} : memref<128x128xbf16, #tpu.memory_space<vmem>>, vector<128x128xbf16>,
    } else {
    }
    return
  }
  func.func @transform_0(%arg0: i32, %arg1: i32, %arg2: i32) -> (i32, i32) {
    %c0_i32 = arith.constant 0 : i32
    return %arg0, %arg2 : i32, i32
  }
  func.func @transform_1(%arg0: i32, %arg1: i32, %arg2: i32) -> (i32, i32) {
    %c0_i32 = arith.constant 0 : i32
    return %arg2, %arg1 : i32, i32
  }
  func.func @transform_2(%arg0: i32, %arg1: i32, %arg2: i32) -> (i32, i32) {
    %c0_i32 = arith.constant 0 : i32
    %c0_i32_0 = arith.constant 0 : i32
    return %c0_i32, %arg2 : i32, i32
  }
  func.func @transform_3(%arg0: i32, %arg1: i32, %arg2: i32) -> (i32, i32) {
    %c0_i32 = arith.constant 0 : i32
    %c0_i32_0 = arith.constant 0 : i32
    return %c0_i32, %arg2 : i32, i32
  }
  func.func @transform_4(%arg0: i32, %arg1: i32, %arg2: i32) -> (i32, i32) {
    %c0_i32 = arith.constant 0 : i32
    %c0_i32_0 = arith.constant 0 : i32
    return %c0_i32, %arg1 : i32, i32
  }
  func.func @transform_5(%arg0: i32, %arg1: i32, %arg2: i32) -> (i32, i32) {
    %c0_i32 = arith.constant 0 : i32
    %c0_i32_0 = arith.constant 0 : i32
    return %c0_i32, %arg1 : i32, i32
  }
  func.func @transform_6(%arg0: i32, %arg1: i32, %arg2: i32) -> (i32, i32) {
    %c0_i32 = arith.constant 0 : i32
    return %arg0, %arg1 : i32, i32
  }
}

module attributes {stable_mosaic.version = 11 : i64} {
  func.func @_conv_mm_kernel(%arg0: i32, %arg1: i32, %arg2: i32, %arg3: memref<128x256xbf16, #tpu.memory_space<vmem>>, %arg4: memref<256x128xbf16, #tpu.memory_space<vmem>>, %arg5: memref<1x256xf32, #tpu.memory_space<vmem>>, %arg6: memref<1x256xf32, #tpu.memory_space<vmem>>, %arg7: memref<1x128xf32, #tpu.memory_space<vmem>>, %arg8: memref<1x128xf32, #tpu.memory_space<vmem>>, %arg9: memref<128x128xbf16, #tpu.memory_space<vmem>>, %arg10: memref<128x128xf32, #tpu.memory_space<vmem>>) attributes {dimension_semantics = [#tpu.dimension_semantics<parallel>, #tpu.dimension_semantics<parallel>, #tpu.dimension_semantics<arbitrary>], iteration_bounds = array<i64: 1, 1, 1>, scalar_prefetch = 0 : i64, scratch_operands = 1 : i64, tpu.core_type = #tpu.core_type<tc>, window_params = [{transform_indices = @transform_0, window_bounds = array<i64: 128, 256>}, {transform_indices = @transform_1, window_bounds = array<i64: 256, 128>}, {transform_indices = @transform_2, window_bounds = array<i64: 1, 256>}, {transform_indices = @transform_3, window_bounds = array<i64: 1, 256>}, {transform_indices = @transform_4, window_bounds = array<i64: 1, 128>}, {transform_indices = @transform_5, window_bounds = array<i64: 1, 128>}, {transform_indices = @transform_6, window_bounds = array<i64: 128, 128>}]} {
    %c0_i32 = arith.constant 0 : i32
    %0 = arith.cmpi eq, %arg2, %c0_i32 : i32
    %1 = arith.extui %0 : i1 to i32
    %c0_i32_0 = arith.constant 0 : i32
    %2 = arith.cmpi ne, %1, %c0_i32_0 : i32
    scf.if %2 {
      %cst_15 = arith.constant 0.000000e+00 : f32
      %22 = vector.broadcast %cst_15 : f32 to vector<128x128xf32>
      %c0_16 = arith.constant 0 : index
      %c0_17 = arith.constant 0 : index
      %23 = vector.load %arg10[%c0_16, %c0_17] : memref<128x128xf32, #tpu.memory_space<vmem>>, vector<128x128xf32>
      tpu.vector_store %arg10[%c0_16, %c0_17], %22 {strides = array<i32>} : memref<128x128xf32, #tpu.memory_space<vmem>>, vector<128x128xf32>,
    } else {
    }
    %c0 = arith.constant 0 : index
    %c0_1 = arith.constant 0 : index
    %3 = vector.load %arg3[%c0, %c0_1] : memref<128x256xbf16, #tpu.memory_space<vmem>>, vector<128x256xbf16>
    %4 = arith.extf %3 : vector<128x256xbf16> to vector<128x256xf32>
    %c0_2 = arith.constant 0 : index
    %c0_3 = arith.constant 0 : index
    %5 = vector.load %arg5[%c0_2, %c0_3] : memref<1x256xf32, #tpu.memory_space<vmem>>, vector<1x256xf32>
    %6 = vector.broadcast %5 : vector<1x256xf32> to vector<128x256xf32>
    %7 = arith.mulf %4, %6 : vector<128x256xf32>
    %c0_4 = arith.constant 0 : index
    %c0_5 = arith.constant 0 : index
    %8 = vector.load %arg6[%c0_4, %c0_5] : memref<1x256xf32, #tpu.memory_space<vmem>>, vector<1x256xf32>
    %9 = vector.broadcast %8 : vector<1x256xf32> to vector<128x256xf32>
    %10 = arith.addf %7, %9 : vector<128x256xf32>
    %cst = arith.constant 0.000000e+00 : f32
    %11 = vector.broadcast %cst : f32 to vector<128x256xf32>
    %12 = arith.maximumf %10, %11 : vector<128x256xf32>
    %13 = arith.truncf %12 : vector<128x256xf32> to vector<128x256xbf16>
    %c0_6 = arith.constant 0 : index
    %c0_7 = arith.constant 0 : index
    %14 = vector.load %arg10[%c0_6, %c0_7] : memref<128x128xf32, #tpu.memory_space<vmem>>, vector<128x128xf32>
    %c0_8 = arith.constant 0 : index
    %c0_9 = arith.constant 0 : index
    %15 = vector.load %arg4[%c0_8, %c0_9] : memref<256x128xbf16, #tpu.memory_space<vmem>>, vector<256x128xbf16>
    %cst_10 = arith.constant dense<0.000000e+00> : vector<128x128xf32>
    %16 = tpu.matmul %13, %15, %cst_10 {dimension_numbers = #tpu.dot_dimension_numbers<[1], [0], [0], [1], [0, 0, 1, 1], [], []>} : vector<128x256xbf16>, vector<256x128xbf16>, vector<128x128xf32> -> vector<128x128xf32>
    %17 = arith.addf %14, %16 : vector<128x128xf32>
    %c0_11 = arith.constant 0 : index
    %c0_12 = arith.constant 0 : index
    %18 = vector.load %arg10[%c0_11, %c0_12] : memref<128x128xf32, #tpu.memory_space<vmem>>, vector<128x128xf32>
    tpu.vector_store %arg10[%c0_11, %c0_12], %17 {strides = array<i32>} : memref<128x128xf32, #tpu.memory_space<vmem>>, vector<128x128xf32>,
    %c0_i32_13 = arith.constant 0 : i32
    %19 = arith.cmpi eq, %arg2, %c0_i32_13 : i32
    %20 = arith.extui %19 : i1 to i32
    %c0_i32_14 = arith.constant 0 : i32
    %21 = arith.cmpi ne, %20, %c0_i32_14 : i32
    scf.if %21 {
      %c0_15 = arith.constant 0 : index
      %c0_16 = arith.constant 0 : index
      %22 = vector.load %arg10[%c0_15, %c0_16] : memref<128x128xf32, #tpu.memory_space<vmem>>, vector<128x128xf32>
      %23 = arith.truncf %22 : vector<128x128xf32> to vector<128x128xbf16>
      %c0_17 = arith.constant 0 : index
      %c0_18 = arith.constant 0 : index
      %24 = vector.load %arg9[%c0_17, %c0_18] : memref<128x128xbf16, #tpu.memory_space<vmem>>, vector<128x128xbf16>
      tpu.vector_store %arg9[%c0_17, %c0_18], %23 {strides = array<i32>} : memref<128x128xbf16, #tpu.memory_space<vmem>>, vector<128x128xbf16>,
    } else {
    }
    return
  }
  func.func @transform_0(%arg0: i32, %arg1: i32, %arg2: i32) -> (i32, i32) {
    %c0_i32 = arith.constant 0 : i32
    return %arg0, %arg2 : i32, i32
  }
  func.func @transform_1(%arg0: i32, %arg1: i32, %arg2: i32) -> (i32, i32) {
    %c0_i32 = arith.constant 0 : i32
    return %arg2, %arg1 : i32, i32
  }
  func.func @transform_2(%arg0: i32, %arg1: i32, %arg2: i32) -> (i32, i32) {
    %c0_i32 = arith.constant 0 : i32
    %c0_i32_0 = arith.constant 0 : i32
    return %c0_i32, %arg2 : i32, i32
  }
  func.func @transform_3(%arg0: i32, %arg1: i32, %arg2: i32) -> (i32, i32) {
    %c0_i32 = arith.constant 0 : i32
    %c0_i32_0 = arith.constant 0 : i32
    return %c0_i32, %arg2 : i32, i32
  }
  func.func @transform_4(%arg0: i32, %arg1: i32, %arg2: i32) -> (i32, i32) {
    %c0_i32 = arith.constant 0 : i32
    %c0_i32_0 = arith.constant 0 : i32
    return %c0_i32, %arg1 : i32, i32
  }
  func.func @transform_5(%arg0: i32, %arg1: i32, %arg2: i32) -> (i32, i32) {
    %c0_i32 = arith.constant 0 : i32
    %c0_i32_0 = arith.constant 0 : i32
    return %c0_i32, %arg1 : i32, i32
  }
  func.func @transform_6(%arg0: i32, %arg1: i32, %arg2: i32) -> (i32, i32) {
    %c0_i32 = arith.constant 0 : i32
    return %arg0, %arg1 : i32, i32
  }
}

module attributes {stable_mosaic.version = 11 : i64} {
  func.func @_conv_mm_kernel(%arg0: i32, %arg1: i32, %arg2: i32, %arg3: memref<32x128xbf16, #tpu.memory_space<vmem>>, %arg4: memref<128x128xbf16, #tpu.memory_space<vmem>>, %arg5: memref<1x128xf32, #tpu.memory_space<vmem>>, %arg6: memref<1x128xf32, #tpu.memory_space<vmem>>, %arg7: memref<1x128xf32, #tpu.memory_space<vmem>>, %arg8: memref<1x128xf32, #tpu.memory_space<vmem>>, %arg9: memref<32x128xbf16, #tpu.memory_space<vmem>>, %arg10: memref<32x128xf32, #tpu.memory_space<vmem>>) attributes {dimension_semantics = [#tpu.dimension_semantics<parallel>, #tpu.dimension_semantics<parallel>, #tpu.dimension_semantics<arbitrary>], iteration_bounds = array<i64: 1, 1, 1>, scalar_prefetch = 0 : i64, scratch_operands = 1 : i64, tpu.core_type = #tpu.core_type<tc>, window_params = [{transform_indices = @transform_0, window_bounds = array<i64: 32, 128>}, {transform_indices = @transform_1, window_bounds = array<i64: 128, 128>}, {transform_indices = @transform_2, window_bounds = array<i64: 1, 128>}, {transform_indices = @transform_3, window_bounds = array<i64: 1, 128>}, {transform_indices = @transform_4, window_bounds = array<i64: 1, 128>}, {transform_indices = @transform_5, window_bounds = array<i64: 1, 128>}, {transform_indices = @transform_6, window_bounds = array<i64: 32, 128>}]} {
    %c0_i32 = arith.constant 0 : i32
    %0 = arith.cmpi eq, %arg2, %c0_i32 : i32
    %1 = arith.extui %0 : i1 to i32
    %c0_i32_0 = arith.constant 0 : i32
    %2 = arith.cmpi ne, %1, %c0_i32_0 : i32
    scf.if %2 {
      %cst_15 = arith.constant 0.000000e+00 : f32
      %22 = vector.broadcast %cst_15 : f32 to vector<32x128xf32>
      %c0_16 = arith.constant 0 : index
      %c0_17 = arith.constant 0 : index
      %23 = vector.load %arg10[%c0_16, %c0_17] : memref<32x128xf32, #tpu.memory_space<vmem>>, vector<32x128xf32>
      tpu.vector_store %arg10[%c0_16, %c0_17], %22 {strides = array<i32>} : memref<32x128xf32, #tpu.memory_space<vmem>>, vector<32x128xf32>,
    } else {
    }
    %c0 = arith.constant 0 : index
    %c0_1 = arith.constant 0 : index
    %3 = vector.load %arg3[%c0, %c0_1] : memref<32x128xbf16, #tpu.memory_space<vmem>>, vector<32x128xbf16>
    %4 = arith.extf %3 : vector<32x128xbf16> to vector<32x128xf32>
    %c0_2 = arith.constant 0 : index
    %c0_3 = arith.constant 0 : index
    %5 = vector.load %arg5[%c0_2, %c0_3] : memref<1x128xf32, #tpu.memory_space<vmem>>, vector<1x128xf32>
    %6 = vector.broadcast %5 : vector<1x128xf32> to vector<32x128xf32>
    %7 = arith.mulf %4, %6 : vector<32x128xf32>
    %c0_4 = arith.constant 0 : index
    %c0_5 = arith.constant 0 : index
    %8 = vector.load %arg6[%c0_4, %c0_5] : memref<1x128xf32, #tpu.memory_space<vmem>>, vector<1x128xf32>
    %9 = vector.broadcast %8 : vector<1x128xf32> to vector<32x128xf32>
    %10 = arith.addf %7, %9 : vector<32x128xf32>
    %cst = arith.constant 0.000000e+00 : f32
    %11 = vector.broadcast %cst : f32 to vector<32x128xf32>
    %12 = arith.maximumf %10, %11 : vector<32x128xf32>
    %13 = arith.truncf %12 : vector<32x128xf32> to vector<32x128xbf16>
    %c0_6 = arith.constant 0 : index
    %c0_7 = arith.constant 0 : index
    %14 = vector.load %arg10[%c0_6, %c0_7] : memref<32x128xf32, #tpu.memory_space<vmem>>, vector<32x128xf32>
    %c0_8 = arith.constant 0 : index
    %c0_9 = arith.constant 0 : index
    %15 = vector.load %arg4[%c0_8, %c0_9] : memref<128x128xbf16, #tpu.memory_space<vmem>>, vector<128x128xbf16>
    %cst_10 = arith.constant dense<0.000000e+00> : vector<32x128xf32>
    %16 = tpu.matmul %13, %15, %cst_10 {dimension_numbers = #tpu.dot_dimension_numbers<[1], [0], [0], [1], [0, 0, 1, 1], [], []>} : vector<32x128xbf16>, vector<128x128xbf16>, vector<32x128xf32> -> vector<32x128xf32>
    %17 = arith.addf %14, %16 : vector<32x128xf32>
    %c0_11 = arith.constant 0 : index
    %c0_12 = arith.constant 0 : index
    %18 = vector.load %arg10[%c0_11, %c0_12] : memref<32x128xf32, #tpu.memory_space<vmem>>, vector<32x128xf32>
    tpu.vector_store %arg10[%c0_11, %c0_12], %17 {strides = array<i32>} : memref<32x128xf32, #tpu.memory_space<vmem>>, vector<32x128xf32>,
    %c0_i32_13 = arith.constant 0 : i32
    %19 = arith.cmpi eq, %arg2, %c0_i32_13 : i32
    %20 = arith.extui %19 : i1 to i32
    %c0_i32_14 = arith.constant 0 : i32
    %21 = arith.cmpi ne, %20, %c0_i32_14 : i32
    scf.if %21 {
      %c0_15 = arith.constant 0 : index
      %c0_16 = arith.constant 0 : index
      %22 = vector.load %arg10[%c0_15, %c0_16] : memref<32x128xf32, #tpu.memory_space<vmem>>, vector<32x128xf32>
      %c0_17 = arith.constant 0 : index
      %c0_18 = arith.constant 0 : index
      %23 = vector.load %arg7[%c0_17, %c0_18] : memref<1x128xf32, #tpu.memory_space<vmem>>, vector<1x128xf32>
      %24 = vector.broadcast %23 : vector<1x128xf32> to vector<32x128xf32>
      %25 = arith.mulf %22, %24 : vector<32x128xf32>
      %c0_19 = arith.constant 0 : index
      %c0_20 = arith.constant 0 : index
      %26 = vector.load %arg8[%c0_19, %c0_20] : memref<1x128xf32, #tpu.memory_space<vmem>>, vector<1x128xf32>
      %27 = vector.broadcast %26 : vector<1x128xf32> to vector<32x128xf32>
      %28 = arith.addf %25, %27 : vector<32x128xf32>
      %cst_21 = arith.constant 0.000000e+00 : f32
      %29 = vector.broadcast %cst_21 : f32 to vector<32x128xf32>
      %30 = arith.maximumf %28, %29 : vector<32x128xf32>
      %31 = arith.truncf %30 : vector<32x128xf32> to vector<32x128xbf16>
      %c0_22 = arith.constant 0 : index
      %c0_23 = arith.constant 0 : index
      %32 = vector.load %arg9[%c0_22, %c0_23] : memref<32x128xbf16, #tpu.memory_space<vmem>>, vector<32x128xbf16>
      tpu.vector_store %arg9[%c0_22, %c0_23], %31 {strides = array<i32>} : memref<32x128xbf16, #tpu.memory_space<vmem>>, vector<32x128xbf16>,
    } else {
    }
    return
  }
  func.func @transform_0(%arg0: i32, %arg1: i32, %arg2: i32) -> (i32, i32) {
    %c0_i32 = arith.constant 0 : i32
    return %arg0, %arg2 : i32, i32
  }
  func.func @transform_1(%arg0: i32, %arg1: i32, %arg2: i32) -> (i32, i32) {
    %c0_i32 = arith.constant 0 : i32
    return %arg2, %arg1 : i32, i32
  }
  func.func @transform_2(%arg0: i32, %arg1: i32, %arg2: i32) -> (i32, i32) {
    %c0_i32 = arith.constant 0 : i32
    %c0_i32_0 = arith.constant 0 : i32
    return %c0_i32, %arg2 : i32, i32
  }
  func.func @transform_3(%arg0: i32, %arg1: i32, %arg2: i32) -> (i32, i32) {
    %c0_i32 = arith.constant 0 : i32
    %c0_i32_0 = arith.constant 0 : i32
    return %c0_i32, %arg2 : i32, i32
  }
  func.func @transform_4(%arg0: i32, %arg1: i32, %arg2: i32) -> (i32, i32) {
    %c0_i32 = arith.constant 0 : i32
    %c0_i32_0 = arith.constant 0 : i32
    return %c0_i32, %arg1 : i32, i32
  }
  func.func @transform_5(%arg0: i32, %arg1: i32, %arg2: i32) -> (i32, i32) {
    %c0_i32 = arith.constant 0 : i32
    %c0_i32_0 = arith.constant 0 : i32
    return %c0_i32, %arg1 : i32, i32
  }
  func.func @transform_6(%arg0: i32, %arg1: i32, %arg2: i32) -> (i32, i32) {
    %c0_i32 = arith.constant 0 : i32
    return %arg0, %arg1 : i32, i32
  }
}

module attributes {stable_mosaic.version = 11 : i64} {
  func.func @_conv_mm_kernel(%arg0: i32, %arg1: i32, %arg2: i32, %arg3: memref<32x384xbf16, #tpu.memory_space<vmem>>, %arg4: memref<384x128xbf16, #tpu.memory_space<vmem>>, %arg5: memref<1x384xf32, #tpu.memory_space<vmem>>, %arg6: memref<1x384xf32, #tpu.memory_space<vmem>>, %arg7: memref<1x128xf32, #tpu.memory_space<vmem>>, %arg8: memref<1x128xf32, #tpu.memory_space<vmem>>, %arg9: memref<32x128xbf16, #tpu.memory_space<vmem>>, %arg10: memref<32x128xf32, #tpu.memory_space<vmem>>) attributes {dimension_semantics = [#tpu.dimension_semantics<parallel>, #tpu.dimension_semantics<parallel>, #tpu.dimension_semantics<arbitrary>], iteration_bounds = array<i64: 1, 1, 3>, scalar_prefetch = 0 : i64, scratch_operands = 1 : i64, tpu.core_type = #tpu.core_type<tc>, window_params = [{transform_indices = @transform_0, window_bounds = array<i64: 32, 384>}, {transform_indices = @transform_1, window_bounds = array<i64: 384, 128>}, {transform_indices = @transform_2, window_bounds = array<i64: 1, 384>}, {transform_indices = @transform_3, window_bounds = array<i64: 1, 384>}, {transform_indices = @transform_4, window_bounds = array<i64: 1, 128>}, {transform_indices = @transform_5, window_bounds = array<i64: 1, 128>}, {transform_indices = @transform_6, window_bounds = array<i64: 32, 128>}]} {
    %c0_i32 = arith.constant 0 : i32
    %0 = arith.cmpi eq, %arg2, %c0_i32 : i32
    %1 = arith.extui %0 : i1 to i32
    %c0_i32_0 = arith.constant 0 : i32
    %2 = arith.cmpi ne, %1, %c0_i32_0 : i32
    scf.if %2 {
      %cst_9 = arith.constant 0.000000e+00 : f32
      %12 = vector.broadcast %cst_9 : f32 to vector<32x128xf32>
      %c0_10 = arith.constant 0 : index
      %c0_11 = arith.constant 0 : index
      %13 = vector.load %arg10[%c0_10, %c0_11] : memref<32x128xf32, #tpu.memory_space<vmem>>, vector<32x128xf32>
      tpu.vector_store %arg10[%c0_10, %c0_11], %12 {strides = array<i32>} : memref<32x128xf32, #tpu.memory_space<vmem>>, vector<32x128xf32>,
    } else {
    }
    %c0 = arith.constant 0 : index
    %c0_1 = arith.constant 0 : index
    %3 = vector.load %arg3[%c0, %c0_1] : memref<32x384xbf16, #tpu.memory_space<vmem>>, vector<32x384xbf16>
    %c0_2 = arith.constant 0 : index
    %c0_3 = arith.constant 0 : index
    %4 = vector.load %arg10[%c0_2, %c0_3] : memref<32x128xf32, #tpu.memory_space<vmem>>, vector<32x128xf32>
    %c0_4 = arith.constant 0 : index
    %c0_5 = arith.constant 0 : index
    %5 = vector.load %arg4[%c0_4, %c0_5] : memref<384x128xbf16, #tpu.memory_space<vmem>>, vector<384x128xbf16>
    %cst = arith.constant dense<0.000000e+00> : vector<32x128xf32>
    %6 = tpu.matmul %3, %5, %cst {dimension_numbers = #tpu.dot_dimension_numbers<[1], [0], [0], [1], [0, 0, 1, 1], [], []>} : vector<32x384xbf16>, vector<384x128xbf16>, vector<32x128xf32> -> vector<32x128xf32>
    %7 = arith.addf %4, %6 : vector<32x128xf32>
    %c0_6 = arith.constant 0 : index
    %c0_7 = arith.constant 0 : index
    %8 = vector.load %arg10[%c0_6, %c0_7] : memref<32x128xf32, #tpu.memory_space<vmem>>, vector<32x128xf32>
    tpu.vector_store %arg10[%c0_6, %c0_7], %7 {strides = array<i32>} : memref<32x128xf32, #tpu.memory_space<vmem>>, vector<32x128xf32>,
    %c2_i32 = arith.constant 2 : i32
    %9 = arith.cmpi eq, %arg2, %c2_i32 : i32
    %10 = arith.extui %9 : i1 to i32
    %c0_i32_8 = arith.constant 0 : i32
    %11 = arith.cmpi ne, %10, %c0_i32_8 : i32
    scf.if %11 {
      %c0_9 = arith.constant 0 : index
      %c0_10 = arith.constant 0 : index
      %12 = vector.load %arg10[%c0_9, %c0_10] : memref<32x128xf32, #tpu.memory_space<vmem>>, vector<32x128xf32>
      %13 = arith.truncf %12 : vector<32x128xf32> to vector<32x128xbf16>
      %c0_11 = arith.constant 0 : index
      %c0_12 = arith.constant 0 : index
      %14 = vector.load %arg9[%c0_11, %c0_12] : memref<32x128xbf16, #tpu.memory_space<vmem>>, vector<32x128xbf16>
      tpu.vector_store %arg9[%c0_11, %c0_12], %13 {strides = array<i32>} : memref<32x128xbf16, #tpu.memory_space<vmem>>, vector<32x128xbf16>,
    } else {
    }
    return
  }
  func.func @transform_0(%arg0: i32, %arg1: i32, %arg2: i32) -> (i32, i32) {
    %c0_i32 = arith.constant 0 : i32
    return %arg0, %arg2 : i32, i32
  }
  func.func @transform_1(%arg0: i32, %arg1: i32, %arg2: i32) -> (i32, i32) {
    %c0_i32 = arith.constant 0 : i32
    return %arg2, %arg1 : i32, i32
  }
  func.func @transform_2(%arg0: i32, %arg1: i32, %arg2: i32) -> (i32, i32) {
    %c0_i32 = arith.constant 0 : i32
    %c0_i32_0 = arith.constant 0 : i32
    return %c0_i32, %arg2 : i32, i32
  }
  func.func @transform_3(%arg0: i32, %arg1: i32, %arg2: i32) -> (i32, i32) {
    %c0_i32 = arith.constant 0 : i32
    %c0_i32_0 = arith.constant 0 : i32
    return %c0_i32, %arg2 : i32, i32
  }
  func.func @transform_4(%arg0: i32, %arg1: i32, %arg2: i32) -> (i32, i32) {
    %c0_i32 = arith.constant 0 : i32
    %c0_i32_0 = arith.constant 0 : i32
    return %c0_i32, %arg1 : i32, i32
  }
  func.func @transform_5(%arg0: i32, %arg1: i32, %arg2: i32) -> (i32, i32) {
    %c0_i32 = arith.constant 0 : i32
    %c0_i32_0 = arith.constant 0 : i32
    return %c0_i32, %arg1 : i32, i32
  }
  func.func @transform_6(%arg0: i32, %arg1: i32, %arg2: i32) -> (i32, i32) {
    %c0_i32 = arith.constant 0 : i32
    return %arg0, %arg1 : i32, i32
  }
}

module attributes {stable_mosaic.version = 11 : i64} {
  func.func @_conv_mm_kernel(%arg0: i32, %arg1: i32, %arg2: i32, %arg3: memref<32x256xbf16, #tpu.memory_space<vmem>>, %arg4: memref<256x128xbf16, #tpu.memory_space<vmem>>, %arg5: memref<1x256xf32, #tpu.memory_space<vmem>>, %arg6: memref<1x256xf32, #tpu.memory_space<vmem>>, %arg7: memref<1x128xf32, #tpu.memory_space<vmem>>, %arg8: memref<1x128xf32, #tpu.memory_space<vmem>>, %arg9: memref<32x128xbf16, #tpu.memory_space<vmem>>, %arg10: memref<32x128xf32, #tpu.memory_space<vmem>>) attributes {dimension_semantics = [#tpu.dimension_semantics<parallel>, #tpu.dimension_semantics<parallel>, #tpu.dimension_semantics<arbitrary>], iteration_bounds = array<i64: 1, 1, 1>, scalar_prefetch = 0 : i64, scratch_operands = 1 : i64, tpu.core_type = #tpu.core_type<tc>, window_params = [{transform_indices = @transform_0, window_bounds = array<i64: 32, 256>}, {transform_indices = @transform_1, window_bounds = array<i64: 256, 128>}, {transform_indices = @transform_2, window_bounds = array<i64: 1, 256>}, {transform_indices = @transform_3, window_bounds = array<i64: 1, 256>}, {transform_indices = @transform_4, window_bounds = array<i64: 1, 128>}, {transform_indices = @transform_5, window_bounds = array<i64: 1, 128>}, {transform_indices = @transform_6, window_bounds = array<i64: 32, 128>}]} {
    %c0_i32 = arith.constant 0 : i32
    %0 = arith.cmpi eq, %arg2, %c0_i32 : i32
    %1 = arith.extui %0 : i1 to i32
    %c0_i32_0 = arith.constant 0 : i32
    %2 = arith.cmpi ne, %1, %c0_i32_0 : i32
    scf.if %2 {
      %cst_15 = arith.constant 0.000000e+00 : f32
      %22 = vector.broadcast %cst_15 : f32 to vector<32x128xf32>
      %c0_16 = arith.constant 0 : index
      %c0_17 = arith.constant 0 : index
      %23 = vector.load %arg10[%c0_16, %c0_17] : memref<32x128xf32, #tpu.memory_space<vmem>>, vector<32x128xf32>
      tpu.vector_store %arg10[%c0_16, %c0_17], %22 {strides = array<i32>} : memref<32x128xf32, #tpu.memory_space<vmem>>, vector<32x128xf32>,
    } else {
    }
    %c0 = arith.constant 0 : index
    %c0_1 = arith.constant 0 : index
    %3 = vector.load %arg3[%c0, %c0_1] : memref<32x256xbf16, #tpu.memory_space<vmem>>, vector<32x256xbf16>
    %4 = arith.extf %3 : vector<32x256xbf16> to vector<32x256xf32>
    %c0_2 = arith.constant 0 : index
    %c0_3 = arith.constant 0 : index
    %5 = vector.load %arg5[%c0_2, %c0_3] : memref<1x256xf32, #tpu.memory_space<vmem>>, vector<1x256xf32>
    %6 = vector.broadcast %5 : vector<1x256xf32> to vector<32x256xf32>
    %7 = arith.mulf %4, %6 : vector<32x256xf32>
    %c0_4 = arith.constant 0 : index
    %c0_5 = arith.constant 0 : index
    %8 = vector.load %arg6[%c0_4, %c0_5] : memref<1x256xf32, #tpu.memory_space<vmem>>, vector<1x256xf32>
    %9 = vector.broadcast %8 : vector<1x256xf32> to vector<32x256xf32>
    %10 = arith.addf %7, %9 : vector<32x256xf32>
    %cst = arith.constant 0.000000e+00 : f32
    %11 = vector.broadcast %cst : f32 to vector<32x256xf32>
    %12 = arith.maximumf %10, %11 : vector<32x256xf32>
    %13 = arith.truncf %12 : vector<32x256xf32> to vector<32x256xbf16>
    %c0_6 = arith.constant 0 : index
    %c0_7 = arith.constant 0 : index
    %14 = vector.load %arg10[%c0_6, %c0_7] : memref<32x128xf32, #tpu.memory_space<vmem>>, vector<32x128xf32>
    %c0_8 = arith.constant 0 : index
    %c0_9 = arith.constant 0 : index
    %15 = vector.load %arg4[%c0_8, %c0_9] : memref<256x128xbf16, #tpu.memory_space<vmem>>, vector<256x128xbf16>
    %cst_10 = arith.constant dense<0.000000e+00> : vector<32x128xf32>
    %16 = tpu.matmul %13, %15, %cst_10 {dimension_numbers = #tpu.dot_dimension_numbers<[1], [0], [0], [1], [0, 0, 1, 1], [], []>} : vector<32x256xbf16>, vector<256x128xbf16>, vector<32x128xf32> -> vector<32x128xf32>
    %17 = arith.addf %14, %16 : vector<32x128xf32>
    %c0_11 = arith.constant 0 : index
    %c0_12 = arith.constant 0 : index
    %18 = vector.load %arg10[%c0_11, %c0_12] : memref<32x128xf32, #tpu.memory_space<vmem>>, vector<32x128xf32>
    tpu.vector_store %arg10[%c0_11, %c0_12], %17 {strides = array<i32>} : memref<32x128xf32, #tpu.memory_space<vmem>>, vector<32x128xf32>,
    %c0_i32_13 = arith.constant 0 : i32
    %19 = arith.cmpi eq, %arg2, %c0_i32_13 : i32
    %20 = arith.extui %19 : i1 to i32
    %c0_i32_14 = arith.constant 0 : i32
    %21 = arith.cmpi ne, %20, %c0_i32_14 : i32
    scf.if %21 {
      %c0_15 = arith.constant 0 : index
      %c0_16 = arith.constant 0 : index
      %22 = vector.load %arg10[%c0_15, %c0_16] : memref<32x128xf32, #tpu.memory_space<vmem>>, vector<32x128xf32>
      %c0_17 = arith.constant 0 : index
      %c0_18 = arith.constant 0 : index
      %23 = vector.load %arg7[%c0_17, %c0_18] : memref<1x128xf32, #tpu.memory_space<vmem>>, vector<1x128xf32>
      %24 = vector.broadcast %23 : vector<1x128xf32> to vector<32x128xf32>
      %25 = arith.mulf %22, %24 : vector<32x128xf32>
      %c0_19 = arith.constant 0 : index
      %c0_20 = arith.constant 0 : index
      %26 = vector.load %arg8[%c0_19, %c0_20] : memref<1x128xf32, #tpu.memory_space<vmem>>, vector<1x128xf32>
      %27 = vector.broadcast %26 : vector<1x128xf32> to vector<32x128xf32>
      %28 = arith.addf %25, %27 : vector<32x128xf32>
      %cst_21 = arith.constant 0.000000e+00 : f32
      %29 = vector.broadcast %cst_21 : f32 to vector<32x128xf32>
      %30 = arith.maximumf %28, %29 : vector<32x128xf32>
      %31 = arith.truncf %30 : vector<32x128xf32> to vector<32x128xbf16>
      %c0_22 = arith.constant 0 : index
      %c0_23 = arith.constant 0 : index
      %32 = vector.load %arg9[%c0_22, %c0_23] : memref<32x128xbf16, #tpu.memory_space<vmem>>, vector<32x128xbf16>
      tpu.vector_store %arg9[%c0_22, %c0_23], %31 {strides = array<i32>} : memref<32x128xbf16, #tpu.memory_space<vmem>>, vector<32x128xbf16>,
    } else {
    }
    return
  }
  func.func @transform_0(%arg0: i32, %arg1: i32, %arg2: i32) -> (i32, i32) {
    %c0_i32 = arith.constant 0 : i32
    return %arg0, %arg2 : i32, i32
  }
  func.func @transform_1(%arg0: i32, %arg1: i32, %arg2: i32) -> (i32, i32) {
    %c0_i32 = arith.constant 0 : i32
    return %arg2, %arg1 : i32, i32
  }
  func.func @transform_2(%arg0: i32, %arg1: i32, %arg2: i32) -> (i32, i32) {
    %c0_i32 = arith.constant 0 : i32
    %c0_i32_0 = arith.constant 0 : i32
    return %c0_i32, %arg2 : i32, i32
  }
  func.func @transform_3(%arg0: i32, %arg1: i32, %arg2: i32) -> (i32, i32) {
    %c0_i32 = arith.constant 0 : i32
    %c0_i32_0 = arith.constant 0 : i32
    return %c0_i32, %arg2 : i32, i32
  }
  func.func @transform_4(%arg0: i32, %arg1: i32, %arg2: i32) -> (i32, i32) {
    %c0_i32 = arith.constant 0 : i32
    %c0_i32_0 = arith.constant 0 : i32
    return %c0_i32, %arg1 : i32, i32
  }
  func.func @transform_5(%arg0: i32, %arg1: i32, %arg2: i32) -> (i32, i32) {
    %c0_i32 = arith.constant 0 : i32
    %c0_i32_0 = arith.constant 0 : i32
    return %c0_i32, %arg1 : i32, i32
  }
  func.func @transform_6(%arg0: i32, %arg1: i32, %arg2: i32) -> (i32, i32) {
    %c0_i32 = arith.constant 0 : i32
    return %arg0, %arg1 : i32, i32
  }
}

module attributes {stable_mosaic.version = 11 : i64} {
  func.func @_conv_mm_kernel(%arg0: i32, %arg1: i32, %arg2: i32, %arg3: memref<32x384xbf16, #tpu.memory_space<vmem>>, %arg4: memref<384x128xbf16, #tpu.memory_space<vmem>>, %arg5: memref<1x384xf32, #tpu.memory_space<vmem>>, %arg6: memref<1x384xf32, #tpu.memory_space<vmem>>, %arg7: memref<1x128xf32, #tpu.memory_space<vmem>>, %arg8: memref<1x128xf32, #tpu.memory_space<vmem>>, %arg9: memref<32x128xbf16, #tpu.memory_space<vmem>>, %arg10: memref<32x128xf32, #tpu.memory_space<vmem>>) attributes {dimension_semantics = [#tpu.dimension_semantics<parallel>, #tpu.dimension_semantics<parallel>, #tpu.dimension_semantics<arbitrary>], iteration_bounds = array<i64: 1, 1, 1>, scalar_prefetch = 0 : i64, scratch_operands = 1 : i64, tpu.core_type = #tpu.core_type<tc>, window_params = [{transform_indices = @transform_0, window_bounds = array<i64: 32, 384>}, {transform_indices = @transform_1, window_bounds = array<i64: 384, 128>}, {transform_indices = @transform_2, window_bounds = array<i64: 1, 384>}, {transform_indices = @transform_3, window_bounds = array<i64: 1, 384>}, {transform_indices = @transform_4, window_bounds = array<i64: 1, 128>}, {transform_indices = @transform_5, window_bounds = array<i64: 1, 128>}, {transform_indices = @transform_6, window_bounds = array<i64: 32, 128>}]} {
    %c0_i32 = arith.constant 0 : i32
    %0 = arith.cmpi eq, %arg2, %c0_i32 : i32
    %1 = arith.extui %0 : i1 to i32
    %c0_i32_0 = arith.constant 0 : i32
    %2 = arith.cmpi ne, %1, %c0_i32_0 : i32
    scf.if %2 {
      %cst_15 = arith.constant 0.000000e+00 : f32
      %22 = vector.broadcast %cst_15 : f32 to vector<32x128xf32>
      %c0_16 = arith.constant 0 : index
      %c0_17 = arith.constant 0 : index
      %23 = vector.load %arg10[%c0_16, %c0_17] : memref<32x128xf32, #tpu.memory_space<vmem>>, vector<32x128xf32>
      tpu.vector_store %arg10[%c0_16, %c0_17], %22 {strides = array<i32>} : memref<32x128xf32, #tpu.memory_space<vmem>>, vector<32x128xf32>,
    } else {
    }
    %c0 = arith.constant 0 : index
    %c0_1 = arith.constant 0 : index
    %3 = vector.load %arg3[%c0, %c0_1] : memref<32x384xbf16, #tpu.memory_space<vmem>>, vector<32x384xbf16>
    %4 = arith.extf %3 : vector<32x384xbf16> to vector<32x384xf32>
    %c0_2 = arith.constant 0 : index
    %c0_3 = arith.constant 0 : index
    %5 = vector.load %arg5[%c0_2, %c0_3] : memref<1x384xf32, #tpu.memory_space<vmem>>, vector<1x384xf32>
    %6 = vector.broadcast %5 : vector<1x384xf32> to vector<32x384xf32>
    %7 = arith.mulf %4, %6 : vector<32x384xf32>
    %c0_4 = arith.constant 0 : index
    %c0_5 = arith.constant 0 : index
    %8 = vector.load %arg6[%c0_4, %c0_5] : memref<1x384xf32, #tpu.memory_space<vmem>>, vector<1x384xf32>
    %9 = vector.broadcast %8 : vector<1x384xf32> to vector<32x384xf32>
    %10 = arith.addf %7, %9 : vector<32x384xf32>
    %cst = arith.constant 0.000000e+00 : f32
    %11 = vector.broadcast %cst : f32 to vector<32x384xf32>
    %12 = arith.maximumf %10, %11 : vector<32x384xf32>
    %13 = arith.truncf %12 : vector<32x384xf32> to vector<32x384xbf16>
    %c0_6 = arith.constant 0 : index
    %c0_7 = arith.constant 0 : index
    %14 = vector.load %arg10[%c0_6, %c0_7] : memref<32x128xf32, #tpu.memory_space<vmem>>, vector<32x128xf32>
    %c0_8 = arith.constant 0 : index
    %c0_9 = arith.constant 0 : index
    %15 = vector.load %arg4[%c0_8, %c0_9] : memref<384x128xbf16, #tpu.memory_space<vmem>>, vector<384x128xbf16>
    %cst_10 = arith.constant dense<0.000000e+00> : vector<32x128xf32>
    %16 = tpu.matmul %13, %15, %cst_10 {dimension_numbers = #tpu.dot_dimension_numbers<[1], [0], [0], [1], [0, 0, 1, 1], [], []>} : vector<32x384xbf16>, vector<384x128xbf16>, vector<32x128xf32> -> vector<32x128xf32>
    %17 = arith.addf %14, %16 : vector<32x128xf32>
    %c0_11 = arith.constant 0 : index
    %c0_12 = arith.constant 0 : index
    %18 = vector.load %arg10[%c0_11, %c0_12] : memref<32x128xf32, #tpu.memory_space<vmem>>, vector<32x128xf32>
    tpu.vector_store %arg10[%c0_11, %c0_12], %17 {strides = array<i32>} : memref<32x128xf32, #tpu.memory_space<vmem>>, vector<32x128xf32>,
    %c0_i32_13 = arith.constant 0 : i32
    %19 = arith.cmpi eq, %arg2, %c0_i32_13 : i32
    %20 = arith.extui %19 : i1 to i32
    %c0_i32_14 = arith.constant 0 : i32
    %21 = arith.cmpi ne, %20, %c0_i32_14 : i32
    scf.if %21 {
      %c0_15 = arith.constant 0 : index
      %c0_16 = arith.constant 0 : index
      %22 = vector.load %arg10[%c0_15, %c0_16] : memref<32x128xf32, #tpu.memory_space<vmem>>, vector<32x128xf32>
      %c0_17 = arith.constant 0 : index
      %c0_18 = arith.constant 0 : index
      %23 = vector.load %arg7[%c0_17, %c0_18] : memref<1x128xf32, #tpu.memory_space<vmem>>, vector<1x128xf32>
      %24 = vector.broadcast %23 : vector<1x128xf32> to vector<32x128xf32>
      %25 = arith.mulf %22, %24 : vector<32x128xf32>
      %c0_19 = arith.constant 0 : index
      %c0_20 = arith.constant 0 : index
      %26 = vector.load %arg8[%c0_19, %c0_20] : memref<1x128xf32, #tpu.memory_space<vmem>>, vector<1x128xf32>
      %27 = vector.broadcast %26 : vector<1x128xf32> to vector<32x128xf32>
      %28 = arith.addf %25, %27 : vector<32x128xf32>
      %cst_21 = arith.constant 0.000000e+00 : f32
      %29 = vector.broadcast %cst_21 : f32 to vector<32x128xf32>
      %30 = arith.maximumf %28, %29 : vector<32x128xf32>
      %31 = arith.truncf %30 : vector<32x128xf32> to vector<32x128xbf16>
      %c0_22 = arith.constant 0 : index
      %c0_23 = arith.constant 0 : index
      %32 = vector.load %arg9[%c0_22, %c0_23] : memref<32x128xbf16, #tpu.memory_space<vmem>>, vector<32x128xbf16>
      tpu.vector_store %arg9[%c0_22, %c0_23], %31 {strides = array<i32>} : memref<32x128xbf16, #tpu.memory_space<vmem>>, vector<32x128xbf16>,
    } else {
    }
    return
  }
  func.func @transform_0(%arg0: i32, %arg1: i32, %arg2: i32) -> (i32, i32) {
    %c0_i32 = arith.constant 0 : i32
    return %arg0, %arg2 : i32, i32
  }
  func.func @transform_1(%arg0: i32, %arg1: i32, %arg2: i32) -> (i32, i32) {
    %c0_i32 = arith.constant 0 : i32
    return %arg2, %arg1 : i32, i32
  }
  func.func @transform_2(%arg0: i32, %arg1: i32, %arg2: i32) -> (i32, i32) {
    %c0_i32 = arith.constant 0 : i32
    %c0_i32_0 = arith.constant 0 : i32
    return %c0_i32, %arg2 : i32, i32
  }
  func.func @transform_3(%arg0: i32, %arg1: i32, %arg2: i32) -> (i32, i32) {
    %c0_i32 = arith.constant 0 : i32
    %c0_i32_0 = arith.constant 0 : i32
    return %c0_i32, %arg2 : i32, i32
  }
  func.func @transform_4(%arg0: i32, %arg1: i32, %arg2: i32) -> (i32, i32) {
    %c0_i32 = arith.constant 0 : i32
    %c0_i32_0 = arith.constant 0 : i32
    return %c0_i32, %arg1 : i32, i32
  }
  func.func @transform_5(%arg0: i32, %arg1: i32, %arg2: i32) -> (i32, i32) {
    %c0_i32 = arith.constant 0 : i32
    %c0_i32_0 = arith.constant 0 : i32
    return %c0_i32, %arg1 : i32, i32
  }
  func.func @transform_6(%arg0: i32, %arg1: i32, %arg2: i32) -> (i32, i32) {
    %c0_i32 = arith.constant 0 : i32
    return %arg0, %arg1 : i32, i32
  }
}

module attributes {stable_mosaic.version = 11 : i64} {
  func.func @_conv_mm_kernel(%arg0: i32, %arg1: i32, %arg2: i32, %arg3: memref<32x512xbf16, #tpu.memory_space<vmem>>, %arg4: memref<512x128xbf16, #tpu.memory_space<vmem>>, %arg5: memref<1x512xf32, #tpu.memory_space<vmem>>, %arg6: memref<1x512xf32, #tpu.memory_space<vmem>>, %arg7: memref<1x128xf32, #tpu.memory_space<vmem>>, %arg8: memref<1x128xf32, #tpu.memory_space<vmem>>, %arg9: memref<32x128xbf16, #tpu.memory_space<vmem>>, %arg10: memref<32x128xf32, #tpu.memory_space<vmem>>) attributes {dimension_semantics = [#tpu.dimension_semantics<parallel>, #tpu.dimension_semantics<parallel>, #tpu.dimension_semantics<arbitrary>], iteration_bounds = array<i64: 1, 1, 1>, scalar_prefetch = 0 : i64, scratch_operands = 1 : i64, tpu.core_type = #tpu.core_type<tc>, window_params = [{transform_indices = @transform_0, window_bounds = array<i64: 32, 512>}, {transform_indices = @transform_1, window_bounds = array<i64: 512, 128>}, {transform_indices = @transform_2, window_bounds = array<i64: 1, 512>}, {transform_indices = @transform_3, window_bounds = array<i64: 1, 512>}, {transform_indices = @transform_4, window_bounds = array<i64: 1, 128>}, {transform_indices = @transform_5, window_bounds = array<i64: 1, 128>}, {transform_indices = @transform_6, window_bounds = array<i64: 32, 128>}]} {
    %c0_i32 = arith.constant 0 : i32
    %0 = arith.cmpi eq, %arg2, %c0_i32 : i32
    %1 = arith.extui %0 : i1 to i32
    %c0_i32_0 = arith.constant 0 : i32
    %2 = arith.cmpi ne, %1, %c0_i32_0 : i32
    scf.if %2 {
      %cst_15 = arith.constant 0.000000e+00 : f32
      %22 = vector.broadcast %cst_15 : f32 to vector<32x128xf32>
      %c0_16 = arith.constant 0 : index
      %c0_17 = arith.constant 0 : index
      %23 = vector.load %arg10[%c0_16, %c0_17] : memref<32x128xf32, #tpu.memory_space<vmem>>, vector<32x128xf32>
      tpu.vector_store %arg10[%c0_16, %c0_17], %22 {strides = array<i32>} : memref<32x128xf32, #tpu.memory_space<vmem>>, vector<32x128xf32>,
    } else {
    }
    %c0 = arith.constant 0 : index
    %c0_1 = arith.constant 0 : index
    %3 = vector.load %arg3[%c0, %c0_1] : memref<32x512xbf16, #tpu.memory_space<vmem>>, vector<32x512xbf16>
    %4 = arith.extf %3 : vector<32x512xbf16> to vector<32x512xf32>
    %c0_2 = arith.constant 0 : index
    %c0_3 = arith.constant 0 : index
    %5 = vector.load %arg5[%c0_2, %c0_3] : memref<1x512xf32, #tpu.memory_space<vmem>>, vector<1x512xf32>
    %6 = vector.broadcast %5 : vector<1x512xf32> to vector<32x512xf32>
    %7 = arith.mulf %4, %6 : vector<32x512xf32>
    %c0_4 = arith.constant 0 : index
    %c0_5 = arith.constant 0 : index
    %8 = vector.load %arg6[%c0_4, %c0_5] : memref<1x512xf32, #tpu.memory_space<vmem>>, vector<1x512xf32>
    %9 = vector.broadcast %8 : vector<1x512xf32> to vector<32x512xf32>
    %10 = arith.addf %7, %9 : vector<32x512xf32>
    %cst = arith.constant 0.000000e+00 : f32
    %11 = vector.broadcast %cst : f32 to vector<32x512xf32>
    %12 = arith.maximumf %10, %11 : vector<32x512xf32>
    %13 = arith.truncf %12 : vector<32x512xf32> to vector<32x512xbf16>
    %c0_6 = arith.constant 0 : index
    %c0_7 = arith.constant 0 : index
    %14 = vector.load %arg10[%c0_6, %c0_7] : memref<32x128xf32, #tpu.memory_space<vmem>>, vector<32x128xf32>
    %c0_8 = arith.constant 0 : index
    %c0_9 = arith.constant 0 : index
    %15 = vector.load %arg4[%c0_8, %c0_9] : memref<512x128xbf16, #tpu.memory_space<vmem>>, vector<512x128xbf16>
    %cst_10 = arith.constant dense<0.000000e+00> : vector<32x128xf32>
    %16 = tpu.matmul %13, %15, %cst_10 {dimension_numbers = #tpu.dot_dimension_numbers<[1], [0], [0], [1], [0, 0, 1, 1], [], []>} : vector<32x512xbf16>, vector<512x128xbf16>, vector<32x128xf32> -> vector<32x128xf32>
    %17 = arith.addf %14, %16 : vector<32x128xf32>
    %c0_11 = arith.constant 0 : index
    %c0_12 = arith.constant 0 : index
    %18 = vector.load %arg10[%c0_11, %c0_12] : memref<32x128xf32, #tpu.memory_space<vmem>>, vector<32x128xf32>
    tpu.vector_store %arg10[%c0_11, %c0_12], %17 {strides = array<i32>} : memref<32x128xf32, #tpu.memory_space<vmem>>, vector<32x128xf32>,
    %c0_i32_13 = arith.constant 0 : i32
    %19 = arith.cmpi eq, %arg2, %c0_i32_13 : i32
    %20 = arith.extui %19 : i1 to i32
    %c0_i32_14 = arith.constant 0 : i32
    %21 = arith.cmpi ne, %20, %c0_i32_14 : i32
    scf.if %21 {
      %c0_15 = arith.constant 0 : index
      %c0_16 = arith.constant 0 : index
      %22 = vector.load %arg10[%c0_15, %c0_16] : memref<32x128xf32, #tpu.memory_space<vmem>>, vector<32x128xf32>
      %c0_17 = arith.constant 0 : index
      %c0_18 = arith.constant 0 : index
      %23 = vector.load %arg7[%c0_17, %c0_18] : memref<1x128xf32, #tpu.memory_space<vmem>>, vector<1x128xf32>
      %24 = vector.broadcast %23 : vector<1x128xf32> to vector<32x128xf32>
      %25 = arith.mulf %22, %24 : vector<32x128xf32>
      %c0_19 = arith.constant 0 : index
      %c0_20 = arith.constant 0 : index
      %26 = vector.load %arg8[%c0_19, %c0_20] : memref<1x128xf32, #tpu.memory_space<vmem>>, vector<1x128xf32>
      %27 = vector.broadcast %26 : vector<1x128xf32> to vector<32x128xf32>
      %28 = arith.addf %25, %27 : vector<32x128xf32>
      %cst_21 = arith.constant 0.000000e+00 : f32
      %29 = vector.broadcast %cst_21 : f32 to vector<32x128xf32>
      %30 = arith.maximumf %28, %29 : vector<32x128xf32>
      %31 = arith.truncf %30 : vector<32x128xf32> to vector<32x128xbf16>
      %c0_22 = arith.constant 0 : index
      %c0_23 = arith.constant 0 : index
      %32 = vector.load %arg9[%c0_22, %c0_23] : memref<32x128xbf16, #tpu.memory_space<vmem>>, vector<32x128xbf16>
      tpu.vector_store %arg9[%c0_22, %c0_23], %31 {strides = array<i32>} : memref<32x128xbf16, #tpu.memory_space<vmem>>, vector<32x128xbf16>,
    } else {
    }
    return
  }
  func.func @transform_0(%arg0: i32, %arg1: i32, %arg2: i32) -> (i32, i32) {
    %c0_i32 = arith.constant 0 : i32
    return %arg0, %arg2 : i32, i32
  }
  func.func @transform_1(%arg0: i32, %arg1: i32, %arg2: i32) -> (i32, i32) {
    %c0_i32 = arith.constant 0 : i32
    return %arg2, %arg1 : i32, i32
  }
  func.func @transform_2(%arg0: i32, %arg1: i32, %arg2: i32) -> (i32, i32) {
    %c0_i32 = arith.constant 0 : i32
    %c0_i32_0 = arith.constant 0 : i32
    return %c0_i32, %arg2 : i32, i32
  }
  func.func @transform_3(%arg0: i32, %arg1: i32, %arg2: i32) -> (i32, i32) {
    %c0_i32 = arith.constant 0 : i32
    %c0_i32_0 = arith.constant 0 : i32
    return %c0_i32, %arg2 : i32, i32
  }
  func.func @transform_4(%arg0: i32, %arg1: i32, %arg2: i32) -> (i32, i32) {
    %c0_i32 = arith.constant 0 : i32
    %c0_i32_0 = arith.constant 0 : i32
    return %c0_i32, %arg1 : i32, i32
  }
  func.func @transform_5(%arg0: i32, %arg1: i32, %arg2: i32) -> (i32, i32) {
    %c0_i32 = arith.constant 0 : i32
    %c0_i32_0 = arith.constant 0 : i32
    return %c0_i32, %arg1 : i32, i32
  }
  func.func @transform_6(%arg0: i32, %arg1: i32, %arg2: i32) -> (i32, i32) {
    %c0_i32 = arith.constant 0 : i32
    return %arg0, %arg1 : i32, i32
  }
}

module attributes {stable_mosaic.version = 11 : i64} {
  func.func @_conv_mm_kernel(%arg0: i32, %arg1: i32, %arg2: i32, %arg3: memref<32x512xbf16, #tpu.memory_space<vmem>>, %arg4: memref<512x256xbf16, #tpu.memory_space<vmem>>, %arg5: memref<1x512xf32, #tpu.memory_space<vmem>>, %arg6: memref<1x512xf32, #tpu.memory_space<vmem>>, %arg7: memref<1x256xf32, #tpu.memory_space<vmem>>, %arg8: memref<1x256xf32, #tpu.memory_space<vmem>>, %arg9: memref<32x256xbf16, #tpu.memory_space<vmem>>, %arg10: memref<32x256xf32, #tpu.memory_space<vmem>>) attributes {dimension_semantics = [#tpu.dimension_semantics<parallel>, #tpu.dimension_semantics<parallel>, #tpu.dimension_semantics<arbitrary>], iteration_bounds = array<i64: 1, 1, 1>, scalar_prefetch = 0 : i64, scratch_operands = 1 : i64, tpu.core_type = #tpu.core_type<tc>, window_params = [{transform_indices = @transform_0, window_bounds = array<i64: 32, 512>}, {transform_indices = @transform_1, window_bounds = array<i64: 512, 256>}, {transform_indices = @transform_2, window_bounds = array<i64: 1, 512>}, {transform_indices = @transform_3, window_bounds = array<i64: 1, 512>}, {transform_indices = @transform_4, window_bounds = array<i64: 1, 256>}, {transform_indices = @transform_5, window_bounds = array<i64: 1, 256>}, {transform_indices = @transform_6, window_bounds = array<i64: 32, 256>}]} {
    %c0_i32 = arith.constant 0 : i32
    %0 = arith.cmpi eq, %arg2, %c0_i32 : i32
    %1 = arith.extui %0 : i1 to i32
    %c0_i32_0 = arith.constant 0 : i32
    %2 = arith.cmpi ne, %1, %c0_i32_0 : i32
    scf.if %2 {
      %cst_15 = arith.constant 0.000000e+00 : f32
      %22 = vector.broadcast %cst_15 : f32 to vector<32x256xf32>
      %c0_16 = arith.constant 0 : index
      %c0_17 = arith.constant 0 : index
      %23 = vector.load %arg10[%c0_16, %c0_17] : memref<32x256xf32, #tpu.memory_space<vmem>>, vector<32x256xf32>
      tpu.vector_store %arg10[%c0_16, %c0_17], %22 {strides = array<i32>} : memref<32x256xf32, #tpu.memory_space<vmem>>, vector<32x256xf32>,
    } else {
    }
    %c0 = arith.constant 0 : index
    %c0_1 = arith.constant 0 : index
    %3 = vector.load %arg3[%c0, %c0_1] : memref<32x512xbf16, #tpu.memory_space<vmem>>, vector<32x512xbf16>
    %4 = arith.extf %3 : vector<32x512xbf16> to vector<32x512xf32>
    %c0_2 = arith.constant 0 : index
    %c0_3 = arith.constant 0 : index
    %5 = vector.load %arg5[%c0_2, %c0_3] : memref<1x512xf32, #tpu.memory_space<vmem>>, vector<1x512xf32>
    %6 = vector.broadcast %5 : vector<1x512xf32> to vector<32x512xf32>
    %7 = arith.mulf %4, %6 : vector<32x512xf32>
    %c0_4 = arith.constant 0 : index
    %c0_5 = arith.constant 0 : index
    %8 = vector.load %arg6[%c0_4, %c0_5] : memref<1x512xf32, #tpu.memory_space<vmem>>, vector<1x512xf32>
    %9 = vector.broadcast %8 : vector<1x512xf32> to vector<32x512xf32>
    %10 = arith.addf %7, %9 : vector<32x512xf32>
    %cst = arith.constant 0.000000e+00 : f32
    %11 = vector.broadcast %cst : f32 to vector<32x512xf32>
    %12 = arith.maximumf %10, %11 : vector<32x512xf32>
    %13 = arith.truncf %12 : vector<32x512xf32> to vector<32x512xbf16>
    %c0_6 = arith.constant 0 : index
    %c0_7 = arith.constant 0 : index
    %14 = vector.load %arg10[%c0_6, %c0_7] : memref<32x256xf32, #tpu.memory_space<vmem>>, vector<32x256xf32>
    %c0_8 = arith.constant 0 : index
    %c0_9 = arith.constant 0 : index
    %15 = vector.load %arg4[%c0_8, %c0_9] : memref<512x256xbf16, #tpu.memory_space<vmem>>, vector<512x256xbf16>
    %cst_10 = arith.constant dense<0.000000e+00> : vector<32x256xf32>
    %16 = tpu.matmul %13, %15, %cst_10 {dimension_numbers = #tpu.dot_dimension_numbers<[1], [0], [0], [1], [0, 0, 1, 1], [], []>} : vector<32x512xbf16>, vector<512x256xbf16>, vector<32x256xf32> -> vector<32x256xf32>
    %17 = arith.addf %14, %16 : vector<32x256xf32>
    %c0_11 = arith.constant 0 : index
    %c0_12 = arith.constant 0 : index
    %18 = vector.load %arg10[%c0_11, %c0_12] : memref<32x256xf32, #tpu.memory_space<vmem>>, vector<32x256xf32>
    tpu.vector_store %arg10[%c0_11, %c0_12], %17 {strides = array<i32>} : memref<32x256xf32, #tpu.memory_space<vmem>>, vector<32x256xf32>,
    %c0_i32_13 = arith.constant 0 : i32
    %19 = arith.cmpi eq, %arg2, %c0_i32_13 : i32
    %20 = arith.extui %19 : i1 to i32
    %c0_i32_14 = arith.constant 0 : i32
    %21 = arith.cmpi ne, %20, %c0_i32_14 : i32
    scf.if %21 {
      %c0_15 = arith.constant 0 : index
      %c0_16 = arith.constant 0 : index
      %22 = vector.load %arg10[%c0_15, %c0_16] : memref<32x256xf32, #tpu.memory_space<vmem>>, vector<32x256xf32>
      %23 = arith.truncf %22 : vector<32x256xf32> to vector<32x256xbf16>
      %c0_17 = arith.constant 0 : index
      %c0_18 = arith.constant 0 : index
      %24 = vector.load %arg9[%c0_17, %c0_18] : memref<32x256xbf16, #tpu.memory_space<vmem>>, vector<32x256xbf16>
      tpu.vector_store %arg9[%c0_17, %c0_18], %23 {strides = array<i32>} : memref<32x256xbf16, #tpu.memory_space<vmem>>, vector<32x256xbf16>,
    } else {
    }
    return
  }
  func.func @transform_0(%arg0: i32, %arg1: i32, %arg2: i32) -> (i32, i32) {
    %c0_i32 = arith.constant 0 : i32
    return %arg0, %arg2 : i32, i32
  }
  func.func @transform_1(%arg0: i32, %arg1: i32, %arg2: i32) -> (i32, i32) {
    %c0_i32 = arith.constant 0 : i32
    return %arg2, %arg1 : i32, i32
  }
  func.func @transform_2(%arg0: i32, %arg1: i32, %arg2: i32) -> (i32, i32) {
    %c0_i32 = arith.constant 0 : i32
    %c0_i32_0 = arith.constant 0 : i32
    return %c0_i32, %arg2 : i32, i32
  }
  func.func @transform_3(%arg0: i32, %arg1: i32, %arg2: i32) -> (i32, i32) {
    %c0_i32 = arith.constant 0 : i32
    %c0_i32_0 = arith.constant 0 : i32
    return %c0_i32, %arg2 : i32, i32
  }
  func.func @transform_4(%arg0: i32, %arg1: i32, %arg2: i32) -> (i32, i32) {
    %c0_i32 = arith.constant 0 : i32
    %c0_i32_0 = arith.constant 0 : i32
    return %c0_i32, %arg1 : i32, i32
  }
  func.func @transform_5(%arg0: i32, %arg1: i32, %arg2: i32) -> (i32, i32) {
    %c0_i32 = arith.constant 0 : i32
    %c0_i32_0 = arith.constant 0 : i32
    return %c0_i32, %arg1 : i32, i32
  }
  func.func @transform_6(%arg0: i32, %arg1: i32, %arg2: i32) -> (i32, i32) {
    %c0_i32 = arith.constant 0 : i32
    return %arg0, %arg1 : i32, i32
  }
}

module attributes {stable_mosaic.version = 11 : i64} {
  func.func @_conv_mm_kernel(%arg0: i32, %arg1: i32, %arg2: i32, %arg3: memref<8x256xbf16, #tpu.memory_space<vmem>>, %arg4: memref<256x128xbf16, #tpu.memory_space<vmem>>, %arg5: memref<1x256xf32, #tpu.memory_space<vmem>>, %arg6: memref<1x256xf32, #tpu.memory_space<vmem>>, %arg7: memref<1x128xf32, #tpu.memory_space<vmem>>, %arg8: memref<1x128xf32, #tpu.memory_space<vmem>>, %arg9: memref<8x128xbf16, #tpu.memory_space<vmem>>, %arg10: memref<8x128xf32, #tpu.memory_space<vmem>>) attributes {dimension_semantics = [#tpu.dimension_semantics<parallel>, #tpu.dimension_semantics<parallel>, #tpu.dimension_semantics<arbitrary>], iteration_bounds = array<i64: 1, 1, 1>, scalar_prefetch = 0 : i64, scratch_operands = 1 : i64, tpu.core_type = #tpu.core_type<tc>, window_params = [{transform_indices = @transform_0, window_bounds = array<i64: 8, 256>}, {transform_indices = @transform_1, window_bounds = array<i64: 256, 128>}, {transform_indices = @transform_2, window_bounds = array<i64: 1, 256>}, {transform_indices = @transform_3, window_bounds = array<i64: 1, 256>}, {transform_indices = @transform_4, window_bounds = array<i64: 1, 128>}, {transform_indices = @transform_5, window_bounds = array<i64: 1, 128>}, {transform_indices = @transform_6, window_bounds = array<i64: 8, 128>}]} {
    %c0_i32 = arith.constant 0 : i32
    %0 = arith.cmpi eq, %arg2, %c0_i32 : i32
    %1 = arith.extui %0 : i1 to i32
    %c0_i32_0 = arith.constant 0 : i32
    %2 = arith.cmpi ne, %1, %c0_i32_0 : i32
    scf.if %2 {
      %cst_15 = arith.constant 0.000000e+00 : f32
      %22 = vector.broadcast %cst_15 : f32 to vector<8x128xf32>
      %c0_16 = arith.constant 0 : index
      %c0_17 = arith.constant 0 : index
      %23 = vector.load %arg10[%c0_16, %c0_17] : memref<8x128xf32, #tpu.memory_space<vmem>>, vector<8x128xf32>
      tpu.vector_store %arg10[%c0_16, %c0_17], %22 {strides = array<i32>} : memref<8x128xf32, #tpu.memory_space<vmem>>, vector<8x128xf32>,
    } else {
    }
    %c0 = arith.constant 0 : index
    %c0_1 = arith.constant 0 : index
    %3 = vector.load %arg3[%c0, %c0_1] : memref<8x256xbf16, #tpu.memory_space<vmem>>, vector<8x256xbf16>
    %4 = arith.extf %3 : vector<8x256xbf16> to vector<8x256xf32>
    %c0_2 = arith.constant 0 : index
    %c0_3 = arith.constant 0 : index
    %5 = vector.load %arg5[%c0_2, %c0_3] : memref<1x256xf32, #tpu.memory_space<vmem>>, vector<1x256xf32>
    %6 = vector.broadcast %5 : vector<1x256xf32> to vector<8x256xf32>
    %7 = arith.mulf %4, %6 : vector<8x256xf32>
    %c0_4 = arith.constant 0 : index
    %c0_5 = arith.constant 0 : index
    %8 = vector.load %arg6[%c0_4, %c0_5] : memref<1x256xf32, #tpu.memory_space<vmem>>, vector<1x256xf32>
    %9 = vector.broadcast %8 : vector<1x256xf32> to vector<8x256xf32>
    %10 = arith.addf %7, %9 : vector<8x256xf32>
    %cst = arith.constant 0.000000e+00 : f32
    %11 = vector.broadcast %cst : f32 to vector<8x256xf32>
    %12 = arith.maximumf %10, %11 : vector<8x256xf32>
    %13 = arith.truncf %12 : vector<8x256xf32> to vector<8x256xbf16>
    %c0_6 = arith.constant 0 : index
    %c0_7 = arith.constant 0 : index
    %14 = vector.load %arg10[%c0_6, %c0_7] : memref<8x128xf32, #tpu.memory_space<vmem>>, vector<8x128xf32>
    %c0_8 = arith.constant 0 : index
    %c0_9 = arith.constant 0 : index
    %15 = vector.load %arg4[%c0_8, %c0_9] : memref<256x128xbf16, #tpu.memory_space<vmem>>, vector<256x128xbf16>
    %cst_10 = arith.constant dense<0.000000e+00> : vector<8x128xf32>
    %16 = tpu.matmul %13, %15, %cst_10 {dimension_numbers = #tpu.dot_dimension_numbers<[1], [0], [0], [1], [0, 0, 1, 1], [], []>} : vector<8x256xbf16>, vector<256x128xbf16>, vector<8x128xf32> -> vector<8x128xf32>
    %17 = arith.addf %14, %16 : vector<8x128xf32>
    %c0_11 = arith.constant 0 : index
    %c0_12 = arith.constant 0 : index
    %18 = vector.load %arg10[%c0_11, %c0_12] : memref<8x128xf32, #tpu.memory_space<vmem>>, vector<8x128xf32>
    tpu.vector_store %arg10[%c0_11, %c0_12], %17 {strides = array<i32>} : memref<8x128xf32, #tpu.memory_space<vmem>>, vector<8x128xf32>,
    %c0_i32_13 = arith.constant 0 : i32
    %19 = arith.cmpi eq, %arg2, %c0_i32_13 : i32
    %20 = arith.extui %19 : i1 to i32
    %c0_i32_14 = arith.constant 0 : i32
    %21 = arith.cmpi ne, %20, %c0_i32_14 : i32
    scf.if %21 {
      %c0_15 = arith.constant 0 : index
      %c0_16 = arith.constant 0 : index
      %22 = vector.load %arg10[%c0_15, %c0_16] : memref<8x128xf32, #tpu.memory_space<vmem>>, vector<8x128xf32>
      %c0_17 = arith.constant 0 : index
      %c0_18 = arith.constant 0 : index
      %23 = vector.load %arg7[%c0_17, %c0_18] : memref<1x128xf32, #tpu.memory_space<vmem>>, vector<1x128xf32>
      %24 = vector.broadcast %23 : vector<1x128xf32> to vector<8x128xf32>
      %25 = arith.mulf %22, %24 : vector<8x128xf32>
      %c0_19 = arith.constant 0 : index
      %c0_20 = arith.constant 0 : index
      %26 = vector.load %arg8[%c0_19, %c0_20] : memref<1x128xf32, #tpu.memory_space<vmem>>, vector<1x128xf32>
      %27 = vector.broadcast %26 : vector<1x128xf32> to vector<8x128xf32>
      %28 = arith.addf %25, %27 : vector<8x128xf32>
      %cst_21 = arith.constant 0.000000e+00 : f32
      %29 = vector.broadcast %cst_21 : f32 to vector<8x128xf32>
      %30 = arith.maximumf %28, %29 : vector<8x128xf32>
      %31 = arith.truncf %30 : vector<8x128xf32> to vector<8x128xbf16>
      %c0_22 = arith.constant 0 : index
      %c0_23 = arith.constant 0 : index
      %32 = vector.load %arg9[%c0_22, %c0_23] : memref<8x128xbf16, #tpu.memory_space<vmem>>, vector<8x128xbf16>
      tpu.vector_store %arg9[%c0_22, %c0_23], %31 {strides = array<i32>} : memref<8x128xbf16, #tpu.memory_space<vmem>>, vector<8x128xbf16>,
    } else {
    }
    return
  }
  func.func @transform_0(%arg0: i32, %arg1: i32, %arg2: i32) -> (i32, i32) {
    %c0_i32 = arith.constant 0 : i32
    return %arg0, %arg2 : i32, i32
  }
  func.func @transform_1(%arg0: i32, %arg1: i32, %arg2: i32) -> (i32, i32) {
    %c0_i32 = arith.constant 0 : i32
    return %arg2, %arg1 : i32, i32
  }
  func.func @transform_2(%arg0: i32, %arg1: i32, %arg2: i32) -> (i32, i32) {
    %c0_i32 = arith.constant 0 : i32
    %c0_i32_0 = arith.constant 0 : i32
    return %c0_i32, %arg2 : i32, i32
  }
  func.func @transform_3(%arg0: i32, %arg1: i32, %arg2: i32) -> (i32, i32) {
    %c0_i32 = arith.constant 0 : i32
    %c0_i32_0 = arith.constant 0 : i32
    return %c0_i32, %arg2 : i32, i32
  }
  func.func @transform_4(%arg0: i32, %arg1: i32, %arg2: i32) -> (i32, i32) {
    %c0_i32 = arith.constant 0 : i32
    %c0_i32_0 = arith.constant 0 : i32
    return %c0_i32, %arg1 : i32, i32
  }
  func.func @transform_5(%arg0: i32, %arg1: i32, %arg2: i32) -> (i32, i32) {
    %c0_i32 = arith.constant 0 : i32
    %c0_i32_0 = arith.constant 0 : i32
    return %c0_i32, %arg1 : i32, i32
  }
  func.func @transform_6(%arg0: i32, %arg1: i32, %arg2: i32) -> (i32, i32) {
    %c0_i32 = arith.constant 0 : i32
    return %arg0, %arg1 : i32, i32
  }
}

module attributes {stable_mosaic.version = 11 : i64} {
  func.func @_conv_mm_kernel(%arg0: i32, %arg1: i32, %arg2: i32, %arg3: memref<8x384xbf16, #tpu.memory_space<vmem>>, %arg4: memref<384x128xbf16, #tpu.memory_space<vmem>>, %arg5: memref<1x384xf32, #tpu.memory_space<vmem>>, %arg6: memref<1x384xf32, #tpu.memory_space<vmem>>, %arg7: memref<1x128xf32, #tpu.memory_space<vmem>>, %arg8: memref<1x128xf32, #tpu.memory_space<vmem>>, %arg9: memref<8x128xbf16, #tpu.memory_space<vmem>>, %arg10: memref<8x128xf32, #tpu.memory_space<vmem>>) attributes {dimension_semantics = [#tpu.dimension_semantics<parallel>, #tpu.dimension_semantics<parallel>, #tpu.dimension_semantics<arbitrary>], iteration_bounds = array<i64: 1, 1, 3>, scalar_prefetch = 0 : i64, scratch_operands = 1 : i64, tpu.core_type = #tpu.core_type<tc>, window_params = [{transform_indices = @transform_0, window_bounds = array<i64: 8, 384>}, {transform_indices = @transform_1, window_bounds = array<i64: 384, 128>}, {transform_indices = @transform_2, window_bounds = array<i64: 1, 384>}, {transform_indices = @transform_3, window_bounds = array<i64: 1, 384>}, {transform_indices = @transform_4, window_bounds = array<i64: 1, 128>}, {transform_indices = @transform_5, window_bounds = array<i64: 1, 128>}, {transform_indices = @transform_6, window_bounds = array<i64: 8, 128>}]} {
    %c0_i32 = arith.constant 0 : i32
    %0 = arith.cmpi eq, %arg2, %c0_i32 : i32
    %1 = arith.extui %0 : i1 to i32
    %c0_i32_0 = arith.constant 0 : i32
    %2 = arith.cmpi ne, %1, %c0_i32_0 : i32
    scf.if %2 {
      %cst_9 = arith.constant 0.000000e+00 : f32
      %12 = vector.broadcast %cst_9 : f32 to vector<8x128xf32>
      %c0_10 = arith.constant 0 : index
      %c0_11 = arith.constant 0 : index
      %13 = vector.load %arg10[%c0_10, %c0_11] : memref<8x128xf32, #tpu.memory_space<vmem>>, vector<8x128xf32>
      tpu.vector_store %arg10[%c0_10, %c0_11], %12 {strides = array<i32>} : memref<8x128xf32, #tpu.memory_space<vmem>>, vector<8x128xf32>,
    } else {
    }
    %c0 = arith.constant 0 : index
    %c0_1 = arith.constant 0 : index
    %3 = vector.load %arg3[%c0, %c0_1] : memref<8x384xbf16, #tpu.memory_space<vmem>>, vector<8x384xbf16>
    %c0_2 = arith.constant 0 : index
    %c0_3 = arith.constant 0 : index
    %4 = vector.load %arg10[%c0_2, %c0_3] : memref<8x128xf32, #tpu.memory_space<vmem>>, vector<8x128xf32>
    %c0_4 = arith.constant 0 : index
    %c0_5 = arith.constant 0 : index
    %5 = vector.load %arg4[%c0_4, %c0_5] : memref<384x128xbf16, #tpu.memory_space<vmem>>, vector<384x128xbf16>
    %cst = arith.constant dense<0.000000e+00> : vector<8x128xf32>
    %6 = tpu.matmul %3, %5, %cst {dimension_numbers = #tpu.dot_dimension_numbers<[1], [0], [0], [1], [0, 0, 1, 1], [], []>} : vector<8x384xbf16>, vector<384x128xbf16>, vector<8x128xf32> -> vector<8x128xf32>
    %7 = arith.addf %4, %6 : vector<8x128xf32>
    %c0_6 = arith.constant 0 : index
    %c0_7 = arith.constant 0 : index
    %8 = vector.load %arg10[%c0_6, %c0_7] : memref<8x128xf32, #tpu.memory_space<vmem>>, vector<8x128xf32>
    tpu.vector_store %arg10[%c0_6, %c0_7], %7 {strides = array<i32>} : memref<8x128xf32, #tpu.memory_space<vmem>>, vector<8x128xf32>,
    %c2_i32 = arith.constant 2 : i32
    %9 = arith.cmpi eq, %arg2, %c2_i32 : i32
    %10 = arith.extui %9 : i1 to i32
    %c0_i32_8 = arith.constant 0 : i32
    %11 = arith.cmpi ne, %10, %c0_i32_8 : i32
    scf.if %11 {
      %c0_9 = arith.constant 0 : index
      %c0_10 = arith.constant 0 : index
      %12 = vector.load %arg10[%c0_9, %c0_10] : memref<8x128xf32, #tpu.memory_space<vmem>>, vector<8x128xf32>
      %13 = arith.truncf %12 : vector<8x128xf32> to vector<8x128xbf16>
      %c0_11 = arith.constant 0 : index
      %c0_12 = arith.constant 0 : index
      %14 = vector.load %arg9[%c0_11, %c0_12] : memref<8x128xbf16, #tpu.memory_space<vmem>>, vector<8x128xbf16>
      tpu.vector_store %arg9[%c0_11, %c0_12], %13 {strides = array<i32>} : memref<8x128xbf16, #tpu.memory_space<vmem>>, vector<8x128xbf16>,
    } else {
    }
    return
  }
  func.func @transform_0(%arg0: i32, %arg1: i32, %arg2: i32) -> (i32, i32) {
    %c0_i32 = arith.constant 0 : i32
    return %arg0, %arg2 : i32, i32
  }
  func.func @transform_1(%arg0: i32, %arg1: i32, %arg2: i32) -> (i32, i32) {
    %c0_i32 = arith.constant 0 : i32
    return %arg2, %arg1 : i32, i32
  }
  func.func @transform_2(%arg0: i32, %arg1: i32, %arg2: i32) -> (i32, i32) {
    %c0_i32 = arith.constant 0 : i32
    %c0_i32_0 = arith.constant 0 : i32
    return %c0_i32, %arg2 : i32, i32
  }
  func.func @transform_3(%arg0: i32, %arg1: i32, %arg2: i32) -> (i32, i32) {
    %c0_i32 = arith.constant 0 : i32
    %c0_i32_0 = arith.constant 0 : i32
    return %c0_i32, %arg2 : i32, i32
  }
  func.func @transform_4(%arg0: i32, %arg1: i32, %arg2: i32) -> (i32, i32) {
    %c0_i32 = arith.constant 0 : i32
    %c0_i32_0 = arith.constant 0 : i32
    return %c0_i32, %arg1 : i32, i32
  }
  func.func @transform_5(%arg0: i32, %arg1: i32, %arg2: i32) -> (i32, i32) {
    %c0_i32 = arith.constant 0 : i32
    %c0_i32_0 = arith.constant 0 : i32
    return %c0_i32, %arg1 : i32, i32
  }
  func.func @transform_6(%arg0: i32, %arg1: i32, %arg2: i32) -> (i32, i32) {
    %c0_i32 = arith.constant 0 : i32
    return %arg0, %arg1 : i32, i32
  }
}

module attributes {stable_mosaic.version = 11 : i64} {
  func.func @_conv_mm_kernel(%arg0: i32, %arg1: i32, %arg2: i32, %arg3: memref<8x384xbf16, #tpu.memory_space<vmem>>, %arg4: memref<384x128xbf16, #tpu.memory_space<vmem>>, %arg5: memref<1x384xf32, #tpu.memory_space<vmem>>, %arg6: memref<1x384xf32, #tpu.memory_space<vmem>>, %arg7: memref<1x128xf32, #tpu.memory_space<vmem>>, %arg8: memref<1x128xf32, #tpu.memory_space<vmem>>, %arg9: memref<8x128xbf16, #tpu.memory_space<vmem>>, %arg10: memref<8x128xf32, #tpu.memory_space<vmem>>) attributes {dimension_semantics = [#tpu.dimension_semantics<parallel>, #tpu.dimension_semantics<parallel>, #tpu.dimension_semantics<arbitrary>], iteration_bounds = array<i64: 1, 1, 1>, scalar_prefetch = 0 : i64, scratch_operands = 1 : i64, tpu.core_type = #tpu.core_type<tc>, window_params = [{transform_indices = @transform_0, window_bounds = array<i64: 8, 384>}, {transform_indices = @transform_1, window_bounds = array<i64: 384, 128>}, {transform_indices = @transform_2, window_bounds = array<i64: 1, 384>}, {transform_indices = @transform_3, window_bounds = array<i64: 1, 384>}, {transform_indices = @transform_4, window_bounds = array<i64: 1, 128>}, {transform_indices = @transform_5, window_bounds = array<i64: 1, 128>}, {transform_indices = @transform_6, window_bounds = array<i64: 8, 128>}]} {
    %c0_i32 = arith.constant 0 : i32
    %0 = arith.cmpi eq, %arg2, %c0_i32 : i32
    %1 = arith.extui %0 : i1 to i32
    %c0_i32_0 = arith.constant 0 : i32
    %2 = arith.cmpi ne, %1, %c0_i32_0 : i32
    scf.if %2 {
      %cst_15 = arith.constant 0.000000e+00 : f32
      %22 = vector.broadcast %cst_15 : f32 to vector<8x128xf32>
      %c0_16 = arith.constant 0 : index
      %c0_17 = arith.constant 0 : index
      %23 = vector.load %arg10[%c0_16, %c0_17] : memref<8x128xf32, #tpu.memory_space<vmem>>, vector<8x128xf32>
      tpu.vector_store %arg10[%c0_16, %c0_17], %22 {strides = array<i32>} : memref<8x128xf32, #tpu.memory_space<vmem>>, vector<8x128xf32>,
    } else {
    }
    %c0 = arith.constant 0 : index
    %c0_1 = arith.constant 0 : index
    %3 = vector.load %arg3[%c0, %c0_1] : memref<8x384xbf16, #tpu.memory_space<vmem>>, vector<8x384xbf16>
    %4 = arith.extf %3 : vector<8x384xbf16> to vector<8x384xf32>
    %c0_2 = arith.constant 0 : index
    %c0_3 = arith.constant 0 : index
    %5 = vector.load %arg5[%c0_2, %c0_3] : memref<1x384xf32, #tpu.memory_space<vmem>>, vector<1x384xf32>
    %6 = vector.broadcast %5 : vector<1x384xf32> to vector<8x384xf32>
    %7 = arith.mulf %4, %6 : vector<8x384xf32>
    %c0_4 = arith.constant 0 : index
    %c0_5 = arith.constant 0 : index
    %8 = vector.load %arg6[%c0_4, %c0_5] : memref<1x384xf32, #tpu.memory_space<vmem>>, vector<1x384xf32>
    %9 = vector.broadcast %8 : vector<1x384xf32> to vector<8x384xf32>
    %10 = arith.addf %7, %9 : vector<8x384xf32>
    %cst = arith.constant 0.000000e+00 : f32
    %11 = vector.broadcast %cst : f32 to vector<8x384xf32>
    %12 = arith.maximumf %10, %11 : vector<8x384xf32>
    %13 = arith.truncf %12 : vector<8x384xf32> to vector<8x384xbf16>
    %c0_6 = arith.constant 0 : index
    %c0_7 = arith.constant 0 : index
    %14 = vector.load %arg10[%c0_6, %c0_7] : memref<8x128xf32, #tpu.memory_space<vmem>>, vector<8x128xf32>
    %c0_8 = arith.constant 0 : index
    %c0_9 = arith.constant 0 : index
    %15 = vector.load %arg4[%c0_8, %c0_9] : memref<384x128xbf16, #tpu.memory_space<vmem>>, vector<384x128xbf16>
    %cst_10 = arith.constant dense<0.000000e+00> : vector<8x128xf32>
    %16 = tpu.matmul %13, %15, %cst_10 {dimension_numbers = #tpu.dot_dimension_numbers<[1], [0], [0], [1], [0, 0, 1, 1], [], []>} : vector<8x384xbf16>, vector<384x128xbf16>, vector<8x128xf32> -> vector<8x128xf32>
    %17 = arith.addf %14, %16 : vector<8x128xf32>
    %c0_11 = arith.constant 0 : index
    %c0_12 = arith.constant 0 : index
    %18 = vector.load %arg10[%c0_11, %c0_12] : memref<8x128xf32, #tpu.memory_space<vmem>>, vector<8x128xf32>
    tpu.vector_store %arg10[%c0_11, %c0_12], %17 {strides = array<i32>} : memref<8x128xf32, #tpu.memory_space<vmem>>, vector<8x128xf32>,
    %c0_i32_13 = arith.constant 0 : i32
    %19 = arith.cmpi eq, %arg2, %c0_i32_13 : i32
    %20 = arith.extui %19 : i1 to i32
    %c0_i32_14 = arith.constant 0 : i32
    %21 = arith.cmpi ne, %20, %c0_i32_14 : i32
    scf.if %21 {
      %c0_15 = arith.constant 0 : index
      %c0_16 = arith.constant 0 : index
      %22 = vector.load %arg10[%c0_15, %c0_16] : memref<8x128xf32, #tpu.memory_space<vmem>>, vector<8x128xf32>
      %c0_17 = arith.constant 0 : index
      %c0_18 = arith.constant 0 : index
      %23 = vector.load %arg7[%c0_17, %c0_18] : memref<1x128xf32, #tpu.memory_space<vmem>>, vector<1x128xf32>
      %24 = vector.broadcast %23 : vector<1x128xf32> to vector<8x128xf32>
      %25 = arith.mulf %22, %24 : vector<8x128xf32>
      %c0_19 = arith.constant 0 : index
      %c0_20 = arith.constant 0 : index
      %26 = vector.load %arg8[%c0_19, %c0_20] : memref<1x128xf32, #tpu.memory_space<vmem>>, vector<1x128xf32>
      %27 = vector.broadcast %26 : vector<1x128xf32> to vector<8x128xf32>
      %28 = arith.addf %25, %27 : vector<8x128xf32>
      %cst_21 = arith.constant 0.000000e+00 : f32
      %29 = vector.broadcast %cst_21 : f32 to vector<8x128xf32>
      %30 = arith.maximumf %28, %29 : vector<8x128xf32>
      %31 = arith.truncf %30 : vector<8x128xf32> to vector<8x128xbf16>
      %c0_22 = arith.constant 0 : index
      %c0_23 = arith.constant 0 : index
      %32 = vector.load %arg9[%c0_22, %c0_23] : memref<8x128xbf16, #tpu.memory_space<vmem>>, vector<8x128xbf16>
      tpu.vector_store %arg9[%c0_22, %c0_23], %31 {strides = array<i32>} : memref<8x128xbf16, #tpu.memory_space<vmem>>, vector<8x128xbf16>,
    } else {
    }
    return
  }
  func.func @transform_0(%arg0: i32, %arg1: i32, %arg2: i32) -> (i32, i32) {
    %c0_i32 = arith.constant 0 : i32
    return %arg0, %arg2 : i32, i32
  }
  func.func @transform_1(%arg0: i32, %arg1: i32, %arg2: i32) -> (i32, i32) {
    %c0_i32 = arith.constant 0 : i32
    return %arg2, %arg1 : i32, i32
  }
  func.func @transform_2(%arg0: i32, %arg1: i32, %arg2: i32) -> (i32, i32) {
    %c0_i32 = arith.constant 0 : i32
    %c0_i32_0 = arith.constant 0 : i32
    return %c0_i32, %arg2 : i32, i32
  }
  func.func @transform_3(%arg0: i32, %arg1: i32, %arg2: i32) -> (i32, i32) {
    %c0_i32 = arith.constant 0 : i32
    %c0_i32_0 = arith.constant 0 : i32
    return %c0_i32, %arg2 : i32, i32
  }
  func.func @transform_4(%arg0: i32, %arg1: i32, %arg2: i32) -> (i32, i32) {
    %c0_i32 = arith.constant 0 : i32
    %c0_i32_0 = arith.constant 0 : i32
    return %c0_i32, %arg1 : i32, i32
  }
  func.func @transform_5(%arg0: i32, %arg1: i32, %arg2: i32) -> (i32, i32) {
    %c0_i32 = arith.constant 0 : i32
    %c0_i32_0 = arith.constant 0 : i32
    return %c0_i32, %arg1 : i32, i32
  }
  func.func @transform_6(%arg0: i32, %arg1: i32, %arg2: i32) -> (i32, i32) {
    %c0_i32 = arith.constant 0 : i32
    return %arg0, %arg1 : i32, i32
  }
}

module attributes {stable_mosaic.version = 11 : i64} {
  func.func @_conv_mm_kernel(%arg0: i32, %arg1: i32, %arg2: i32, %arg3: memref<8x512xbf16, #tpu.memory_space<vmem>>, %arg4: memref<512x128xbf16, #tpu.memory_space<vmem>>, %arg5: memref<1x512xf32, #tpu.memory_space<vmem>>, %arg6: memref<1x512xf32, #tpu.memory_space<vmem>>, %arg7: memref<1x128xf32, #tpu.memory_space<vmem>>, %arg8: memref<1x128xf32, #tpu.memory_space<vmem>>, %arg9: memref<8x128xbf16, #tpu.memory_space<vmem>>, %arg10: memref<8x128xf32, #tpu.memory_space<vmem>>) attributes {dimension_semantics = [#tpu.dimension_semantics<parallel>, #tpu.dimension_semantics<parallel>, #tpu.dimension_semantics<arbitrary>], iteration_bounds = array<i64: 1, 1, 1>, scalar_prefetch = 0 : i64, scratch_operands = 1 : i64, tpu.core_type = #tpu.core_type<tc>, window_params = [{transform_indices = @transform_0, window_bounds = array<i64: 8, 512>}, {transform_indices = @transform_1, window_bounds = array<i64: 512, 128>}, {transform_indices = @transform_2, window_bounds = array<i64: 1, 512>}, {transform_indices = @transform_3, window_bounds = array<i64: 1, 512>}, {transform_indices = @transform_4, window_bounds = array<i64: 1, 128>}, {transform_indices = @transform_5, window_bounds = array<i64: 1, 128>}, {transform_indices = @transform_6, window_bounds = array<i64: 8, 128>}]} {
    %c0_i32 = arith.constant 0 : i32
    %0 = arith.cmpi eq, %arg2, %c0_i32 : i32
    %1 = arith.extui %0 : i1 to i32
    %c0_i32_0 = arith.constant 0 : i32
    %2 = arith.cmpi ne, %1, %c0_i32_0 : i32
    scf.if %2 {
      %cst_15 = arith.constant 0.000000e+00 : f32
      %22 = vector.broadcast %cst_15 : f32 to vector<8x128xf32>
      %c0_16 = arith.constant 0 : index
      %c0_17 = arith.constant 0 : index
      %23 = vector.load %arg10[%c0_16, %c0_17] : memref<8x128xf32, #tpu.memory_space<vmem>>, vector<8x128xf32>
      tpu.vector_store %arg10[%c0_16, %c0_17], %22 {strides = array<i32>} : memref<8x128xf32, #tpu.memory_space<vmem>>, vector<8x128xf32>,
    } else {
    }
    %c0 = arith.constant 0 : index
    %c0_1 = arith.constant 0 : index
    %3 = vector.load %arg3[%c0, %c0_1] : memref<8x512xbf16, #tpu.memory_space<vmem>>, vector<8x512xbf16>
    %4 = arith.extf %3 : vector<8x512xbf16> to vector<8x512xf32>
    %c0_2 = arith.constant 0 : index
    %c0_3 = arith.constant 0 : index
    %5 = vector.load %arg5[%c0_2, %c0_3] : memref<1x512xf32, #tpu.memory_space<vmem>>, vector<1x512xf32>
    %6 = vector.broadcast %5 : vector<1x512xf32> to vector<8x512xf32>
    %7 = arith.mulf %4, %6 : vector<8x512xf32>
    %c0_4 = arith.constant 0 : index
    %c0_5 = arith.constant 0 : index
    %8 = vector.load %arg6[%c0_4, %c0_5] : memref<1x512xf32, #tpu.memory_space<vmem>>, vector<1x512xf32>
    %9 = vector.broadcast %8 : vector<1x512xf32> to vector<8x512xf32>
    %10 = arith.addf %7, %9 : vector<8x512xf32>
    %cst = arith.constant 0.000000e+00 : f32
    %11 = vector.broadcast %cst : f32 to vector<8x512xf32>
    %12 = arith.maximumf %10, %11 : vector<8x512xf32>
    %13 = arith.truncf %12 : vector<8x512xf32> to vector<8x512xbf16>
    %c0_6 = arith.constant 0 : index
    %c0_7 = arith.constant 0 : index
    %14 = vector.load %arg10[%c0_6, %c0_7] : memref<8x128xf32, #tpu.memory_space<vmem>>, vector<8x128xf32>
    %c0_8 = arith.constant 0 : index
    %c0_9 = arith.constant 0 : index
    %15 = vector.load %arg4[%c0_8, %c0_9] : memref<512x128xbf16, #tpu.memory_space<vmem>>, vector<512x128xbf16>
    %cst_10 = arith.constant dense<0.000000e+00> : vector<8x128xf32>
    %16 = tpu.matmul %13, %15, %cst_10 {dimension_numbers = #tpu.dot_dimension_numbers<[1], [0], [0], [1], [0, 0, 1, 1], [], []>} : vector<8x512xbf16>, vector<512x128xbf16>, vector<8x128xf32> -> vector<8x128xf32>
    %17 = arith.addf %14, %16 : vector<8x128xf32>
    %c0_11 = arith.constant 0 : index
    %c0_12 = arith.constant 0 : index
    %18 = vector.load %arg10[%c0_11, %c0_12] : memref<8x128xf32, #tpu.memory_space<vmem>>, vector<8x128xf32>
    tpu.vector_store %arg10[%c0_11, %c0_12], %17 {strides = array<i32>} : memref<8x128xf32, #tpu.memory_space<vmem>>, vector<8x128xf32>,
    %c0_i32_13 = arith.constant 0 : i32
    %19 = arith.cmpi eq, %arg2, %c0_i32_13 : i32
    %20 = arith.extui %19 : i1 to i32
    %c0_i32_14 = arith.constant 0 : i32
    %21 = arith.cmpi ne, %20, %c0_i32_14 : i32
    scf.if %21 {
      %c0_15 = arith.constant 0 : index
      %c0_16 = arith.constant 0 : index
      %22 = vector.load %arg10[%c0_15, %c0_16] : memref<8x128xf32, #tpu.memory_space<vmem>>, vector<8x128xf32>
      %c0_17 = arith.constant 0 : index
      %c0_18 = arith.constant 0 : index
      %23 = vector.load %arg7[%c0_17, %c0_18] : memref<1x128xf32, #tpu.memory_space<vmem>>, vector<1x128xf32>
      %24 = vector.broadcast %23 : vector<1x128xf32> to vector<8x128xf32>
      %25 = arith.mulf %22, %24 : vector<8x128xf32>
      %c0_19 = arith.constant 0 : index
      %c0_20 = arith.constant 0 : index
      %26 = vector.load %arg8[%c0_19, %c0_20] : memref<1x128xf32, #tpu.memory_space<vmem>>, vector<1x128xf32>
      %27 = vector.broadcast %26 : vector<1x128xf32> to vector<8x128xf32>
      %28 = arith.addf %25, %27 : vector<8x128xf32>
      %cst_21 = arith.constant 0.000000e+00 : f32
      %29 = vector.broadcast %cst_21 : f32 to vector<8x128xf32>
      %30 = arith.maximumf %28, %29 : vector<8x128xf32>
      %31 = arith.truncf %30 : vector<8x128xf32> to vector<8x128xbf16>
      %c0_22 = arith.constant 0 : index
      %c0_23 = arith.constant 0 : index
      %32 = vector.load %arg9[%c0_22, %c0_23] : memref<8x128xbf16, #tpu.memory_space<vmem>>, vector<8x128xbf16>
      tpu.vector_store %arg9[%c0_22, %c0_23], %31 {strides = array<i32>} : memref<8x128xbf16, #tpu.memory_space<vmem>>, vector<8x128xbf16>,
    } else {
    }
    return
  }
  func.func @transform_0(%arg0: i32, %arg1: i32, %arg2: i32) -> (i32, i32) {
    %c0_i32 = arith.constant 0 : i32
    return %arg0, %arg2 : i32, i32
  }
  func.func @transform_1(%arg0: i32, %arg1: i32, %arg2: i32) -> (i32, i32) {
    %c0_i32 = arith.constant 0 : i32
    return %arg2, %arg1 : i32, i32
  }
  func.func @transform_2(%arg0: i32, %arg1: i32, %arg2: i32) -> (i32, i32) {
    %c0_i32 = arith.constant 0 : i32
    %c0_i32_0 = arith.constant 0 : i32
    return %c0_i32, %arg2 : i32, i32
  }
  func.func @transform_3(%arg0: i32, %arg1: i32, %arg2: i32) -> (i32, i32) {
    %c0_i32 = arith.constant 0 : i32
    %c0_i32_0 = arith.constant 0 : i32
    return %c0_i32, %arg2 : i32, i32
  }
  func.func @transform_4(%arg0: i32, %arg1: i32, %arg2: i32) -> (i32, i32) {
    %c0_i32 = arith.constant 0 : i32
    %c0_i32_0 = arith.constant 0 : i32
    return %c0_i32, %arg1 : i32, i32
  }
  func.func @transform_5(%arg0: i32, %arg1: i32, %arg2: i32) -> (i32, i32) {
    %c0_i32 = arith.constant 0 : i32
    %c0_i32_0 = arith.constant 0 : i32
    return %c0_i32, %arg1 : i32, i32
  }
  func.func @transform_6(%arg0: i32, %arg1: i32, %arg2: i32) -> (i32, i32) {
    %c0_i32 = arith.constant 0 : i32
    return %arg0, %arg1 : i32, i32
  }
}

module attributes {stable_mosaic.version = 11 : i64} {
  func.func @_conv_mm_kernel(%arg0: i32, %arg1: i32, %arg2: i32, %arg3: memref<8x128xbf16, #tpu.memory_space<vmem>>, %arg4: memref<128x128xbf16, #tpu.memory_space<vmem>>, %arg5: memref<1x128xf32, #tpu.memory_space<vmem>>, %arg6: memref<1x128xf32, #tpu.memory_space<vmem>>, %arg7: memref<1x128xf32, #tpu.memory_space<vmem>>, %arg8: memref<1x128xf32, #tpu.memory_space<vmem>>, %arg9: memref<8x128xbf16, #tpu.memory_space<vmem>>, %arg10: memref<8x128xf32, #tpu.memory_space<vmem>>) attributes {dimension_semantics = [#tpu.dimension_semantics<parallel>, #tpu.dimension_semantics<parallel>, #tpu.dimension_semantics<arbitrary>], iteration_bounds = array<i64: 1, 1, 5>, scalar_prefetch = 0 : i64, scratch_operands = 1 : i64, tpu.core_type = #tpu.core_type<tc>, window_params = [{transform_indices = @transform_0, window_bounds = array<i64: 8, 128>}, {transform_indices = @transform_1, window_bounds = array<i64: 128, 128>}, {transform_indices = @transform_2, window_bounds = array<i64: 1, 128>}, {transform_indices = @transform_3, window_bounds = array<i64: 1, 128>}, {transform_indices = @transform_4, window_bounds = array<i64: 1, 128>}, {transform_indices = @transform_5, window_bounds = array<i64: 1, 128>}, {transform_indices = @transform_6, window_bounds = array<i64: 8, 128>}]} {
    %c0_i32 = arith.constant 0 : i32
    %0 = arith.cmpi eq, %arg2, %c0_i32 : i32
    %1 = arith.extui %0 : i1 to i32
    %c0_i32_0 = arith.constant 0 : i32
    %2 = arith.cmpi ne, %1, %c0_i32_0 : i32
    scf.if %2 {
      %cst_14 = arith.constant 0.000000e+00 : f32
      %22 = vector.broadcast %cst_14 : f32 to vector<8x128xf32>
      %c0_15 = arith.constant 0 : index
      %c0_16 = arith.constant 0 : index
      %23 = vector.load %arg10[%c0_15, %c0_16] : memref<8x128xf32, #tpu.memory_space<vmem>>, vector<8x128xf32>
      tpu.vector_store %arg10[%c0_15, %c0_16], %22 {strides = array<i32>} : memref<8x128xf32, #tpu.memory_space<vmem>>, vector<8x128xf32>,
    } else {
    }
    %c0 = arith.constant 0 : index
    %c0_1 = arith.constant 0 : index
    %3 = vector.load %arg3[%c0, %c0_1] : memref<8x128xbf16, #tpu.memory_space<vmem>>, vector<8x128xbf16>
    %4 = arith.extf %3 : vector<8x128xbf16> to vector<8x128xf32>
    %c0_2 = arith.constant 0 : index
    %c0_3 = arith.constant 0 : index
    %5 = vector.load %arg5[%c0_2, %c0_3] : memref<1x128xf32, #tpu.memory_space<vmem>>, vector<1x128xf32>
    %6 = vector.broadcast %5 : vector<1x128xf32> to vector<8x128xf32>
    %7 = arith.mulf %4, %6 : vector<8x128xf32>
    %c0_4 = arith.constant 0 : index
    %c0_5 = arith.constant 0 : index
    %8 = vector.load %arg6[%c0_4, %c0_5] : memref<1x128xf32, #tpu.memory_space<vmem>>, vector<1x128xf32>
    %9 = vector.broadcast %8 : vector<1x128xf32> to vector<8x128xf32>
    %10 = arith.addf %7, %9 : vector<8x128xf32>
    %cst = arith.constant 0.000000e+00 : f32
    %11 = vector.broadcast %cst : f32 to vector<8x128xf32>
    %12 = arith.maximumf %10, %11 : vector<8x128xf32>
    %13 = arith.truncf %12 : vector<8x128xf32> to vector<8x128xbf16>
    %c0_6 = arith.constant 0 : index
    %c0_7 = arith.constant 0 : index
    %14 = vector.load %arg10[%c0_6, %c0_7] : memref<8x128xf32, #tpu.memory_space<vmem>>, vector<8x128xf32>
    %c0_8 = arith.constant 0 : index
    %c0_9 = arith.constant 0 : index
    %15 = vector.load %arg4[%c0_8, %c0_9] : memref<128x128xbf16, #tpu.memory_space<vmem>>, vector<128x128xbf16>
    %cst_10 = arith.constant dense<0.000000e+00> : vector<8x128xf32>
    %16 = tpu.matmul %13, %15, %cst_10 {dimension_numbers = #tpu.dot_dimension_numbers<[1], [0], [0], [1], [0, 0, 1, 1], [], []>} : vector<8x128xbf16>, vector<128x128xbf16>, vector<8x128xf32> -> vector<8x128xf32>
    %17 = arith.addf %14, %16 : vector<8x128xf32>
    %c0_11 = arith.constant 0 : index
    %c0_12 = arith.constant 0 : index
    %18 = vector.load %arg10[%c0_11, %c0_12] : memref<8x128xf32, #tpu.memory_space<vmem>>, vector<8x128xf32>
    tpu.vector_store %arg10[%c0_11, %c0_12], %17 {strides = array<i32>} : memref<8x128xf32, #tpu.memory_space<vmem>>, vector<8x128xf32>,
    %c4_i32 = arith.constant 4 : i32
    %19 = arith.cmpi eq, %arg2, %c4_i32 : i32
    %20 = arith.extui %19 : i1 to i32
    %c0_i32_13 = arith.constant 0 : i32
    %21 = arith.cmpi ne, %20, %c0_i32_13 : i32
    scf.if %21 {
      %c0_14 = arith.constant 0 : index
      %c0_15 = arith.constant 0 : index
      %22 = vector.load %arg10[%c0_14, %c0_15] : memref<8x128xf32, #tpu.memory_space<vmem>>, vector<8x128xf32>
      %c0_16 = arith.constant 0 : index
      %c0_17 = arith.constant 0 : index
      %23 = vector.load %arg7[%c0_16, %c0_17] : memref<1x128xf32, #tpu.memory_space<vmem>>, vector<1x128xf32>
      %24 = vector.broadcast %23 : vector<1x128xf32> to vector<8x128xf32>
      %25 = arith.mulf %22, %24 : vector<8x128xf32>
      %c0_18 = arith.constant 0 : index
      %c0_19 = arith.constant 0 : index
      %26 = vector.load %arg8[%c0_18, %c0_19] : memref<1x128xf32, #tpu.memory_space<vmem>>, vector<1x128xf32>
      %27 = vector.broadcast %26 : vector<1x128xf32> to vector<8x128xf32>
      %28 = arith.addf %25, %27 : vector<8x128xf32>
      %cst_20 = arith.constant 0.000000e+00 : f32
      %29 = vector.broadcast %cst_20 : f32 to vector<8x128xf32>
      %30 = arith.maximumf %28, %29 : vector<8x128xf32>
      %31 = arith.truncf %30 : vector<8x128xf32> to vector<8x128xbf16>
      %c0_21 = arith.constant 0 : index
      %c0_22 = arith.constant 0 : index
      %32 = vector.load %arg9[%c0_21, %c0_22] : memref<8x128xbf16, #tpu.memory_space<vmem>>, vector<8x128xbf16>
      tpu.vector_store %arg9[%c0_21, %c0_22], %31 {strides = array<i32>} : memref<8x128xbf16, #tpu.memory_space<vmem>>, vector<8x128xbf16>,
    } else {
    }
    return
  }
  func.func @transform_0(%arg0: i32, %arg1: i32, %arg2: i32) -> (i32, i32) {
    %c0_i32 = arith.constant 0 : i32
    return %arg0, %arg2 : i32, i32
  }
  func.func @transform_1(%arg0: i32, %arg1: i32, %arg2: i32) -> (i32, i32) {
    %c0_i32 = arith.constant 0 : i32
    return %arg2, %arg1 : i32, i32
  }
  func.func @transform_2(%arg0: i32, %arg1: i32, %arg2: i32) -> (i32, i32) {
    %c0_i32 = arith.constant 0 : i32
    %c0_i32_0 = arith.constant 0 : i32
    return %c0_i32, %arg2 : i32, i32
  }
  func.func @transform_3(%arg0: i32, %arg1: i32, %arg2: i32) -> (i32, i32) {
    %c0_i32 = arith.constant 0 : i32
    %c0_i32_0 = arith.constant 0 : i32
    return %c0_i32, %arg2 : i32, i32
  }
  func.func @transform_4(%arg0: i32, %arg1: i32, %arg2: i32) -> (i32, i32) {
    %c0_i32 = arith.constant 0 : i32
    %c0_i32_0 = arith.constant 0 : i32
    return %c0_i32, %arg1 : i32, i32
  }
  func.func @transform_5(%arg0: i32, %arg1: i32, %arg2: i32) -> (i32, i32) {
    %c0_i32 = arith.constant 0 : i32
    %c0_i32_0 = arith.constant 0 : i32
    return %c0_i32, %arg1 : i32, i32
  }
  func.func @transform_6(%arg0: i32, %arg1: i32, %arg2: i32) -> (i32, i32) {
    %c0_i32 = arith.constant 0 : i32
    return %arg0, %arg1 : i32, i32
  }
}

module attributes {stable_mosaic.version = 11 : i64} {
  func.func @_conv_mm_kernel(%arg0: i32, %arg1: i32, %arg2: i32, %arg3: memref<8x384xbf16, #tpu.memory_space<vmem>>, %arg4: memref<384x128xbf16, #tpu.memory_space<vmem>>, %arg5: memref<1x384xf32, #tpu.memory_space<vmem>>, %arg6: memref<1x384xf32, #tpu.memory_space<vmem>>, %arg7: memref<1x128xf32, #tpu.memory_space<vmem>>, %arg8: memref<1x128xf32, #tpu.memory_space<vmem>>, %arg9: memref<8x128xbf16, #tpu.memory_space<vmem>>, %arg10: memref<8x128xf32, #tpu.memory_space<vmem>>) attributes {dimension_semantics = [#tpu.dimension_semantics<parallel>, #tpu.dimension_semantics<parallel>, #tpu.dimension_semantics<arbitrary>], iteration_bounds = array<i64: 1, 1, 2>, scalar_prefetch = 0 : i64, scratch_operands = 1 : i64, tpu.core_type = #tpu.core_type<tc>, window_params = [{transform_indices = @transform_0, window_bounds = array<i64: 8, 384>}, {transform_indices = @transform_1, window_bounds = array<i64: 384, 128>}, {transform_indices = @transform_2, window_bounds = array<i64: 1, 384>}, {transform_indices = @transform_3, window_bounds = array<i64: 1, 384>}, {transform_indices = @transform_4, window_bounds = array<i64: 1, 128>}, {transform_indices = @transform_5, window_bounds = array<i64: 1, 128>}, {transform_indices = @transform_6, window_bounds = array<i64: 8, 128>}]} {
    %c0_i32 = arith.constant 0 : i32
    %0 = arith.cmpi eq, %arg2, %c0_i32 : i32
    %1 = arith.extui %0 : i1 to i32
    %c0_i32_0 = arith.constant 0 : i32
    %2 = arith.cmpi ne, %1, %c0_i32_0 : i32
    scf.if %2 {
      %cst_14 = arith.constant 0.000000e+00 : f32
      %22 = vector.broadcast %cst_14 : f32 to vector<8x128xf32>
      %c0_15 = arith.constant 0 : index
      %c0_16 = arith.constant 0 : index
      %23 = vector.load %arg10[%c0_15, %c0_16] : memref<8x128xf32, #tpu.memory_space<vmem>>, vector<8x128xf32>
      tpu.vector_store %arg10[%c0_15, %c0_16], %22 {strides = array<i32>} : memref<8x128xf32, #tpu.memory_space<vmem>>, vector<8x128xf32>,
    } else {
    }
    %c0 = arith.constant 0 : index
    %c0_1 = arith.constant 0 : index
    %3 = vector.load %arg3[%c0, %c0_1] : memref<8x384xbf16, #tpu.memory_space<vmem>>, vector<8x384xbf16>
    %4 = arith.extf %3 : vector<8x384xbf16> to vector<8x384xf32>
    %c0_2 = arith.constant 0 : index
    %c0_3 = arith.constant 0 : index
    %5 = vector.load %arg5[%c0_2, %c0_3] : memref<1x384xf32, #tpu.memory_space<vmem>>, vector<1x384xf32>
    %6 = vector.broadcast %5 : vector<1x384xf32> to vector<8x384xf32>
    %7 = arith.mulf %4, %6 : vector<8x384xf32>
    %c0_4 = arith.constant 0 : index
    %c0_5 = arith.constant 0 : index
    %8 = vector.load %arg6[%c0_4, %c0_5] : memref<1x384xf32, #tpu.memory_space<vmem>>, vector<1x384xf32>
    %9 = vector.broadcast %8 : vector<1x384xf32> to vector<8x384xf32>
    %10 = arith.addf %7, %9 : vector<8x384xf32>
    %cst = arith.constant 0.000000e+00 : f32
    %11 = vector.broadcast %cst : f32 to vector<8x384xf32>
    %12 = arith.maximumf %10, %11 : vector<8x384xf32>
    %13 = arith.truncf %12 : vector<8x384xf32> to vector<8x384xbf16>
    %c0_6 = arith.constant 0 : index
    %c0_7 = arith.constant 0 : index
    %14 = vector.load %arg10[%c0_6, %c0_7] : memref<8x128xf32, #tpu.memory_space<vmem>>, vector<8x128xf32>
    %c0_8 = arith.constant 0 : index
    %c0_9 = arith.constant 0 : index
    %15 = vector.load %arg4[%c0_8, %c0_9] : memref<384x128xbf16, #tpu.memory_space<vmem>>, vector<384x128xbf16>
    %cst_10 = arith.constant dense<0.000000e+00> : vector<8x128xf32>
    %16 = tpu.matmul %13, %15, %cst_10 {dimension_numbers = #tpu.dot_dimension_numbers<[1], [0], [0], [1], [0, 0, 1, 1], [], []>} : vector<8x384xbf16>, vector<384x128xbf16>, vector<8x128xf32> -> vector<8x128xf32>
    %17 = arith.addf %14, %16 : vector<8x128xf32>
    %c0_11 = arith.constant 0 : index
    %c0_12 = arith.constant 0 : index
    %18 = vector.load %arg10[%c0_11, %c0_12] : memref<8x128xf32, #tpu.memory_space<vmem>>, vector<8x128xf32>
    tpu.vector_store %arg10[%c0_11, %c0_12], %17 {strides = array<i32>} : memref<8x128xf32, #tpu.memory_space<vmem>>, vector<8x128xf32>,
    %c1_i32 = arith.constant 1 : i32
    %19 = arith.cmpi eq, %arg2, %c1_i32 : i32
    %20 = arith.extui %19 : i1 to i32
    %c0_i32_13 = arith.constant 0 : i32
    %21 = arith.cmpi ne, %20, %c0_i32_13 : i32
    scf.if %21 {
      %c0_14 = arith.constant 0 : index
      %c0_15 = arith.constant 0 : index
      %22 = vector.load %arg10[%c0_14, %c0_15] : memref<8x128xf32, #tpu.memory_space<vmem>>, vector<8x128xf32>
      %c0_16 = arith.constant 0 : index
      %c0_17 = arith.constant 0 : index
      %23 = vector.load %arg7[%c0_16, %c0_17] : memref<1x128xf32, #tpu.memory_space<vmem>>, vector<1x128xf32>
      %24 = vector.broadcast %23 : vector<1x128xf32> to vector<8x128xf32>
      %25 = arith.mulf %22, %24 : vector<8x128xf32>
      %c0_18 = arith.constant 0 : index
      %c0_19 = arith.constant 0 : index
      %26 = vector.load %arg8[%c0_18, %c0_19] : memref<1x128xf32, #tpu.memory_space<vmem>>, vector<1x128xf32>
      %27 = vector.broadcast %26 : vector<1x128xf32> to vector<8x128xf32>
      %28 = arith.addf %25, %27 : vector<8x128xf32>
      %cst_20 = arith.constant 0.000000e+00 : f32
      %29 = vector.broadcast %cst_20 : f32 to vector<8x128xf32>
      %30 = arith.maximumf %28, %29 : vector<8x128xf32>
      %31 = arith.truncf %30 : vector<8x128xf32> to vector<8x128xbf16>
      %c0_21 = arith.constant 0 : index
      %c0_22 = arith.constant 0 : index
      %32 = vector.load %arg9[%c0_21, %c0_22] : memref<8x128xbf16, #tpu.memory_space<vmem>>, vector<8x128xbf16>
      tpu.vector_store %arg9[%c0_21, %c0_22], %31 {strides = array<i32>} : memref<8x128xbf16, #tpu.memory_space<vmem>>, vector<8x128xbf16>,
    } else {
    }
    return
  }
  func.func @transform_0(%arg0: i32, %arg1: i32, %arg2: i32) -> (i32, i32) {
    %c0_i32 = arith.constant 0 : i32
    return %arg0, %arg2 : i32, i32
  }
  func.func @transform_1(%arg0: i32, %arg1: i32, %arg2: i32) -> (i32, i32) {
    %c0_i32 = arith.constant 0 : i32
    return %arg2, %arg1 : i32, i32
  }
  func.func @transform_2(%arg0: i32, %arg1: i32, %arg2: i32) -> (i32, i32) {
    %c0_i32 = arith.constant 0 : i32
    %c0_i32_0 = arith.constant 0 : i32
    return %c0_i32, %arg2 : i32, i32
  }
  func.func @transform_3(%arg0: i32, %arg1: i32, %arg2: i32) -> (i32, i32) {
    %c0_i32 = arith.constant 0 : i32
    %c0_i32_0 = arith.constant 0 : i32
    return %c0_i32, %arg2 : i32, i32
  }
  func.func @transform_4(%arg0: i32, %arg1: i32, %arg2: i32) -> (i32, i32) {
    %c0_i32 = arith.constant 0 : i32
    %c0_i32_0 = arith.constant 0 : i32
    return %c0_i32, %arg1 : i32, i32
  }
  func.func @transform_5(%arg0: i32, %arg1: i32, %arg2: i32) -> (i32, i32) {
    %c0_i32 = arith.constant 0 : i32
    %c0_i32_0 = arith.constant 0 : i32
    return %c0_i32, %arg1 : i32, i32
  }
  func.func @transform_6(%arg0: i32, %arg1: i32, %arg2: i32) -> (i32, i32) {
    %c0_i32 = arith.constant 0 : i32
    return %arg0, %arg1 : i32, i32
  }
}

module attributes {stable_mosaic.version = 11 : i64} {
  func.func @_conv_mm_kernel(%arg0: i32, %arg1: i32, %arg2: i32, %arg3: memref<8x128xbf16, #tpu.memory_space<vmem>>, %arg4: memref<128x128xbf16, #tpu.memory_space<vmem>>, %arg5: memref<1x128xf32, #tpu.memory_space<vmem>>, %arg6: memref<1x128xf32, #tpu.memory_space<vmem>>, %arg7: memref<1x128xf32, #tpu.memory_space<vmem>>, %arg8: memref<1x128xf32, #tpu.memory_space<vmem>>, %arg9: memref<8x128xbf16, #tpu.memory_space<vmem>>, %arg10: memref<8x128xf32, #tpu.memory_space<vmem>>) attributes {dimension_semantics = [#tpu.dimension_semantics<parallel>, #tpu.dimension_semantics<parallel>, #tpu.dimension_semantics<arbitrary>], iteration_bounds = array<i64: 1, 1, 7>, scalar_prefetch = 0 : i64, scratch_operands = 1 : i64, tpu.core_type = #tpu.core_type<tc>, window_params = [{transform_indices = @transform_0, window_bounds = array<i64: 8, 128>}, {transform_indices = @transform_1, window_bounds = array<i64: 128, 128>}, {transform_indices = @transform_2, window_bounds = array<i64: 1, 128>}, {transform_indices = @transform_3, window_bounds = array<i64: 1, 128>}, {transform_indices = @transform_4, window_bounds = array<i64: 1, 128>}, {transform_indices = @transform_5, window_bounds = array<i64: 1, 128>}, {transform_indices = @transform_6, window_bounds = array<i64: 8, 128>}]} {
    %c0_i32 = arith.constant 0 : i32
    %0 = arith.cmpi eq, %arg2, %c0_i32 : i32
    %1 = arith.extui %0 : i1 to i32
    %c0_i32_0 = arith.constant 0 : i32
    %2 = arith.cmpi ne, %1, %c0_i32_0 : i32
    scf.if %2 {
      %cst_14 = arith.constant 0.000000e+00 : f32
      %22 = vector.broadcast %cst_14 : f32 to vector<8x128xf32>
      %c0_15 = arith.constant 0 : index
      %c0_16 = arith.constant 0 : index
      %23 = vector.load %arg10[%c0_15, %c0_16] : memref<8x128xf32, #tpu.memory_space<vmem>>, vector<8x128xf32>
      tpu.vector_store %arg10[%c0_15, %c0_16], %22 {strides = array<i32>} : memref<8x128xf32, #tpu.memory_space<vmem>>, vector<8x128xf32>,
    } else {
    }
    %c0 = arith.constant 0 : index
    %c0_1 = arith.constant 0 : index
    %3 = vector.load %arg3[%c0, %c0_1] : memref<8x128xbf16, #tpu.memory_space<vmem>>, vector<8x128xbf16>
    %4 = arith.extf %3 : vector<8x128xbf16> to vector<8x128xf32>
    %c0_2 = arith.constant 0 : index
    %c0_3 = arith.constant 0 : index
    %5 = vector.load %arg5[%c0_2, %c0_3] : memref<1x128xf32, #tpu.memory_space<vmem>>, vector<1x128xf32>
    %6 = vector.broadcast %5 : vector<1x128xf32> to vector<8x128xf32>
    %7 = arith.mulf %4, %6 : vector<8x128xf32>
    %c0_4 = arith.constant 0 : index
    %c0_5 = arith.constant 0 : index
    %8 = vector.load %arg6[%c0_4, %c0_5] : memref<1x128xf32, #tpu.memory_space<vmem>>, vector<1x128xf32>
    %9 = vector.broadcast %8 : vector<1x128xf32> to vector<8x128xf32>
    %10 = arith.addf %7, %9 : vector<8x128xf32>
    %cst = arith.constant 0.000000e+00 : f32
    %11 = vector.broadcast %cst : f32 to vector<8x128xf32>
    %12 = arith.maximumf %10, %11 : vector<8x128xf32>
    %13 = arith.truncf %12 : vector<8x128xf32> to vector<8x128xbf16>
    %c0_6 = arith.constant 0 : index
    %c0_7 = arith.constant 0 : index
    %14 = vector.load %arg10[%c0_6, %c0_7] : memref<8x128xf32, #tpu.memory_space<vmem>>, vector<8x128xf32>
    %c0_8 = arith.constant 0 : index
    %c0_9 = arith.constant 0 : index
    %15 = vector.load %arg4[%c0_8, %c0_9] : memref<128x128xbf16, #tpu.memory_space<vmem>>, vector<128x128xbf16>
    %cst_10 = arith.constant dense<0.000000e+00> : vector<8x128xf32>
    %16 = tpu.matmul %13, %15, %cst_10 {dimension_numbers = #tpu.dot_dimension_numbers<[1], [0], [0], [1], [0, 0, 1, 1], [], []>} : vector<8x128xbf16>, vector<128x128xbf16>, vector<8x128xf32> -> vector<8x128xf32>
    %17 = arith.addf %14, %16 : vector<8x128xf32>
    %c0_11 = arith.constant 0 : index
    %c0_12 = arith.constant 0 : index
    %18 = vector.load %arg10[%c0_11, %c0_12] : memref<8x128xf32, #tpu.memory_space<vmem>>, vector<8x128xf32>
    tpu.vector_store %arg10[%c0_11, %c0_12], %17 {strides = array<i32>} : memref<8x128xf32, #tpu.memory_space<vmem>>, vector<8x128xf32>,
    %c6_i32 = arith.constant 6 : i32
    %19 = arith.cmpi eq, %arg2, %c6_i32 : i32
    %20 = arith.extui %19 : i1 to i32
    %c0_i32_13 = arith.constant 0 : i32
    %21 = arith.cmpi ne, %20, %c0_i32_13 : i32
    scf.if %21 {
      %c0_14 = arith.constant 0 : index
      %c0_15 = arith.constant 0 : index
      %22 = vector.load %arg10[%c0_14, %c0_15] : memref<8x128xf32, #tpu.memory_space<vmem>>, vector<8x128xf32>
      %c0_16 = arith.constant 0 : index
      %c0_17 = arith.constant 0 : index
      %23 = vector.load %arg7[%c0_16, %c0_17] : memref<1x128xf32, #tpu.memory_space<vmem>>, vector<1x128xf32>
      %24 = vector.broadcast %23 : vector<1x128xf32> to vector<8x128xf32>
      %25 = arith.mulf %22, %24 : vector<8x128xf32>
      %c0_18 = arith.constant 0 : index
      %c0_19 = arith.constant 0 : index
      %26 = vector.load %arg8[%c0_18, %c0_19] : memref<1x128xf32, #tpu.memory_space<vmem>>, vector<1x128xf32>
      %27 = vector.broadcast %26 : vector<1x128xf32> to vector<8x128xf32>
      %28 = arith.addf %25, %27 : vector<8x128xf32>
      %cst_20 = arith.constant 0.000000e+00 : f32
      %29 = vector.broadcast %cst_20 : f32 to vector<8x128xf32>
      %30 = arith.maximumf %28, %29 : vector<8x128xf32>
      %31 = arith.truncf %30 : vector<8x128xf32> to vector<8x128xbf16>
      %c0_21 = arith.constant 0 : index
      %c0_22 = arith.constant 0 : index
      %32 = vector.load %arg9[%c0_21, %c0_22] : memref<8x128xbf16, #tpu.memory_space<vmem>>, vector<8x128xbf16>
      tpu.vector_store %arg9[%c0_21, %c0_22], %31 {strides = array<i32>} : memref<8x128xbf16, #tpu.memory_space<vmem>>, vector<8x128xbf16>,
    } else {
    }
    return
  }
  func.func @transform_0(%arg0: i32, %arg1: i32, %arg2: i32) -> (i32, i32) {
    %c0_i32 = arith.constant 0 : i32
    return %arg0, %arg2 : i32, i32
  }
  func.func @transform_1(%arg0: i32, %arg1: i32, %arg2: i32) -> (i32, i32) {
    %c0_i32 = arith.constant 0 : i32
    return %arg2, %arg1 : i32, i32
  }
  func.func @transform_2(%arg0: i32, %arg1: i32, %arg2: i32) -> (i32, i32) {
    %c0_i32 = arith.constant 0 : i32
    %c0_i32_0 = arith.constant 0 : i32
    return %c0_i32, %arg2 : i32, i32
  }
  func.func @transform_3(%arg0: i32, %arg1: i32, %arg2: i32) -> (i32, i32) {
    %c0_i32 = arith.constant 0 : i32
    %c0_i32_0 = arith.constant 0 : i32
    return %c0_i32, %arg2 : i32, i32
  }
  func.func @transform_4(%arg0: i32, %arg1: i32, %arg2: i32) -> (i32, i32) {
    %c0_i32 = arith.constant 0 : i32
    %c0_i32_0 = arith.constant 0 : i32
    return %c0_i32, %arg1 : i32, i32
  }
  func.func @transform_5(%arg0: i32, %arg1: i32, %arg2: i32) -> (i32, i32) {
    %c0_i32 = arith.constant 0 : i32
    %c0_i32_0 = arith.constant 0 : i32
    return %c0_i32, %arg1 : i32, i32
  }
  func.func @transform_6(%arg0: i32, %arg1: i32, %arg2: i32) -> (i32, i32) {
    %c0_i32 = arith.constant 0 : i32
    return %arg0, %arg1 : i32, i32
  }
}

module attributes {stable_mosaic.version = 11 : i64} {
  func.func @_conv_mm_kernel(%arg0: i32, %arg1: i32, %arg2: i32, %arg3: memref<8x512xbf16, #tpu.memory_space<vmem>>, %arg4: memref<512x128xbf16, #tpu.memory_space<vmem>>, %arg5: memref<1x512xf32, #tpu.memory_space<vmem>>, %arg6: memref<1x512xf32, #tpu.memory_space<vmem>>, %arg7: memref<1x128xf32, #tpu.memory_space<vmem>>, %arg8: memref<1x128xf32, #tpu.memory_space<vmem>>, %arg9: memref<8x128xbf16, #tpu.memory_space<vmem>>, %arg10: memref<8x128xf32, #tpu.memory_space<vmem>>) attributes {dimension_semantics = [#tpu.dimension_semantics<parallel>, #tpu.dimension_semantics<parallel>, #tpu.dimension_semantics<arbitrary>], iteration_bounds = array<i64: 1, 1, 2>, scalar_prefetch = 0 : i64, scratch_operands = 1 : i64, tpu.core_type = #tpu.core_type<tc>, window_params = [{transform_indices = @transform_0, window_bounds = array<i64: 8, 512>}, {transform_indices = @transform_1, window_bounds = array<i64: 512, 128>}, {transform_indices = @transform_2, window_bounds = array<i64: 1, 512>}, {transform_indices = @transform_3, window_bounds = array<i64: 1, 512>}, {transform_indices = @transform_4, window_bounds = array<i64: 1, 128>}, {transform_indices = @transform_5, window_bounds = array<i64: 1, 128>}, {transform_indices = @transform_6, window_bounds = array<i64: 8, 128>}]} {
    %c0_i32 = arith.constant 0 : i32
    %0 = arith.cmpi eq, %arg2, %c0_i32 : i32
    %1 = arith.extui %0 : i1 to i32
    %c0_i32_0 = arith.constant 0 : i32
    %2 = arith.cmpi ne, %1, %c0_i32_0 : i32
    scf.if %2 {
      %cst_14 = arith.constant 0.000000e+00 : f32
      %22 = vector.broadcast %cst_14 : f32 to vector<8x128xf32>
      %c0_15 = arith.constant 0 : index
      %c0_16 = arith.constant 0 : index
      %23 = vector.load %arg10[%c0_15, %c0_16] : memref<8x128xf32, #tpu.memory_space<vmem>>, vector<8x128xf32>
      tpu.vector_store %arg10[%c0_15, %c0_16], %22 {strides = array<i32>} : memref<8x128xf32, #tpu.memory_space<vmem>>, vector<8x128xf32>,
    } else {
    }
    %c0 = arith.constant 0 : index
    %c0_1 = arith.constant 0 : index
    %3 = vector.load %arg3[%c0, %c0_1] : memref<8x512xbf16, #tpu.memory_space<vmem>>, vector<8x512xbf16>
    %4 = arith.extf %3 : vector<8x512xbf16> to vector<8x512xf32>
    %c0_2 = arith.constant 0 : index
    %c0_3 = arith.constant 0 : index
    %5 = vector.load %arg5[%c0_2, %c0_3] : memref<1x512xf32, #tpu.memory_space<vmem>>, vector<1x512xf32>
    %6 = vector.broadcast %5 : vector<1x512xf32> to vector<8x512xf32>
    %7 = arith.mulf %4, %6 : vector<8x512xf32>
    %c0_4 = arith.constant 0 : index
    %c0_5 = arith.constant 0 : index
    %8 = vector.load %arg6[%c0_4, %c0_5] : memref<1x512xf32, #tpu.memory_space<vmem>>, vector<1x512xf32>
    %9 = vector.broadcast %8 : vector<1x512xf32> to vector<8x512xf32>
    %10 = arith.addf %7, %9 : vector<8x512xf32>
    %cst = arith.constant 0.000000e+00 : f32
    %11 = vector.broadcast %cst : f32 to vector<8x512xf32>
    %12 = arith.maximumf %10, %11 : vector<8x512xf32>
    %13 = arith.truncf %12 : vector<8x512xf32> to vector<8x512xbf16>
    %c0_6 = arith.constant 0 : index
    %c0_7 = arith.constant 0 : index
    %14 = vector.load %arg10[%c0_6, %c0_7] : memref<8x128xf32, #tpu.memory_space<vmem>>, vector<8x128xf32>
    %c0_8 = arith.constant 0 : index
    %c0_9 = arith.constant 0 : index
    %15 = vector.load %arg4[%c0_8, %c0_9] : memref<512x128xbf16, #tpu.memory_space<vmem>>, vector<512x128xbf16>
    %cst_10 = arith.constant dense<0.000000e+00> : vector<8x128xf32>
    %16 = tpu.matmul %13, %15, %cst_10 {dimension_numbers = #tpu.dot_dimension_numbers<[1], [0], [0], [1], [0, 0, 1, 1], [], []>} : vector<8x512xbf16>, vector<512x128xbf16>, vector<8x128xf32> -> vector<8x128xf32>
    %17 = arith.addf %14, %16 : vector<8x128xf32>
    %c0_11 = arith.constant 0 : index
    %c0_12 = arith.constant 0 : index
    %18 = vector.load %arg10[%c0_11, %c0_12] : memref<8x128xf32, #tpu.memory_space<vmem>>, vector<8x128xf32>
    tpu.vector_store %arg10[%c0_11, %c0_12], %17 {strides = array<i32>} : memref<8x128xf32, #tpu.memory_space<vmem>>, vector<8x128xf32>,
    %c1_i32 = arith.constant 1 : i32
    %19 = arith.cmpi eq, %arg2, %c1_i32 : i32
    %20 = arith.extui %19 : i1 to i32
    %c0_i32_13 = arith.constant 0 : i32
    %21 = arith.cmpi ne, %20, %c0_i32_13 : i32
    scf.if %21 {
      %c0_14 = arith.constant 0 : index
      %c0_15 = arith.constant 0 : index
      %22 = vector.load %arg10[%c0_14, %c0_15] : memref<8x128xf32, #tpu.memory_space<vmem>>, vector<8x128xf32>
      %c0_16 = arith.constant 0 : index
      %c0_17 = arith.constant 0 : index
      %23 = vector.load %arg7[%c0_16, %c0_17] : memref<1x128xf32, #tpu.memory_space<vmem>>, vector<1x128xf32>
      %24 = vector.broadcast %23 : vector<1x128xf32> to vector<8x128xf32>
      %25 = arith.mulf %22, %24 : vector<8x128xf32>
      %c0_18 = arith.constant 0 : index
      %c0_19 = arith.constant 0 : index
      %26 = vector.load %arg8[%c0_18, %c0_19] : memref<1x128xf32, #tpu.memory_space<vmem>>, vector<1x128xf32>
      %27 = vector.broadcast %26 : vector<1x128xf32> to vector<8x128xf32>
      %28 = arith.addf %25, %27 : vector<8x128xf32>
      %cst_20 = arith.constant 0.000000e+00 : f32
      %29 = vector.broadcast %cst_20 : f32 to vector<8x128xf32>
      %30 = arith.maximumf %28, %29 : vector<8x128xf32>
      %31 = arith.truncf %30 : vector<8x128xf32> to vector<8x128xbf16>
      %c0_21 = arith.constant 0 : index
      %c0_22 = arith.constant 0 : index
      %32 = vector.load %arg9[%c0_21, %c0_22] : memref<8x128xbf16, #tpu.memory_space<vmem>>, vector<8x128xbf16>
      tpu.vector_store %arg9[%c0_21, %c0_22], %31 {strides = array<i32>} : memref<8x128xbf16, #tpu.memory_space<vmem>>, vector<8x128xbf16>,
    } else {
    }
    return
  }
  func.func @transform_0(%arg0: i32, %arg1: i32, %arg2: i32) -> (i32, i32) {
    %c0_i32 = arith.constant 0 : i32
    return %arg0, %arg2 : i32, i32
  }
  func.func @transform_1(%arg0: i32, %arg1: i32, %arg2: i32) -> (i32, i32) {
    %c0_i32 = arith.constant 0 : i32
    return %arg2, %arg1 : i32, i32
  }
  func.func @transform_2(%arg0: i32, %arg1: i32, %arg2: i32) -> (i32, i32) {
    %c0_i32 = arith.constant 0 : i32
    %c0_i32_0 = arith.constant 0 : i32
    return %c0_i32, %arg2 : i32, i32
  }
  func.func @transform_3(%arg0: i32, %arg1: i32, %arg2: i32) -> (i32, i32) {
    %c0_i32 = arith.constant 0 : i32
    %c0_i32_0 = arith.constant 0 : i32
    return %c0_i32, %arg2 : i32, i32
  }
  func.func @transform_4(%arg0: i32, %arg1: i32, %arg2: i32) -> (i32, i32) {
    %c0_i32 = arith.constant 0 : i32
    %c0_i32_0 = arith.constant 0 : i32
    return %c0_i32, %arg1 : i32, i32
  }
  func.func @transform_5(%arg0: i32, %arg1: i32, %arg2: i32) -> (i32, i32) {
    %c0_i32 = arith.constant 0 : i32
    %c0_i32_0 = arith.constant 0 : i32
    return %c0_i32, %arg1 : i32, i32
  }
  func.func @transform_6(%arg0: i32, %arg1: i32, %arg2: i32) -> (i32, i32) {
    %c0_i32 = arith.constant 0 : i32
    return %arg0, %arg1 : i32, i32
  }
}

module attributes {stable_mosaic.version = 11 : i64} {
  func.func @_conv_mm_kernel(%arg0: i32, %arg1: i32, %arg2: i32, %arg3: memref<8x512xbf16, #tpu.memory_space<vmem>>, %arg4: memref<512x256xbf16, #tpu.memory_space<vmem>>, %arg5: memref<1x512xf32, #tpu.memory_space<vmem>>, %arg6: memref<1x512xf32, #tpu.memory_space<vmem>>, %arg7: memref<1x256xf32, #tpu.memory_space<vmem>>, %arg8: memref<1x256xf32, #tpu.memory_space<vmem>>, %arg9: memref<8x256xbf16, #tpu.memory_space<vmem>>, %arg10: memref<8x256xf32, #tpu.memory_space<vmem>>) attributes {dimension_semantics = [#tpu.dimension_semantics<parallel>, #tpu.dimension_semantics<parallel>, #tpu.dimension_semantics<arbitrary>], iteration_bounds = array<i64: 1, 2, 2>, scalar_prefetch = 0 : i64, scratch_operands = 1 : i64, tpu.core_type = #tpu.core_type<tc>, window_params = [{transform_indices = @transform_0, window_bounds = array<i64: 8, 512>}, {transform_indices = @transform_1, window_bounds = array<i64: 512, 256>}, {transform_indices = @transform_2, window_bounds = array<i64: 1, 512>}, {transform_indices = @transform_3, window_bounds = array<i64: 1, 512>}, {transform_indices = @transform_4, window_bounds = array<i64: 1, 256>}, {transform_indices = @transform_5, window_bounds = array<i64: 1, 256>}, {transform_indices = @transform_6, window_bounds = array<i64: 8, 256>}]} {
    %c0_i32 = arith.constant 0 : i32
    %0 = arith.cmpi eq, %arg2, %c0_i32 : i32
    %1 = arith.extui %0 : i1 to i32
    %c0_i32_0 = arith.constant 0 : i32
    %2 = arith.cmpi ne, %1, %c0_i32_0 : i32
    scf.if %2 {
      %cst_14 = arith.constant 0.000000e+00 : f32
      %22 = vector.broadcast %cst_14 : f32 to vector<8x256xf32>
      %c0_15 = arith.constant 0 : index
      %c0_16 = arith.constant 0 : index
      %23 = vector.load %arg10[%c0_15, %c0_16] : memref<8x256xf32, #tpu.memory_space<vmem>>, vector<8x256xf32>
      tpu.vector_store %arg10[%c0_15, %c0_16], %22 {strides = array<i32>} : memref<8x256xf32, #tpu.memory_space<vmem>>, vector<8x256xf32>,
    } else {
    }
    %c0 = arith.constant 0 : index
    %c0_1 = arith.constant 0 : index
    %3 = vector.load %arg3[%c0, %c0_1] : memref<8x512xbf16, #tpu.memory_space<vmem>>, vector<8x512xbf16>
    %4 = arith.extf %3 : vector<8x512xbf16> to vector<8x512xf32>
    %c0_2 = arith.constant 0 : index
    %c0_3 = arith.constant 0 : index
    %5 = vector.load %arg5[%c0_2, %c0_3] : memref<1x512xf32, #tpu.memory_space<vmem>>, vector<1x512xf32>
    %6 = vector.broadcast %5 : vector<1x512xf32> to vector<8x512xf32>
    %7 = arith.mulf %4, %6 : vector<8x512xf32>
    %c0_4 = arith.constant 0 : index
    %c0_5 = arith.constant 0 : index
    %8 = vector.load %arg6[%c0_4, %c0_5] : memref<1x512xf32, #tpu.memory_space<vmem>>, vector<1x512xf32>
    %9 = vector.broadcast %8 : vector<1x512xf32> to vector<8x512xf32>
    %10 = arith.addf %7, %9 : vector<8x512xf32>
    %cst = arith.constant 0.000000e+00 : f32
    %11 = vector.broadcast %cst : f32 to vector<8x512xf32>
    %12 = arith.maximumf %10, %11 : vector<8x512xf32>
    %13 = arith.truncf %12 : vector<8x512xf32> to vector<8x512xbf16>
    %c0_6 = arith.constant 0 : index
    %c0_7 = arith.constant 0 : index
    %14 = vector.load %arg10[%c0_6, %c0_7] : memref<8x256xf32, #tpu.memory_space<vmem>>, vector<8x256xf32>
    %c0_8 = arith.constant 0 : index
    %c0_9 = arith.constant 0 : index
    %15 = vector.load %arg4[%c0_8, %c0_9] : memref<512x256xbf16, #tpu.memory_space<vmem>>, vector<512x256xbf16>
    %cst_10 = arith.constant dense<0.000000e+00> : vector<8x256xf32>
    %16 = tpu.matmul %13, %15, %cst_10 {dimension_numbers = #tpu.dot_dimension_numbers<[1], [0], [0], [1], [0, 0, 1, 1], [], []>} : vector<8x512xbf16>, vector<512x256xbf16>, vector<8x256xf32> -> vector<8x256xf32>
    %17 = arith.addf %14, %16 : vector<8x256xf32>
    %c0_11 = arith.constant 0 : index
    %c0_12 = arith.constant 0 : index
    %18 = vector.load %arg10[%c0_11, %c0_12] : memref<8x256xf32, #tpu.memory_space<vmem>>, vector<8x256xf32>
    tpu.vector_store %arg10[%c0_11, %c0_12], %17 {strides = array<i32>} : memref<8x256xf32, #tpu.memory_space<vmem>>, vector<8x256xf32>,
    %c1_i32 = arith.constant 1 : i32
    %19 = arith.cmpi eq, %arg2, %c1_i32 : i32
    %20 = arith.extui %19 : i1 to i32
    %c0_i32_13 = arith.constant 0 : i32
    %21 = arith.cmpi ne, %20, %c0_i32_13 : i32
    scf.if %21 {
      %c0_14 = arith.constant 0 : index
      %c0_15 = arith.constant 0 : index
      %22 = vector.load %arg10[%c0_14, %c0_15] : memref<8x256xf32, #tpu.memory_space<vmem>>, vector<8x256xf32>
      %23 = arith.truncf %22 : vector<8x256xf32> to vector<8x256xbf16>
      %c0_16 = arith.constant 0 : index
      %c0_17 = arith.constant 0 : index
      %24 = vector.load %arg9[%c0_16, %c0_17] : memref<8x256xbf16, #tpu.memory_space<vmem>>, vector<8x256xbf16>
      tpu.vector_store %arg9[%c0_16, %c0_17], %23 {strides = array<i32>} : memref<8x256xbf16, #tpu.memory_space<vmem>>, vector<8x256xbf16>,
    } else {
    }
    return
  }
  func.func @transform_0(%arg0: i32, %arg1: i32, %arg2: i32) -> (i32, i32) {
    %c0_i32 = arith.constant 0 : i32
    return %arg0, %arg2 : i32, i32
  }
  func.func @transform_1(%arg0: i32, %arg1: i32, %arg2: i32) -> (i32, i32) {
    %c0_i32 = arith.constant 0 : i32
    return %arg2, %arg1 : i32, i32
  }
  func.func @transform_2(%arg0: i32, %arg1: i32, %arg2: i32) -> (i32, i32) {
    %c0_i32 = arith.constant 0 : i32
    %c0_i32_0 = arith.constant 0 : i32
    return %c0_i32, %arg2 : i32, i32
  }
  func.func @transform_3(%arg0: i32, %arg1: i32, %arg2: i32) -> (i32, i32) {
    %c0_i32 = arith.constant 0 : i32
    %c0_i32_0 = arith.constant 0 : i32
    return %c0_i32, %arg2 : i32, i32
  }
  func.func @transform_4(%arg0: i32, %arg1: i32, %arg2: i32) -> (i32, i32) {
    %c0_i32 = arith.constant 0 : i32
    %c0_i32_0 = arith.constant 0 : i32
    return %c0_i32, %arg1 : i32, i32
  }
  func.func @transform_5(%arg0: i32, %arg1: i32, %arg2: i32) -> (i32, i32) {
    %c0_i32 = arith.constant 0 : i32
    %c0_i32_0 = arith.constant 0 : i32
    return %c0_i32, %arg1 : i32, i32
  }
  func.func @transform_6(%arg0: i32, %arg1: i32, %arg2: i32) -> (i32, i32) {
    %c0_i32 = arith.constant 0 : i32
    return %arg0, %arg1 : i32, i32
  }
}

module attributes {stable_mosaic.version = 11 : i64} {
  func.func @_head_kernel(%arg0: memref<2x1x1024xbf16, #tpu.memory_space<vmem>>, %arg1: memref<1x1024xf32, #tpu.memory_space<vmem>>, %arg2: memref<1x1024xf32, #tpu.memory_space<vmem>>, %arg3: memref<1024x256xbf16, #tpu.memory_space<vmem>>, %arg4: memref<1x256xf32, #tpu.memory_space<vmem>>, %arg5: memref<256x128xbf16, #tpu.memory_space<vmem>>, %arg6: memref<1x128xf32, #tpu.memory_space<vmem>>, %arg7: memref<2x128xf32, #tpu.memory_space<vmem>>) attributes {dimension_semantics = [], scalar_prefetch = 0 : i64, scratch_operands = 0 : i64, tpu.core_type = #tpu.core_type<tc>} {
    %c0 = arith.constant 0 : index
    %c0_0 = arith.constant 0 : index
    %c0_1 = arith.constant 0 : index
    %0 = vector.load %arg0[%c0, %c0_0, %c0_1] : memref<2x1x1024xbf16, #tpu.memory_space<vmem>>, vector<2x1x1024xbf16>
    %1 = arith.extf %0 : vector<2x1x1024xbf16> to vector<2x1x1024xf32>
    %c0_2 = arith.constant 0 : index
    %c0_3 = arith.constant 0 : index
    %2 = vector.load %arg1[%c0_2, %c0_3] : memref<1x1024xf32, #tpu.memory_space<vmem>>, vector<1x1024xf32>
    %3 = vector.shape_cast %2 : vector<1x1024xf32> to vector<1x1x1024xf32>
    %4 = vector.broadcast %3 : vector<1x1x1024xf32> to vector<2x1x1024xf32>
    %5 = arith.mulf %1, %4 : vector<2x1x1024xf32>
    %c0_4 = arith.constant 0 : index
    %c0_5 = arith.constant 0 : index
    %6 = vector.load %arg2[%c0_4, %c0_5] : memref<1x1024xf32, #tpu.memory_space<vmem>>, vector<1x1024xf32>
    %7 = vector.shape_cast %6 : vector<1x1024xf32> to vector<1x1x1024xf32>
    %8 = vector.broadcast %7 : vector<1x1x1024xf32> to vector<2x1x1024xf32>
    %9 = arith.addf %5, %8 : vector<2x1x1024xf32>
    %cst = arith.constant 0.000000e+00 : f32
    %10 = vector.broadcast %cst : f32 to vector<2x1x1024xf32>
    %11 = arith.maximumf %9, %10 : vector<2x1x1024xf32>
    %cst_6 = arith.constant dense<0.000000e+00> : vector<2x1024xf32>
    %12 = vector.multi_reduction <add>, %11, %cst_6 [1] : vector<2x1x1024xf32> to vector<2x1024xf32>
    %cst_7 = arith.constant 1.000000e+00 : f32
    %13 = vector.broadcast %cst_7 : f32 to vector<2x1024xf32>
    %14 = arith.divf %12, %13 : vector<2x1024xf32>
    %15 = arith.truncf %14 : vector<2x1024xf32> to vector<2x1024xbf16>
    %c0_8 = arith.constant 0 : index
    %c0_9 = arith.constant 0 : index
    %16 = vector.load %arg3[%c0_8, %c0_9] : memref<1024x256xbf16, #tpu.memory_space<vmem>>, vector<1024x256xbf16>
    %cst_10 = arith.constant dense<0.000000e+00> : vector<2x256xf32>
    %17 = tpu.matmul %15, %16, %cst_10 {dimension_numbers = #tpu.dot_dimension_numbers<[1], [0], [0], [1], [0, 0, 1, 1], [], []>} : vector<2x1024xbf16>, vector<1024x256xbf16>, vector<2x256xf32> -> vector<2x256xf32>
    %c0_11 = arith.constant 0 : index
    %c0_12 = arith.constant 0 : index
    %18 = vector.load %arg4[%c0_11, %c0_12] : memref<1x256xf32, #tpu.memory_space<vmem>>, vector<1x256xf32>
    %19 = vector.broadcast %18 : vector<1x256xf32> to vector<2x256xf32>
    %20 = arith.addf %17, %19 : vector<2x256xf32>
    %cst_13 = arith.constant 0.000000e+00 : f32
    %21 = vector.broadcast %cst_13 : f32 to vector<2x256xf32>
    %22 = arith.maximumf %20, %21 : vector<2x256xf32>
    %23 = arith.truncf %22 : vector<2x256xf32> to vector<2x256xbf16>
    %c0_14 = arith.constant 0 : index
    %c0_15 = arith.constant 0 : index
    %24 = vector.load %arg5[%c0_14, %c0_15] : memref<256x128xbf16, #tpu.memory_space<vmem>>, vector<256x128xbf16>
    %cst_16 = arith.constant dense<0.000000e+00> : vector<2x128xf32>
    %25 = tpu.matmul %23, %24, %cst_16 {dimension_numbers = #tpu.dot_dimension_numbers<[1], [0], [0], [1], [0, 0, 1, 1], [], []>} : vector<2x256xbf16>, vector<256x128xbf16>, vector<2x128xf32> -> vector<2x128xf32>
    %c0_17 = arith.constant 0 : index
    %c0_18 = arith.constant 0 : index
    %26 = vector.load %arg6[%c0_17, %c0_18] : memref<1x128xf32, #tpu.memory_space<vmem>>, vector<1x128xf32>
    %27 = vector.broadcast %26 : vector<1x128xf32> to vector<2x128xf32>
    %28 = arith.addf %25, %27 : vector<2x128xf32>
    %cst_19 = arith.constant dense<0xFF800000> : vector<2xf32>
    %29 = vector.multi_reduction <maximumf>, %28, %cst_19 [1] : vector<2x128xf32> to vector<2xf32>
    %30 = vector.shape_cast %29 : vector<2xf32> to vector<2x1xf32>
    %31 = vector.broadcast %30 : vector<2x1xf32> to vector<2x128xf32>
    %32 = arith.subf %28, %31 : vector<2x128xf32>
    %33 = math.exp %32 : vector<2x128xf32>
    %cst_20 = arith.constant dense<0.000000e+00> : vector<2xf32>
    %34 = vector.multi_reduction <add>, %33, %cst_20 [1] : vector<2x128xf32> to vector<2xf32>
    %35 = vector.shape_cast %34 : vector<2xf32> to vector<2x1xf32>
    %36 = math.log %35 : vector<2x1xf32>
    %37 = arith.addf %36, %30 : vector<2x1xf32>
    %38 = vector.broadcast %37 : vector<2x1xf32> to vector<2x128xf32>
    %39 = arith.subf %28, %38 : vector<2x128xf32>
    %c0_21 = arith.constant 0 : index
    %c0_22 = arith.constant 0 : index
    %40 = vector.load %arg7[%c0_21, %c0_22] : memref<2x128xf32, #tpu.memory_space<vmem>>, vector<2x128xf32>
    tpu.vector_store %arg7[%c0_21, %c0_22], %39 {strides = array<i32>} : memref<2x128xf32, #tpu.memory_space<vmem>>, vector<2x128xf32>,
    return
  }
}

</mosaic_0001>

<bundles_post_ra>
// kernel: forward.122
= control target key start
LH: loop header
LB: loop body
LE: loop exit
PB: predicated region body
PF: predicated region fallthrough
CT: control target
= control target key end

     0   :  { %s756_s1 = inlined_call_operand.vmem [shape: bf16[128,128], index: 1, kind: input, shape index: {}]   ;;  %s757_s2 = inlined_call_operand.vmem [shape: f32[1,128], index: 2, kind: input, shape index: {}]   ;;  %s758_s3 = inlined_call_operand.vmem [shape: f32[1,128], index: 3, kind: input, shape index: {}]   ;;  %s759_s4 = inlined_call_operand.vmem [shape: f32[1,128], index: 4, kind: input, shape index: {}]   ;;  %s760_s5 = inlined_call_operand.vmem [shape: f32[1,128], index: 5, kind: input, shape index: {}]   ;;  %s761_s0 = inlined_call_operand.vmem [shape: bf16[128,128], index: 0, kind: input, shape index: {}]   ;;  %s762_s6 = inlined_call_operand.vmem [shape: bf16[128,128], index: 6, kind: output, shape index: {}]  }
   0x1   :  { %v450_v0 = vld [vmem:[%s756_s1 + $0x38] sm:$0xff]  ;;  %v449_v1 = vld [vmem:[%s756_s1 + $0x30] sm:$0xff]  ;;  %v448_v2 = vld [vmem:[%s756_s1 + $0x28] sm:$0xff] }
   0x2   :  { %219 = vmatpush.bf16.msra.mxu0 %v450_v0  ;;  %537 = vmatpush.bf16.msra.mxu1 %v450_v0  ;;  %v452_v3 = vld [vmem:[%s761_s0] sm:$0xff]   ;;  %v524_v5 = vld [vmem:[%s761_s0 + $0x10] sm:$0xff]   ;;  %v446_v15 = vld [vmem:[%s756_s1 + $0x18] sm:$0xff] }
   0x3   :  { %538 = vmatpush.bf16.msra.mxu2 %v450_v0  ;;  %539 = vmatpush.bf16.msra.mxu3 %v450_v0  ;;  %v447_v4 = vld [vmem:[%s756_s1 + $0x20] sm:$0xff]  ;;  %v528_v7 = vld [vmem:[%s761_s0 + $0x30] sm:$0xff]   ;;  %v453_v8 = vunpack.c.l.bf16 %v452_v3  ;;  %v454_v9 = vunpack.c.h.bf16 %v452_v3  ;;  %v461_v11 = vunpack.c.l.bf16 %v524_v5  ;;  %v462_v12 = vunpack.c.h.bf16 %v524_v5  ;;  %v444_v34 = vld [vmem:[%s756_s1 + $0x8] sm:$0xff] }
   0x4   :  { %v526_v6 = vld [vmem:[%s761_s0 + $0x20] sm:$0xff]   ;;  %v477_v16 = vunpack.c.l.bf16 %v528_v7  ;;  %v478_v17 = vunpack.c.h.bf16 %v528_v7  ;;  %v445_v25 = vld [vmem:[%s756_s1 + $0x10] sm:$0xff]  ;;  %v523_v43 = vld [vmem:[%s761_s0 + $0x8] sm:$0xff]  }
   0x5   :  { %v627_v10 = vld [vmem:[%s757_s2] ss:$0 sm:$0xff]  ;;  %v469_v13 = vunpack.c.l.bf16 %v526_v6  ;;  %v470_v14 = vunpack.c.h.bf16 %v526_v6  ;;  %v525_v44 = vld [vmem:[%s761_s0 + $0x18] sm:$0xff]   ;;  %v527_v48 = vld [vmem:[%s761_s0 + $0x28] sm:$0xff]   ;;  %v457_v51 = vunpack.c.l.bf16 %v523_v43  ;;  %v458_v52 = vunpack.c.h.bf16 %v523_v43 }
   0x6   :  { %220 = vmatpush.bf16.msra.mxu0 %v449_v1  ;;  %540 = vmatpush.bf16.msra.mxu1 %v449_v1  ;;  %v79_v18 = vmul.f32 %v627_v10, %v453_v8  ;;  %v80_v19 = vmul.f32 %v627_v10, %v454_v9  ;;  %v637_v20 = vld [vmem:[%s758_s3] ss:$0 sm:$0xff]  ;;  %v83_v21 = vmul.f32 %v627_v10, %v461_v11  ;;  %v529_v49 = vld [vmem:[%s761_s0 + $0x38] sm:$0xff]   ;;  %v465_v53 = vunpack.c.l.bf16 %v525_v44 }
   0x7   :  { %541 = vmatpush.bf16.msra.mxu2 %v449_v1  ;;  %542 = vmatpush.bf16.msra.mxu3 %v449_v1  ;;  %v84_v22 = vmul.f32 %v627_v10, %v462_v12  ;;  %v87_v23 = vmul.f32 %v627_v10, %v469_v13  ;;  %v88_v24 = vmul.f32 %v627_v10, %v470_v14  ;;  %v443_v45 = vld [vmem:[%s756_s1] sm:$0xff]  ;;  %v466_v56 = vunpack.c.h.bf16 %v525_v44 }
   0x8   :  { %v91_v26 = vmul.f32 %v627_v10, %v477_v16  ;;  %v92_v27 = vmul.f32 %v627_v10, %v478_v17  ;;  %v99_v28 = vadd.f32 %v637_v20, %v79_v18  ;;  %v100_v29 = vadd.f32 %v637_v20, %v80_v19 }
   0x9   :  { %v103_v30 = vadd.f32 %v637_v20, %v83_v21  ;;  %v104_v31 = vadd.f32 %v637_v20, %v84_v22  ;;  %v107_v32 = vadd.f32 %v637_v20, %v87_v23  ;;  %v108_v33 = vadd.f32 %v637_v20, %v88_v24 }
   0xa   :  { %221 = vmatpush.bf16.msra.mxu0 %v448_v2  ;;  %543 = vmatpush.bf16.msra.mxu1 %v448_v2  ;;  %v111_v35 = vadd.f32 %v637_v20, %v91_v26  ;;  %v112_v36 = vadd.f32 %v637_v20, %v92_v27  ;;  %v115_v37 = vmax.f32 %v99_v28, 0.0  ;;  %v116_v38 = vmax.f32 %v100_v29, 0.0 }
   0xb   :  { %544 = vmatpush.bf16.msra.mxu2 %v448_v2  ;;  %545 = vmatpush.bf16.msra.mxu3 %v448_v2  ;;  %v119_v39 = vmax.f32 %v103_v30, 0.0  ;;  %v120_v40 = vmax.f32 %v104_v31, 0.0  ;;  %v123_v41 = vmax.f32 %v107_v32, 0.0  ;;  %v124_v42 = vmax.f32 %v108_v33, 0.0  ;;  %v699_v30 = vld [vmem:[%s760_s5] ss:$0 sm:$0xff] }
   0xc   :  { %v127_v46 = vmax.f32 %v111_v35, 0.0  ;;  %v128_v47 = vmax.f32 %v112_v36, 0.0  ;;  %v131_v50 = vpack.c.bf16 %v116_v38, %v115_v37  ;;  %v473_v57 = vunpack.c.l.bf16 %v527_v48 }
   0xd   :  { %v133_v54 = vpack.c.bf16 %v120_v40, %v119_v39  ;;  %v135_v55 = vpack.c.bf16 %v124_v42, %v123_v41  ;;  %v474_v59 = vunpack.c.h.bf16 %v527_v48  ;;  %v481_v60 = vunpack.c.l.bf16 %v529_v49 }
   0xe   :  { %222 = vmatpush.bf16.msra.mxu0 %v447_v4  ;;  %546 = vmatpush.bf16.msra.mxu1 %v447_v4  ;;  %v137_v58 = vpack.c.bf16 %v128_v47, %v127_v46  ;;  %v482_v61 = vunpack.c.h.bf16 %v529_v49  ;;  %v81_v62 = vmul.f32 %v627_v10, %v457_v51  ;;  %v82_v63 = vmul.f32 %v627_v10, %v458_v52 }
   0xf   :  { %547 = vmatpush.bf16.msra.mxu2 %v447_v4  ;;  %548 = vmatpush.bf16.msra.mxu3 %v447_v4  ;;  %v85_v0 = vmul.f32 %v627_v10, %v465_v53  ;;  %v86_v1 = vmul.f32 %v627_v10, %v466_v56  ;;  %v89_v2 = vmul.f32 %v627_v10, %v473_v57 }
  0x10   :  { %v90_v3 = vmul.f32 %v627_v10, %v474_v59  ;;  %v93_v4 = vmul.f32 %v627_v10, %v481_v60  ;;  %v94_v5 = vmul.f32 %v627_v10, %v482_v61  ;;  %v101_v6 = vadd.f32 %v637_v20, %v81_v62 }
  0x11   :  { %v102_v7 = vadd.f32 %v637_v20, %v82_v63  ;;  %v105_v8 = vadd.f32 %v637_v20, %v85_v0  ;;  %v106_v9 = vadd.f32 %v637_v20, %v86_v1  ;;  %v109_v11 = vadd.f32 %v637_v20, %v89_v2 }
  0x12   :  { %223 = vmatpush.bf16.msra.mxu0 %v446_v15  ;;  %549 = vmatpush.bf16.msra.mxu1 %v446_v15  ;;  %v110_v12 = vadd.f32 %v637_v20, %v90_v3  ;;  %v113_v13 = vadd.f32 %v637_v20, %v93_v4  ;;  %v114_v14 = vadd.f32 %v637_v20, %v94_v5  ;;  %v693_v20 = vld [vmem:[%s759_s4] ss:$0 sm:$0xff] }
  0x13   :  { %550 = vmatpush.bf16.msra.mxu2 %v446_v15  ;;  %551 = vmatpush.bf16.msra.mxu3 %v446_v15  ;;  %v117_v15 = vmax.f32 %v101_v6, 0.0  ;;  %v118_v16 = vmax.f32 %v102_v7, 0.0  ;;  %v121_v17 = vmax.f32 %v105_v8, 0.0  ;;  %v122_v10 = vmax.f32 %v106_v9, 0.0 }
  0x14   :  { %v125_v18 = vmax.f32 %v109_v11, 0.0  ;;  %v126_v19 = vmax.f32 %v110_v12, 0.0  ;;  %v129_v21 = vmax.f32 %v113_v13, 0.0  ;;  %v130_v22 = vmax.f32 %v114_v14, 0.0 }
  0x15   :  { %v132_v23 = vpack.c.bf16 %v118_v16, %v117_v15  ;;  %v134_v24 = vpack.c.bf16 %v122_v10, %v121_v17 }
  0x16   :  { %224 = vmatpush.bf16.msra.mxu0 %v445_v25  ;;  %552 = vmatpush.bf16.msra.mxu1 %v445_v25  ;;  %v138_v26 = vpack.c.bf16 %v130_v22, %v129_v21 }
  0x17   :  { %553 = vmatpush.bf16.msra.mxu2 %v445_v25  ;;  %554 = vmatpush.bf16.msra.mxu3 %v445_v25  ;;  %v136_v25 = vpack.c.bf16 %v126_v19, %v125_v18 }
  0x1a   :  { %225 = vmatpush.bf16.msra.mxu0 %v444_v34  ;;  %555 = vmatpush.bf16.msra.mxu1 %v444_v34 }
  0x1b   :  { %556 = vmatpush.bf16.msra.mxu2 %v444_v34  ;;  %557 = vmatpush.bf16.msra.mxu3 %v444_v34 }
  0x1e   :  { %226 = vmatpush.bf16.msra.mxu0 %v443_v45  ;;  %558 = vmatpush.bf16.msra.mxu1 %v443_v45 }
  0x1f   :  { %559 = vmatpush.bf16.msra.mxu2 %v443_v45  ;;  %560 = vmatpush.bf16.msra.mxu3 %v443_v45 }
  0x21   :  { %227 = vmatmul.bf16.vlgmr.msra.gmra.mxu0 %v131_v50  ;;  %237 = vmatmul.bf16.vlgmr.msra.gmra.mxu1 %v133_v54 }
  0x22   :  { %247 = vmatmul.bf16.vlgmr.msra.gmra.mxu2 %v135_v55  ;;  %257 = vmatmul.bf16.vlgmr.msra.gmra.mxu3 %v137_v58 }
  0x31   :  { %232 = vmatmul.bf16.gmra.mxu0 %v132_v23  ;;  %242 = vmatmul.bf16.gmra.mxu1 %v134_v24 }
  0x32   :  { %252 = vmatmul.bf16.gmra.mxu2 %v136_v25  ;;  %262 = vmatmul.bf16.gmra.mxu3 %v138_v26 }
  0x9e   :  { %v228_v27 = vpop.f32.mrf.mxu0  ;;  %v238_v28 = vpop.f32.mrf.mxu1 }
  0x9f   :  { %v323_v29 = vmul.f32 %v693_v20, %v228_v27  ;;  %v327_v31 = vmul.f32 %v693_v20, %v238_v28 }
  0xa1   :  { %v343_v36 = vadd.f32 %v699_v30, %v323_v29  ;;  %v347_v37 = vadd.f32 %v699_v30, %v327_v31 }
  0xa3   :  { %v359_v44 = vmax.f32 %v343_v36, 0.0  ;;  %v363_v45 = vmax.f32 %v347_v37, 0.0 }
  0xa5   :  { %v248_v32 = vpop.f32.mrf.mxu2  ;;  %v258_v33 = vpop.f32.mrf.mxu3 }
  0xa6   :  { %v230_v34 = vpop.f32.mrf.mxu0  ;;  %v240_v35 = vpop.f32.mrf.mxu1  ;;  %v331_v42 = vmul.f32 %v693_v20, %v248_v32  ;;  %v335_v43 = vmul.f32 %v693_v20, %v258_v33 }
  0xa7   :  { %v324_v38 = vmul.f32 %v693_v20, %v230_v34  ;;  %v328_v39 = vmul.f32 %v693_v20, %v240_v35 }
  0xa8   :  { %v351_v52 = vadd.f32 %v699_v30, %v331_v42  ;;  %v355_v53 = vadd.f32 %v699_v30, %v335_v43 }
  0xa9   :  { %v344_v40 = vadd.f32 %v699_v30, %v324_v38  ;;  %v348_v41 = vadd.f32 %v699_v30, %v328_v39 }
  0xaa   :  { %v367_v60 = vmax.f32 %v351_v52, 0.0  ;;  %v371_v61 = vmax.f32 %v355_v53, 0.0 }
  0xab   :  { %v360_v46 = vmax.f32 %v344_v40, 0.0  ;;  %v364_v47 = vmax.f32 %v348_v41, 0.0 }
  0xad   :  { %v486_v48 = vpack.c.bf16 %v360_v46, %v359_v44  ;;  %v496_v49 = vpack.c.bf16 %v364_v47, %v363_v45  ;;  %v250_v50 = vpop.f32.mrf.mxu2  ;;  %v260_v51 = vpop.f32.mrf.mxu3 }
  0xae   :  { %v332_v54 = vmul.f32 %v693_v20, %v250_v50  ;;  %v336_v55 = vmul.f32 %v693_v20, %v260_v51  ;;  %v233_v56 = vpop.f32.mrf.mxu0  ;;  %v243_v57 = vpop.f32.mrf.mxu1 }
  0xaf   :  { %487 = vst [vmem:[%s762_s6] sm:$0xff] %v486_v48   ;;  %v325_v0 = vmul.f32 %v693_v20, %v233_v56  ;;  %v329_v1 = vmul.f32 %v693_v20, %v243_v57 }
  0xb0   :  { %531 = vst [vmem:[%s762_s6 + $0x10] sm:$0xff] %v496_v49   ;;  %v352_v58 = vadd.f32 %v699_v30, %v332_v54  ;;  %v356_v59 = vadd.f32 %v699_v30, %v336_v55 }
  0xb1   :  { %v345_v8 = vadd.f32 %v699_v30, %v325_v0  ;;  %v349_v9 = vadd.f32 %v699_v30, %v329_v1 }
  0xb2   :  { %v368_v62 = vmax.f32 %v352_v58, 0.0  ;;  %v372_v63 = vmax.f32 %v356_v59, 0.0 }
  0xb3   :  { %v361_v17 = vmax.f32 %v345_v8, 0.0  ;;  %v365_v10 = vmax.f32 %v349_v9, 0.0 }
  0xb4   :  { %v506_v2 = vpack.c.bf16 %v368_v62, %v367_v60  ;;  %v516_v3 = vpack.c.bf16 %v372_v63, %v371_v61 }
  0xb5   :  { %v253_v4 = vpop.f32.mrf.mxu2  ;;  %v263_v5 = vpop.f32.mrf.mxu3 }
  0xb6   :  { %533 = vst [vmem:[%s762_s6 + $0x20] sm:$0xff] %v506_v2   ;;  %v235_v6 = vpop.f32.mrf.mxu0  ;;  %v245_v7 = vpop.f32.mrf.mxu1  ;;  %v333_v15 = vmul.f32 %v693_v20, %v253_v4  ;;  %v337_v16 = vmul.f32 %v693_v20, %v263_v5 }
  0xb7   :  { %535 = vst [vmem:[%s762_s6 + $0x30] sm:$0xff] %v516_v3   ;;  %v326_v11 = vmul.f32 %v693_v20, %v235_v6  ;;  %v330_v12 = vmul.f32 %v693_v20, %v245_v7 }
  0xb8   :  { %v353_v25 = vadd.f32 %v699_v30, %v333_v15  ;;  %v357_v26 = vadd.f32 %v699_v30, %v337_v16 }
  0xb9   :  { %v346_v13 = vadd.f32 %v699_v30, %v326_v11  ;;  %v350_v14 = vadd.f32 %v699_v30, %v330_v12 }
  0xba   :  { %v369_v32 = vmax.f32 %v353_v25, 0.0  ;;  %v373_v33 = vmax.f32 %v357_v26, 0.0 }
  0xbb   :  { %v362_v18 = vmax.f32 %v346_v13, 0.0  ;;  %v366_v19 = vmax.f32 %v350_v14, 0.0 }
  0xbd   :  { %v491_v21 = vpack.c.bf16 %v362_v18, %v361_v17  ;;  %v501_v22 = vpack.c.bf16 %v366_v19, %v365_v10  ;;  %v255_v23 = vpop.f32.mrf.mxu2  ;;  %v265_v24 = vpop.f32.mrf.mxu3 }
  0xbe   :  { %v334_v27 = vmul.f32 %v693_v20, %v255_v23  ;;  %v338_v28 = vmul.f32 %v693_v20, %v265_v24 }
  0xbf   :  { %530 = vst [vmem:[%s762_s6 + $0x8] sm:$0xff] %v491_v21  }
  0xc0   :  { %532 = vst [vmem:[%s762_s6 + $0x18] sm:$0xff] %v501_v22   ;;  %v354_v29 = vadd.f32 %v699_v30, %v334_v27  ;;  %v358_v31 = vadd.f32 %v699_v30, %v338_v28 }
  0xc2   :  { %v370_v34 = vmax.f32 %v354_v29, 0.0  ;;  %v374_v35 = vmax.f32 %v358_v31, 0.0 }
  0xc4   :  { %v511_v36 = vpack.c.bf16 %v370_v34, %v369_v32  ;;  %v521_v37 = vpack.c.bf16 %v374_v35, %v373_v33 }
  0xc6   :  { %534 = vst [vmem:[%s762_s6 + $0x28] sm:$0xff] %v511_v36  }
  0xc7   :  { %536 = vst [vmem:[%s762_s6 + $0x38] sm:$0xff] %v521_v37  }

// kernel: forward.121
= control target key start
LH: loop header
LB: loop body
LE: loop exit
PB: predicated region body
PF: predicated region fallthrough
CT: control target
= control target key end

     0   :  { %s1837_s21 = smov 0   ;;  %s1839_s22 = smov 0   ;;  %s2083_s0 = inlined_call_operand.vmem [shape: bf16[512,256], index: 0, kind: input, shape index: {}]   ;;  %s2084_s1 = inlined_call_operand.vmem [shape: bf16[256,128], index: 1, kind: input, shape index: {}]   ;;  %s2085_s2 = inlined_call_operand.vmem [shape: f32[1,256], index: 2, kind: input, shape index: {}, may-alias: {2,3}]   ;;  %s2086_s3 = inlined_call_operand.vmem [shape: f32[1,256], index: 3, kind: input, shape index: {}, may-alias: {2,3}]   ;;  %s2087_s4 = inlined_call_operand.vmem [shape: f32[1,128], index: 4, kind: input, shape index: {}]   ;;  %s2088_s5 = inlined_call_operand.vmem [shape: f32[1,128], index: 5, kind: input, shape index: {}]   ;;  %s2089_s6 = inlined_call_operand.vmem [shape: bf16[512,128], index: 6, kind: output, shape index: {}]  }
   0x1   :  { %s1841_s23 = smov 0  }
   0x2 LB: > { %s35_s2 = sadd.s32 1, %s1796_s22  ;;  %p1392_p0 = scmp.ge.s32.totalorder %s1800_s23, 1  ;;  %s1800_s23 = sphi %s1841_s23, %s16_s23   ;;  %s1796_s22 = sphi %s1839_s22, %s2091_s22   ;;  %s1792_s21 = sphi %s1837_s21, %s2090_s21  }
   0x3   : > { %p37_p1 = scmp.ge.s32.totalorder %s35_s2, 2  ;;  %p294_p2 = scmp.lt.s32.totalorder %s1800_s23, 3 }
   0x5   : > { %s2093_s2 = smov (%p37_p1, %s35_s2), 0  ;;  %p295_p3 = pnand %p1392_p0, %p294_p2 }
   0x6   : > { %s1393_s11 = sshll.u32 (!%p295_p3), %s1792_s21, 5 }
   0x7   : > { %298 = sbr.rel (%p295_p3) target bundleno = 308 (0x134), region = 44  ;;  %p356_p4 = scmp.lt.s32.totalorder (!%p295_p3), %s1393_s11, 63 }
   0xc   : > { %v1632_v0 = vld [vmem:[%s2084_s1 + $0x38] sm:$0xff]  ;;  %v1631_v2 = vld [vmem:[%s2084_s1 + $0x30] sm:$0xff]  ;;  %v1630_v4 = vld [vmem:[%s2084_s1 + $0x28] sm:$0xff]  ;;  %s2095_s11 = smov (!%p356_p4, %s1393_s11), 63 }
   0xd   : > { %v1640_v1 = vld [vmem:[%s2084_s1 + $0x78] sm:$0xff]  ;;  %788 = vmatpush.bf16.msra.mxu0 %v1632_v0  ;;  %1736 = vmatpush.bf16.msra.mxu2 %v1632_v0  ;;  %v1639_v3 = vld [vmem:[%s2084_s1 + $0x70] sm:$0xff]  ;;  %v1638_v5 = vld [vmem:[%s2084_s1 + $0x68] sm:$0xff]  ;;  %s1592_s25 = sshll.u32 %s2095_s11, 3  ;;  %s1397_s18 = sshll.u32 %s2095_s11, 2 }
   0xe   : > { %877 = vmatpush.bf16.msra.mxu1 %v1640_v1  ;;  %1744 = vmatpush.bf16.msra.mxu3 %v1640_v1  ;;  %v1629_v6 = vld [vmem:[%s2084_s1 + $0x20] sm:$0xff]  ;;  %v1628_v8 = vld [vmem:[%s2084_s1 + $0x18] sm:$0xff]  ;;  %v1627_v10 = vld [vmem:[%s2084_s1 + $0x10] sm:$0xff]  ;;  %s1903_s30 = scalar_lea.vmem %s2083_s0, %s1592_s25  ;;  %s1997_s21 = scalar_lea.vmem %s2089_s6, %s1397_s18 }
   0xf   : > { %v1637_v7 = vld [vmem:[%s2084_s1 + $0x60] sm:$0xff]  ;;  %v1636_v9 = vld [vmem:[%s2084_s1 + $0x58] sm:$0xff]  ;;  %v1635_v11 = vld [vmem:[%s2084_s1 + $0x50] sm:$0xff] }
  0x10   : > { %v1626_v12 = vld [vmem:[%s2084_s1 + $0x8] sm:$0xff]  ;;  %v1625_v14 = vld [vmem:[%s2084_s1] sm:$0xff]  ;;  %v1408_v28 = vld [vmem:[%s1903_s30 + $0x10] sm:$0xf] }
  0x11   : > { %789 = vmatpush.bf16.msra.mxu0 %v1631_v2  ;;  %1737 = vmatpush.bf16.msra.mxu2 %v1631_v2  ;;  %v1634_v13 = vld [vmem:[%s2084_s1 + $0x48] sm:$0xff]  ;;  %v1633_v15 = vld [vmem:[%s2084_s1 + $0x40] sm:$0xff]  ;;  %v1596_v29 = vld [vmem:[%s1903_s30 + $0x14] sm:$0xf0] }
  0x12   : > { %878 = vmatpush.bf16.msra.mxu1 %v1639_v3  ;;  %1745 = vmatpush.bf16.msra.mxu3 %v1639_v3  ;;  %v1400_v16 = vld [vmem:[%s1903_s30] sm:$0xf]  ;;  %v1594_v17 = vld [vmem:[%s1903_s30 + $0x4] sm:$0xf0]  ;;  %v1593_v20 = vld [vmem:[%s1903_s30 + $0x4] sm:$0xf]  ;;  %v1409_v36 = vor.u32 %v1596_v29, %v1408_v28 }
  0x13   : > { %v1464_v18 = vld [vmem:[%s1903_s30 + $0x80] sm:$0xf]  ;;  %v1610_v19 = vld [vmem:[%s1903_s30 + $0x84] sm:$0xf0]  ;;  %v1402_v21 = vld [vmem:[%s1903_s30 + $0x8] sm:$0xf0]  ;;  %v1401_v24 = vor.u32 %v1594_v17, %v1400_v16 }
  0x14   : > { %v1609_v22 = vld [vmem:[%s1903_s30 + $0x84] sm:$0xf]  ;;  %v1466_v23 = vld [vmem:[%s1903_s30 + $0x88] sm:$0xf0]  ;;  %v1465_v25 = vor.u32 %v1610_v19, %v1464_v18  ;;  %v1405_v26 = vor.u32 %v1593_v20, %v1402_v21  ;;  %v1472_v30 = vld [vmem:[%s1903_s30 + $0x90] sm:$0xf] }
  0x15   : > { %790 = vmatpush.bf16.msra.mxu0 %v1630_v4  ;;  %1738 = vmatpush.bf16.msra.mxu2 %v1630_v4  ;;  %v1469_v27 = vor.u32 %v1609_v22, %v1466_v23  ;;  %v1612_v31 = vld [vmem:[%s1903_s30 + $0x94] sm:$0xf0]  ;;  %v1595_v32 = vld [vmem:[%s1903_s30 + $0x14] sm:$0xf]  ;;  %v1410_v33 = vld [vmem:[%s1903_s30 + $0x18] sm:$0xf0] }
  0x16   : > { %879 = vmatpush.bf16.msra.mxu1 %v1638_v5  ;;  %1746 = vmatpush.bf16.msra.mxu3 %v1638_v5  ;;  %v1611_v34 = vld [vmem:[%s1903_s30 + $0x94] sm:$0xf]  ;;  %v1474_v35 = vld [vmem:[%s1903_s30 + $0x98] sm:$0xf0]  ;;  %v1473_v37 = vor.u32 %v1612_v31, %v1472_v30  ;;  %v1413_v38 = vor.u32 %v1595_v32, %v1410_v33  ;;  %v1416_v40 = vld [vmem:[%s1903_s30 + $0x20] sm:$0xf] }
  0x17   : > { %v1477_v39 = vor.u32 %v1611_v34, %v1474_v35  ;;  %v1598_v41 = vld [vmem:[%s1903_s30 + $0x24] sm:$0xf0]  ;;  %v1480_v42 = vld [vmem:[%s1903_s30 + $0xa0] sm:$0xf]  ;;  %v1597_v44 = vld [vmem:[%s1903_s30 + $0x24] sm:$0xf] }
  0x18   : > { %v1614_v43 = vld [vmem:[%s1903_s30 + $0xa4] sm:$0xf0]  ;;  %v1418_v45 = vld [vmem:[%s1903_s30 + $0x28] sm:$0xf0]  ;;  %v1613_v46 = vld [vmem:[%s1903_s30 + $0xa4] sm:$0xf]  ;;  %v1417_v48 = vor.u32 %v1598_v41, %v1416_v40 }
  0x19   : > { %791 = vmatpush.bf16.msra.mxu0 %v1629_v6  ;;  %1739 = vmatpush.bf16.msra.mxu2 %v1629_v6  ;;  %v1482_v47 = vld [vmem:[%s1903_s30 + $0xa8] sm:$0xf0]  ;;  %v1481_v49 = vor.u32 %v1614_v43, %v1480_v42  ;;  %v1421_v50 = vor.u32 %v1597_v44, %v1418_v45  ;;  %v1424_v52 = vld [vmem:[%s1903_s30 + $0x30] sm:$0xf]  ;;  %v1600_v53 = vld [vmem:[%s1903_s30 + $0x34] sm:$0xf0] }
  0x1a   : > { %880 = vmatpush.bf16.msra.mxu1 %v1637_v7  ;;  %1747 = vmatpush.bf16.msra.mxu3 %v1637_v7  ;;  %v1485_v51 = vor.u32 %v1613_v46, %v1482_v47  ;;  %v1488_v54 = vld [vmem:[%s1903_s30 + $0xb0] sm:$0xf]  ;;  %v1616_v55 = vld [vmem:[%s1903_s30 + $0xb4] sm:$0xf0]  ;;  %v1599_v56 = vld [vmem:[%s1903_s30 + $0x34] sm:$0xf]  ;;  %v1425_v60 = vor.u32 %v1600_v53, %v1424_v52 }
  0x1b   : > { %v1426_v57 = vld [vmem:[%s1903_s30 + $0x38] sm:$0xf0]  ;;  %v1615_v58 = vld [vmem:[%s1903_s30 + $0xb4] sm:$0xf]  ;;  %v1489_v61 = vor.u32 %v1616_v55, %v1488_v54  ;;  %v1432_v0 = vld [vmem:[%s1903_s30 + $0x40] sm:$0xf] }
  0x1c   : > { %v1490_v59 = vld [vmem:[%s1903_s30 + $0xb8] sm:$0xf0]  ;;  %v1429_v62 = vor.u32 %v1599_v56, %v1426_v57  ;;  %v1602_v1 = vld [vmem:[%s1903_s30 + $0x44] sm:$0xf0]  ;;  %v1496_v2 = vld [vmem:[%s1903_s30 + $0xc0] sm:$0xf] }
  0x1d   : > { %792 = vmatpush.bf16.msra.mxu0 %v1628_v8  ;;  %1740 = vmatpush.bf16.msra.mxu2 %v1628_v8  ;;  %v1493_v63 = vor.u32 %v1615_v58, %v1490_v59  ;;  %v1618_v3 = vld [vmem:[%s1903_s30 + $0xc4] sm:$0xf0]  ;;  %v1601_v4 = vld [vmem:[%s1903_s30 + $0x44] sm:$0xf]  ;;  %v1434_v5 = vld [vmem:[%s1903_s30 + $0x48] sm:$0xf0]  ;;  %v1433_v8 = vor.u32 %v1602_v1, %v1432_v0 }
  0x1e   : > { %881 = vmatpush.bf16.msra.mxu1 %v1636_v9  ;;  %1748 = vmatpush.bf16.msra.mxu3 %v1636_v9  ;;  %v1617_v6 = vld [vmem:[%s1903_s30 + $0xc4] sm:$0xf]  ;;  %v1498_v7 = vld [vmem:[%s1903_s30 + $0xc8] sm:$0xf0]  ;;  %v1497_v9 = vor.u32 %v1618_v3, %v1496_v2  ;;  %v1603_v16 = vld [vmem:[%s1903_s30 + $0x54] sm:$0xf] }
  0x1f   : > { %v1442_v17 = vld [vmem:[%s1903_s30 + $0x58] sm:$0xf0]  ;;  %v1619_v18 = vld [vmem:[%s1903_s30 + $0xd4] sm:$0xf]  ;;  %v1605_v28 = vld [vmem:[%s1903_s30 + $0x64] sm:$0xf] }
  0x20   : > { %v1506_v19 = vld [vmem:[%s1903_s30 + $0xd8] sm:$0xf0]  ;;  %v1445_v22 = vor.u32 %v1603_v16, %v1442_v17  ;;  %v1450_v29 = vld [vmem:[%s1903_s30 + $0x68] sm:$0xf0]  ;;  %v1621_v30 = vld [vmem:[%s1903_s30 + $0xe4] sm:$0xf] }
  0x21   : > { %793 = vmatpush.bf16.msra.mxu0 %v1627_v10  ;;  %1741 = vmatpush.bf16.msra.mxu2 %v1627_v10  ;;  %v1437_v10 = vor.u32 %v1601_v4, %v1434_v5  ;;  %v1509_v23 = vor.u32 %v1619_v18, %v1506_v19  ;;  %v1514_v31 = vld [vmem:[%s1903_s30 + $0xe8] sm:$0xf0]  ;;  %v1453_v34 = vor.u32 %v1605_v28, %v1450_v29  ;;  %v1607_v40 = vld [vmem:[%s1903_s30 + $0x74] sm:$0xf]  ;;  %v1458_v41 = vld [vmem:[%s1903_s30 + $0x78] sm:$0xf0] }
  0x22   : > { %882 = vmatpush.bf16.msra.mxu1 %v1635_v11  ;;  %1749 = vmatpush.bf16.msra.mxu3 %v1635_v11  ;;  %v1501_v11 = vor.u32 %v1617_v6, %v1498_v7  ;;  %v1517_v35 = vor.u32 %v1621_v30, %v1514_v31  ;;  %v1623_v42 = vld [vmem:[%s1903_s30 + $0xf4] sm:$0xf]  ;;  %v1522_v43 = vld [vmem:[%s1903_s30 + $0xf8] sm:$0xf0]  ;;  %v1461_v46 = vor.u32 %v1607_v40, %v1458_v41  ;;  %v1987_v55 = vld [vmem:[%s2088_s5] ss:$0 sm:$0xff] }
  0x23   : > { %v1525_v47 = vor.u32 %v1623_v42, %v1522_v43 }
  0x25   : > { %794 = vmatpush.bf16.msra.mxu0 %v1626_v12  ;;  %1742 = vmatpush.bf16.msra.mxu2 %v1626_v12  ;;  %v1440_v12 = vld [vmem:[%s1903_s30 + $0x50] sm:$0xf] }
  0x26   : > { %883 = vmatpush.bf16.msra.mxu1 %v1634_v13  ;;  %1750 = vmatpush.bf16.msra.mxu3 %v1634_v13  ;;  %v1604_v13 = vld [vmem:[%s1903_s30 + $0x54] sm:$0xf0] }
  0x27   : > { %v1441_v20 = vor.u32 %v1604_v13, %v1440_v12 }
  0x29   : > { %795 = vmatpush.bf16.msra.mxu0 %v1625_v14  ;;  %1743 = vmatpush.bf16.msra.mxu2 %v1625_v14  ;;  %v1504_v14 = vld [vmem:[%s1903_s30 + $0xd0] sm:$0xf] }
  0x2a   : > { %884 = vmatpush.bf16.msra.mxu1 %v1633_v15  ;;  %1751 = vmatpush.bf16.msra.mxu3 %v1633_v15  ;;  %v1620_v15 = vld [vmem:[%s1903_s30 + $0xd4] sm:$0xf0] }
  0x2b   : > { %v1505_v21 = vor.u32 %v1620_v15, %v1504_v14 }
  0x2c   : > { %796 = vmatmul.bf16.vlgmr.msra.gmra.mxu0 %v1401_v24  ;;  %836 = vmatmul.bf16.vlgmr.msra.gmra.mxu2 %v1465_v25  ;;  %v1448_v24 = vld [vmem:[%s1903_s30 + $0x60] sm:$0xf]  ;;  %v1606_v25 = vld [vmem:[%s1903_s30 + $0x64] sm:$0xf0] }
  0x2d   : > { %885 = vmatmul.bf16.vlgmr.msra.gmra.mxu1 %v1405_v26  ;;  %925 = vmatmul.bf16.vlgmr.msra.gmra.mxu3 %v1469_v27  ;;  %v1512_v26 = vld [vmem:[%s1903_s30 + $0xe0] sm:$0xf]  ;;  %v1622_v27 = vld [vmem:[%s1903_s30 + $0xe4] sm:$0xf0]  ;;  %v1449_v32 = vor.u32 %v1606_v25, %v1448_v24 }
  0x2e   : > { %v1513_v33 = vor.u32 %v1622_v27, %v1512_v26 }
  0x3c   : > { %801 = vmatmul.bf16.gmra.mxu0 %v1409_v36  ;;  %841 = vmatmul.bf16.gmra.mxu2 %v1473_v37  ;;  %v1456_v36 = vld [vmem:[%s1903_s30 + $0x70] sm:$0xf]  ;;  %v1608_v37 = vld [vmem:[%s1903_s30 + $0x74] sm:$0xf0] }
  0x3d   : > { %890 = vmatmul.bf16.gmra.mxu1 %v1413_v38  ;;  %930 = vmatmul.bf16.gmra.mxu3 %v1477_v39  ;;  %v1520_v38 = vld [vmem:[%s1903_s30 + $0xf0] sm:$0xf]  ;;  %v1624_v39 = vld [vmem:[%s1903_s30 + $0xf4] sm:$0xf0]  ;;  %v1457_v44 = vor.u32 %v1608_v37, %v1456_v36 }
  0x3e   : > { %v1521_v45 = vor.u32 %v1624_v39, %v1520_v38 }
  0x4c   : > { %806 = vmatmul.bf16.gmra.mxu0 %v1417_v48  ;;  %846 = vmatmul.bf16.gmra.mxu2 %v1481_v49 }
  0x4d   : > { %895 = vmatmul.bf16.gmra.mxu1 %v1421_v50  ;;  %935 = vmatmul.bf16.gmra.mxu3 %v1485_v51  ;;  %v1981_v51 = vld [vmem:[%s2087_s4] ss:$0 sm:$0xff] }
  0x5c   : > { %811 = vmatmul.bf16.gmra.mxu0 %v1425_v60  ;;  %851 = vmatmul.bf16.gmra.mxu2 %v1489_v61 }
  0x5d   : > { %900 = vmatmul.bf16.gmra.mxu1 %v1429_v62  ;;  %940 = vmatmul.bf16.gmra.mxu3 %v1493_v63 }
  0x6c   : > { %816 = vmatmul.bf16.gmra.mxu0 %v1433_v8  ;;  %856 = vmatmul.bf16.gmra.mxu2 %v1497_v9 }
  0x6d   : > { %905 = vmatmul.bf16.gmra.mxu1 %v1437_v10  ;;  %945 = vmatmul.bf16.gmra.mxu3 %v1501_v11 }
  0x7c   : > { %821 = vmatmul.bf16.gmra.mxu0 %v1441_v20  ;;  %861 = vmatmul.bf16.gmra.mxu2 %v1505_v21 }
  0x7d   : > { %910 = vmatmul.bf16.gmra.mxu1 %v1445_v22  ;;  %950 = vmatmul.bf16.gmra.mxu3 %v1509_v23 }
  0x8c   : > { %826 = vmatmul.bf16.gmra.mxu0 %v1449_v32  ;;  %866 = vmatmul.bf16.gmra.mxu2 %v1513_v33 }
  0x8d   : > { %915 = vmatmul.bf16.gmra.mxu1 %v1453_v34  ;;  %955 = vmatmul.bf16.gmra.mxu3 %v1517_v35 }
  0x9c   : > { %831 = vmatmul.bf16.gmra.mxu0 %v1457_v44  ;;  %871 = vmatmul.bf16.gmra.mxu2 %v1521_v45 }
  0x9d   : > { %920 = vmatmul.bf16.gmra.mxu1 %v1461_v46  ;;  %960 = vmatmul.bf16.gmra.mxu3 %v1525_v47 }
  0xa9   : > { %v797_v48 = vpop.f32.mrf.mxu0 }
  0xaa   : > { %v886_v49 = vpop.f32.mrf.mxu1 }
  0xab   : > { %v887_v50 = vadd.f32 %v886_v49, %v797_v48 }
  0xad   : > { %v1069_v54 = vmul.f32 %v1981_v51, %v887_v50 }
  0xaf   : > { %v837_v52 = vpop.f32.mrf.mxu2  ;;  %v1105_v60 = vadd.f32 %v1987_v55, %v1069_v54 }
  0xb0   : > { %v926_v53 = vpop.f32.mrf.mxu3 }
  0xb1   : > { %v799_v56 = vpop.f32.mrf.mxu0  ;;  %v927_v58 = vadd.f32 %v926_v53, %v837_v52  ;;  %v1137_v2 = vmax.f32 %v1105_v60, 0.0 }
  0xb2   : > { %v888_v57 = vpop.f32.mrf.mxu1 }
  0xb3   : > { %v889_v59 = vadd.f32 %v888_v57, %v799_v56  ;;  %v1085_v62 = vmul.f32 %v1981_v51, %v927_v58 }
  0xb5   : > { %v1070_v61 = vmul.f32 %v1981_v51, %v889_v59  ;;  %v1121_v7 = vadd.f32 %v1987_v55, %v1085_v62 }
  0xb7   : > { %v1106_v63 = vadd.f32 %v1987_v55, %v1070_v61  ;;  %v839_v0 = vpop.f32.mrf.mxu2  ;;  %v1153_v12 = vmax.f32 %v1121_v7, 0.0 }
  0xb8   : > { %v928_v1 = vpop.f32.mrf.mxu3 }
  0xb9   : > { %v1138_v3 = vmax.f32 %v1106_v63, 0.0  ;;  %v929_v4 = vadd.f32 %v928_v1, %v839_v0  ;;  %v802_v5 = vpop.f32.mrf.mxu0 }
  0xba   : > { %v891_v6 = vpop.f32.mrf.mxu1 }
  0xbb   : > { %v1644_v8 = vpack.c.bf16 %v1138_v3, %v1137_v2  ;;  %v1086_v9 = vmul.f32 %v1981_v51, %v929_v4  ;;  %v892_v11 = vadd.f32 %v891_v6, %v802_v5 }
  0xbd   : > { %1645 = vst [vmem:[%s1997_s21] sm:$0xff] %v1644_v8   ;;  %v1122_v10 = vadd.f32 %v1987_v55, %v1086_v9  ;;  %v1071_v17 = vmul.f32 %v1981_v51, %v892_v11 }
  0xbf   : > { %v1154_v13 = vmax.f32 %v1122_v10, 0.0  ;;  %v842_v14 = vpop.f32.mrf.mxu2  ;;  %v1107_v22 = vadd.f32 %v1987_v55, %v1071_v17 }
  0xc0   : > { %v931_v15 = vpop.f32.mrf.mxu3 }
  0xc1   : > { %v1684_v16 = vpack.c.bf16 %v1154_v13, %v1153_v12  ;;  %v804_v18 = vpop.f32.mrf.mxu0  ;;  %v932_v20 = vadd.f32 %v931_v15, %v842_v14  ;;  %v1139_v28 = vmax.f32 %v1107_v22, 0.0 }
  0xc2   : > { %v893_v19 = vpop.f32.mrf.mxu1 }
  0xc3   : > { %1728 = vst [vmem:[%s1997_s21 + $0x40] sm:$0xff] %v1684_v16   ;;  %v894_v21 = vadd.f32 %v893_v19, %v804_v18  ;;  %v1087_v24 = vmul.f32 %v1981_v51, %v932_v20 }
  0xc5   : > { %v1072_v23 = vmul.f32 %v1981_v51, %v894_v21  ;;  %v1123_v33 = vadd.f32 %v1987_v55, %v1087_v24 }
  0xc7   : > { %v1108_v25 = vadd.f32 %v1987_v55, %v1072_v23  ;;  %v844_v26 = vpop.f32.mrf.mxu2  ;;  %v1155_v38 = vmax.f32 %v1123_v33, 0.0 }
  0xc8   : > { %v933_v27 = vpop.f32.mrf.mxu3 }
  0xc9   : > { %v1140_v29 = vmax.f32 %v1108_v25, 0.0  ;;  %v934_v30 = vadd.f32 %v933_v27, %v844_v26  ;;  %v807_v31 = vpop.f32.mrf.mxu0 }
  0xca   : > { %v896_v32 = vpop.f32.mrf.mxu1 }
  0xcb   : > { %v1649_v34 = vpack.c.bf16 %v1140_v29, %v1139_v28  ;;  %v1088_v35 = vmul.f32 %v1981_v51, %v934_v30  ;;  %v897_v37 = vadd.f32 %v896_v32, %v807_v31 }
  0xcd   : > { %1721 = vst [vmem:[%s1997_s21 + $0x8] sm:$0xff] %v1649_v34   ;;  %v1124_v36 = vadd.f32 %v1987_v55, %v1088_v35  ;;  %v1073_v43 = vmul.f32 %v1981_v51, %v897_v37 }
  0xcf   : > { %v1156_v39 = vmax.f32 %v1124_v36, 0.0  ;;  %v847_v40 = vpop.f32.mrf.mxu2  ;;  %v1109_v48 = vadd.f32 %v1987_v55, %v1073_v43 }
  0xd0   : > { %v936_v41 = vpop.f32.mrf.mxu3 }
  0xd1   : > { %v1689_v42 = vpack.c.bf16 %v1156_v39, %v1155_v38  ;;  %v809_v44 = vpop.f32.mrf.mxu0  ;;  %v937_v46 = vadd.f32 %v936_v41, %v847_v40  ;;  %v1141_v56 = vmax.f32 %v1109_v48, 0.0 }
  0xd2   : > { %v898_v45 = vpop.f32.mrf.mxu1 }
  0xd3   : > { %1729 = vst [vmem:[%s1997_s21 + $0x48] sm:$0xff] %v1689_v42   ;;  %v899_v47 = vadd.f32 %v898_v45, %v809_v44  ;;  %v1089_v50 = vmul.f32 %v1981_v51, %v937_v46 }
  0xd5   : > { %v1074_v49 = vmul.f32 %v1981_v51, %v899_v47  ;;  %v1125_v61 = vadd.f32 %v1987_v55, %v1089_v50 }
  0xd7   : > { %v1110_v52 = vadd.f32 %v1987_v55, %v1074_v49  ;;  %v849_v53 = vpop.f32.mrf.mxu2  ;;  %v1157_v2 = vmax.f32 %v1125_v61, 0.0 }
  0xd8   : > { %v938_v54 = vpop.f32.mrf.mxu3 }
  0xd9   : > { %v1142_v57 = vmax.f32 %v1110_v52, 0.0  ;;  %v939_v58 = vadd.f32 %v938_v54, %v849_v53  ;;  %v812_v59 = vpop.f32.mrf.mxu0 }
  0xda   : > { %v901_v60 = vpop.f32.mrf.mxu1 }
  0xdb   : > { %v1654_v62 = vpack.c.bf16 %v1142_v57, %v1141_v56  ;;  %v1090_v63 = vmul.f32 %v1981_v51, %v939_v58  ;;  %v902_v1 = vadd.f32 %v901_v60, %v812_v59 }
  0xdd   : > { %1722 = vst [vmem:[%s1997_s21 + $0x10] sm:$0xff] %v1654_v62   ;;  %v1126_v0 = vadd.f32 %v1987_v55, %v1090_v63  ;;  %v1075_v7 = vmul.f32 %v1981_v51, %v902_v1 }
  0xdf   : > { %v1158_v3 = vmax.f32 %v1126_v0, 0.0  ;;  %v852_v4 = vpop.f32.mrf.mxu2  ;;  %v1111_v12 = vadd.f32 %v1987_v55, %v1075_v7 }
  0xe0   : > { %v941_v5 = vpop.f32.mrf.mxu3 }
  0xe1   : > { %v1694_v6 = vpack.c.bf16 %v1158_v3, %v1157_v2  ;;  %v814_v8 = vpop.f32.mrf.mxu0  ;;  %v942_v10 = vadd.f32 %v941_v5, %v852_v4  ;;  %v1143_v18 = vmax.f32 %v1111_v12, 0.0 }
  0xe2   : > { %v903_v9 = vpop.f32.mrf.mxu1 }
  0xe3   : > { %1730 = vst [vmem:[%s1997_s21 + $0x50] sm:$0xff] %v1694_v6   ;;  %v904_v11 = vadd.f32 %v903_v9, %v814_v8  ;;  %v1091_v14 = vmul.f32 %v1981_v51, %v942_v10 }
  0xe5   : > { %v1076_v13 = vmul.f32 %v1981_v51, %v904_v11  ;;  %v1127_v23 = vadd.f32 %v1987_v55, %v1091_v14 }
  0xe7   : > { %v1112_v15 = vadd.f32 %v1987_v55, %v1076_v13  ;;  %v854_v16 = vpop.f32.mrf.mxu2  ;;  %v1159_v28 = vmax.f32 %v1127_v23, 0.0 }
  0xe8   : > { %v943_v17 = vpop.f32.mrf.mxu3 }
  0xe9   : > { %v1144_v19 = vmax.f32 %v1112_v15, 0.0  ;;  %v944_v20 = vadd.f32 %v943_v17, %v854_v16  ;;  %v817_v21 = vpop.f32.mrf.mxu0 }
  0xea   : > { %v906_v22 = vpop.f32.mrf.mxu1 }
  0xeb   : > { %v1659_v24 = vpack.c.bf16 %v1144_v19, %v1143_v18  ;;  %v1092_v25 = vmul.f32 %v1981_v51, %v944_v20  ;;  %v907_v27 = vadd.f32 %v906_v22, %v817_v21 }
  0xed   : > { %1723 = vst [vmem:[%s1997_s21 + $0x18] sm:$0xff] %v1659_v24   ;;  %v1128_v26 = vadd.f32 %v1987_v55, %v1092_v25  ;;  %v1077_v33 = vmul.f32 %v1981_v51, %v907_v27 }
  0xef   : > { %v1160_v29 = vmax.f32 %v1128_v26, 0.0  ;;  %v857_v30 = vpop.f32.mrf.mxu2  ;;  %v1113_v38 = vadd.f32 %v1987_v55, %v1077_v33 }
  0xf0   : > { %v946_v31 = vpop.f32.mrf.mxu3 }
  0xf1   : > { %v1699_v32 = vpack.c.bf16 %v1160_v29, %v1159_v28  ;;  %v819_v34 = vpop.f32.mrf.mxu0  ;;  %v947_v36 = vadd.f32 %v946_v31, %v857_v30  ;;  %v1145_v44 = vmax.f32 %v1113_v38, 0.0 }
  0xf2   : > { %v908_v35 = vpop.f32.mrf.mxu1 }
  0xf3   : > { %1731 = vst [vmem:[%s1997_s21 + $0x58] sm:$0xff] %v1699_v32   ;;  %v909_v37 = vadd.f32 %v908_v35, %v819_v34  ;;  %v1093_v40 = vmul.f32 %v1981_v51, %v947_v36 }
  0xf5   : > { %v1078_v39 = vmul.f32 %v1981_v51, %v909_v37  ;;  %v1129_v49 = vadd.f32 %v1987_v55, %v1093_v40 }
  0xf7   : > { %v1114_v41 = vadd.f32 %v1987_v55, %v1078_v39  ;;  %v859_v42 = vpop.f32.mrf.mxu2  ;;  %v1161_v56 = vmax.f32 %v1129_v49, 0.0 }
  0xf8   : > { %v948_v43 = vpop.f32.mrf.mxu3 }
  0xf9   : > { %v1146_v45 = vmax.f32 %v1114_v41, 0.0  ;;  %v949_v46 = vadd.f32 %v948_v43, %v859_v42  ;;  %v822_v47 = vpop.f32.mrf.mxu0 }
  0xfa   : > { %v911_v48 = vpop.f32.mrf.mxu1 }
  0xfb   : > { %v1664_v50 = vpack.c.bf16 %v1146_v45, %v1145_v44  ;;  %v1094_v52 = vmul.f32 %v1981_v51, %v949_v46  ;;  %v912_v54 = vadd.f32 %v911_v48, %v822_v47 }
  0xfd   : > { %1724 = vst [vmem:[%s1997_s21 + $0x20] sm:$0xff] %v1664_v50   ;;  %v1130_v53 = vadd.f32 %v1987_v55, %v1094_v52  ;;  %v1079_v61 = vmul.f32 %v1981_v51, %v912_v54 }
  0xff   : > { %v1162_v57 = vmax.f32 %v1130_v53, 0.0  ;;  %v862_v58 = vpop.f32.mrf.mxu2  ;;  %v1115_v2 = vadd.f32 %v1987_v55, %v1079_v61 }
 0x100   : > { %v951_v59 = vpop.f32.mrf.mxu3 }
 0x101   : > { %v1704_v60 = vpack.c.bf16 %v1162_v57, %v1161_v56  ;;  %v824_v62 = vpop.f32.mrf.mxu0  ;;  %v952_v0 = vadd.f32 %v951_v59, %v862_v58  ;;  %v1147_v8 = vmax.f32 %v1115_v2, 0.0 }
 0x102   : > { %v913_v63 = vpop.f32.mrf.mxu1 }
 0x103   : > { %1732 = vst [vmem:[%s1997_s21 + $0x60] sm:$0xff] %v1704_v60   ;;  %v914_v1 = vadd.f32 %v913_v63, %v824_v62  ;;  %v1095_v4 = vmul.f32 %v1981_v51, %v952_v0 }
 0x105   : > { %v1080_v3 = vmul.f32 %v1981_v51, %v914_v1  ;;  %v1131_v13 = vadd.f32 %v1987_v55, %v1095_v4 }
 0x107   : > { %v1116_v5 = vadd.f32 %v1987_v55, %v1080_v3  ;;  %v864_v6 = vpop.f32.mrf.mxu2  ;;  %v1163_v18 = vmax.f32 %v1131_v13, 0.0 }
 0x108   : > { %v953_v7 = vpop.f32.mrf.mxu3 }
 0x109   : > { %v1148_v9 = vmax.f32 %v1116_v5, 0.0  ;;  %v954_v10 = vadd.f32 %v953_v7, %v864_v6  ;;  %v827_v11 = vpop.f32.mrf.mxu0 }
 0x10a   : > { %v916_v12 = vpop.f32.mrf.mxu1 }
 0x10b   : > { %v1669_v14 = vpack.c.bf16 %v1148_v9, %v1147_v8  ;;  %v1096_v15 = vmul.f32 %v1981_v51, %v954_v10  ;;  %v917_v17 = vadd.f32 %v916_v12, %v827_v11 }
 0x10d   : > { %1725 = vst [vmem:[%s1997_s21 + $0x28] sm:$0xff] %v1669_v14   ;;  %v1132_v16 = vadd.f32 %v1987_v55, %v1096_v15  ;;  %v1081_v23 = vmul.f32 %v1981_v51, %v917_v17 }
 0x10f   : > { %v1164_v19 = vmax.f32 %v1132_v16, 0.0  ;;  %v867_v20 = vpop.f32.mrf.mxu2  ;;  %v1117_v28 = vadd.f32 %v1987_v55, %v1081_v23 }
 0x110   : > { %v956_v21 = vpop.f32.mrf.mxu3 }
 0x111   : > { %v1709_v22 = vpack.c.bf16 %v1164_v19, %v1163_v18  ;;  %v829_v24 = vpop.f32.mrf.mxu0  ;;  %v957_v26 = vadd.f32 %v956_v21, %v867_v20  ;;  %v1149_v34 = vmax.f32 %v1117_v28, 0.0 }
 0x112   : > { %v918_v25 = vpop.f32.mrf.mxu1 }
 0x113   : > { %1733 = vst [vmem:[%s1997_s21 + $0x68] sm:$0xff] %v1709_v22   ;;  %v919_v27 = vadd.f32 %v918_v25, %v829_v24  ;;  %v1097_v30 = vmul.f32 %v1981_v51, %v957_v26 }
 0x115   : > { %v1082_v29 = vmul.f32 %v1981_v51, %v919_v27  ;;  %v1133_v39 = vadd.f32 %v1987_v55, %v1097_v30 }
 0x117   : > { %v1118_v31 = vadd.f32 %v1987_v55, %v1082_v29  ;;  %v869_v32 = vpop.f32.mrf.mxu2  ;;  %v1165_v44 = vmax.f32 %v1133_v39, 0.0 }
 0x118   : > { %v958_v33 = vpop.f32.mrf.mxu3 }
 0x119   : > { %v1150_v35 = vmax.f32 %v1118_v31, 0.0  ;;  %v959_v36 = vadd.f32 %v958_v33, %v869_v32  ;;  %v832_v37 = vpop.f32.mrf.mxu0 }
 0x11a   : > { %v921_v38 = vpop.f32.mrf.mxu1 }
 0x11b   : > { %v1674_v40 = vpack.c.bf16 %v1150_v35, %v1149_v34  ;;  %v1098_v41 = vmul.f32 %v1981_v51, %v959_v36  ;;  %v922_v43 = vadd.f32 %v921_v38, %v832_v37 }
 0x11d   : > { %1726 = vst [vmem:[%s1997_s21 + $0x30] sm:$0xff] %v1674_v40   ;;  %v1134_v42 = vadd.f32 %v1987_v55, %v1098_v41  ;;  %v1083_v49 = vmul.f32 %v1981_v51, %v922_v43 }
 0x11f   : > { %v1166_v45 = vmax.f32 %v1134_v42, 0.0  ;;  %v872_v46 = vpop.f32.mrf.mxu2  ;;  %v1119_v56 = vadd.f32 %v1987_v55, %v1083_v49 }
 0x120   : > { %v961_v47 = vpop.f32.mrf.mxu3 }
 0x121   : > { %v1714_v48 = vpack.c.bf16 %v1166_v45, %v1165_v44  ;;  %v834_v50 = vpop.f32.mrf.mxu0  ;;  %v962_v53 = vadd.f32 %v961_v47, %v872_v46  ;;  %v1151_v62 = vmax.f32 %v1119_v56, 0.0 }
 0x122   : > { %v923_v52 = vpop.f32.mrf.mxu1 }
 0x123   : > { %1734 = vst [vmem:[%s1997_s21 + $0x70] sm:$0xff] %v1714_v48   ;;  %v924_v54 = vadd.f32 %v923_v52, %v834_v50  ;;  %v1099_v58 = vmul.f32 %v1981_v51, %v962_v53 }
 0x125   : > { %v1084_v57 = vmul.f32 %v1981_v51, %v924_v54  ;;  %v1135_v1 = vadd.f32 %v1987_v55, %v1099_v58 }
 0x127   : > { %v1120_v59 = vadd.f32 %v1987_v55, %v1084_v57  ;;  %v874_v60 = vpop.f32.mrf.mxu2  ;;  %v1167_v5 = vmax.f32 %v1135_v1, 0.0 }
 0x128   : > { %v963_v61 = vpop.f32.mrf.mxu3 }
 0x129   : > { %v1152_v63 = vmax.f32 %v1120_v59, 0.0  ;;  %v964_v0 = vadd.f32 %v963_v61, %v874_v60 }
 0x12b   : > { %v1679_v2 = vpack.c.bf16 %v1152_v63, %v1151_v62  ;;  %v1100_v3 = vmul.f32 %v1981_v51, %v964_v0 }
 0x12d   : > { %1727 = vst [vmem:[%s1997_s21 + $0x38] sm:$0xff] %v1679_v2   ;;  %v1136_v4 = vadd.f32 %v1987_v55, %v1100_v3 }
 0x12f   : > { %v1168_v6 = vmax.f32 %v1136_v4, 0.0 }
 0x131   : > { %v1719_v7 = vpack.c.bf16 %v1168_v6, %v1167_v5 }
 0x133   : > { %1735 = vst [vmem:[%s1997_s21 + $0x78] sm:$0xff] %v1719_v7  }
 0x134 PF: > { %s16_s23 = sadd.s32 1, %s1800_s23   ;;  %s2090_s21 = smov %s1796_s22 }
 0x135   : > { %p13_p5 = scmp.ge.s32.totalorder %s16_s23, 4   ;;  %s2091_s22 = smov %s2093_s2 }
 0x137   :  { %15 = sbr.rel (!%p13_p5) target bundleno = 2 (0x2), region = 97 }

// kernel: forward.123
= control target key start
LH: loop header
LB: loop body
LE: loop exit
PB: predicated region body
PF: predicated region fallthrough
CT: control target
= control target key end

     0   :  { %s1719_s21 = smov 0   ;;  %s1721_s22 = smov 0   ;;  %s2006_s0 = inlined_call_operand.vmem [shape: bf16[128,1152], index: 0, kind: input, shape index: {}]   ;;  %s2007_s1 = inlined_call_operand.vmem [shape: bf16[1152,128], index: 1, kind: input, shape index: {}]   ;;  %s2008_s2 = inlined_call_operand.vmem [shape: f32[1,1152], index: 2, kind: input, shape index: {}, may-alias: {2,3}]   ;;  %s2009_s3 = inlined_call_operand.vmem [shape: f32[1,1152], index: 3, kind: input, shape index: {}, may-alias: {2,3}]   ;;  %s2010_s4 = inlined_call_operand.vmem [shape: f32[1,128], index: 4, kind: input, shape index: {}, may-alias: {4,5}]   ;;  %s2011_s5 = inlined_call_operand.vmem [shape: f32[1,128], index: 5, kind: input, shape index: {}, may-alias: {4,5}]   ;;  %s2012_s6 = inlined_call_operand.vmem [shape: bf16[128,128], index: 6, kind: output, shape index: {}]  }
   0x1   :  { %s1723_s23 = smov 0   ;;  %s1725_s24 = smov 0  }
   0x2   :  { %s1727_s2 = smov 0  }
   0x3 LB: > { %s28_s3 = sadd.s32 1, %s1677_s24  ;;  %p51_p1 = scmp.ne.s32.totalorder %s1669_s22, %s1665_s21  ;;  %s1681_s2 = sphi %s1727_s2, %s16_s2   ;;  %s1677_s24 = sphi %s1725_s24, %s2016_s24   ;;  %s1673_s23 = sphi %s1723_s23, %s2015_s23   ;;  %s1669_s22 = sphi %s1721_s22, %s2014_s22   ;;  %s1665_s21 = sphi %s1719_s21, %s2013_s21  }
   0x4   : > { %p29_p0 = scmp.ge.s32.totalorder %s28_s3, 3  ;;  %p52_p2 = scmp.eq.s32.totalorder %s1681_s2, 0 }
   0x5   : > { %s44_s5 = sadd.s32 1, %s1669_s22  ;;  %p1246_p5 = scmp.ge.s32.totalorder %s1681_s2, 3 }
   0x6   : > { %s2018_s3 = smov (%p29_p0, %s28_s3), 0  ;;  %p53_p3 = por %p52_p2, %p51_p1 }
   0x7   : > { %s40_s4 = ssub.s32 %s1677_s24, %s2018_s3  ;;  %249 = sbr.rel (%p1246_p5) target bundleno = 49 (0x31), region = 24 }
   0x8   : > { %p42_p4 = scmp.eq.s32.totalorder %s40_s4, 0 }
   0xa   : > { %s1754_s25 = scalar_select %p42_p4, %s1669_s22, %s44_s5  }
   0xc   : > { %252 = sbr.rel (!%p53_p3) target bundleno = 49 (0x31), region = 28  ;;  %s254_s26 = sand.u32 (%p53_p3), 1, %s1669_s22  }
   0xd   : > { %s1480_s27 = smul.u32 (%p53_p3), 12, %s1677_s24 }
   0xe   : > { %s1600_s28 = smul.u32 (%p53_p3), 192, %s254_s26 }
   0xf   : > { %s1762_s7 = scalar_lea.vmem (%p53_p3), %s2006_s0, %s1480_s27 }
  0x10   : > { %v277_v0 = vld [vmem:[%s1762_s7] sm:$0xff] (%p53_p3)  ;;  %v281_v2 = vld [vmem:[%s1762_s7 + $0x48] sm:$0xff] (%p53_p3)  ;;  %s1767_s8 = scalar_lea.vmem (%p53_p3), [#allocation3], %s1600_s28  ;;  %v285_v4 = vld [vmem:[%s1762_s7 + $0x90] sm:$0xff] (%p53_p3) }
  0x11   : > { %v279_v1 = vld [vmem:[%s1762_s7 + $0x24] sm:$0xff]  ;;  %278 = vst [vmem:[%s1767_s8] sm:$0xff] %v277_v0  ;;  %v283_v3 = vld [vmem:[%s1762_s7 + $0x6c] sm:$0xff]  ;;  %v287_v5 = vld [vmem:[%s1762_s7 + $0xb4] sm:$0xff] }
  0x12   : > { %280 = vst [vmem:[%s1767_s8 + $0xc] sm:$0xff] %v279_v1  ;;  %v289_v6 = vld [vmem:[%s1762_s7 + $0xd8] sm:$0xff]  ;;  %v293_v8 = vld [vmem:[%s1762_s7 + $0x120] sm:$0xff]  ;;  %v297_v10 = vld [vmem:[%s1762_s7 + $0x168] sm:$0xff] }
  0x13   : > { %282 = vst [vmem:[%s1767_s8 + $0x18] sm:$0xff] %v281_v2  ;;  %v291_v7 = vld [vmem:[%s1762_s7 + $0xfc] sm:$0xff]  ;;  %v295_v9 = vld [vmem:[%s1762_s7 + $0x144] sm:$0xff]  ;;  %v299_v11 = vld [vmem:[%s1762_s7 + $0x18c] sm:$0xff] }
  0x14   : > { %284 = vst [vmem:[%s1767_s8 + $0x24] sm:$0xff] %v283_v3  ;;  %v301_v12 = vld [vmem:[%s1762_s7 + $0x1b0] sm:$0xff]  ;;  %v305_v14 = vld [vmem:[%s1762_s7 + $0x1f8] sm:$0xff]  ;;  %v1248_v16 = vld [vmem:[%s1762_s7 + $0x8] sm:$0xf] }
  0x15   : > { %286 = vst [vmem:[%s1767_s8 + $0x30] sm:$0xff] %v285_v4  ;;  %v303_v13 = vld [vmem:[%s1762_s7 + $0x1d4] sm:$0xff]  ;;  %v307_v15 = vld [vmem:[%s1762_s7 + $0x21c] sm:$0xff]  ;;  %v1250_v17 = vld [vmem:[%s1762_s7 + $0x2c] sm:$0xf] }
  0x16   : > { %288 = vst [vmem:[%s1767_s8 + $0x3c] sm:$0xff] %v287_v5  ;;  %v1252_v18 = vld [vmem:[%s1762_s7 + $0x50] sm:$0xf]  ;;  %v1254_v19 = vld [vmem:[%s1762_s7 + $0x74] sm:$0xf] }
  0x17   : > { %290 = vst [vmem:[%s1767_s8 + $0x48] sm:$0xff] %v289_v6  ;;  %v1256_v20 = vld [vmem:[%s1762_s7 + $0x98] sm:$0xf]  ;;  %v1258_v21 = vld [vmem:[%s1762_s7 + $0xbc] sm:$0xf] }
  0x18   : > { %292 = vst [vmem:[%s1767_s8 + $0x54] sm:$0xff] %v291_v7  ;;  %v1260_v22 = vld [vmem:[%s1762_s7 + $0xe0] sm:$0xf]  ;;  %v1262_v23 = vld [vmem:[%s1762_s7 + $0x104] sm:$0xf] }
  0x19   : > { %294 = vst [vmem:[%s1767_s8 + $0x60] sm:$0xff] %v293_v8  ;;  %v1264_v24 = vld [vmem:[%s1762_s7 + $0x128] sm:$0xf]  ;;  %v1266_v25 = vld [vmem:[%s1762_s7 + $0x14c] sm:$0xf] }
  0x1a   : > { %296 = vst [vmem:[%s1767_s8 + $0x6c] sm:$0xff] %v295_v9  ;;  %v1268_v26 = vld [vmem:[%s1762_s7 + $0x170] sm:$0xf]  ;;  %v1270_v27 = vld [vmem:[%s1762_s7 + $0x194] sm:$0xf] }
  0x1b   : > { %298 = vst [vmem:[%s1767_s8 + $0x78] sm:$0xff] %v297_v10  ;;  %v1272_v28 = vld [vmem:[%s1762_s7 + $0x1b8] sm:$0xf]  ;;  %v1274_v29 = vld [vmem:[%s1762_s7 + $0x1dc] sm:$0xf] }
  0x1c   : > { %300 = vst [vmem:[%s1767_s8 + $0x84] sm:$0xff] %v299_v11  ;;  %v1276_v30 = vld [vmem:[%s1762_s7 + $0x200] sm:$0xf]  ;;  %v1278_v31 = vld [vmem:[%s1762_s7 + $0x224] sm:$0xf] }
  0x1d   : > { %302 = vst [vmem:[%s1767_s8 + $0x90] sm:$0xff] %v301_v12 }
  0x1e   : > { %304 = vst [vmem:[%s1767_s8 + $0x9c] sm:$0xff] %v303_v13 }
  0x1f   : > { %306 = vst [vmem:[%s1767_s8 + $0xa8] sm:$0xff] %v305_v14 }
  0x20   : > { %308 = vst [vmem:[%s1767_s8 + $0xb4] sm:$0xff] %v307_v15 }
  0x21   : > { %1249 = vst [vmem:[%s1767_s8 + $0x8] sm:$0xf] %v1248_v16 }
  0x22   : > { %1251 = vst [vmem:[%s1767_s8 + $0x14] sm:$0xf] %v1250_v17 }
  0x23   : > { %1253 = vst [vmem:[%s1767_s8 + $0x20] sm:$0xf] %v1252_v18 }
  0x24   : > { %1255 = vst [vmem:[%s1767_s8 + $0x2c] sm:$0xf] %v1254_v19 }
  0x25   : > { %1257 = vst [vmem:[%s1767_s8 + $0x38] sm:$0xf] %v1256_v20 }
  0x26   : > { %1259 = vst [vmem:[%s1767_s8 + $0x44] sm:$0xf] %v1258_v21 }
  0x27   : > { %1261 = vst [vmem:[%s1767_s8 + $0x50] sm:$0xf] %v1260_v22 }
  0x28   : > { %1263 = vst [vmem:[%s1767_s8 + $0x5c] sm:$0xf] %v1262_v23 }
  0x29   : > { %1265 = vst [vmem:[%s1767_s8 + $0x68] sm:$0xf] %v1264_v24 }
  0x2a   : > { %1267 = vst [vmem:[%s1767_s8 + $0x74] sm:$0xf] %v1266_v25 }
  0x2b   : > { %1269 = vst [vmem:[%s1767_s8 + $0x80] sm:$0xf] %v1268_v26 }
  0x2c   : > { %1271 = vst [vmem:[%s1767_s8 + $0x8c] sm:$0xf] %v1270_v27 }
  0x2d   : > { %1273 = vst [vmem:[%s1767_s8 + $0x98] sm:$0xf] %v1272_v28 }
  0x2e   : > { %1275 = vst [vmem:[%s1767_s8 + $0xa4] sm:$0xf] %v1274_v29 }
  0x2f   : > { %1277 = vst [vmem:[%s1767_s8 + $0xb0] sm:$0xf] %v1276_v30 }
  0x30   : > { %1279 = vst [vmem:[%s1767_s8 + $0xbc] sm:$0xf] %v1278_v31 }
  0x31 PF: > { %p1280_p6 = scmp.ge.s32.totalorder %s1681_s2, 1  ;;  %p381_p7 = scmp.lt.s32.totalorder %s1681_s2, 4 }
  0x33   : > { %p382_p8 = pnand %p1280_p6, %p381_p7 }
  0x34   : > { %s388_s9 = sand.u32 (!%p382_p8), 1, %s1665_s21   ;;  %s444_s10 = smul.u32 (!%p382_p8), 48, %s1673_s23 }
  0x35   : > { %385 = sbr.rel (%p382_p8) target bundleno = 350 (0x15e), region = 66  ;;  %p1282_p10 = scmp.ne.s32.totalorder (!%p382_p8), %s1673_s23, 0 }
  0x36   : > { %s1601_s11 = smul.u32 (!%p382_p8), 192, %s388_s9  ;;  %p445_p9 = scmp.lt.s32.totalorder (!%p382_p8), %s444_s10, 143 }
  0x38   : > { %s1839_s16 = scalar_lea.vmem (!%p382_p8), [#allocation3], %s1601_s11 }
  0x3a   : > { %s2020_s10 = smov (!%p445_p9, %s444_s10), 143  ;;  %481 = sbr.rel (%p1282_p10) target bundleno = 80 (0x50), region = 74 }
  0x3b   : > { %s1281_s12 = sshll.u32 %s2020_s10, 2 }
  0x3c   : > { %s1837_s15 = scalar_lea.vmem %s2007_s1, %s1281_s12 }
  0x3f   : > { %v1683_v32 = vmov 0.0  }
  0x40   : > { %482 = vst [vmem:[#allocation2 + $0x30] sm:$0xff] %v1683_v32 }
  0x41   : > { %483 = vst [vmem:[#allocation2] sm:$0xff] %v1683_v32 }
  0x42   : > { %484 = vst [vmem:[#allocation2 + $0x58] sm:$0xff] %v1683_v32 }
  0x43   : > { %485 = vst [vmem:[#allocation2 + $0x18] sm:$0xff] %v1683_v32 }
  0x44   : > { %486 = vst [vmem:[#allocation2 + $0x50] sm:$0xff] %v1683_v32 }
  0x45   : > { %487 = vst [vmem:[#allocation2 + $0x68] sm:$0xff] %v1683_v32 }
  0x46   : > { %488 = vst [vmem:[#allocation2 + $0x8] sm:$0xff] %v1683_v32 }
  0x47   : > { %489 = vst [vmem:[#allocation2 + $0x48] sm:$0xff] %v1683_v32 }
  0x48   : > { %490 = vst [vmem:[#allocation2 + $0x40] sm:$0xff] %v1683_v32 }
  0x49   : > { %491 = vst [vmem:[#allocation2 + $0x20] sm:$0xff] %v1683_v32 }
  0x4a   : > { %492 = vst [vmem:[#allocation2 + $0x10] sm:$0xff] %v1683_v32 }
  0x4b   : > { %493 = vst [vmem:[#allocation2 + $0x38] sm:$0xff] %v1683_v32 }
  0x4c   : > { %494 = vst [vmem:[#allocation2 + $0x60] sm:$0xff] %v1683_v32 }
  0x4d   : > { %495 = vst [vmem:[#allocation2 + $0x70] sm:$0xff] %v1683_v32 }
  0x4e   : > { %496 = vst [vmem:[#allocation2 + $0x78] sm:$0xff] %v1683_v32 }
  0x4f   : > { %497 = vst [vmem:[#allocation2 + $0x28] sm:$0xff] %v1683_v32 }
  0x50 PF: > { %v1512_v33 = vld [vmem:[%s1837_s15 + $0x38] sm:$0xff]  ;;  %v1511_v36 = vld [vmem:[%s1837_s15 + $0x30] sm:$0xff]  ;;  %v1510_v39 = vld [vmem:[%s1837_s15 + $0x28] sm:$0xff]  ;;  %p1475_p11 = scmp.ne.s32.totalorder %s1673_s23, 2 }
  0x51   : > { %v1844_v34 = vld [vmem:[%s1837_s15 + $0x78] sm:$0xff]  ;;  %866 = vmatpush.bf16.msra.mxu0 %v1512_v33  ;;  %1576 = vmatpush.bf16.msra.mxu3 %v1512_v33  ;;  %v1853_v37 = vld [vmem:[%s1837_s15 + $0x70] sm:$0xff]  ;;  %v1518_v40 = vld [vmem:[%s1837_s15 + $0x68] sm:$0xff] }
  0x52   : > { %v1847_v35 = vld [vmem:[%s1837_s15 + $0xb8] sm:$0xff]  ;;  %915 = vmatpush.bf16.msra.mxu1 %v1844_v34  ;;  %v1856_v38 = vld [vmem:[%s1837_s15 + $0xb0] sm:$0xff]  ;;  %v1863_v41 = vld [vmem:[%s1837_s15 + $0xa8] sm:$0xff] }
  0x53   : > { %964 = vmatpush.bf16.msra.mxu2 %v1847_v35  ;;  %v1509_v42 = vld [vmem:[%s1837_s15 + $0x20] sm:$0xff]  ;;  %v1508_v45 = vld [vmem:[%s1837_s15 + $0x18] sm:$0xff]  ;;  %v1507_v48 = vld [vmem:[%s1837_s15 + $0x10] sm:$0xff] }
  0x54   : > { %v1517_v43 = vld [vmem:[%s1837_s15 + $0x60] sm:$0xff]  ;;  %v1516_v46 = vld [vmem:[%s1837_s15 + $0x58] sm:$0xff]  ;;  %v1515_v49 = vld [vmem:[%s1837_s15 + $0x50] sm:$0xff] }
  0x55   : > { %867 = vmatpush.bf16.msra.mxu0 %v1511_v36  ;;  %1577 = vmatpush.bf16.msra.mxu3 %v1511_v36  ;;  %v1869_v44 = vld [vmem:[%s1837_s15 + $0xa0] sm:$0xff]  ;;  %v1875_v47 = vld [vmem:[%s1837_s15 + $0x98] sm:$0xff]  ;;  %v1881_v50 = vld [vmem:[%s1837_s15 + $0x90] sm:$0xff] }
  0x56   : > { %916 = vmatpush.bf16.msra.mxu1 %v1853_v37  ;;  %v1506_v51 = vld [vmem:[%s1837_s15 + $0x8] sm:$0xff]  ;;  %v1505_v54 = vld [vmem:[%s1837_s15] sm:$0xff]  ;;  %v1357_v59 = vld [vmem:[%s1839_s16 + $0x90] sm:$0xf] }
  0x57   : > { %965 = vmatpush.bf16.msra.mxu2 %v1856_v38  ;;  %v1514_v52 = vld [vmem:[%s1837_s15 + $0x48] sm:$0xff]  ;;  %v1513_v55 = vld [vmem:[%s1837_s15 + $0x40] sm:$0xff]  ;;  %v1500_v60 = vld [vmem:[%s1839_s16 + $0x98] sm:$0xf0] }
  0x58   : > { %v1887_v53 = vld [vmem:[%s1837_s15 + $0x88] sm:$0xff]  ;;  %v1892_v56 = vld [vmem:[%s1837_s15 + $0x80] sm:$0xff]  ;;  %v1287_v62 = vld [vmem:[%s1839_s16 + $0xc] sm:$0xf0]  ;;  %v1358_v2 = vor.u32 %v1500_v60, %v1357_v59 }
  0x59   : > { %868 = vmatpush.bf16.msra.mxu0 %v1510_v39  ;;  %1578 = vmatpush.bf16.msra.mxu3 %v1510_v39  ;;  %v1285_v57 = vld [vmem:[%s1839_s16] sm:$0xf]  ;;  %v1482_v58 = vld [vmem:[%s1839_s16 + $0x8] sm:$0xf0]  ;;  %v1481_v61 = vld [vmem:[%s1839_s16 + $0x4] sm:$0xf] }
  0x5a   : > { %917 = vmatpush.bf16.msra.mxu1 %v1518_v40  ;;  %v1293_v63 = vld [vmem:[%s1839_s16 + $0x8] sm:$0xf]  ;;  %v1483_v0 = vld [vmem:[%s1839_s16 + $0x10] sm:$0xf0]  ;;  %v1286_v1 = vor.u32 %v1482_v58, %v1285_v57  ;;  %v1290_v3 = vor.u32 %v1481_v61, %v1287_v62  ;;  %v1297_v5 = vld [vmem:[%s1839_s16 + $0x18] sm:$0xf] }
  0x5b   : > { %966 = vmatpush.bf16.msra.mxu2 %v1863_v41  ;;  %v1294_v4 = vor.u32 %v1483_v0, %v1293_v63  ;;  %v1485_v6 = vld [vmem:[%s1839_s16 + $0x20] sm:$0xf0]  ;;  %v1369_v7 = vld [vmem:[%s1839_s16 + $0xa8] sm:$0xf]  ;;  %v1503_v8 = vld [vmem:[%s1839_s16 + $0xb0] sm:$0xf0] }
  0x5c   : > { %v1484_v9 = vld [vmem:[%s1839_s16 + $0x1c] sm:$0xf]  ;;  %v1299_v10 = vld [vmem:[%s1839_s16 + $0x24] sm:$0xf0]  ;;  %v1305_v11 = vld [vmem:[%s1839_s16 + $0x20] sm:$0xf]  ;;  %v1298_v13 = vor.u32 %v1485_v6, %v1297_v5  ;;  %v1370_v14 = vor.u32 %v1503_v8, %v1369_v7 }
  0x5d   : > { %869 = vmatpush.bf16.msra.mxu0 %v1509_v42  ;;  %1579 = vmatpush.bf16.msra.mxu3 %v1509_v42  ;;  %v1486_v12 = vld [vmem:[%s1839_s16 + $0x28] sm:$0xf0]  ;;  %v1302_v15 = vor.u32 %v1484_v9, %v1299_v10  ;;  %v1309_v17 = vld [vmem:[%s1839_s16 + $0x30] sm:$0xf]  ;;  %v1488_v18 = vld [vmem:[%s1839_s16 + $0x38] sm:$0xf0] }
  0x5e   : > { %918 = vmatpush.bf16.msra.mxu1 %v1517_v43  ;;  %v1306_v16 = vor.u32 %v1486_v12, %v1305_v11  ;;  %v1487_v19 = vld [vmem:[%s1839_s16 + $0x34] sm:$0xf]  ;;  %v1359_v21 = vld [vmem:[%s1839_s16 + $0x9c] sm:$0xf0]  ;;  %v1317_v23 = vld [vmem:[%s1839_s16 + $0x38] sm:$0xf]  ;;  %v1310_v25 = vor.u32 %v1488_v18, %v1309_v17 }
  0x5f   : > { %967 = vmatpush.bf16.msra.mxu2 %v1869_v44  ;;  %v1499_v20 = vld [vmem:[%s1839_s16 + $0x94] sm:$0xf]  ;;  %v1311_v22 = vld [vmem:[%s1839_s16 + $0x3c] sm:$0xf0]  ;;  %v1489_v24 = vld [vmem:[%s1839_s16 + $0x40] sm:$0xf0] }
  0x60   : > { %v1362_v26 = vor.u32 %v1499_v20, %v1359_v21  ;;  %v1314_v27 = vor.u32 %v1487_v19, %v1311_v22  ;;  %v1318_v28 = vor.u32 %v1489_v24, %v1317_v23  ;;  %v1321_v29 = vld [vmem:[%s1839_s16 + $0x48] sm:$0xf]  ;;  %v1491_v30 = vld [vmem:[%s1839_s16 + $0x50] sm:$0xf0]  ;;  %v1490_v31 = vld [vmem:[%s1839_s16 + $0x4c] sm:$0xf] }
  0x61   : > { %870 = vmatpush.bf16.msra.mxu0 %v1508_v45  ;;  %1580 = vmatpush.bf16.msra.mxu3 %v1508_v45  ;;  %v1502_v32 = vld [vmem:[%s1839_s16 + $0xac] sm:$0xf]  ;;  %v1371_v33 = vld [vmem:[%s1839_s16 + $0xb4] sm:$0xf0]  ;;  %v1492_v36 = vld [vmem:[%s1839_s16 + $0x58] sm:$0xf0] }
  0x62   : > { %919 = vmatpush.bf16.msra.mxu1 %v1516_v46  ;;  %v1374_v39 = vor.u32 %v1502_v32, %v1371_v33  ;;  %v1494_v42 = vld [vmem:[%s1839_s16 + $0x68] sm:$0xf0]  ;;  %v1501_v45 = vld [vmem:[%s1839_s16 + $0xa0] sm:$0xf0]  ;;  %v1377_v57 = vld [vmem:[%s1839_s16 + $0xb0] sm:$0xf] }
  0x63   : > { %968 = vmatpush.bf16.msra.mxu2 %v1875_v47  ;;  %v1347_v58 = vld [vmem:[%s1839_s16 + $0x84] sm:$0xf0]  ;;  %v1353_v59 = vld [vmem:[%s1839_s16 + $0x80] sm:$0xf]  ;;  %v1498_v60 = vld [vmem:[%s1839_s16 + $0x88] sm:$0xf0] }
  0x64   : > { %v1354_v0 = vor.u32 %v1498_v60, %v1353_v59  ;;  %v530_v5 = vld [vmem:[#allocation2 + $0x30] sm:$0xff]  ;;  %v532_v21 = vld [vmem:[#allocation2 + $0x58] sm:$0xff] }
  0x65   : > { %871 = vmatpush.bf16.msra.mxu0 %v1507_v48  ;;  %1581 = vmatpush.bf16.msra.mxu3 %v1507_v48  ;;  %v1495_v48 = vld [vmem:[%s1839_s16 + $0x70] sm:$0xf0] }
  0x66   : > { %920 = vmatpush.bf16.msra.mxu1 %v1515_v49 }
  0x67   : > { %969 = vmatpush.bf16.msra.mxu2 %v1881_v50 }
  0x69   : > { %872 = vmatpush.bf16.msra.mxu0 %v1506_v51  ;;  %1582 = vmatpush.bf16.msra.mxu3 %v1506_v51 }
  0x6a   : > { %921 = vmatpush.bf16.msra.mxu1 %v1514_v52 }
  0x6b   : > { %970 = vmatpush.bf16.msra.mxu2 %v1887_v53 }
  0x6d   : > { %873 = vmatpush.bf16.msra.mxu0 %v1505_v54  ;;  %1583 = vmatpush.bf16.msra.mxu3 %v1505_v54  ;;  %v1497_v54 = vld [vmem:[%s1839_s16 + $0x80] sm:$0xf0] }
  0x6e   : > { %922 = vmatpush.bf16.msra.mxu1 %v1513_v55 }
  0x6f   : > { %971 = vmatpush.bf16.msra.mxu2 %v1892_v56 }
  0x70   : > { %874 = vmatmul.bf16.vlgmr.msra.gmra.mxu0 %v1286_v1  ;;  %904 = vmatmul.bf16.vlgmr.msra.gmra.mxu3 %v1358_v2 }
  0x71   : > { %1584 = vmatpush.bf16.msrb.mxu3 %v1844_v34  ;;  %923 = vmatmul.bf16.vlgmr.msra.gmra.mxu1 %v1290_v3  ;;  %v1323_v34 = vld [vmem:[%s1839_s16 + $0x54] sm:$0xf0] }
  0x72   : > { %972 = vmatmul.bf16.vlgmr.msra.gmra.mxu2 %v1294_v4 }
  0x75   : > { %1585 = vmatpush.bf16.msrb.mxu3 %v1853_v37  ;;  %v1322_v37 = vor.u32 %v1491_v30, %v1321_v29  ;;  %v533_v29 = vld [vmem:[#allocation2 + $0x18] sm:$0xff] }
  0x79   : > { %1586 = vmatpush.bf16.msrb.mxu3 %v1518_v40 }
  0x7d   : > { %1587 = vmatpush.bf16.msrb.mxu3 %v1517_v43  ;;  %v1493_v43 = vld [vmem:[%s1839_s16 + $0x64] sm:$0xf] }
  0x80   : > { %879 = vmatmul.bf16.gmra.mxu0 %v1298_v13  ;;  %909 = vmatmul.bf16.gmra.mxu3 %v1370_v14  ;;  %v531_v13 = vld [vmem:[#allocation2] sm:$0xff] }
  0x81   : > { %1588 = vmatpush.bf16.msrb.mxu3 %v1516_v46  ;;  %928 = vmatmul.bf16.gmra.mxu1 %v1302_v15  ;;  %v1335_v46 = vld [vmem:[%s1839_s16 + $0x6c] sm:$0xf0] }
  0x82   : > { %977 = vmatmul.bf16.gmra.mxu2 %v1306_v16  ;;  %v1338_v51 = vor.u32 %v1493_v43, %v1335_v46 }
  0x85   : > { %1589 = vmatpush.bf16.msrb.mxu3 %v1515_v49 }
  0x89   : > { %1590 = vmatpush.bf16.msrb.mxu3 %v1514_v52 }
  0x8d   : > { %1591 = vmatpush.bf16.msrb.mxu3 %v1513_v55  ;;  %v1496_v55 = vld [vmem:[%s1839_s16 + $0x7c] sm:$0xf] }
  0x8e   : > { %v1350_v63 = vor.u32 %v1496_v55, %v1347_v58 }
  0x90   : > { %884 = vmatmul.bf16.gmra.mxu0 %v1310_v25  ;;  %953 = vmatmul.bf16.vlgmr.msrb.gmra.mxu3 %v1362_v26 }
  0x91   : > { %1592 = vmatpush.bf16.msra.mxu3 %v1847_v35  ;;  %933 = vmatmul.bf16.gmra.mxu1 %v1314_v27  ;;  %v1329_v35 = vld [vmem:[%s1839_s16 + $0x50] sm:$0xf] }
  0x92   : > { %982 = vmatmul.bf16.gmra.mxu2 %v1318_v28  ;;  %v1330_v40 = vor.u32 %v1492_v36, %v1329_v35 }
  0x95   : > { %1593 = vmatpush.bf16.msra.mxu3 %v1856_v38  ;;  %v1326_v38 = vor.u32 %v1490_v31, %v1323_v34 }
  0x99   : > { %1594 = vmatpush.bf16.msra.mxu3 %v1863_v41  ;;  %v1333_v41 = vld [vmem:[%s1839_s16 + $0x60] sm:$0xf] }
  0x9a   : > { %v1334_v49 = vor.u32 %v1494_v42, %v1333_v41 }
  0x9d   : > { %1595 = vmatpush.bf16.msra.mxu3 %v1869_v44  ;;  %v1365_v44 = vld [vmem:[%s1839_s16 + $0x98] sm:$0xf] }
  0xa0   : > { %889 = vmatmul.bf16.gmra.mxu0 %v1322_v37  ;;  %958 = vmatmul.bf16.gmra.mxu3 %v1374_v39  ;;  %v534_v37 = vld [vmem:[#allocation2 + $0x50] sm:$0xff] }
  0xa1   : > { %1596 = vmatpush.bf16.msra.mxu3 %v1875_v47  ;;  %938 = vmatmul.bf16.gmra.mxu1 %v1326_v38  ;;  %v1341_v47 = vld [vmem:[%s1839_s16 + $0x68] sm:$0xf] }
  0xa2   : > { %987 = vmatmul.bf16.gmra.mxu2 %v1330_v40  ;;  %v1342_v52 = vor.u32 %v1495_v48, %v1341_v47 }
  0xa5   : > { %1597 = vmatpush.bf16.msra.mxu3 %v1881_v50  ;;  %v1366_v50 = vor.u32 %v1501_v45, %v1365_v44  ;;  %v535_v45 = vld [vmem:[#allocation2 + $0x68] sm:$0xff] }
  0xa9   : > { %1598 = vmatpush.bf16.msra.mxu3 %v1887_v53  ;;  %v1345_v53 = vld [vmem:[%s1839_s16 + $0x78] sm:$0xf] }
  0xaa   : > { %v1346_v61 = vor.u32 %v1497_v54, %v1345_v53  ;;  %v536_v53 = vld [vmem:[#allocation2 + $0x8] sm:$0xff] }
  0xad   : > { %1599 = vmatpush.bf16.msra.mxu3 %v1892_v56  ;;  %v1504_v56 = vld [vmem:[%s1839_s16 + $0xb8] sm:$0xf0] }
  0xae   : > { %v1378_v62 = vor.u32 %v1504_v56, %v1377_v57 }
  0xb0   : > { %894 = vmatmul.bf16.gmra.mxu0 %v1334_v49  ;;  %1002 = vmatmul.bf16.vlgmr.msra.gmra.mxu3 %v1366_v50 }
  0xb1   : > { %943 = vmatmul.bf16.gmra.mxu1 %v1338_v51 }
  0xb2   : > { %992 = vmatmul.bf16.gmra.mxu2 %v1342_v52 }
  0xc0   : > { %899 = vmatmul.bf16.gmra.mxu0 %v1346_v61  ;;  %1007 = vmatmul.bf16.gmra.mxu3 %v1378_v62  ;;  %v537_v61 = vld [vmem:[#allocation2 + $0x48] sm:$0xff] }
  0xc1   : > { %948 = vmatmul.bf16.gmra.mxu1 %v1350_v63 }
  0xc2   : > { %997 = vmatmul.bf16.gmra.mxu2 %v1354_v0 }
  0xed   : > { %v875_v1 = vpop.f32.mrf.mxu0 }
  0xee   : > { %v924_v2 = vpop.f32.mrf.mxu1 }
  0xef   : > { %v925_v3 = vadd.f32 %v924_v2, %v875_v1 }
  0xf3   : > { %v1954_v4 = vpop.f32.mrf.mxu3 }
  0xf5   : > { %v973_v6 = vpop.f32.mrf.mxu2  ;;  %v877_v8 = vpop.f32.mrf.mxu0 }
  0xf6   : > { %v974_v7 = vadd.f32 %v973_v6, %v925_v3  ;;  %v926_v9 = vpop.f32.mrf.mxu1  ;;  %v542_v6 = vld [vmem:[#allocation2 + $0x60] sm:$0xff] }
  0xf7   : > { %v927_v11 = vadd.f32 %v926_v9, %v877_v8  ;;  %v538_v8 = vld [vmem:[#allocation2 + $0x40] sm:$0xff] }
  0xf8   : > { %v1013_v10 = vadd.f32 %v974_v7, %v530_v5 }
  0xfa   : > { %1029 = vst [vmem:[#allocation2 + $0x30] sm:$0xff] %v1013_v10 }
  0xfb   : > { %v1956_v12 = vpop.f32.mrf.mxu3 }
  0xfd   : > { %v975_v14 = vpop.f32.mrf.mxu2  ;;  %v880_v16 = vpop.f32.mrf.mxu0 }
  0xfe   : > { %v976_v15 = vadd.f32 %v975_v14, %v927_v11  ;;  %v929_v17 = vpop.f32.mrf.mxu1 }
  0xff   : > { %v930_v19 = vadd.f32 %v929_v17, %v880_v16 }
 0x100   : > { %v1014_v18 = vadd.f32 %v976_v15, %v531_v13 }
 0x102   : > { %1030 = vst [vmem:[#allocation2] sm:$0xff] %v1014_v18 }
 0x103   : > { %v1958_v20 = vpop.f32.mrf.mxu3 }
 0x105   : > { %v978_v22 = vpop.f32.mrf.mxu2  ;;  %v882_v24 = vpop.f32.mrf.mxu0 }
 0x106   : > { %v979_v23 = vadd.f32 %v978_v22, %v930_v19  ;;  %v931_v25 = vpop.f32.mrf.mxu1  ;;  %v543_v19 = vld [vmem:[#allocation2 + $0x70] sm:$0xff]  ;;  %v539_v22 = vld [vmem:[#allocation2 + $0x20] sm:$0xff] }
 0x107   : > { %v932_v27 = vadd.f32 %v931_v25, %v882_v24 }
 0x108   : > { %v1015_v26 = vadd.f32 %v979_v23, %v532_v21 }
 0x10a   : > { %1031 = vst [vmem:[#allocation2 + $0x58] sm:$0xff] %v1015_v26 }
 0x10b   : > { %v1960_v28 = vpop.f32.mrf.mxu3 }
 0x10d   : > { %v980_v30 = vpop.f32.mrf.mxu2  ;;  %v885_v32 = vpop.f32.mrf.mxu0 }
 0x10e   : > { %v981_v31 = vadd.f32 %v980_v30, %v932_v27  ;;  %v934_v33 = vpop.f32.mrf.mxu1 }
 0x10f   : > { %v935_v35 = vadd.f32 %v934_v33, %v885_v32  ;;  %v544_v32 = vld [vmem:[#allocation2 + $0x78] sm:$0xff] }
 0x110   : > { %v1016_v34 = vadd.f32 %v981_v31, %v533_v29 }
 0x112   : > { %1032 = vst [vmem:[#allocation2 + $0x18] sm:$0xff] %v1016_v34  ;;  %v540_v34 = vld [vmem:[#allocation2 + $0x10] sm:$0xff] }
 0x113   : > { %v954_v36 = vpop.f32.mrf.mxu3 }
 0x114   : > { %v955_v5 = vadd.f32 %v954_v36, %v1954_v4 }
 0x115   : > { %v983_v39 = vpop.f32.mrf.mxu2  ;;  %v887_v40 = vpop.f32.mrf.mxu0 }
 0x116   : > { %v984_v38 = vadd.f32 %v983_v39, %v935_v35  ;;  %v936_v41 = vpop.f32.mrf.mxu1 }
 0x117   : > { %v937_v43 = vadd.f32 %v936_v41, %v887_v40 }
 0x118   : > { %v1017_v42 = vadd.f32 %v984_v38, %v534_v37 }
 0x11a   : > { %1033 = vst [vmem:[#allocation2 + $0x50] sm:$0xff] %v1017_v42 }
 0x11b   : > { %v956_v44 = vpop.f32.mrf.mxu3 }
 0x11c   : > { %v957_v17 = vadd.f32 %v956_v44, %v1956_v12 }
 0x11d   : > { %v985_v46 = vpop.f32.mrf.mxu2  ;;  %v890_v48 = vpop.f32.mrf.mxu0 }
 0x11e   : > { %v986_v47 = vadd.f32 %v985_v46, %v937_v43  ;;  %v939_v49 = vpop.f32.mrf.mxu1  ;;  %v545_v43 = vld [vmem:[#allocation2 + $0x28] sm:$0xff] }
 0x11f   : > { %v940_v51 = vadd.f32 %v939_v49, %v890_v48 }
 0x120   : > { %v1018_v50 = vadd.f32 %v986_v47, %v535_v45  ;;  %v541_v45 = vld [vmem:[#allocation2 + $0x38] sm:$0xff] }
 0x122   : > { %1034 = vst [vmem:[#allocation2 + $0x68] sm:$0xff] %v1018_v50 }
 0x123   : > { %v959_v52 = vpop.f32.mrf.mxu3 }
 0x124   : > { %v960_v31 = vadd.f32 %v959_v52, %v1958_v20 }
 0x125   : > { %v988_v54 = vpop.f32.mrf.mxu2  ;;  %v892_v57 = vpop.f32.mrf.mxu0 }
 0x126   : > { %v989_v55 = vadd.f32 %v988_v54, %v940_v51  ;;  %v941_v56 = vpop.f32.mrf.mxu1 }
 0x127   : > { %v942_v59 = vadd.f32 %v941_v56, %v892_v57 }
 0x128   : > { %v1019_v58 = vadd.f32 %v989_v55, %v536_v53 }
 0x12a   : > { %1035 = vst [vmem:[#allocation2 + $0x8] sm:$0xff] %v1019_v58 }
 0x12b   : > { %v961_v60 = vpop.f32.mrf.mxu3 }
 0x12c   : > { %v962_v41 = vadd.f32 %v961_v60, %v1960_v28 }
 0x12d   : > { %v990_v62 = vpop.f32.mrf.mxu2  ;;  %v895_v0 = vpop.f32.mrf.mxu0 }
 0x12e   : > { %v991_v63 = vadd.f32 %v990_v62, %v942_v59  ;;  %v944_v1 = vpop.f32.mrf.mxu1 }
 0x12f   : > { %v945_v3 = vadd.f32 %v944_v1, %v895_v0 }
 0x130   : > { %v1020_v2 = vadd.f32 %v991_v63, %v537_v61 }
 0x132   : > { %1036 = vst [vmem:[#allocation2 + $0x48] sm:$0xff] %v1020_v2 }
 0x133   : > { %v1003_v7 = vpop.f32.mrf.mxu3 }
 0x134   : > { %v1004_v10 = vadd.f32 %v1003_v7, %v955_v5 }
 0x135   : > { %v993_v9 = vpop.f32.mrf.mxu2  ;;  %v897_v13 = vpop.f32.mrf.mxu0 }
 0x136   : > { %v994_v11 = vadd.f32 %v993_v9, %v945_v3  ;;  %v1025_v14 = vadd.f32 %v1004_v10, %v542_v6  ;;  %v946_v15 = vpop.f32.mrf.mxu1 }
 0x137   : > { %v947_v18 = vadd.f32 %v946_v15, %v897_v13 }
 0x138   : > { %v1021_v16 = vadd.f32 %v994_v11, %v538_v8  ;;  %1041 = vst [vmem:[#allocation2 + $0x60] sm:$0xff] %v1025_v14 }
 0x13a   : > { %1037 = vst [vmem:[#allocation2 + $0x40] sm:$0xff] %v1021_v16 }
 0x13b   : > { %v1005_v21 = vpop.f32.mrf.mxu3 }
 0x13c   : > { %v1006_v4 = vadd.f32 %v1005_v21, %v957_v17 }
 0x13d   : > { %v995_v23 = vpop.f32.mrf.mxu2  ;;  %v900_v26 = vpop.f32.mrf.mxu0 }
 0x13e   : > { %v996_v24 = vadd.f32 %v995_v23, %v947_v18  ;;  %v1026_v25 = vadd.f32 %v1006_v4, %v543_v19  ;;  %v949_v27 = vpop.f32.mrf.mxu1 }
 0x13f   : > { %v950_v30 = vadd.f32 %v949_v27, %v900_v26 }
 0x140   : > { %v1022_v29 = vadd.f32 %v996_v24, %v539_v22  ;;  %1042 = vst [vmem:[#allocation2 + $0x70] sm:$0xff] %v1026_v25 }
 0x142   : > { %1038 = vst [vmem:[#allocation2 + $0x20] sm:$0xff] %v1022_v29 }
 0x143   : > { %v1008_v33 = vpop.f32.mrf.mxu3 }
 0x144   : > { %v1009_v35 = vadd.f32 %v1008_v33, %v960_v31 }
 0x145   : > { %v998_v12 = vpop.f32.mrf.mxu2  ;;  %v902_v38 = vpop.f32.mrf.mxu0 }
 0x146   : > { %v999_v36 = vadd.f32 %v998_v12, %v950_v30  ;;  %v1027_v37 = vadd.f32 %v1009_v35, %v544_v32  ;;  %v951_v40 = vpop.f32.mrf.mxu1 }
 0x147   : > { %v952_v42 = vadd.f32 %v951_v40, %v902_v38 }
 0x148   : > { %v1023_v39 = vadd.f32 %v999_v36, %v540_v34  ;;  %1043 = vst [vmem:[#allocation2 + $0x78] sm:$0xff] %v1027_v37 }
 0x14a   : > { %1039 = vst [vmem:[#allocation2 + $0x10] sm:$0xff] %v1023_v39 }
 0x14b   : > { %v1010_v44 = vpop.f32.mrf.mxu3 }
 0x14c   : > { %v1011_v20 = vadd.f32 %v1010_v44, %v962_v41 }
 0x14d   : > { %v1000_v46 = vpop.f32.mrf.mxu2 }
 0x14e   : > { %v1001_v47 = vadd.f32 %v1000_v46, %v952_v42  ;;  %v1028_v48 = vadd.f32 %v1011_v20, %v545_v43  ;;  %1048 = sbr.rel (%p1475_p11) target bundleno = 350 (0x15e), region = 78 }
 0x150   : > { %v1024_v49 = vadd.f32 %v1001_v47, %v541_v45  ;;  %1044 = vst [vmem:[#allocation2 + $0x28] sm:$0xff] %v1028_v48 }
 0x152   : > { %1040 = vst [vmem:[#allocation2 + $0x38] sm:$0xff] %v1024_v49 }
 0x153   : > { %v1049_v50 = vld [vmem:[#allocation2 + $0x30] sm:$0xff]  ;;  %v1050_v51 = vld [vmem:[#allocation2] sm:$0xff]  ;;  %v1051_v52 = vld [vmem:[#allocation2 + $0x58] sm:$0xff] }
 0x154   : > { %v1532_v53 = vpack.c.bf16 %v1050_v51, %v1049_v50  ;;  %v1052_v54 = vld [vmem:[#allocation2 + $0x18] sm:$0xff]  ;;  %v1053_v28 = vld [vmem:[#allocation2 + $0x50] sm:$0xff]  ;;  %v1054_v55 = vld [vmem:[#allocation2 + $0x68] sm:$0xff] }
 0x155   : > { %v1537_v57 = vpack.c.bf16 %v1052_v54, %v1051_v52  ;;  %v1542_v56 = vpack.c.bf16 %v1054_v55, %v1053_v28  ;;  %v1055_v58 = vld [vmem:[#allocation2 + $0x8] sm:$0xff]  ;;  %v1057_v60 = vld [vmem:[#allocation2 + $0x40] sm:$0xff]  ;;  %v1059_v63 = vld [vmem:[#allocation2 + $0x10] sm:$0xff] }
 0x156   : > { %v1056_v59 = vld [vmem:[#allocation2 + $0x48] sm:$0xff]  ;;  %1533 = vst [vmem:[%s2012_s6] sm:$0xff] %v1532_v53   ;;  %v1058_v62 = vld [vmem:[#allocation2 + $0x20] sm:$0xff]  ;;  %v1062_v5 = vld [vmem:[#allocation2 + $0x70] sm:$0xff] }
 0x157   : > { %v1547_v61 = vpack.c.bf16 %v1056_v59, %v1055_v58  ;;  %1569 = vst [vmem:[%s2012_s6 + $0x8] sm:$0xff] %v1537_v57   ;;  %v1552_v1 = vpack.c.bf16 %v1058_v62, %v1057_v60  ;;  %v1061_v3 = vld [vmem:[#allocation2 + $0x60] sm:$0xff]  ;;  %v1063_v6 = vld [vmem:[#allocation2 + $0x78] sm:$0xff]  ;;  %v1064_v8 = vld [vmem:[#allocation2 + $0x28] sm:$0xff] }
 0x158   : > { %1570 = vst [vmem:[%s2012_s6 + $0x10] sm:$0xff] %v1542_v56   ;;  %v1562_v7 = vpack.c.bf16 %v1062_v5, %v1061_v3  ;;  %v1567_v9 = vpack.c.bf16 %v1064_v8, %v1063_v6 }
 0x159   : > { %v1060_v0 = vld [vmem:[#allocation2 + $0x38] sm:$0xff]  ;;  %1571 = vst [vmem:[%s2012_s6 + $0x18] sm:$0xff] %v1547_v61  }
 0x15a   : > { %v1557_v2 = vpack.c.bf16 %v1060_v0, %v1059_v63  ;;  %1572 = vst [vmem:[%s2012_s6 + $0x20] sm:$0xff] %v1552_v1  }
 0x15b   : > { %1574 = vst [vmem:[%s2012_s6 + $0x30] sm:$0xff] %v1562_v7  }
 0x15c   : > { %1573 = vst [vmem:[%s2012_s6 + $0x28] sm:$0xff] %v1557_v2  }
 0x15d   : > { %1575 = vst [vmem:[%s2012_s6 + $0x38] sm:$0xff] %v1567_v9  }
 0x15e PF: > { %s16_s2 = sadd.s32 1, %s1681_s2   ;;  %s2013_s21 = smov %s1669_s22 }
 0x15f   : > { %p13_p12 = scmp.ge.s32.totalorder %s16_s2, 5   ;;  %s2014_s22 = smov %s1754_s25 }
 0x160   : > { %s2015_s23 = smov %s1677_s24  ;;  %s2016_s24 = smov %s2018_s3 }
 0x161   :  { %15 = sbr.rel (!%p13_p12) target bundleno = 3 (0x3), region = 134 }

// kernel: forward.128
= control target key start
LH: loop header
LB: loop body
LE: loop exit
PB: predicated region body
PF: predicated region fallthrough
CT: control target
= control target key end

     0   :  { %s1020_s1 = inlined_call_operand.vmem [shape: bf16[256,128], index: 1, kind: input, shape index: {}]   ;;  %s1021_s0 = inlined_call_operand.vmem [shape: bf16[128,256], index: 0, kind: input, shape index: {}]   ;;  %s1022_s2 = inlined_call_operand.vmem [shape: f32[1,256], index: 2, kind: input, shape index: {}]   ;;  %s1023_s3 = inlined_call_operand.vmem [shape: f32[1,256], index: 3, kind: input, shape index: {}]   ;;  %s1024_s4 = inlined_call_operand.vmem [shape: f32[1,128], index: 4, kind: input, shape index: {}]   ;;  %s1025_s5 = inlined_call_operand.vmem [shape: f32[1,128], index: 5, kind: input, shape index: {}]   ;;  %s1026_s6 = inlined_call_operand.vmem [shape: bf16[128,128], index: 6, kind: output, shape index: {}]  }
   0x1   :  { %v671_v0 = vld [vmem:[%s1020_s1 + $0x38] sm:$0xff]  ;;  %v670_v2 = vld [vmem:[%s1020_s1 + $0x30] sm:$0xff]  ;;  %v669_v4 = vld [vmem:[%s1020_s1 + $0x28] sm:$0xff] }
   0x2   :  { %v679_v1 = vld [vmem:[%s1020_s1 + $0x78] sm:$0xff]  ;;  %359 = vmatpush.bf16.msra.mxu0 %v671_v0  ;;  %727 = vmatpush.bf16.msra.mxu2 %v671_v0  ;;  %v678_v3 = vld [vmem:[%s1020_s1 + $0x70] sm:$0xff]  ;;  %v677_v5 = vld [vmem:[%s1020_s1 + $0x68] sm:$0xff] }
   0x3   :  { %408 = vmatpush.bf16.msra.mxu1 %v679_v1  ;;  %735 = vmatpush.bf16.msra.mxu3 %v679_v1  ;;  %v43_v6 = vld [vmem:[%s1021_s0] sm:$0xff]  ;;  %v44_v7 = vld [vmem:[%s1021_s0 + $0x8] sm:$0xff]  ;;  %v667_v22 = vld [vmem:[%s1020_s1 + $0x18] sm:$0xff] }
   0x4   :  { %v91_v8 = vld [vmem:[%s1022_s2] sm:$0x3]  ;;  %v52_v10 = vld [vmem:[%s1021_s0 + $0x48] sm:$0xff]  ;;  %v59_v13 = vunpack.c.l.bf16 %v43_v6  ;;  %v61_v14 = vunpack.c.l.bf16 %v44_v7  ;;  %v60_v19 = vunpack.c.h.bf16 %v43_v6  ;;  %v62_v20 = vunpack.c.h.bf16 %v44_v7  ;;  %v675_v25 = vld [vmem:[%s1020_s1 + $0x58] sm:$0xff] }
   0x5   :  { %v51_v9 = vld [vmem:[%s1021_s0 + $0x40] sm:$0xff]  ;;  %v819_v15 = vperm.slane %v91_v8, 0  ;;  %v77_v18 = vunpack.c.l.bf16 %v52_v10  ;;  %v824_v21 = vperm.slane %v91_v8, 1  ;;  %v78_v24 = vunpack.c.h.bf16 %v52_v10  ;;  %v666_v34 = vld [vmem:[%s1020_s1 + $0x10] sm:$0xff]  ;;  %v665_v44 = vld [vmem:[%s1020_s1 + $0x8] sm:$0xff] }
   0x6   :  { %360 = vmatpush.bf16.msra.mxu0 %v670_v2  ;;  %728 = vmatpush.bf16.msra.mxu2 %v670_v2  ;;  %v668_v11 = vld [vmem:[%s1020_s1 + $0x20] sm:$0xff]  ;;  %v75_v17 = vunpack.c.l.bf16 %v51_v9  ;;  %v76_v23 = vunpack.c.h.bf16 %v51_v9  ;;  %v674_v37 = vld [vmem:[%s1020_s1 + $0x50] sm:$0xff]  ;;  %v673_v47 = vld [vmem:[%s1020_s1 + $0x48] sm:$0xff] }
   0x7   :  { %409 = vmatpush.bf16.msra.mxu1 %v678_v3  ;;  %736 = vmatpush.bf16.msra.mxu3 %v678_v3  ;;  %v676_v12 = vld [vmem:[%s1020_s1 + $0x60] sm:$0xff]  ;;  %v97_v27 = vmul.f32 %v819_v15, %v59_v13  ;;  %v99_v28 = vmul.f32 %v819_v15, %v61_v14  ;;  %v115_v30 = vmul.f32 %v819_v15, %v77_v18  ;;  %v45_v54 = vld [vmem:[%s1021_s0 + $0x10] sm:$0xff]  ;;  %v46_v55 = vld [vmem:[%s1021_s0 + $0x18] sm:$0xff] }
   0x8   :  { %v129_v16 = vld [vmem:[%s1023_s3] sm:$0x3]  ;;  %v113_v29 = vmul.f32 %v819_v15, %v75_v17  ;;  %v98_v31 = vmul.f32 %v824_v21, %v60_v19  ;;  %v100_v32 = vmul.f32 %v824_v21, %v62_v20  ;;  %v114_v35 = vmul.f32 %v824_v21, %v76_v23  ;;  %v53_v59 = vld [vmem:[%s1021_s0 + $0x50] sm:$0xff]  ;;  %v54_v60 = vld [vmem:[%s1021_s0 + $0x58] sm:$0xff] }
   0x9   :  { %v832_v26 = vperm.slane %v129_v16, 0  ;;  %v840_v33 = vperm.slane %v129_v16, 1  ;;  %v116_v36 = vmul.f32 %v824_v21, %v78_v24  ;;  %v664_v56 = vld [vmem:[%s1020_s1] sm:$0xff]  ;;  %v63_v0 = vunpack.c.l.bf16 %v45_v54 }
   0xa   :  { %361 = vmatpush.bf16.msra.mxu0 %v669_v4  ;;  %729 = vmatpush.bf16.msra.mxu2 %v669_v4  ;;  %v672_v61 = vld [vmem:[%s1020_s1 + $0x40] sm:$0xff]  ;;  %v65_v1 = vunpack.c.l.bf16 %v46_v55  ;;  %v79_v3 = vunpack.c.l.bf16 %v53_v59  ;;  %v81_v4 = vunpack.c.l.bf16 %v54_v60  ;;  %v66_v7 = vunpack.c.h.bf16 %v46_v55 }
   0xb   :  { %410 = vmatpush.bf16.msra.mxu1 %v677_v5  ;;  %737 = vmatpush.bf16.msra.mxu3 %v677_v5  ;;  %v135_v38 = vadd.f32 %v832_v26, %v97_v27  ;;  %v137_v39 = vadd.f32 %v832_v26, %v99_v28  ;;  %v151_v40 = vadd.f32 %v832_v26, %v113_v29  ;;  %v64_v5 = vunpack.c.h.bf16 %v45_v54  ;;  %v47_v29 = vld [vmem:[%s1021_s0 + $0x20] sm:$0xff] }
   0xc   :  { %v153_v41 = vadd.f32 %v832_v26, %v115_v30  ;;  %v136_v42 = vadd.f32 %v840_v33, %v98_v31  ;;  %v138_v43 = vadd.f32 %v840_v33, %v100_v32  ;;  %v152_v45 = vadd.f32 %v840_v33, %v114_v35  ;;  %v48_v30 = vld [vmem:[%s1021_s0 + $0x28] sm:$0xff] }
   0xd   :  { %v154_v46 = vadd.f32 %v840_v33, %v116_v36  ;;  %v167_v48 = vmax.f32 %v135_v38, 0.0  ;;  %v169_v49 = vmax.f32 %v137_v39, 0.0  ;;  %v183_v50 = vmax.f32 %v151_v40, 0.0  ;;  %v55_v36 = vld [vmem:[%s1021_s0 + $0x60] sm:$0xff] }
   0xe   :  { %362 = vmatpush.bf16.msra.mxu0 %v668_v11  ;;  %730 = vmatpush.bf16.msra.mxu2 %v668_v11  ;;  %v185_v51 = vmax.f32 %v153_v41, 0.0  ;;  %v168_v52 = vmax.f32 %v136_v42, 0.0  ;;  %v170_v53 = vmax.f32 %v138_v43, 0.0  ;;  %v184_v57 = vmax.f32 %v152_v45, 0.0 }
   0xf   :  { %411 = vmatpush.bf16.msra.mxu1 %v676_v12  ;;  %738 = vmatpush.bf16.msra.mxu3 %v676_v12  ;;  %v186_v58 = vmax.f32 %v154_v46, 0.0  ;;  %v199_v62 = vpack.c.bf16 %v169_v49, %v167_v48  ;;  %v80_v8 = vunpack.c.h.bf16 %v53_v59  ;;  %v82_v9 = vunpack.c.h.bf16 %v54_v60 }
  0x10   :  { %v207_v63 = vpack.c.bf16 %v185_v51, %v183_v50  ;;  %v200_v2 = vpack.c.bf16 %v170_v53, %v168_v52  ;;  %v101_v10 = vmul.f32 %v819_v15, %v63_v0  ;;  %v103_v11 = vmul.f32 %v819_v15, %v65_v1 }
  0x11   :  { %v208_v6 = vpack.c.bf16 %v186_v58, %v184_v57  ;;  %v117_v12 = vmul.f32 %v819_v15, %v79_v3  ;;  %v119_v13 = vmul.f32 %v819_v15, %v81_v4  ;;  %v102_v14 = vmul.f32 %v824_v21, %v64_v5 }
  0x12   :  { %363 = vmatpush.bf16.msra.mxu0 %v667_v22  ;;  %731 = vmatpush.bf16.msra.mxu2 %v667_v22  ;;  %v104_v16 = vmul.f32 %v824_v21, %v66_v7  ;;  %v118_v17 = vmul.f32 %v824_v21, %v80_v8  ;;  %v120_v18 = vmul.f32 %v824_v21, %v82_v9  ;;  %v67_v42 = vunpack.c.l.bf16 %v47_v29 }
  0x13   :  { %412 = vmatpush.bf16.msra.mxu1 %v675_v25  ;;  %739 = vmatpush.bf16.msra.mxu3 %v675_v25  ;;  %v139_v19 = vadd.f32 %v832_v26, %v101_v10  ;;  %v141_v20 = vadd.f32 %v832_v26, %v103_v11  ;;  %v155_v22 = vadd.f32 %v832_v26, %v117_v12  ;;  %v69_v43 = vunpack.c.l.bf16 %v48_v30  ;;  %v49_v12 = vld [vmem:[%s1021_s0 + $0x30] sm:$0xff] }
  0x14   :  { %v157_v23 = vadd.f32 %v832_v26, %v119_v13  ;;  %v140_v24 = vadd.f32 %v840_v33, %v102_v14  ;;  %v142_v25 = vadd.f32 %v840_v33, %v104_v16  ;;  %v156_v27 = vadd.f32 %v840_v33, %v118_v17  ;;  %v50_v13 = vld [vmem:[%s1021_s0 + $0x38] sm:$0xff]  ;;  %v57_v17 = vld [vmem:[%s1021_s0 + $0x70] sm:$0xff] }
  0x15   :  { %v158_v28 = vadd.f32 %v840_v33, %v120_v18  ;;  %v171_v31 = vmax.f32 %v139_v19, 0.0  ;;  %v173_v32 = vmax.f32 %v141_v20, 0.0  ;;  %v68_v48 = vunpack.c.h.bf16 %v47_v29  ;;  %v58_v18 = vld [vmem:[%s1021_s0 + $0x78] sm:$0xff] }
  0x16   :  { %364 = vmatpush.bf16.msra.mxu0 %v666_v34  ;;  %732 = vmatpush.bf16.msra.mxu2 %v666_v34  ;;  %v187_v34 = vmax.f32 %v155_v22, 0.0  ;;  %v189_v35 = vmax.f32 %v157_v23, 0.0  ;;  %v172_v38 = vmax.f32 %v140_v24, 0.0  ;;  %v174_v39 = vmax.f32 %v142_v25, 0.0 }
  0x17   :  { %413 = vmatpush.bf16.msra.mxu1 %v674_v37  ;;  %740 = vmatpush.bf16.msra.mxu3 %v674_v37  ;;  %v56_v37 = vld [vmem:[%s1021_s0 + $0x68] sm:$0xff]  ;;  %v188_v40 = vmax.f32 %v156_v27, 0.0  ;;  %v190_v41 = vmax.f32 %v158_v28, 0.0  ;;  %v201_v46 = vpack.c.bf16 %v173_v32, %v171_v31  ;;  %v70_v49 = vunpack.c.h.bf16 %v48_v30 }
  0x18   :  { %v85_v45 = vunpack.c.l.bf16 %v56_v37  ;;  %v202_v50 = vpack.c.bf16 %v174_v39, %v172_v38  ;;  %v84_v52 = vunpack.c.h.bf16 %v55_v36  ;;  %v86_v53 = vunpack.c.h.bf16 %v56_v37 }
  0x19   :  { %v210_v51 = vpack.c.bf16 %v190_v41, %v188_v40  ;;  %v105_v54 = vmul.f32 %v819_v15, %v67_v42  ;;  %v107_v55 = vmul.f32 %v819_v15, %v69_v43  ;;  %v106_v58 = vmul.f32 %v824_v21, %v68_v48 }
  0x1a   :  { %365 = vmatpush.bf16.msra.mxu0 %v665_v44  ;;  %733 = vmatpush.bf16.msra.mxu2 %v665_v44  ;;  %v83_v44 = vunpack.c.l.bf16 %v55_v36  ;;  %v123_v57 = vmul.f32 %v819_v15, %v85_v45  ;;  %v108_v59 = vmul.f32 %v824_v21, %v70_v49  ;;  %v122_v60 = vmul.f32 %v824_v21, %v84_v52 }
  0x1b   :  { %414 = vmatpush.bf16.msra.mxu1 %v673_v47  ;;  %741 = vmatpush.bf16.msra.mxu3 %v673_v47  ;;  %v209_v47 = vpack.c.bf16 %v189_v35, %v187_v34  ;;  %v71_v22 = vunpack.c.l.bf16 %v49_v12  ;;  %v73_v23 = vunpack.c.l.bf16 %v50_v13  ;;  %v87_v25 = vunpack.c.l.bf16 %v57_v17 }
  0x1c   :  { %v161_v1 = vadd.f32 %v832_v26, %v123_v57  ;;  %v146_v3 = vadd.f32 %v840_v33, %v108_v59  ;;  %v160_v4 = vadd.f32 %v840_v33, %v122_v60  ;;  %v89_v27 = vunpack.c.l.bf16 %v58_v18 }
  0x1d   :  { %v72_v28 = vunpack.c.h.bf16 %v49_v12  ;;  %v74_v30 = vunpack.c.h.bf16 %v50_v13  ;;  %v88_v31 = vunpack.c.h.bf16 %v57_v17  ;;  %v90_v32 = vunpack.c.h.bf16 %v58_v18 }
  0x1e   :  { %366 = vmatpush.bf16.msra.mxu0 %v664_v56  ;;  %734 = vmatpush.bf16.msra.mxu2 %v664_v56  ;;  %v121_v56 = vmul.f32 %v819_v15, %v83_v44  ;;  %v193_v9 = vmax.f32 %v161_v1, 0.0  ;;  %v178_v11 = vmax.f32 %v146_v3, 0.0  ;;  %v192_v14 = vmax.f32 %v160_v4, 0.0  ;;  %v963_v1 = vld [vmem:[%s1025_s5] ss:$0 sm:$0xff] }
  0x1f   :  { %415 = vmatpush.bf16.msra.mxu1 %v672_v61  ;;  %742 = vmatpush.bf16.msra.mxu3 %v672_v61  ;;  %v124_v61 = vmul.f32 %v824_v21, %v86_v53  ;;  %v109_v34 = vmul.f32 %v819_v15, %v71_v22  ;;  %v111_v35 = vmul.f32 %v819_v15, %v73_v23 }
  0x20   :  { %v159_v0 = vadd.f32 %v832_v26, %v121_v56  ;;  %v125_v36 = vmul.f32 %v819_v15, %v87_v25  ;;  %v127_v37 = vmul.f32 %v819_v15, %v89_v27  ;;  %v110_v38 = vmul.f32 %v824_v21, %v72_v28 }
  0x21   :  { %367 = vmatmul.bf16.vlgmr.msra.gmra.mxu0 %v199_v62  ;;  %387 = vmatmul.bf16.vlgmr.msra.gmra.mxu2 %v207_v63  ;;  %v143_v62 = vadd.f32 %v832_v26, %v105_v54  ;;  %v145_v63 = vadd.f32 %v832_v26, %v107_v55  ;;  %v162_v5 = vadd.f32 %v840_v33, %v124_v61 }
  0x22   :  { %416 = vmatmul.bf16.vlgmr.msra.gmra.mxu1 %v200_v2  ;;  %436 = vmatmul.bf16.vlgmr.msra.gmra.mxu3 %v208_v6  ;;  %v144_v2 = vadd.f32 %v840_v33, %v106_v58  ;;  %v191_v8 = vmax.f32 %v159_v0, 0.0  ;;  %v112_v39 = vmul.f32 %v824_v21, %v74_v30  ;;  %v126_v40 = vmul.f32 %v824_v21, %v88_v31 }
  0x23   :  { %v175_v6 = vmax.f32 %v143_v62, 0.0  ;;  %v177_v7 = vmax.f32 %v145_v63, 0.0  ;;  %v194_v16 = vmax.f32 %v162_v5, 0.0  ;;  %v128_v41 = vmul.f32 %v824_v21, %v90_v32 }
  0x24   :  { %v176_v10 = vmax.f32 %v144_v2, 0.0  ;;  %v211_v20 = vpack.c.bf16 %v193_v9, %v191_v8  ;;  %v147_v42 = vadd.f32 %v832_v26, %v109_v34  ;;  %v149_v43 = vadd.f32 %v832_v26, %v111_v35 }
  0x25   :  { %v203_v19 = vpack.c.bf16 %v177_v7, %v175_v6  ;;  %v212_v29 = vpack.c.bf16 %v194_v16, %v192_v14  ;;  %v163_v44 = vadd.f32 %v832_v26, %v125_v36  ;;  %v165_v45 = vadd.f32 %v832_v26, %v127_v37 }
  0x26   :  { %v204_v24 = vpack.c.bf16 %v178_v11, %v176_v10  ;;  %v148_v15 = vadd.f32 %v840_v33, %v110_v38  ;;  %v166_v48 = vadd.f32 %v840_v33, %v128_v41  ;;  %v179_v49 = vmax.f32 %v147_v42, 0.0 }
  0x27   :  { %v197_v21 = vmax.f32 %v165_v45, 0.0 }
  0x28   :  { %v180_v52 = vmax.f32 %v148_v15, 0.0  ;;  %v198_v55 = vmax.f32 %v166_v48, 0.0 }
  0x31   :  { %372 = vmatmul.bf16.gmra.mxu0 %v201_v46  ;;  %392 = vmatmul.bf16.gmra.mxu2 %v209_v47  ;;  %v150_v46 = vadd.f32 %v840_v33, %v112_v39  ;;  %v164_v47 = vadd.f32 %v840_v33, %v126_v40  ;;  %v957_v33 = vld [vmem:[%s1024_s4] ss:$0 sm:$0xff] }
  0x32   :  { %421 = vmatmul.bf16.gmra.mxu1 %v202_v50  ;;  %441 = vmatmul.bf16.gmra.mxu3 %v210_v51  ;;  %v181_v50 = vmax.f32 %v149_v43, 0.0  ;;  %v195_v51 = vmax.f32 %v163_v44, 0.0 }
  0x33   :  { %v182_v53 = vmax.f32 %v150_v46, 0.0  ;;  %v196_v54 = vmax.f32 %v164_v47, 0.0 }
  0x34   :  { %v205_v56 = vpack.c.bf16 %v181_v50, %v179_v49  ;;  %v213_v57 = vpack.c.bf16 %v197_v21, %v195_v51 }
  0x35   :  { %v206_v58 = vpack.c.bf16 %v182_v53, %v180_v52  ;;  %v214_v26 = vpack.c.bf16 %v198_v55, %v196_v54 }
  0x41   :  { %377 = vmatmul.bf16.gmra.mxu0 %v203_v19  ;;  %397 = vmatmul.bf16.gmra.mxu2 %v211_v20 }
  0x42   :  { %426 = vmatmul.bf16.gmra.mxu1 %v204_v24  ;;  %446 = vmatmul.bf16.gmra.mxu3 %v212_v29 }
  0x51   :  { %382 = vmatmul.bf16.gmra.mxu0 %v205_v56  ;;  %402 = vmatmul.bf16.gmra.mxu2 %v213_v57 }
  0x52   :  { %431 = vmatmul.bf16.gmra.mxu1 %v206_v58  ;;  %451 = vmatmul.bf16.gmra.mxu3 %v214_v26 }
  0x9e   :  { %v368_v59 = vpop.f32.mrf.mxu0 }
  0x9f   :  { %v417_v60 = vpop.f32.mrf.mxu1 }
  0xa0   :  { %v418_v61 = vadd.f32 %v417_v60, %v368_v59 }
  0xa2   :  { %v512_v0 = vmul.f32 %v957_v33, %v418_v61 }
  0xa4   :  { %v388_v62 = vpop.f32.mrf.mxu2  ;;  %v532_v6 = vadd.f32 %v963_v1, %v512_v0 }
  0xa5   :  { %v437_v63 = vpop.f32.mrf.mxu3 }
  0xa6   :  { %v370_v2 = vpop.f32.mrf.mxu0  ;;  %v438_v4 = vadd.f32 %v437_v63, %v388_v62  ;;  %v548_v12 = vmax.f32 %v532_v6, 0.0 }
  0xa7   :  { %v419_v3 = vpop.f32.mrf.mxu1 }
  0xa8   :  { %v420_v5 = vadd.f32 %v419_v3, %v370_v2  ;;  %v520_v8 = vmul.f32 %v957_v33, %v438_v4 }
  0xaa   :  { %v513_v7 = vmul.f32 %v957_v33, %v420_v5  ;;  %v540_v18 = vadd.f32 %v963_v1, %v520_v8 }
  0xac   :  { %v533_v9 = vadd.f32 %v963_v1, %v513_v7  ;;  %v390_v10 = vpop.f32.mrf.mxu2  ;;  %v556_v24 = vmax.f32 %v540_v18, 0.0 }
  0xad   :  { %v439_v11 = vpop.f32.mrf.mxu3 }
  0xae   :  { %v549_v13 = vmax.f32 %v533_v9, 0.0  ;;  %v440_v14 = vadd.f32 %v439_v11, %v390_v10  ;;  %v373_v16 = vpop.f32.mrf.mxu0 }
  0xaf   :  { %v422_v17 = vpop.f32.mrf.mxu1 }
  0xb0   :  { %v683_v19 = vpack.c.bf16 %v549_v13, %v548_v12  ;;  %v521_v20 = vmul.f32 %v957_v33, %v440_v14  ;;  %v423_v23 = vadd.f32 %v422_v17, %v373_v16 }
  0xb2   :  { %684 = vst [vmem:[%s1026_s6] sm:$0xff] %v683_v19   ;;  %v541_v22 = vadd.f32 %v963_v1, %v521_v20  ;;  %v514_v30 = vmul.f32 %v957_v33, %v423_v23 }
  0xb4   :  { %v557_v25 = vmax.f32 %v541_v22, 0.0  ;;  %v393_v27 = vpop.f32.mrf.mxu2  ;;  %v534_v36 = vadd.f32 %v963_v1, %v514_v30 }
  0xb5   :  { %v442_v28 = vpop.f32.mrf.mxu3 }
  0xb6   :  { %v703_v29 = vpack.c.bf16 %v557_v25, %v556_v24  ;;  %v375_v31 = vpop.f32.mrf.mxu0  ;;  %v443_v34 = vadd.f32 %v442_v28, %v393_v27  ;;  %v550_v42 = vmax.f32 %v534_v36, 0.0 }
  0xb7   :  { %v424_v32 = vpop.f32.mrf.mxu1 }
  0xb8   :  { %723 = vst [vmem:[%s1026_s6 + $0x20] sm:$0xff] %v703_v29   ;;  %v425_v35 = vadd.f32 %v424_v32, %v375_v31  ;;  %v522_v38 = vmul.f32 %v957_v33, %v443_v34 }
  0xba   :  { %v515_v37 = vmul.f32 %v957_v33, %v425_v35  ;;  %v542_v46 = vadd.f32 %v963_v1, %v522_v38 }
  0xbc   :  { %v535_v39 = vadd.f32 %v963_v1, %v515_v37  ;;  %v395_v40 = vpop.f32.mrf.mxu2  ;;  %v558_v51 = vmax.f32 %v542_v46, 0.0 }
  0xbd   :  { %v444_v41 = vpop.f32.mrf.mxu3 }
  0xbe   :  { %v551_v43 = vmax.f32 %v535_v39, 0.0  ;;  %v445_v44 = vadd.f32 %v444_v41, %v395_v40  ;;  %v378_v45 = vpop.f32.mrf.mxu0 }
  0xbf   :  { %v427_v15 = vpop.f32.mrf.mxu1 }
  0xc0   :  { %v688_v47 = vpack.c.bf16 %v551_v43, %v550_v42  ;;  %v523_v48 = vmul.f32 %v957_v33, %v445_v44  ;;  %v428_v50 = vadd.f32 %v427_v15, %v378_v45 }
  0xc2   :  { %720 = vst [vmem:[%s1026_s6 + $0x8] sm:$0xff] %v688_v47   ;;  %v543_v49 = vadd.f32 %v963_v1, %v523_v48  ;;  %v516_v55 = vmul.f32 %v957_v33, %v428_v50 }
  0xc4   :  { %v559_v21 = vmax.f32 %v543_v49, 0.0  ;;  %v398_v52 = vpop.f32.mrf.mxu2  ;;  %v536_v59 = vadd.f32 %v963_v1, %v516_v55 }
  0xc5   :  { %v447_v53 = vpop.f32.mrf.mxu3 }
  0xc6   :  { %v708_v54 = vpack.c.bf16 %v559_v21, %v558_v51  ;;  %v380_v56 = vpop.f32.mrf.mxu0  ;;  %v448_v58 = vadd.f32 %v447_v53, %v398_v52  ;;  %v552_v2 = vmax.f32 %v536_v59, 0.0 }
  0xc7   :  { %v429_v57 = vpop.f32.mrf.mxu1 }
  0xc8   :  { %724 = vst [vmem:[%s1026_s6 + $0x28] sm:$0xff] %v708_v54   ;;  %v430_v26 = vadd.f32 %v429_v57, %v380_v56  ;;  %v524_v61 = vmul.f32 %v957_v33, %v448_v58 }
  0xca   :  { %v517_v60 = vmul.f32 %v957_v33, %v430_v26  ;;  %v544_v7 = vadd.f32 %v963_v1, %v524_v61 }
  0xcc   :  { %v537_v62 = vadd.f32 %v963_v1, %v517_v60  ;;  %v400_v63 = vpop.f32.mrf.mxu2  ;;  %v560_v12 = vmax.f32 %v544_v7, 0.0 }
  0xcd   :  { %v449_v0 = vpop.f32.mrf.mxu3 }
  0xce   :  { %v553_v3 = vmax.f32 %v537_v62, 0.0  ;;  %v450_v4 = vadd.f32 %v449_v0, %v400_v63  ;;  %v383_v5 = vpop.f32.mrf.mxu0 }
  0xcf   :  { %v432_v6 = vpop.f32.mrf.mxu1 }
  0xd0   :  { %v693_v8 = vpack.c.bf16 %v553_v3, %v552_v2  ;;  %v525_v9 = vmul.f32 %v957_v33, %v450_v4  ;;  %v433_v11 = vadd.f32 %v432_v6, %v383_v5 }
  0xd2   :  { %721 = vst [vmem:[%s1026_s6 + $0x10] sm:$0xff] %v693_v8   ;;  %v545_v10 = vadd.f32 %v963_v1, %v525_v9  ;;  %v518_v18 = vmul.f32 %v957_v33, %v433_v11 }
  0xd4   :  { %v561_v13 = vmax.f32 %v545_v10, 0.0  ;;  %v403_v14 = vpop.f32.mrf.mxu2  ;;  %v538_v24 = vadd.f32 %v963_v1, %v518_v18 }
  0xd5   :  { %v452_v16 = vpop.f32.mrf.mxu3 }
  0xd6   :  { %v713_v17 = vpack.c.bf16 %v561_v13, %v560_v12  ;;  %v385_v19 = vpop.f32.mrf.mxu0  ;;  %v453_v22 = vadd.f32 %v452_v16, %v403_v14  ;;  %v554_v31 = vmax.f32 %v538_v24, 0.0 }
  0xd7   :  { %v434_v20 = vpop.f32.mrf.mxu1 }
  0xd8   :  { %725 = vst [vmem:[%s1026_s6 + $0x30] sm:$0xff] %v713_v17   ;;  %v435_v23 = vadd.f32 %v434_v20, %v385_v19  ;;  %v526_v27 = vmul.f32 %v957_v33, %v453_v22 }
  0xda   :  { %v519_v25 = vmul.f32 %v957_v33, %v435_v23  ;;  %v546_v35 = vadd.f32 %v963_v1, %v526_v27 }
  0xdc   :  { %v539_v28 = vadd.f32 %v963_v1, %v519_v25  ;;  %v405_v29 = vpop.f32.mrf.mxu2  ;;  %v562_v39 = vmax.f32 %v546_v35, 0.0 }
  0xdd   :  { %v454_v30 = vpop.f32.mrf.mxu3 }
  0xde   :  { %v555_v32 = vmax.f32 %v539_v28, 0.0  ;;  %v455_v34 = vadd.f32 %v454_v30, %v405_v29 }
  0xe0   :  { %v698_v36 = vpack.c.bf16 %v555_v32, %v554_v31  ;;  %v527_v37 = vmul.f32 %v957_v33, %v455_v34 }
  0xe2   :  { %722 = vst [vmem:[%s1026_s6 + $0x18] sm:$0xff] %v698_v36   ;;  %v547_v38 = vadd.f32 %v963_v1, %v527_v37 }
  0xe4   :  { %v563_v40 = vmax.f32 %v547_v38, 0.0 }
  0xe6   :  { %v718_v41 = vpack.c.bf16 %v563_v40, %v562_v39 }
  0xe8   :  { %726 = vst [vmem:[%s1026_s6 + $0x38] sm:$0xff] %v718_v41  }

// kernel: forward.134
= control target key start
LH: loop header
LB: loop body
LE: loop exit
PB: predicated region body
PF: predicated region fallthrough
CT: control target
= control target key end

     0   :  { %s920_s1 = inlined_call_operand.vmem [shape: bf16[256,128], index: 1, kind: input, shape index: {}]   ;;  %s921_s4 = inlined_call_operand.vmem [shape: f32[1,128], index: 4, kind: input, shape index: {}, may-alias: {4,5}]   ;;  %s922_s5 = inlined_call_operand.vmem [shape: f32[1,128], index: 5, kind: input, shape index: {}, may-alias: {4,5}]   ;;  %s923_s0 = inlined_call_operand.vmem [shape: bf16[128,256], index: 0, kind: input, shape index: {}]   ;;  %s924_s2 = inlined_call_operand.vmem [shape: f32[1,256], index: 2, kind: input, shape index: {}]   ;;  %s925_s3 = inlined_call_operand.vmem [shape: f32[1,256], index: 3, kind: input, shape index: {}]   ;;  %s926_s6 = inlined_call_operand.vmem [shape: bf16[128,128], index: 6, kind: output, shape index: {}]  }
   0x1   :  { %v615_v0 = vld [vmem:[%s920_s1 + $0x38] sm:$0xff]  ;;  %v614_v2 = vld [vmem:[%s920_s1 + $0x30] sm:$0xff]  ;;  %v613_v4 = vld [vmem:[%s920_s1 + $0x28] sm:$0xff] }
   0x2   :  { %v623_v1 = vld [vmem:[%s920_s1 + $0x78] sm:$0xff]  ;;  %359 = vmatpush.bf16.msra.mxu0 %v615_v0  ;;  %671 = vmatpush.bf16.msra.mxu2 %v615_v0  ;;  %v622_v3 = vld [vmem:[%s920_s1 + $0x70] sm:$0xff]  ;;  %v621_v5 = vld [vmem:[%s920_s1 + $0x68] sm:$0xff] }
   0x3   :  { %408 = vmatpush.bf16.msra.mxu1 %v623_v1  ;;  %679 = vmatpush.bf16.msra.mxu3 %v623_v1  ;;  %v43_v6 = vld [vmem:[%s923_s0] sm:$0xff]  ;;  %v44_v7 = vld [vmem:[%s923_s0 + $0x8] sm:$0xff]  ;;  %v611_v22 = vld [vmem:[%s920_s1 + $0x18] sm:$0xff] }
   0x4   :  { %v91_v8 = vld [vmem:[%s924_s2] sm:$0x3]  ;;  %v52_v10 = vld [vmem:[%s923_s0 + $0x48] sm:$0xff]  ;;  %v59_v13 = vunpack.c.l.bf16 %v43_v6  ;;  %v61_v14 = vunpack.c.l.bf16 %v44_v7  ;;  %v60_v19 = vunpack.c.h.bf16 %v43_v6  ;;  %v62_v20 = vunpack.c.h.bf16 %v44_v7  ;;  %v619_v25 = vld [vmem:[%s920_s1 + $0x58] sm:$0xff] }
   0x5   :  { %v51_v9 = vld [vmem:[%s923_s0 + $0x40] sm:$0xff]  ;;  %v761_v15 = vperm.slane %v91_v8, 0  ;;  %v77_v18 = vunpack.c.l.bf16 %v52_v10  ;;  %v766_v21 = vperm.slane %v91_v8, 1  ;;  %v78_v24 = vunpack.c.h.bf16 %v52_v10  ;;  %v610_v34 = vld [vmem:[%s920_s1 + $0x10] sm:$0xff]  ;;  %v609_v44 = vld [vmem:[%s920_s1 + $0x8] sm:$0xff] }
   0x6   :  { %360 = vmatpush.bf16.msra.mxu0 %v614_v2  ;;  %672 = vmatpush.bf16.msra.mxu2 %v614_v2  ;;  %v612_v11 = vld [vmem:[%s920_s1 + $0x20] sm:$0xff]  ;;  %v75_v17 = vunpack.c.l.bf16 %v51_v9  ;;  %v76_v23 = vunpack.c.h.bf16 %v51_v9  ;;  %v618_v37 = vld [vmem:[%s920_s1 + $0x50] sm:$0xff]  ;;  %v617_v47 = vld [vmem:[%s920_s1 + $0x48] sm:$0xff] }
   0x7   :  { %409 = vmatpush.bf16.msra.mxu1 %v622_v3  ;;  %680 = vmatpush.bf16.msra.mxu3 %v622_v3  ;;  %v620_v12 = vld [vmem:[%s920_s1 + $0x60] sm:$0xff]  ;;  %v97_v27 = vmul.f32 %v761_v15, %v59_v13  ;;  %v99_v28 = vmul.f32 %v761_v15, %v61_v14  ;;  %v115_v30 = vmul.f32 %v761_v15, %v77_v18  ;;  %v45_v54 = vld [vmem:[%s923_s0 + $0x10] sm:$0xff]  ;;  %v46_v55 = vld [vmem:[%s923_s0 + $0x18] sm:$0xff] }
   0x8   :  { %v129_v16 = vld [vmem:[%s925_s3] sm:$0x3]  ;;  %v113_v29 = vmul.f32 %v761_v15, %v75_v17  ;;  %v98_v31 = vmul.f32 %v766_v21, %v60_v19  ;;  %v100_v32 = vmul.f32 %v766_v21, %v62_v20  ;;  %v114_v35 = vmul.f32 %v766_v21, %v76_v23  ;;  %v53_v59 = vld [vmem:[%s923_s0 + $0x50] sm:$0xff]  ;;  %v54_v60 = vld [vmem:[%s923_s0 + $0x58] sm:$0xff] }
   0x9   :  { %v774_v26 = vperm.slane %v129_v16, 0  ;;  %v782_v33 = vperm.slane %v129_v16, 1  ;;  %v116_v36 = vmul.f32 %v766_v21, %v78_v24  ;;  %v608_v56 = vld [vmem:[%s920_s1] sm:$0xff]  ;;  %v63_v0 = vunpack.c.l.bf16 %v45_v54 }
   0xa   :  { %361 = vmatpush.bf16.msra.mxu0 %v613_v4  ;;  %673 = vmatpush.bf16.msra.mxu2 %v613_v4  ;;  %v616_v61 = vld [vmem:[%s920_s1 + $0x40] sm:$0xff]  ;;  %v65_v1 = vunpack.c.l.bf16 %v46_v55  ;;  %v79_v3 = vunpack.c.l.bf16 %v53_v59  ;;  %v81_v4 = vunpack.c.l.bf16 %v54_v60  ;;  %v66_v7 = vunpack.c.h.bf16 %v46_v55 }
   0xb   :  { %410 = vmatpush.bf16.msra.mxu1 %v621_v5  ;;  %681 = vmatpush.bf16.msra.mxu3 %v621_v5  ;;  %v135_v38 = vadd.f32 %v774_v26, %v97_v27  ;;  %v137_v39 = vadd.f32 %v774_v26, %v99_v28  ;;  %v151_v40 = vadd.f32 %v774_v26, %v113_v29  ;;  %v64_v5 = vunpack.c.h.bf16 %v45_v54  ;;  %v47_v29 = vld [vmem:[%s923_s0 + $0x20] sm:$0xff] }
   0xc   :  { %v153_v41 = vadd.f32 %v774_v26, %v115_v30  ;;  %v136_v42 = vadd.f32 %v782_v33, %v98_v31  ;;  %v138_v43 = vadd.f32 %v782_v33, %v100_v32  ;;  %v152_v45 = vadd.f32 %v782_v33, %v114_v35  ;;  %v48_v30 = vld [vmem:[%s923_s0 + $0x28] sm:$0xff] }
   0xd   :  { %v154_v46 = vadd.f32 %v782_v33, %v116_v36  ;;  %v167_v48 = vmax.f32 %v135_v38, 0.0  ;;  %v169_v49 = vmax.f32 %v137_v39, 0.0  ;;  %v183_v50 = vmax.f32 %v151_v40, 0.0  ;;  %v55_v36 = vld [vmem:[%s923_s0 + $0x60] sm:$0xff] }
   0xe   :  { %362 = vmatpush.bf16.msra.mxu0 %v612_v11  ;;  %674 = vmatpush.bf16.msra.mxu2 %v612_v11  ;;  %v185_v51 = vmax.f32 %v153_v41, 0.0  ;;  %v168_v52 = vmax.f32 %v136_v42, 0.0  ;;  %v170_v53 = vmax.f32 %v138_v43, 0.0  ;;  %v184_v57 = vmax.f32 %v152_v45, 0.0 }
   0xf   :  { %411 = vmatpush.bf16.msra.mxu1 %v620_v12  ;;  %682 = vmatpush.bf16.msra.mxu3 %v620_v12  ;;  %v186_v58 = vmax.f32 %v154_v46, 0.0  ;;  %v199_v62 = vpack.c.bf16 %v169_v49, %v167_v48  ;;  %v80_v8 = vunpack.c.h.bf16 %v53_v59  ;;  %v82_v9 = vunpack.c.h.bf16 %v54_v60 }
  0x10   :  { %v207_v63 = vpack.c.bf16 %v185_v51, %v183_v50  ;;  %v200_v2 = vpack.c.bf16 %v170_v53, %v168_v52  ;;  %v101_v10 = vmul.f32 %v761_v15, %v63_v0  ;;  %v103_v11 = vmul.f32 %v761_v15, %v65_v1 }
  0x11   :  { %v208_v6 = vpack.c.bf16 %v186_v58, %v184_v57  ;;  %v117_v12 = vmul.f32 %v761_v15, %v79_v3  ;;  %v119_v13 = vmul.f32 %v761_v15, %v81_v4  ;;  %v102_v14 = vmul.f32 %v766_v21, %v64_v5 }
  0x12   :  { %363 = vmatpush.bf16.msra.mxu0 %v611_v22  ;;  %675 = vmatpush.bf16.msra.mxu2 %v611_v22  ;;  %v104_v16 = vmul.f32 %v766_v21, %v66_v7  ;;  %v118_v17 = vmul.f32 %v766_v21, %v80_v8  ;;  %v120_v18 = vmul.f32 %v766_v21, %v82_v9  ;;  %v67_v42 = vunpack.c.l.bf16 %v47_v29 }
  0x13   :  { %412 = vmatpush.bf16.msra.mxu1 %v619_v25  ;;  %683 = vmatpush.bf16.msra.mxu3 %v619_v25  ;;  %v139_v19 = vadd.f32 %v774_v26, %v101_v10  ;;  %v141_v20 = vadd.f32 %v774_v26, %v103_v11  ;;  %v155_v22 = vadd.f32 %v774_v26, %v117_v12  ;;  %v69_v43 = vunpack.c.l.bf16 %v48_v30  ;;  %v49_v12 = vld [vmem:[%s923_s0 + $0x30] sm:$0xff] }
  0x14   :  { %v157_v23 = vadd.f32 %v774_v26, %v119_v13  ;;  %v140_v24 = vadd.f32 %v782_v33, %v102_v14  ;;  %v142_v25 = vadd.f32 %v782_v33, %v104_v16  ;;  %v156_v27 = vadd.f32 %v782_v33, %v118_v17  ;;  %v50_v13 = vld [vmem:[%s923_s0 + $0x38] sm:$0xff]  ;;  %v57_v17 = vld [vmem:[%s923_s0 + $0x70] sm:$0xff] }
  0x15   :  { %v158_v28 = vadd.f32 %v782_v33, %v120_v18  ;;  %v171_v31 = vmax.f32 %v139_v19, 0.0  ;;  %v173_v32 = vmax.f32 %v141_v20, 0.0  ;;  %v68_v48 = vunpack.c.h.bf16 %v47_v29  ;;  %v58_v18 = vld [vmem:[%s923_s0 + $0x78] sm:$0xff] }
  0x16   :  { %364 = vmatpush.bf16.msra.mxu0 %v610_v34  ;;  %676 = vmatpush.bf16.msra.mxu2 %v610_v34  ;;  %v187_v34 = vmax.f32 %v155_v22, 0.0  ;;  %v189_v35 = vmax.f32 %v157_v23, 0.0  ;;  %v172_v38 = vmax.f32 %v140_v24, 0.0  ;;  %v174_v39 = vmax.f32 %v142_v25, 0.0 }
  0x17   :  { %413 = vmatpush.bf16.msra.mxu1 %v618_v37  ;;  %684 = vmatpush.bf16.msra.mxu3 %v618_v37  ;;  %v56_v37 = vld [vmem:[%s923_s0 + $0x68] sm:$0xff]  ;;  %v188_v40 = vmax.f32 %v156_v27, 0.0  ;;  %v190_v41 = vmax.f32 %v158_v28, 0.0  ;;  %v201_v46 = vpack.c.bf16 %v173_v32, %v171_v31  ;;  %v70_v49 = vunpack.c.h.bf16 %v48_v30 }
  0x18   :  { %v85_v45 = vunpack.c.l.bf16 %v56_v37  ;;  %v202_v50 = vpack.c.bf16 %v174_v39, %v172_v38  ;;  %v84_v52 = vunpack.c.h.bf16 %v55_v36  ;;  %v86_v53 = vunpack.c.h.bf16 %v56_v37 }
  0x19   :  { %v210_v51 = vpack.c.bf16 %v190_v41, %v188_v40  ;;  %v105_v54 = vmul.f32 %v761_v15, %v67_v42  ;;  %v107_v55 = vmul.f32 %v761_v15, %v69_v43  ;;  %v106_v58 = vmul.f32 %v766_v21, %v68_v48 }
  0x1a   :  { %365 = vmatpush.bf16.msra.mxu0 %v609_v44  ;;  %677 = vmatpush.bf16.msra.mxu2 %v609_v44  ;;  %v83_v44 = vunpack.c.l.bf16 %v55_v36  ;;  %v123_v57 = vmul.f32 %v761_v15, %v85_v45  ;;  %v108_v59 = vmul.f32 %v766_v21, %v70_v49  ;;  %v122_v60 = vmul.f32 %v766_v21, %v84_v52 }
  0x1b   :  { %414 = vmatpush.bf16.msra.mxu1 %v617_v47  ;;  %685 = vmatpush.bf16.msra.mxu3 %v617_v47  ;;  %v209_v47 = vpack.c.bf16 %v189_v35, %v187_v34  ;;  %v71_v22 = vunpack.c.l.bf16 %v49_v12  ;;  %v73_v23 = vunpack.c.l.bf16 %v50_v13  ;;  %v87_v25 = vunpack.c.l.bf16 %v57_v17 }
  0x1c   :  { %v161_v1 = vadd.f32 %v774_v26, %v123_v57  ;;  %v146_v3 = vadd.f32 %v782_v33, %v108_v59  ;;  %v160_v4 = vadd.f32 %v782_v33, %v122_v60  ;;  %v89_v27 = vunpack.c.l.bf16 %v58_v18 }
  0x1d   :  { %v72_v28 = vunpack.c.h.bf16 %v49_v12  ;;  %v74_v30 = vunpack.c.h.bf16 %v50_v13  ;;  %v88_v31 = vunpack.c.h.bf16 %v57_v17  ;;  %v90_v32 = vunpack.c.h.bf16 %v58_v18 }
  0x1e   :  { %366 = vmatpush.bf16.msra.mxu0 %v608_v56  ;;  %678 = vmatpush.bf16.msra.mxu2 %v608_v56  ;;  %v121_v56 = vmul.f32 %v761_v15, %v83_v44  ;;  %v193_v9 = vmax.f32 %v161_v1, 0.0  ;;  %v178_v11 = vmax.f32 %v146_v3, 0.0  ;;  %v192_v14 = vmax.f32 %v160_v4, 0.0 }
  0x1f   :  { %415 = vmatpush.bf16.msra.mxu1 %v616_v61  ;;  %686 = vmatpush.bf16.msra.mxu3 %v616_v61  ;;  %v124_v61 = vmul.f32 %v766_v21, %v86_v53  ;;  %v109_v34 = vmul.f32 %v761_v15, %v71_v22  ;;  %v111_v35 = vmul.f32 %v761_v15, %v73_v23 }
  0x20   :  { %v159_v0 = vadd.f32 %v774_v26, %v121_v56  ;;  %v125_v36 = vmul.f32 %v761_v15, %v87_v25  ;;  %v127_v37 = vmul.f32 %v761_v15, %v89_v27  ;;  %v110_v38 = vmul.f32 %v766_v21, %v72_v28 }
  0x21   :  { %367 = vmatmul.bf16.vlgmr.msra.gmra.mxu0 %v199_v62  ;;  %387 = vmatmul.bf16.vlgmr.msra.gmra.mxu2 %v207_v63  ;;  %v143_v62 = vadd.f32 %v774_v26, %v105_v54  ;;  %v145_v63 = vadd.f32 %v774_v26, %v107_v55  ;;  %v162_v5 = vadd.f32 %v782_v33, %v124_v61 }
  0x22   :  { %416 = vmatmul.bf16.vlgmr.msra.gmra.mxu1 %v200_v2  ;;  %436 = vmatmul.bf16.vlgmr.msra.gmra.mxu3 %v208_v6  ;;  %v144_v2 = vadd.f32 %v782_v33, %v106_v58  ;;  %v191_v8 = vmax.f32 %v159_v0, 0.0  ;;  %v112_v39 = vmul.f32 %v766_v21, %v74_v30  ;;  %v126_v40 = vmul.f32 %v766_v21, %v88_v31 }
  0x23   :  { %v175_v6 = vmax.f32 %v143_v62, 0.0  ;;  %v177_v7 = vmax.f32 %v145_v63, 0.0  ;;  %v194_v16 = vmax.f32 %v162_v5, 0.0  ;;  %v128_v41 = vmul.f32 %v766_v21, %v90_v32 }
  0x24   :  { %v176_v10 = vmax.f32 %v144_v2, 0.0  ;;  %v211_v20 = vpack.c.bf16 %v193_v9, %v191_v8  ;;  %v147_v42 = vadd.f32 %v774_v26, %v109_v34  ;;  %v149_v43 = vadd.f32 %v774_v26, %v111_v35 }
  0x25   :  { %v203_v19 = vpack.c.bf16 %v177_v7, %v175_v6  ;;  %v212_v29 = vpack.c.bf16 %v194_v16, %v192_v14  ;;  %v163_v44 = vadd.f32 %v774_v26, %v125_v36  ;;  %v165_v45 = vadd.f32 %v774_v26, %v127_v37 }
  0x26   :  { %v204_v24 = vpack.c.bf16 %v178_v11, %v176_v10  ;;  %v148_v15 = vadd.f32 %v782_v33, %v110_v38  ;;  %v166_v48 = vadd.f32 %v782_v33, %v128_v41  ;;  %v179_v49 = vmax.f32 %v147_v42, 0.0 }
  0x27   :  { %v197_v21 = vmax.f32 %v165_v45, 0.0 }
  0x28   :  { %v180_v52 = vmax.f32 %v148_v15, 0.0  ;;  %v198_v55 = vmax.f32 %v166_v48, 0.0 }
  0x31   :  { %372 = vmatmul.bf16.gmra.mxu0 %v201_v46  ;;  %392 = vmatmul.bf16.gmra.mxu2 %v209_v47  ;;  %v150_v46 = vadd.f32 %v782_v33, %v112_v39  ;;  %v164_v47 = vadd.f32 %v782_v33, %v126_v40 }
  0x32   :  { %421 = vmatmul.bf16.gmra.mxu1 %v202_v50  ;;  %441 = vmatmul.bf16.gmra.mxu3 %v210_v51  ;;  %v181_v50 = vmax.f32 %v149_v43, 0.0  ;;  %v195_v51 = vmax.f32 %v163_v44, 0.0 }
  0x33   :  { %v182_v53 = vmax.f32 %v150_v46, 0.0  ;;  %v196_v54 = vmax.f32 %v164_v47, 0.0 }
  0x34   :  { %v205_v56 = vpack.c.bf16 %v181_v50, %v179_v49  ;;  %v213_v57 = vpack.c.bf16 %v197_v21, %v195_v51 }
  0x35   :  { %v206_v58 = vpack.c.bf16 %v182_v53, %v180_v52  ;;  %v214_v26 = vpack.c.bf16 %v198_v55, %v196_v54 }
  0x41   :  { %377 = vmatmul.bf16.gmra.mxu0 %v203_v19  ;;  %397 = vmatmul.bf16.gmra.mxu2 %v211_v20 }
  0x42   :  { %426 = vmatmul.bf16.gmra.mxu1 %v204_v24  ;;  %446 = vmatmul.bf16.gmra.mxu3 %v212_v29 }
  0x51   :  { %382 = vmatmul.bf16.gmra.mxu0 %v205_v56  ;;  %402 = vmatmul.bf16.gmra.mxu2 %v213_v57 }
  0x52   :  { %431 = vmatmul.bf16.gmra.mxu1 %v206_v58  ;;  %451 = vmatmul.bf16.gmra.mxu3 %v214_v26 }
  0x9e   :  { %v368_v59 = vpop.f32.mrf.mxu0 }
  0x9f   :  { %v417_v60 = vpop.f32.mrf.mxu1 }
  0xa0   :  { %v418_v0 = vadd.f32 %v417_v60, %v368_v59 }
  0xa4   :  { %v388_v61 = vpop.f32.mrf.mxu2 }
  0xa5   :  { %v437_v33 = vpop.f32.mrf.mxu3 }
  0xa6   :  { %v370_v62 = vpop.f32.mrf.mxu0  ;;  %v438_v5 = vadd.f32 %v437_v33, %v388_v61 }
  0xa7   :  { %v419_v63 = vpop.f32.mrf.mxu1 }
  0xa8   :  { %v420_v1 = vadd.f32 %v419_v63, %v370_v62 }
  0xaa   :  { %v627_v2 = vpack.c.bf16 %v420_v1, %v418_v0 }
  0xac   :  { %628 = vst [vmem:[%s926_s6] sm:$0xff] %v627_v2   ;;  %v390_v3 = vpop.f32.mrf.mxu2 }
  0xad   :  { %v439_v4 = vpop.f32.mrf.mxu3 }
  0xae   :  { %v440_v6 = vadd.f32 %v439_v4, %v390_v3  ;;  %v373_v7 = vpop.f32.mrf.mxu0 }
  0xaf   :  { %v422_v8 = vpop.f32.mrf.mxu1 }
  0xb0   :  { %v647_v9 = vpack.c.bf16 %v440_v6, %v438_v5  ;;  %v423_v14 = vadd.f32 %v422_v8, %v373_v7 }
  0xb2   :  { %667 = vst [vmem:[%s926_s6 + $0x20] sm:$0xff] %v647_v9  }
  0xb4   :  { %v393_v10 = vpop.f32.mrf.mxu2 }
  0xb5   :  { %v442_v11 = vpop.f32.mrf.mxu3 }
  0xb6   :  { %v375_v12 = vpop.f32.mrf.mxu0  ;;  %v443_v20 = vadd.f32 %v442_v11, %v393_v10 }
  0xb7   :  { %v424_v13 = vpop.f32.mrf.mxu1 }
  0xb8   :  { %v425_v16 = vadd.f32 %v424_v13, %v375_v12 }
  0xba   :  { %v632_v17 = vpack.c.bf16 %v425_v16, %v423_v14 }
  0xbc   :  { %664 = vst [vmem:[%s926_s6 + $0x8] sm:$0xff] %v632_v17   ;;  %v395_v18 = vpop.f32.mrf.mxu2 }
  0xbd   :  { %v444_v19 = vpop.f32.mrf.mxu3 }
  0xbe   :  { %v445_v22 = vadd.f32 %v444_v19, %v395_v18  ;;  %v378_v23 = vpop.f32.mrf.mxu0 }
  0xbf   :  { %v427_v24 = vpop.f32.mrf.mxu1 }
  0xc0   :  { %v652_v25 = vpack.c.bf16 %v445_v22, %v443_v20  ;;  %v428_v31 = vadd.f32 %v427_v24, %v378_v23 }
  0xc2   :  { %668 = vst [vmem:[%s926_s6 + $0x28] sm:$0xff] %v652_v25  }
  0xc4   :  { %v398_v27 = vpop.f32.mrf.mxu2 }
  0xc5   :  { %v447_v28 = vpop.f32.mrf.mxu3 }
  0xc6   :  { %v380_v29 = vpop.f32.mrf.mxu0  ;;  %v448_v37 = vadd.f32 %v447_v28, %v398_v27 }
  0xc7   :  { %v429_v30 = vpop.f32.mrf.mxu1 }
  0xc8   :  { %v430_v32 = vadd.f32 %v429_v30, %v380_v29 }
  0xca   :  { %v637_v34 = vpack.c.bf16 %v430_v32, %v428_v31 }
  0xcc   :  { %665 = vst [vmem:[%s926_s6 + $0x10] sm:$0xff] %v637_v34   ;;  %v400_v35 = vpop.f32.mrf.mxu2 }
  0xcd   :  { %v449_v36 = vpop.f32.mrf.mxu3 }
  0xce   :  { %v450_v38 = vadd.f32 %v449_v36, %v400_v35  ;;  %v383_v39 = vpop.f32.mrf.mxu0 }
  0xcf   :  { %v432_v40 = vpop.f32.mrf.mxu1 }
  0xd0   :  { %v657_v41 = vpack.c.bf16 %v450_v38, %v448_v37  ;;  %v433_v15 = vadd.f32 %v432_v40, %v383_v39 }
  0xd2   :  { %669 = vst [vmem:[%s926_s6 + $0x30] sm:$0xff] %v657_v41  }
  0xd4   :  { %v403_v42 = vpop.f32.mrf.mxu2 }
  0xd5   :  { %v452_v43 = vpop.f32.mrf.mxu3 }
  0xd6   :  { %v385_v44 = vpop.f32.mrf.mxu0  ;;  %v453_v50 = vadd.f32 %v452_v43, %v403_v42 }
  0xd7   :  { %v434_v45 = vpop.f32.mrf.mxu1 }
  0xd8   :  { %v435_v46 = vadd.f32 %v434_v45, %v385_v44 }
  0xda   :  { %v642_v47 = vpack.c.bf16 %v435_v46, %v433_v15 }
  0xdc   :  { %666 = vst [vmem:[%s926_s6 + $0x18] sm:$0xff] %v642_v47   ;;  %v405_v48 = vpop.f32.mrf.mxu2 }
  0xdd   :  { %v454_v49 = vpop.f32.mrf.mxu3 }
  0xde   :  { %v455_v51 = vadd.f32 %v454_v49, %v405_v48 }
  0xe0   :  { %v662_v21 = vpack.c.bf16 %v455_v51, %v453_v50 }
  0xe2   :  { %670 = vst [vmem:[%s926_s6 + $0x38] sm:$0xff] %v662_v21  }

// kernel: forward.135
= control target key start
LH: loop header
LB: loop body
LE: loop exit
PB: predicated region body
PF: predicated region fallthrough
CT: control target
= control target key end

     0   :  { %s350_s1 = inlined_call_operand.vmem [shape: bf16[128,128], index: 1, kind: input, shape index: {}]   ;;  %s351_s2 = inlined_call_operand.vmem [shape: f32[1,128], index: 2, kind: input, shape index: {}]   ;;  %s352_s3 = inlined_call_operand.vmem [shape: f32[1,128], index: 3, kind: input, shape index: {}]   ;;  %s353_s4 = inlined_call_operand.vmem [shape: f32[1,128], index: 4, kind: input, shape index: {}]   ;;  %s354_s5 = inlined_call_operand.vmem [shape: f32[1,128], index: 5, kind: input, shape index: {}]   ;;  %s355_s0 = inlined_call_operand.vmem [shape: bf16[32,128], index: 0, kind: input, shape index: {}]   ;;  %s356_s6 = inlined_call_operand.vmem [shape: bf16[32,128], index: 6, kind: output, shape index: {}]  }
   0x1   :  { %v234_v0 = vld [vmem:[%s350_s1 + $0x38] sm:$0xff]  ;;  %v233_v1 = vld [vmem:[%s350_s1 + $0x30] sm:$0xff]  ;;  %v232_v2 = vld [vmem:[%s350_s1 + $0x28] sm:$0xff] }
   0x2   :  { %129 = vmatpush.bf16.msra.mxu0 %v234_v0  ;;  %255 = vmatpush.bf16.msra.mxu1 %v234_v0  ;;  %v231_v3 = vld [vmem:[%s350_s1 + $0x20] sm:$0xff]  ;;  %v253_v5 = vld [vmem:[%s355_s0 + $0x8] sm:$0xff]   ;;  %v230_v11 = vld [vmem:[%s350_s1 + $0x18] sm:$0xff] }
   0x3   :  { %v236_v4 = vld [vmem:[%s355_s0] sm:$0xff]   ;;  %v241_v9 = vunpack.c.l.bf16 %v253_v5  ;;  %v242_v10 = vunpack.c.h.bf16 %v253_v5  ;;  %v229_v17 = vld [vmem:[%s350_s1 + $0x10] sm:$0xff]  ;;  %v228_v22 = vld [vmem:[%s350_s1 + $0x8] sm:$0xff] }
   0x4   :  { %v237_v6 = vunpack.c.l.bf16 %v236_v4  ;;  %v238_v7 = vunpack.c.h.bf16 %v236_v4  ;;  %v263_v8 = vld [vmem:[%s351_s2] ss:$0 sm:$0xff] }
   0x5   :  { %v264_v14 = vld [vmem:[%s352_s3] ss:$0 sm:$0xff]  ;;  %v45_v15 = vmul.f32 %v263_v8, %v241_v9  ;;  %v46_v16 = vmul.f32 %v263_v8, %v242_v10 }
   0x6   :  { %130 = vmatpush.bf16.msra.mxu0 %v233_v1  ;;  %256 = vmatpush.bf16.msra.mxu1 %v233_v1  ;;  %v43_v12 = vmul.f32 %v263_v8, %v237_v6  ;;  %v44_v13 = vmul.f32 %v263_v8, %v238_v7  ;;  %v227_v27 = vld [vmem:[%s350_s1] sm:$0xff] }
   0x7   :  { %v53_v20 = vadd.f32 %v264_v14, %v45_v15  ;;  %v54_v21 = vadd.f32 %v264_v14, %v46_v16  ;;  %v265_v32 = vld [vmem:[%s353_s4] ss:$0 sm:$0xff] }
   0x8   :  { %v51_v18 = vadd.f32 %v264_v14, %v43_v12  ;;  %v52_v19 = vadd.f32 %v264_v14, %v44_v13  ;;  %v266_v34 = vld [vmem:[%s354_s5] ss:$0 sm:$0xff] }
   0x9   :  { %v57_v25 = vmax.f32 %v53_v20, 0.0  ;;  %v58_v26 = vmax.f32 %v54_v21, 0.0 }
   0xa   :  { %131 = vmatpush.bf16.msra.mxu0 %v232_v2  ;;  %257 = vmatpush.bf16.msra.mxu1 %v232_v2  ;;  %v55_v23 = vmax.f32 %v51_v18, 0.0  ;;  %v56_v24 = vmax.f32 %v52_v19, 0.0 }
   0xb   :  { %v60_v29 = vpack.c.bf16 %v58_v26, %v57_v25 }
   0xc   :  { %v59_v28 = vpack.c.bf16 %v56_v24, %v55_v23 }
   0xe   :  { %132 = vmatpush.bf16.msra.mxu0 %v231_v3  ;;  %258 = vmatpush.bf16.msra.mxu1 %v231_v3 }
  0x12   :  { %133 = vmatpush.bf16.msra.mxu0 %v230_v11  ;;  %259 = vmatpush.bf16.msra.mxu1 %v230_v11 }
  0x16   :  { %134 = vmatpush.bf16.msra.mxu0 %v229_v17  ;;  %260 = vmatpush.bf16.msra.mxu1 %v229_v17 }
  0x1a   :  { %135 = vmatpush.bf16.msra.mxu0 %v228_v22  ;;  %261 = vmatpush.bf16.msra.mxu1 %v228_v22 }
  0x1e   :  { %136 = vmatpush.bf16.msra.mxu0 %v227_v27  ;;  %262 = vmatpush.bf16.msra.mxu1 %v227_v27 }
  0x21   :  { %137 = vmatmul.bf16.vlgmr.msra.gmra.mxu0 %v59_v28  ;;  %142 = vmatmul.bf16.vlgmr.msra.gmra.mxu1 %v60_v29 }
  0x9e   :  { %v138_v30 = vpop.f32.mrf.mxu0  ;;  %v143_v31 = vpop.f32.mrf.mxu1 }
  0x9f   :  { %v167_v33 = vmul.f32 %v265_v32, %v138_v30  ;;  %v169_v35 = vmul.f32 %v265_v32, %v143_v31 }
  0xa1   :  { %v175_v38 = vadd.f32 %v266_v34, %v167_v33  ;;  %v177_v39 = vadd.f32 %v266_v34, %v169_v35 }
  0xa3   :  { %v179_v44 = vmax.f32 %v175_v38, 0.0  ;;  %v181_v45 = vmax.f32 %v177_v39, 0.0 }
  0xa6   :  { %v140_v36 = vpop.f32.mrf.mxu0  ;;  %v145_v37 = vpop.f32.mrf.mxu1 }
  0xa7   :  { %v168_v40 = vmul.f32 %v265_v32, %v140_v36  ;;  %v170_v41 = vmul.f32 %v265_v32, %v145_v37 }
  0xa9   :  { %v176_v42 = vadd.f32 %v266_v34, %v168_v40  ;;  %v178_v43 = vadd.f32 %v266_v34, %v170_v41 }
  0xab   :  { %v180_v46 = vmax.f32 %v176_v42, 0.0  ;;  %v182_v47 = vmax.f32 %v178_v43, 0.0 }
  0xad   :  { %v246_v48 = vpack.c.bf16 %v180_v46, %v179_v44  ;;  %v251_v49 = vpack.c.bf16 %v182_v47, %v181_v45 }
  0xaf   :  { %247 = vst [vmem:[%s356_s6] sm:$0xff] %v246_v48  }
  0xb0   :  { %254 = vst [vmem:[%s356_s6 + $0x8] sm:$0xff] %v251_v49  }

// kernel: forward.136
= control target key start
LH: loop header
LB: loop body
LE: loop exit
PB: predicated region body
PF: predicated region fallthrough
CT: control target
= control target key end

     0   :  { %s1211_s21 = smov 0   ;;  %s1213_s22 = smov 0   ;;  %s1324_s0 = inlined_call_operand.vmem [shape: bf16[32,1152], index: 0, kind: input, shape index: {}]   ;;  %s1325_s1 = inlined_call_operand.vmem [shape: bf16[1152,128], index: 1, kind: input, shape index: {}]   ;;  %s1326_s2 = inlined_call_operand.vmem [shape: f32[1,1152], index: 2, kind: input, shape index: {}, may-alias: {2,3}]   ;;  %s1327_s3 = inlined_call_operand.vmem [shape: f32[1,1152], index: 3, kind: input, shape index: {}, may-alias: {2,3}]   ;;  %s1328_s4 = inlined_call_operand.vmem [shape: f32[1,128], index: 4, kind: input, shape index: {}, may-alias: {4,5}]   ;;  %s1329_s5 = inlined_call_operand.vmem [shape: f32[1,128], index: 5, kind: input, shape index: {}, may-alias: {4,5}]   ;;  %s1330_s6 = inlined_call_operand.vmem [shape: bf16[32,128], index: 6, kind: output, shape index: {}]  }
   0x1   :  { %s1215_s23 = smov 0   ;;  %s1217_s24 = smov 0  }
   0x2   :  { %s1219_s2 = smov 0  }
   0x3 LB: > { %s28_s3 = sadd.s32 1, %s1169_s24  ;;  %p51_p1 = scmp.ne.s32.totalorder %s1161_s22, %s1157_s21  ;;  %s1173_s2 = sphi %s1219_s2, %s16_s2   ;;  %s1169_s24 = sphi %s1217_s24, %s1334_s24   ;;  %s1165_s23 = sphi %s1215_s23, %s1333_s23   ;;  %s1161_s22 = sphi %s1213_s22, %s1332_s22   ;;  %s1157_s21 = sphi %s1211_s21, %s1331_s21  }
   0x4   : > { %p29_p0 = scmp.ge.s32.totalorder %s28_s3, 3  ;;  %p52_p2 = scmp.eq.s32.totalorder %s1173_s2, 0 }
   0x5   : > { %s44_s5 = sadd.s32 1, %s1161_s22  ;;  %p904_p5 = scmp.ge.s32.totalorder %s1173_s2, 3 }
   0x6   : > { %s1336_s3 = smov (%p29_p0, %s28_s3), 0  ;;  %p53_p3 = por %p52_p2, %p51_p1 }
   0x7   : > { %s40_s4 = ssub.s32 %s1169_s24, %s1336_s3  ;;  %249 = sbr.rel (%p904_p5) target bundleno = 25 (0x19), region = 24 }
   0x8   : > { %p42_p4 = scmp.eq.s32.totalorder %s40_s4, 0 }
   0xa   : > { %s1246_s25 = scalar_select %p42_p4, %s1161_s22, %s44_s5  }
   0xc   : > { %252 = sbr.rel (!%p53_p3) target bundleno = 25 (0x19), region = 28  ;;  %s254_s26 = sand.u32 (%p53_p3), 1, %s1161_s22  }
   0xd   : > { %s1042_s27 = smul.u32 (%p53_p3), 12, %s1169_s24 }
   0xe   : > { %s1092_s28 = smul.u32 (%p53_p3), 48, %s254_s26 }
   0xf   : > { %s262_s7 = scalar_lea.vmem (%p53_p3), %s1324_s0, %s1042_s27 }
  0x10   : > { %v277_v0 = vld [vmem:[%s262_s7] sm:$0xff] (%p53_p3)  ;;  %v281_v2 = vld [vmem:[%s262_s7 + $0x48] sm:$0xff] (%p53_p3)  ;;  %s256_s8 = scalar_lea.vmem (%p53_p3), [#allocation3], %s1092_s28  ;;  %v910_v6 = vld [vmem:[%s262_s7 + $0x50] sm:$0xf] (%p53_p3) }
  0x11   : > { %v279_v1 = vld [vmem:[%s262_s7 + $0x24] sm:$0xff]  ;;  %278 = vst [vmem:[%s256_s8] sm:$0xff] %v277_v0  ;;  %v283_v3 = vld [vmem:[%s262_s7 + $0x6c] sm:$0xff]  ;;  %v912_v7 = vld [vmem:[%s262_s7 + $0x74] sm:$0xf] }
  0x12   : > { %280 = vst [vmem:[%s256_s8 + $0xc] sm:$0xff] %v279_v1  ;;  %v906_v4 = vld [vmem:[%s262_s7 + $0x8] sm:$0xf]  ;;  %v908_v5 = vld [vmem:[%s262_s7 + $0x2c] sm:$0xf] }
  0x13   : > { %282 = vst [vmem:[%s256_s8 + $0x18] sm:$0xff] %v281_v2 }
  0x14   : > { %284 = vst [vmem:[%s256_s8 + $0x24] sm:$0xff] %v283_v3 }
  0x15   : > { %907 = vst [vmem:[%s256_s8 + $0x8] sm:$0xf] %v906_v4 }
  0x16   : > { %909 = vst [vmem:[%s256_s8 + $0x14] sm:$0xf] %v908_v5 }
  0x17   : > { %911 = vst [vmem:[%s256_s8 + $0x20] sm:$0xf] %v910_v6 }
  0x18   : > { %913 = vst [vmem:[%s256_s8 + $0x2c] sm:$0xf] %v912_v7 }
  0x19 PF: > { %p914_p6 = scmp.ge.s32.totalorder %s1173_s2, 1  ;;  %p333_p7 = scmp.lt.s32.totalorder %s1173_s2, 4 }
  0x1b   : > { %p334_p8 = pnand %p914_p6, %p333_p7 }
  0x1c   : > { %s340_s9 = sand.u32 (!%p334_p8), 1, %s1157_s21   ;;  %s396_s10 = smul.u32 (!%p334_p8), 48, %s1165_s23 }
  0x1d   : > { %337 = sbr.rel (%p334_p8) target bundleno = 249 (0xf9), region = 66  ;;  %p916_p10 = scmp.ne.s32.totalorder (!%p334_p8), %s1165_s23, 0 }
  0x1e   : > { %s1093_s11 = smul.u32 (!%p334_p8), 48, %s340_s9  ;;  %p397_p9 = scmp.lt.s32.totalorder (!%p334_p8), %s396_s10, 143 }
  0x20   : > { %s1263_s16 = scalar_lea.vmem (!%p334_p8), [#allocation3], %s1093_s11 }
  0x22   : > { %s1338_s10 = smov (!%p397_p9, %s396_s10), 143  ;;  %433 = sbr.rel (%p916_p10) target bundleno = 44 (0x2c), region = 74 }
  0x23   : > { %s915_s12 = sshll.u32 %s1338_s10, 2 }
  0x24   : > { %s1261_s15 = scalar_lea.vmem %s1325_s1, %s915_s12 }
  0x27   : > { %v1175_v8 = vmov 0.0  }
  0x28   : > { %434 = vst [vmem:[#allocation2 + $0x10] sm:$0xff] %v1175_v8 }
  0x29   : > { %435 = vst [vmem:[#allocation2] sm:$0xff] %v1175_v8 }
  0x2a   : > { %436 = vst [vmem:[#allocation2 + $0x18] sm:$0xff] %v1175_v8 }
  0x2b   : > { %437 = vst [vmem:[#allocation2 + $0x8] sm:$0xff] %v1175_v8 }
  0x2c PF: > { %v1056_v9 = vld [vmem:[%s1261_s15 + $0x38] sm:$0xff]  ;;  %v1055_v12 = vld [vmem:[%s1261_s15 + $0x30] sm:$0xff]  ;;  %v1054_v15 = vld [vmem:[%s1261_s15 + $0x28] sm:$0xff]  ;;  %p1037_p11 = scmp.ne.s32.totalorder %s1165_s23, 2 }
  0x2d   : > { %v1064_v10 = vld [vmem:[%s1261_s15 + $0x78] sm:$0xff]  ;;  %674 = vmatpush.bf16.msra.mxu0 %v1056_v9  ;;  %v1063_v13 = vld [vmem:[%s1261_s15 + $0x70] sm:$0xff]  ;;  %1084 = vmatpush.bf16.msra.mxu3 %v1056_v9  ;;  %v1062_v16 = vld [vmem:[%s1261_s15 + $0x68] sm:$0xff] }
  0x2e   : > { %v1072_v11 = vld [vmem:[%s1261_s15 + $0xb8] sm:$0xff]  ;;  %693 = vmatpush.bf16.msra.mxu1 %v1064_v10  ;;  %v1071_v14 = vld [vmem:[%s1261_s15 + $0xb0] sm:$0xff]  ;;  %v1070_v17 = vld [vmem:[%s1261_s15 + $0xa8] sm:$0xff] }
  0x2f   : > { %712 = vmatpush.bf16.msra.mxu2 %v1072_v11  ;;  %v1053_v18 = vld [vmem:[%s1261_s15 + $0x20] sm:$0xff]  ;;  %v1052_v21 = vld [vmem:[%s1261_s15 + $0x18] sm:$0xff]  ;;  %v1051_v24 = vld [vmem:[%s1261_s15 + $0x10] sm:$0xff] }
  0x30   : > { %v1061_v19 = vld [vmem:[%s1261_s15 + $0x60] sm:$0xff]  ;;  %v1060_v22 = vld [vmem:[%s1261_s15 + $0x58] sm:$0xff]  ;;  %v1059_v25 = vld [vmem:[%s1261_s15 + $0x50] sm:$0xff] }
  0x31   : > { %675 = vmatpush.bf16.msra.mxu0 %v1055_v12  ;;  %1085 = vmatpush.bf16.msra.mxu3 %v1055_v12  ;;  %v1069_v20 = vld [vmem:[%s1261_s15 + $0xa0] sm:$0xff]  ;;  %v1068_v23 = vld [vmem:[%s1261_s15 + $0x98] sm:$0xff]  ;;  %v1067_v26 = vld [vmem:[%s1261_s15 + $0x90] sm:$0xff] }
  0x32   : > { %694 = vmatpush.bf16.msra.mxu1 %v1063_v13  ;;  %v1050_v27 = vld [vmem:[%s1261_s15 + $0x8] sm:$0xff]  ;;  %v1049_v30 = vld [vmem:[%s1261_s15] sm:$0xff]  ;;  %v446_v54 = vld [vmem:[#allocation2 + $0x10] sm:$0xff] }
  0x33   : > { %713 = vmatpush.bf16.msra.mxu2 %v1071_v14  ;;  %v1058_v28 = vld [vmem:[%s1261_s15 + $0x48] sm:$0xff]  ;;  %v1057_v31 = vld [vmem:[%s1261_s15 + $0x40] sm:$0xff]  ;;  %v448_v4 = vld [vmem:[#allocation2 + $0x18] sm:$0xff] }
  0x34   : > { %v1066_v29 = vld [vmem:[%s1261_s15 + $0x88] sm:$0xff]  ;;  %v1065_v32 = vld [vmem:[%s1261_s15 + $0x80] sm:$0xff] }
  0x35   : > { %676 = vmatpush.bf16.msra.mxu0 %v1054_v15  ;;  %1086 = vmatpush.bf16.msra.mxu3 %v1054_v15  ;;  %v919_v33 = vld [vmem:[%s1263_s16] sm:$0xf]  ;;  %v1044_v34 = vld [vmem:[%s1263_s16 + $0x8] sm:$0xf0]  ;;  %v1043_v35 = vld [vmem:[%s1263_s16 + $0x4] sm:$0xf] }
  0x36   : > { %695 = vmatpush.bf16.msra.mxu1 %v1062_v16  ;;  %v921_v36 = vld [vmem:[%s1263_s16 + $0xc] sm:$0xf0]  ;;  %v927_v37 = vld [vmem:[%s1263_s16 + $0x8] sm:$0xf]  ;;  %v1045_v38 = vld [vmem:[%s1263_s16 + $0x10] sm:$0xf0]  ;;  %v920_v41 = vor.u32 %v1044_v34, %v919_v33 }
  0x37   : > { %714 = vmatpush.bf16.msra.mxu2 %v1070_v17  ;;  %v931_v39 = vld [vmem:[%s1263_s16 + $0x18] sm:$0xf]  ;;  %v1047_v40 = vld [vmem:[%s1263_s16 + $0x20] sm:$0xf0]  ;;  %v924_v42 = vor.u32 %v1043_v35, %v921_v36  ;;  %v928_v43 = vor.u32 %v1045_v38, %v927_v37  ;;  %v1046_v45 = vld [vmem:[%s1263_s16 + $0x1c] sm:$0xf] }
  0x38   : > { %v932_v44 = vor.u32 %v1047_v40, %v931_v39  ;;  %v933_v46 = vld [vmem:[%s1263_s16 + $0x24] sm:$0xf0]  ;;  %v939_v47 = vld [vmem:[%s1263_s16 + $0x20] sm:$0xf]  ;;  %v1048_v48 = vld [vmem:[%s1263_s16 + $0x28] sm:$0xf0] }
  0x39   : > { %677 = vmatpush.bf16.msra.mxu0 %v1053_v18  ;;  %1087 = vmatpush.bf16.msra.mxu3 %v1053_v18  ;;  %v936_v49 = vor.u32 %v1046_v45, %v933_v46  ;;  %v940_v50 = vor.u32 %v1048_v48, %v939_v47  ;;  %v447_v61 = vld [vmem:[#allocation2] sm:$0xff]  ;;  %v449_v11 = vld [vmem:[#allocation2 + $0x8] sm:$0xff] }
  0x3a   : > { %696 = vmatpush.bf16.msra.mxu1 %v1061_v19 }
  0x3b   : > { %715 = vmatpush.bf16.msra.mxu2 %v1069_v20 }
  0x3d   : > { %678 = vmatpush.bf16.msra.mxu0 %v1052_v21  ;;  %1088 = vmatpush.bf16.msra.mxu3 %v1052_v21 }
  0x3e   : > { %697 = vmatpush.bf16.msra.mxu1 %v1060_v22 }
  0x3f   : > { %716 = vmatpush.bf16.msra.mxu2 %v1068_v23 }
  0x41   : > { %679 = vmatpush.bf16.msra.mxu0 %v1051_v24  ;;  %1089 = vmatpush.bf16.msra.mxu3 %v1051_v24 }
  0x42   : > { %698 = vmatpush.bf16.msra.mxu1 %v1059_v25 }
  0x43   : > { %717 = vmatpush.bf16.msra.mxu2 %v1067_v26 }
  0x45   : > { %680 = vmatpush.bf16.msra.mxu0 %v1050_v27  ;;  %1090 = vmatpush.bf16.msra.mxu3 %v1050_v27 }
  0x46   : > { %699 = vmatpush.bf16.msra.mxu1 %v1058_v28 }
  0x47   : > { %718 = vmatpush.bf16.msra.mxu2 %v1066_v29 }
  0x49   : > { %681 = vmatpush.bf16.msra.mxu0 %v1049_v30  ;;  %1091 = vmatpush.bf16.msra.mxu3 %v1049_v30 }
  0x4a   : > { %700 = vmatpush.bf16.msra.mxu1 %v1057_v31 }
  0x4b   : > { %719 = vmatpush.bf16.msra.mxu2 %v1065_v32 }
  0x4c   : > { %682 = vmatmul.bf16.vlgmr.msra.gmra.mxu0 %v920_v41  ;;  %687 = vmatmul.bf16.vlgmr.msra.gmra.mxu3 %v932_v44 }
  0x4d   : > { %701 = vmatmul.bf16.vlgmr.msra.gmra.mxu1 %v924_v42 }
  0x4e   : > { %720 = vmatmul.bf16.vlgmr.msra.gmra.mxu2 %v928_v43 }
  0x5d   : > { %706 = vmatmul.bf16.gmra.mxu1 %v936_v49 }
  0x5e   : > { %725 = vmatmul.bf16.gmra.mxu2 %v940_v50 }
  0xc9   : > { %v683_v52 = vpop.f32.mrf.mxu0 }
  0xca   : > { %v702_v51 = vpop.f32.mrf.mxu1 }
  0xcb   : > { %v703_v53 = vadd.f32 %v702_v51, %v683_v52 }
  0xcf   : > { %v688_v2 = vpop.f32.mrf.mxu3 }
  0xd1   : > { %v721_v55 = vpop.f32.mrf.mxu2  ;;  %v685_v59 = vpop.f32.mrf.mxu0 }
  0xd2   : > { %v722_v56 = vadd.f32 %v721_v55, %v703_v53  ;;  %v704_v57 = vpop.f32.mrf.mxu1 }
  0xd3   : > { %v705_v60 = vadd.f32 %v704_v57, %v685_v59 }
  0xd4   : > { %v731_v58 = vadd.f32 %v722_v56, %v446_v54 }
  0xd6   : > { %735 = vst [vmem:[#allocation2 + $0x10] sm:$0xff] %v731_v58 }
  0xd7   : > { %v690_v9 = vpop.f32.mrf.mxu3 }
  0xd9   : > { %v723_v62 = vpop.f32.mrf.mxu2 }
  0xda   : > { %v724_v63 = vadd.f32 %v723_v62, %v705_v60  ;;  %v707_v0 = vpop.f32.mrf.mxu1 }
  0xdb   : > { %v708_v3 = vadd.f32 %v707_v0, %v688_v2 }
  0xdc   : > { %v732_v1 = vadd.f32 %v724_v63, %v447_v61 }
  0xde   : > { %736 = vst [vmem:[#allocation2] sm:$0xff] %v732_v1 }
  0xe1   : > { %v726_v5 = vpop.f32.mrf.mxu2 }
  0xe2   : > { %v727_v6 = vadd.f32 %v726_v5, %v708_v3  ;;  %v709_v8 = vpop.f32.mrf.mxu1 }
  0xe3   : > { %v710_v10 = vadd.f32 %v709_v8, %v690_v9 }
  0xe4   : > { %v733_v7 = vadd.f32 %v727_v6, %v448_v4 }
  0xe6   : > { %737 = vst [vmem:[#allocation2 + $0x18] sm:$0xff] %v733_v7 }
  0xe9   : > { %v728_v12 = vpop.f32.mrf.mxu2 }
  0xea   : > { %v729_v13 = vadd.f32 %v728_v12, %v710_v10  ;;  %742 = sbr.rel (%p1037_p11) target bundleno = 249 (0xf9), region = 78 }
  0xec   : > { %v734_v14 = vadd.f32 %v729_v13, %v449_v11 }
  0xee   : > { %738 = vst [vmem:[#allocation2 + $0x8] sm:$0xff] %v734_v14 }
  0xef   : > { %v743_v15 = vld [vmem:[#allocation2 + $0x10] sm:$0xff]  ;;  %v744_v16 = vld [vmem:[#allocation2] sm:$0xff]  ;;  %v745_v17 = vld [vmem:[#allocation2 + $0x18] sm:$0xff] }
  0xf0   : > { %v1076_v18 = vpack.c.bf16 %v744_v16, %v743_v15 }
  0xf2   : > { %1077 = vst [vmem:[%s1330_s6] sm:$0xff] %v1076_v18  }
  0xf5   : > { %v746_v19 = vld [vmem:[#allocation2 + $0x8] sm:$0xff] }
  0xf6   : > { %v1081_v20 = vpack.c.bf16 %v746_v19, %v745_v17 }
  0xf8   : > { %1083 = vst [vmem:[%s1330_s6 + $0x8] sm:$0xff] %v1081_v20  }
  0xf9 PF: > { %s16_s2 = sadd.s32 1, %s1173_s2   ;;  %s1331_s21 = smov %s1161_s22 }
  0xfa   : > { %p13_p12 = scmp.ge.s32.totalorder %s16_s2, 5   ;;  %s1332_s22 = smov %s1246_s25 }
  0xfb   : > { %s1333_s23 = smov %s1169_s24  ;;  %s1334_s24 = smov %s1336_s3 }
  0xfc   :  { %15 = sbr.rel (!%p13_p12) target bundleno = 3 (0x3), region = 134 }

// kernel: forward.137
= control target key start
LH: loop header
LB: loop body
LE: loop exit
PB: predicated region body
PF: predicated region fallthrough
CT: control target
= control target key end

     0   :  { %s522_s1 = inlined_call_operand.vmem [shape: bf16[256,128], index: 1, kind: input, shape index: {}]   ;;  %s523_s0 = inlined_call_operand.vmem [shape: bf16[32,256], index: 0, kind: input, shape index: {}]   ;;  %s524_s2 = inlined_call_operand.vmem [shape: f32[1,256], index: 2, kind: input, shape index: {}]   ;;  %s525_s3 = inlined_call_operand.vmem [shape: f32[1,256], index: 3, kind: input, shape index: {}]   ;;  %s526_s4 = inlined_call_operand.vmem [shape: f32[1,128], index: 4, kind: input, shape index: {}]   ;;  %s527_s5 = inlined_call_operand.vmem [shape: f32[1,128], index: 5, kind: input, shape index: {}]   ;;  %s528_s6 = inlined_call_operand.vmem [shape: bf16[32,128], index: 6, kind: output, shape index: {}]  }
   0x1   :  { %v371_v0 = vld [vmem:[%s522_s1 + $0x38] sm:$0xff]  ;;  %v370_v2 = vld [vmem:[%s522_s1 + $0x30] sm:$0xff]  ;;  %v369_v4 = vld [vmem:[%s522_s1 + $0x28] sm:$0xff] }
   0x2   :  { %v379_v1 = vld [vmem:[%s522_s1 + $0x78] sm:$0xff]  ;;  %215 = vmatpush.bf16.msra.mxu0 %v371_v0  ;;  %391 = vmatpush.bf16.msra.mxu2 %v371_v0  ;;  %v378_v3 = vld [vmem:[%s522_s1 + $0x70] sm:$0xff]  ;;  %v377_v5 = vld [vmem:[%s522_s1 + $0x68] sm:$0xff] }
   0x3   :  { %234 = vmatpush.bf16.msra.mxu1 %v379_v1  ;;  %399 = vmatpush.bf16.msra.mxu3 %v379_v1  ;;  %v31_v6 = vld [vmem:[%s523_s0] sm:$0xff]  ;;  %v32_v7 = vld [vmem:[%s523_s0 + $0x8] sm:$0xff]  ;;  %v33_v10 = vld [vmem:[%s523_s0 + $0x10] sm:$0xff] }
   0x4   :  { %v43_v8 = vld [vmem:[%s524_s2] sm:$0x3]  ;;  %v34_v11 = vld [vmem:[%s523_s0 + $0x18] sm:$0xff]  ;;  %v35_v13 = vunpack.c.l.bf16 %v31_v6  ;;  %v37_v14 = vunpack.c.l.bf16 %v32_v7  ;;  %v39_v17 = vunpack.c.l.bf16 %v33_v10  ;;  %v36_v19 = vunpack.c.h.bf16 %v31_v6  ;;  %v366_v33 = vld [vmem:[%s522_s1 + $0x10] sm:$0xff] }
   0x5   :  { %v368_v9 = vld [vmem:[%s522_s1 + $0x20] sm:$0xff]  ;;  %v45_v15 = vperm.slane %v43_v8, 0  ;;  %v41_v18 = vunpack.c.l.bf16 %v34_v11  ;;  %v46_v20 = vperm.slane %v43_v8, 1  ;;  %v367_v21 = vld [vmem:[%s522_s1 + $0x18] sm:$0xff]  ;;  %v38_v22 = vunpack.c.h.bf16 %v32_v7  ;;  %v374_v37 = vld [vmem:[%s522_s1 + $0x50] sm:$0xff] }
   0x6   :  { %216 = vmatpush.bf16.msra.mxu0 %v370_v2  ;;  %392 = vmatpush.bf16.msra.mxu2 %v370_v2  ;;  %v376_v12 = vld [vmem:[%s522_s1 + $0x60] sm:$0xff]  ;;  %v40_v23 = vunpack.c.h.bf16 %v33_v10  ;;  %v42_v24 = vunpack.c.h.bf16 %v34_v11  ;;  %v375_v25 = vld [vmem:[%s522_s1 + $0x58] sm:$0xff]  ;;  %v365_v43 = vld [vmem:[%s522_s1 + $0x8] sm:$0xff] }
   0x7   :  { %235 = vmatpush.bf16.msra.mxu1 %v378_v3  ;;  %400 = vmatpush.bf16.msra.mxu3 %v378_v3  ;;  %v57_v16 = vld [vmem:[%s525_s3] sm:$0x3]  ;;  %v49_v26 = vmul.f32 %v45_v15, %v35_v13  ;;  %v51_v29 = vmul.f32 %v45_v15, %v37_v14  ;;  %v53_v30 = vmul.f32 %v45_v15, %v39_v17  ;;  %v373_v47 = vld [vmem:[%s522_s1 + $0x48] sm:$0xff] }
   0x8   :  { %v59_v27 = vperm.slane %v57_v16, 0  ;;  %v60_v28 = vperm.slane %v57_v16, 1  ;;  %v55_v31 = vmul.f32 %v45_v15, %v41_v18  ;;  %v50_v32 = vmul.f32 %v46_v20, %v36_v19  ;;  %v364_v52 = vld [vmem:[%s522_s1] sm:$0xff] }
   0x9   :  { %v52_v34 = vmul.f32 %v46_v20, %v38_v22  ;;  %v54_v35 = vmul.f32 %v46_v20, %v40_v23  ;;  %v56_v36 = vmul.f32 %v46_v20, %v42_v24  ;;  %v372_v57 = vld [vmem:[%s522_s1 + $0x40] sm:$0xff] }
   0xa   :  { %217 = vmatpush.bf16.msra.mxu0 %v369_v4  ;;  %393 = vmatpush.bf16.msra.mxu2 %v369_v4  ;;  %v63_v38 = vadd.f32 %v59_v27, %v49_v26  ;;  %v65_v39 = vadd.f32 %v59_v27, %v51_v29  ;;  %v67_v40 = vadd.f32 %v59_v27, %v53_v30  ;;  %v407_v1 = vld [vmem:[%s526_s4] ss:$0 sm:$0xff] }
   0xb   :  { %236 = vmatpush.bf16.msra.mxu1 %v377_v5  ;;  %401 = vmatpush.bf16.msra.mxu3 %v377_v5  ;;  %v69_v41 = vadd.f32 %v59_v27, %v55_v31  ;;  %v64_v42 = vadd.f32 %v60_v28, %v50_v32  ;;  %v66_v44 = vadd.f32 %v60_v28, %v52_v34  ;;  %v408_v5 = vld [vmem:[%s527_s5] ss:$0 sm:$0xff] }
   0xc   :  { %v68_v45 = vadd.f32 %v60_v28, %v54_v35  ;;  %v70_v46 = vadd.f32 %v60_v28, %v56_v36  ;;  %v71_v48 = vmax.f32 %v63_v38, 0.0  ;;  %v73_v49 = vmax.f32 %v65_v39, 0.0 }
   0xd   :  { %v75_v50 = vmax.f32 %v67_v40, 0.0  ;;  %v77_v51 = vmax.f32 %v69_v41, 0.0  ;;  %v72_v53 = vmax.f32 %v64_v42, 0.0  ;;  %v74_v54 = vmax.f32 %v66_v44, 0.0 }
   0xe   :  { %218 = vmatpush.bf16.msra.mxu0 %v368_v9  ;;  %394 = vmatpush.bf16.msra.mxu2 %v368_v9  ;;  %v76_v55 = vmax.f32 %v68_v45, 0.0  ;;  %v78_v56 = vmax.f32 %v70_v46, 0.0  ;;  %v79_v58 = vpack.c.bf16 %v73_v49, %v71_v48 }
   0xf   :  { %237 = vmatpush.bf16.msra.mxu1 %v376_v12  ;;  %402 = vmatpush.bf16.msra.mxu3 %v376_v12  ;;  %v81_v59 = vpack.c.bf16 %v77_v51, %v75_v50  ;;  %v80_v60 = vpack.c.bf16 %v74_v54, %v72_v53 }
  0x10   :  { %v82_v61 = vpack.c.bf16 %v78_v56, %v76_v55 }
  0x12   :  { %219 = vmatpush.bf16.msra.mxu0 %v367_v21  ;;  %395 = vmatpush.bf16.msra.mxu2 %v367_v21 }
  0x13   :  { %238 = vmatpush.bf16.msra.mxu1 %v375_v25  ;;  %403 = vmatpush.bf16.msra.mxu3 %v375_v25 }
  0x16   :  { %220 = vmatpush.bf16.msra.mxu0 %v366_v33  ;;  %396 = vmatpush.bf16.msra.mxu2 %v366_v33 }
  0x17   :  { %239 = vmatpush.bf16.msra.mxu1 %v374_v37  ;;  %404 = vmatpush.bf16.msra.mxu3 %v374_v37 }
  0x1a   :  { %221 = vmatpush.bf16.msra.mxu0 %v365_v43  ;;  %397 = vmatpush.bf16.msra.mxu2 %v365_v43 }
  0x1b   :  { %240 = vmatpush.bf16.msra.mxu1 %v373_v47  ;;  %405 = vmatpush.bf16.msra.mxu3 %v373_v47 }
  0x1e   :  { %222 = vmatpush.bf16.msra.mxu0 %v364_v52  ;;  %398 = vmatpush.bf16.msra.mxu2 %v364_v52 }
  0x1f   :  { %241 = vmatpush.bf16.msra.mxu1 %v372_v57  ;;  %406 = vmatpush.bf16.msra.mxu3 %v372_v57 }
  0x21   :  { %223 = vmatmul.bf16.vlgmr.msra.gmra.mxu0 %v79_v58  ;;  %228 = vmatmul.bf16.vlgmr.msra.gmra.mxu2 %v81_v59 }
  0x22   :  { %242 = vmatmul.bf16.vlgmr.msra.gmra.mxu1 %v80_v60  ;;  %247 = vmatmul.bf16.vlgmr.msra.gmra.mxu3 %v82_v61 }
  0x9e   :  { %v224_v62 = vpop.f32.mrf.mxu0 }
  0x9f   :  { %v243_v63 = vpop.f32.mrf.mxu1 }
  0xa0   :  { %v244_v0 = vadd.f32 %v243_v63, %v224_v62 }
  0xa2   :  { %v272_v4 = vmul.f32 %v407_v1, %v244_v0 }
  0xa4   :  { %v229_v2 = vpop.f32.mrf.mxu2  ;;  %v280_v10 = vadd.f32 %v408_v5, %v272_v4 }
  0xa5   :  { %v248_v3 = vpop.f32.mrf.mxu3 }
  0xa6   :  { %v226_v6 = vpop.f32.mrf.mxu0  ;;  %v249_v8 = vadd.f32 %v248_v3, %v229_v2  ;;  %v284_v16 = vmax.f32 %v280_v10, 0.0 }
  0xa7   :  { %v245_v7 = vpop.f32.mrf.mxu1 }
  0xa8   :  { %v246_v9 = vadd.f32 %v245_v7, %v226_v6  ;;  %v274_v12 = vmul.f32 %v407_v1, %v249_v8 }
  0xaa   :  { %v273_v11 = vmul.f32 %v407_v1, %v246_v9  ;;  %v282_v19 = vadd.f32 %v408_v5, %v274_v12 }
  0xac   :  { %v281_v13 = vadd.f32 %v408_v5, %v273_v11  ;;  %v231_v14 = vpop.f32.mrf.mxu2  ;;  %v286_v23 = vmax.f32 %v282_v19, 0.0 }
  0xad   :  { %v250_v15 = vpop.f32.mrf.mxu3 }
  0xae   :  { %v285_v17 = vmax.f32 %v281_v13, 0.0  ;;  %v251_v18 = vadd.f32 %v250_v15, %v231_v14 }
  0xb0   :  { %v383_v20 = vpack.c.bf16 %v285_v17, %v284_v16  ;;  %v275_v21 = vmul.f32 %v407_v1, %v251_v18 }
  0xb2   :  { %384 = vst [vmem:[%s528_s6] sm:$0xff] %v383_v20   ;;  %v283_v22 = vadd.f32 %v408_v5, %v275_v21 }
  0xb4   :  { %v287_v24 = vmax.f32 %v283_v22, 0.0 }
  0xb6   :  { %v388_v25 = vpack.c.bf16 %v287_v24, %v286_v23 }
  0xb8   :  { %390 = vst [vmem:[%s528_s6 + $0x8] sm:$0xff] %v388_v25  }

// kernel: forward.145
= control target key start
LH: loop header
LB: loop body
LE: loop exit
PB: predicated region body
PF: predicated region fallthrough
CT: control target
= control target key end

     0   :  { %s731_s1 = inlined_call_operand.vmem [shape: bf16[384,128], index: 1, kind: input, shape index: {}]   ;;  %s732_s0 = inlined_call_operand.vmem [shape: bf16[32,384], index: 0, kind: input, shape index: {}]   ;;  %s733_s2 = inlined_call_operand.vmem [shape: f32[1,384], index: 2, kind: input, shape index: {}]   ;;  %s734_s3 = inlined_call_operand.vmem [shape: f32[1,384], index: 3, kind: input, shape index: {}]   ;;  %s735_s4 = inlined_call_operand.vmem [shape: f32[1,128], index: 4, kind: input, shape index: {}]   ;;  %s736_s5 = inlined_call_operand.vmem [shape: f32[1,128], index: 5, kind: input, shape index: {}]   ;;  %s737_s6 = inlined_call_operand.vmem [shape: bf16[32,128], index: 6, kind: output, shape index: {}]  }
   0x1   :  { %v512_v0 = vld [vmem:[%s731_s1 + $0x38] sm:$0xff]  ;;  %v511_v3 = vld [vmem:[%s731_s1 + $0x30] sm:$0xff]  ;;  %v510_v6 = vld [vmem:[%s731_s1 + $0x28] sm:$0xff] }
   0x2   :  { %v520_v1 = vld [vmem:[%s731_s1 + $0x78] sm:$0xff]  ;;  %305 = vmatpush.bf16.msra.mxu0 %v512_v0  ;;  %v519_v4 = vld [vmem:[%s731_s1 + $0x70] sm:$0xff]  ;;  %540 = vmatpush.bf16.msra.mxu3 %v512_v0  ;;  %v518_v7 = vld [vmem:[%s731_s1 + $0x68] sm:$0xff] }
   0x3   :  { %v528_v2 = vld [vmem:[%s731_s1 + $0xb8] sm:$0xff]  ;;  %324 = vmatpush.bf16.msra.mxu1 %v520_v1  ;;  %v527_v5 = vld [vmem:[%s731_s1 + $0xb0] sm:$0xff]  ;;  %v526_v8 = vld [vmem:[%s731_s1 + $0xa8] sm:$0xff] }
   0x4   :  { %343 = vmatpush.bf16.msra.mxu2 %v528_v2  ;;  %v509_v9 = vld [vmem:[%s731_s1 + $0x20] sm:$0xff]  ;;  %v33_v11 = vld [vmem:[%s732_s0 + $0xc] sm:$0xff]  ;;  %v32_v15 = vld [vmem:[%s732_s0 + $0x8] sm:$0xf] }
   0x5   :  { %v31_v10 = vld [vmem:[%s732_s0] sm:$0xff]  ;;  %v34_v16 = vld [vmem:[%s732_s0 + $0x14] sm:$0xf]  ;;  %v639_v17 = vld [vmem:[%s732_s0 + $0x18] sm:$0xff]  ;;  %v42_v20 = vunpack.c.l.bf16 %v33_v11  ;;  %v43_v24 = vunpack.c.h.bf16 %v33_v11  ;;  %v41_v26 = vunpack.c.l.bf16 %v32_v15 }
   0x6   :  { %306 = vmatpush.bf16.msra.mxu0 %v511_v3  ;;  %541 = vmatpush.bf16.msra.mxu3 %v511_v3  ;;  %v51_v12 = vld [vmem:[%s733_s2] sm:$0x7]  ;;  %v644_v18 = vld [vmem:[%s732_s0 + $0x24] sm:$0xff]  ;;  %v39_v19 = vunpack.c.l.bf16 %v31_v10  ;;  %v40_v22 = vunpack.c.h.bf16 %v31_v10  ;;  %v508_v28 = vld [vmem:[%s731_s1 + $0x18] sm:$0xff]  ;;  %v44_v30 = vunpack.c.l.bf16 %v34_v16  ;;  %v45_v31 = vunpack.c.l.bf16 %v639_v17 }
   0x7   :  { %325 = vmatpush.bf16.msra.mxu1 %v519_v4  ;;  %v517_v13 = vld [vmem:[%s731_s1 + $0x60] sm:$0xff]  ;;  %v53_v21 = vperm.slane %v51_v12, 0  ;;  %v649_v25 = vperm.slane %v51_v12, 1  ;;  %v651_v27 = vperm.slane %v51_v12, 2  ;;  %v516_v29 = vld [vmem:[%s731_s1 + $0x58] sm:$0xff]  ;;  %v48_v32 = vunpack.c.l.bf16 %v644_v18  ;;  %v507_v42 = vld [vmem:[%s731_s1 + $0x10] sm:$0xff] }
   0x8   :  { %344 = vmatpush.bf16.msra.mxu2 %v527_v5  ;;  %v525_v14 = vld [vmem:[%s731_s1 + $0xa0] sm:$0xff]  ;;  %v524_v33 = vld [vmem:[%s731_s1 + $0x98] sm:$0xff]  ;;  %v515_v43 = vld [vmem:[%s731_s1 + $0x50] sm:$0xff]  ;;  %v46_v10 = vunpack.c.h.bf16 %v639_v17  ;;  %v49_v11 = vunpack.c.h.bf16 %v644_v18 }
   0x9   :  { %v71_v23 = vld [vmem:[%s734_s3] sm:$0x7]  ;;  %v59_v34 = vmul.f32 %v53_v21, %v39_v19  ;;  %v62_v35 = vmul.f32 %v53_v21, %v42_v20  ;;  %v60_v38 = vmul.f32 %v649_v25, %v40_v22  ;;  %v63_v39 = vmul.f32 %v649_v25, %v43_v24  ;;  %v523_v47 = vld [vmem:[%s731_s1 + $0x90] sm:$0xff]  ;;  %v506_v53 = vld [vmem:[%s731_s1 + $0x8] sm:$0xff] }
   0xa   :  { %307 = vmatpush.bf16.msra.mxu0 %v510_v6  ;;  %542 = vmatpush.bf16.msra.mxu3 %v510_v6  ;;  %v73_v36 = vperm.slane %v71_v23, 0  ;;  %v664_v37 = vperm.slane %v71_v23, 1  ;;  %v61_v40 = vmul.f32 %v651_v27, %v41_v26  ;;  %v669_v41 = vperm.slane %v71_v23, 2  ;;  %v514_v54 = vld [vmem:[%s731_s1 + $0x48] sm:$0xff]  ;;  %v505_v63 = vld [vmem:[%s731_s1] sm:$0xff] }
   0xb   :  { %326 = vmatpush.bf16.msra.mxu1 %v518_v7  ;;  %v64_v44 = vmul.f32 %v651_v27, %v44_v30  ;;  %v65_v45 = vmul.f32 %v53_v21, %v45_v31  ;;  %v68_v46 = vmul.f32 %v53_v21, %v48_v32  ;;  %v522_v58 = vld [vmem:[%s731_s1 + $0x88] sm:$0xff]  ;;  %v513_v0 = vld [vmem:[%s731_s1 + $0x40] sm:$0xff]  ;;  %v66_v16 = vmul.f32 %v649_v25, %v46_v10 }
   0xc   :  { %345 = vmatpush.bf16.msra.mxu2 %v526_v8  ;;  %v79_v48 = vadd.f32 %v73_v36, %v59_v34  ;;  %v82_v49 = vadd.f32 %v73_v36, %v62_v35  ;;  %v80_v50 = vadd.f32 %v664_v37, %v60_v38  ;;  %v83_v51 = vadd.f32 %v664_v37, %v63_v39  ;;  %v521_v5 = vld [vmem:[%s731_s1 + $0x80] sm:$0xff]  ;;  %v38_v7 = vld [vmem:[%s732_s0 + $0x2c] sm:$0xf] }
   0xd   :  { %v81_v52 = vadd.f32 %v669_v41, %v61_v40  ;;  %v84_v55 = vadd.f32 %v669_v41, %v64_v44  ;;  %v85_v56 = vadd.f32 %v73_v36, %v65_v45  ;;  %v88_v57 = vadd.f32 %v73_v36, %v68_v46  ;;  %v36_v6 = vld [vmem:[%s732_s0 + $0x20] sm:$0xf] }
   0xe   :  { %308 = vmatpush.bf16.msra.mxu0 %v509_v9  ;;  %543 = vmatpush.bf16.msra.mxu3 %v509_v9  ;;  %v91_v59 = vmax.f32 %v79_v48, 0.0  ;;  %v94_v60 = vmax.f32 %v82_v49, 0.0  ;;  %v92_v61 = vmax.f32 %v80_v50, 0.0  ;;  %v95_v62 = vmax.f32 %v83_v51, 0.0  ;;  %v548_v36 = vld [vmem:[%s735_s4] ss:$0 sm:$0xff] }
   0xf   :  { %327 = vmatpush.bf16.msra.mxu1 %v517_v13  ;;  %v93_v1 = vmax.f32 %v81_v52, 0.0  ;;  %v96_v2 = vmax.f32 %v84_v55, 0.0  ;;  %v97_v3 = vmax.f32 %v85_v56, 0.0  ;;  %v100_v4 = vmax.f32 %v88_v57, 0.0  ;;  %v549_v39 = vld [vmem:[%s736_s5] ss:$0 sm:$0xff] }
  0x10   :  { %346 = vmatpush.bf16.msra.mxu2 %v525_v14  ;;  %v103_v8 = vpack.c.bf16 %v94_v60, %v91_v59  ;;  %v104_v9 = vpack.c.bf16 %v95_v62, %v92_v61  ;;  %v47_v14 = vunpack.c.l.bf16 %v36_v6  ;;  %v50_v15 = vunpack.c.l.bf16 %v38_v7 }
  0x11   :  { %v105_v12 = vpack.c.bf16 %v96_v2, %v93_v1  ;;  %v106_v13 = vpack.c.bf16 %v100_v4, %v97_v3  ;;  %v69_v19 = vmul.f32 %v649_v25, %v49_v11  ;;  %v86_v20 = vadd.f32 %v664_v37, %v66_v16 }
  0x12   :  { %309 = vmatpush.bf16.msra.mxu0 %v508_v28  ;;  %544 = vmatpush.bf16.msra.mxu3 %v508_v28  ;;  %v67_v17 = vmul.f32 %v651_v27, %v47_v14  ;;  %v70_v18 = vmul.f32 %v651_v27, %v50_v15 }
  0x13   :  { %328 = vmatpush.bf16.msra.mxu1 %v516_v29  ;;  %v89_v21 = vadd.f32 %v664_v37, %v69_v19  ;;  %v98_v24 = vmax.f32 %v86_v20, 0.0 }
  0x14   :  { %347 = vmatpush.bf16.msra.mxu2 %v524_v33  ;;  %v87_v22 = vadd.f32 %v669_v41, %v67_v17  ;;  %v90_v23 = vadd.f32 %v669_v41, %v70_v18 }
  0x15   :  { %v101_v26 = vmax.f32 %v89_v21, 0.0 }
  0x16   :  { %310 = vmatpush.bf16.msra.mxu0 %v507_v42  ;;  %545 = vmatpush.bf16.msra.mxu3 %v507_v42  ;;  %v99_v28 = vmax.f32 %v87_v22, 0.0  ;;  %v102_v29 = vmax.f32 %v90_v23, 0.0 }
  0x17   :  { %329 = vmatpush.bf16.msra.mxu1 %v515_v43  ;;  %v107_v30 = vpack.c.bf16 %v101_v26, %v98_v24 }
  0x18   :  { %348 = vmatpush.bf16.msra.mxu2 %v523_v47  ;;  %v108_v25 = vpack.c.bf16 %v102_v29, %v99_v28 }
  0x1a   :  { %311 = vmatpush.bf16.msra.mxu0 %v506_v53  ;;  %546 = vmatpush.bf16.msra.mxu3 %v506_v53 }
  0x1b   :  { %330 = vmatpush.bf16.msra.mxu1 %v514_v54 }
  0x1c   :  { %349 = vmatpush.bf16.msra.mxu2 %v522_v58 }
  0x1e   :  { %312 = vmatpush.bf16.msra.mxu0 %v505_v63  ;;  %547 = vmatpush.bf16.msra.mxu3 %v505_v63 }
  0x1f   :  { %331 = vmatpush.bf16.msra.mxu1 %v513_v0 }
  0x20   :  { %350 = vmatpush.bf16.msra.mxu2 %v521_v5 }
  0x21   :  { %313 = vmatmul.bf16.vlgmr.msra.gmra.mxu0 %v103_v8  ;;  %318 = vmatmul.bf16.vlgmr.msra.gmra.mxu3 %v106_v13 }
  0x22   :  { %332 = vmatmul.bf16.vlgmr.msra.gmra.mxu1 %v104_v9 }
  0x23   :  { %351 = vmatmul.bf16.vlgmr.msra.gmra.mxu2 %v105_v12 }
  0x32   :  { %337 = vmatmul.bf16.gmra.mxu1 %v107_v30 }
  0x33   :  { %356 = vmatmul.bf16.gmra.mxu2 %v108_v25 }
  0x9e   :  { %v314_v32 = vpop.f32.mrf.mxu0 }
  0x9f   :  { %v333_v31 = vpop.f32.mrf.mxu1 }
  0xa0   :  { %v334_v33 = vadd.f32 %v333_v31, %v314_v32 }
  0xa4   :  { %v319_v46 = vpop.f32.mrf.mxu3 }
  0xa6   :  { %v352_v27 = vpop.f32.mrf.mxu2  ;;  %v316_v37 = vpop.f32.mrf.mxu0 }
  0xa7   :  { %v335_v34 = vpop.f32.mrf.mxu1  ;;  %v353_v35 = vadd.f32 %v352_v27, %v334_v33 }
  0xa8   :  { %v336_v40 = vadd.f32 %v335_v34, %v316_v37 }
  0xa9   :  { %v381_v38 = vmul.f32 %v548_v36, %v353_v35 }
  0xab   :  { %v389_v44 = vadd.f32 %v549_v39, %v381_v38 }
  0xac   :  { %v321_v55 = vpop.f32.mrf.mxu3 }
  0xad   :  { %v393_v48 = vmax.f32 %v389_v44, 0.0 }
  0xae   :  { %v354_v41 = vpop.f32.mrf.mxu2 }
  0xaf   :  { %v355_v42 = vadd.f32 %v354_v41, %v336_v40  ;;  %v338_v43 = vpop.f32.mrf.mxu1 }
  0xb0   :  { %v339_v50 = vadd.f32 %v338_v43, %v319_v46 }
  0xb1   :  { %v382_v45 = vmul.f32 %v548_v36, %v355_v42 }
  0xb3   :  { %v390_v47 = vadd.f32 %v549_v39, %v382_v45 }
  0xb5   :  { %v394_v49 = vmax.f32 %v390_v47, 0.0 }
  0xb6   :  { %v357_v51 = vpop.f32.mrf.mxu2 }
  0xb7   :  { %v532_v52 = vpack.c.bf16 %v394_v49, %v393_v48  ;;  %v358_v53 = vadd.f32 %v357_v51, %v339_v50  ;;  %v340_v54 = vpop.f32.mrf.mxu1 }
  0xb8   :  { %v341_v57 = vadd.f32 %v340_v54, %v321_v55 }
  0xb9   :  { %533 = vst [vmem:[%s737_s6] sm:$0xff] %v532_v52   ;;  %v383_v56 = vmul.f32 %v548_v36, %v358_v53 }
  0xbb   :  { %v391_v60 = vadd.f32 %v549_v39, %v383_v56 }
  0xbd   :  { %v395_v63 = vmax.f32 %v391_v60, 0.0 }
  0xbe   :  { %v359_v58 = vpop.f32.mrf.mxu2 }
  0xbf   :  { %v360_v59 = vadd.f32 %v359_v58, %v341_v57 }
  0xc1   :  { %v384_v61 = vmul.f32 %v548_v36, %v360_v59 }
  0xc3   :  { %v392_v62 = vadd.f32 %v549_v39, %v384_v61 }
  0xc5   :  { %v396_v0 = vmax.f32 %v392_v62, 0.0 }
  0xc7   :  { %v537_v1 = vpack.c.bf16 %v396_v0, %v395_v63 }
  0xc9   :  { %539 = vst [vmem:[%s737_s6 + $0x8] sm:$0xff] %v537_v1  }

// kernel: forward.153
= control target key start
LH: loop header
LB: loop body
LE: loop exit
PB: predicated region body
PF: predicated region fallthrough
CT: control target
= control target key end

     0   :  { %s908_s1 = inlined_call_operand.vmem [shape: bf16[512,128], index: 1, kind: input, shape index: {}]   ;;  %s909_s0 = inlined_call_operand.vmem [shape: bf16[32,512], index: 0, kind: input, shape index: {}]   ;;  %s910_s2 = inlined_call_operand.vmem [shape: f32[1,512], index: 2, kind: input, shape index: {}]   ;;  %s911_s3 = inlined_call_operand.vmem [shape: f32[1,512], index: 3, kind: input, shape index: {}]   ;;  %s912_s4 = inlined_call_operand.vmem [shape: f32[1,128], index: 4, kind: input, shape index: {}]   ;;  %s913_s5 = inlined_call_operand.vmem [shape: f32[1,128], index: 5, kind: input, shape index: {}]   ;;  %s914_s6 = inlined_call_operand.vmem [shape: bf16[32,128], index: 6, kind: output, shape index: {}]  }
   0x1   :  { %v649_v0 = vld [vmem:[%s908_s1 + $0x38] sm:$0xff]  ;;  %v648_v4 = vld [vmem:[%s908_s1 + $0x30] sm:$0xff]  ;;  %v647_v8 = vld [vmem:[%s908_s1 + $0x28] sm:$0xff] }
   0x2   :  { %v657_v1 = vld [vmem:[%s908_s1 + $0x78] sm:$0xff]  ;;  %391 = vmatpush.bf16.msra.mxu0 %v649_v0  ;;  %v656_v5 = vld [vmem:[%s908_s1 + $0x70] sm:$0xff]  ;;  %v655_v9 = vld [vmem:[%s908_s1 + $0x68] sm:$0xff] }
   0x3   :  { %v665_v2 = vld [vmem:[%s908_s1 + $0xb8] sm:$0xff]  ;;  %410 = vmatpush.bf16.msra.mxu1 %v657_v1  ;;  %v664_v6 = vld [vmem:[%s908_s1 + $0xb0] sm:$0xff]  ;;  %v663_v10 = vld [vmem:[%s908_s1 + $0xa8] sm:$0xff] }
   0x4   :  { %v673_v3 = vld [vmem:[%s908_s1 + $0xf8] sm:$0xff]  ;;  %429 = vmatpush.bf16.msra.mxu2 %v665_v2  ;;  %v672_v7 = vld [vmem:[%s908_s1 + $0xf0] sm:$0xff]  ;;  %v671_v11 = vld [vmem:[%s908_s1 + $0xe8] sm:$0xff] }
   0x5   :  { %448 = vmatpush.bf16.msra.mxu3 %v673_v3  ;;  %v646_v12 = vld [vmem:[%s908_s1 + $0x20] sm:$0xff]  ;;  %v33_v17 = vld [vmem:[%s909_s0 + $0x10] sm:$0xff]  ;;  %v32_v25 = vld [vmem:[%s909_s0 + $0x8] sm:$0xff] }
   0x6   :  { %392 = vmatpush.bf16.msra.mxu0 %v648_v4  ;;  %v654_v13 = vld [vmem:[%s908_s1 + $0x60] sm:$0xff]  ;;  %v43_v20 = vunpack.c.l.bf16 %v33_v17  ;;  %v44_v24 = vunpack.c.h.bf16 %v33_v17  ;;  %v34_v26 = vld [vmem:[%s909_s0 + $0x18] sm:$0xff]  ;;  %v41_v28 = vunpack.c.l.bf16 %v32_v25  ;;  %v42_v37 = vunpack.c.h.bf16 %v32_v25  ;;  %v644_v47 = vld [vmem:[%s908_s1 + $0x10] sm:$0xff] }
   0x7   :  { %411 = vmatpush.bf16.msra.mxu1 %v656_v5  ;;  %v662_v14 = vld [vmem:[%s908_s1 + $0xa0] sm:$0xff]  ;;  %v45_v29 = vunpack.c.l.bf16 %v34_v26  ;;  %v645_v30 = vld [vmem:[%s908_s1 + $0x18] sm:$0xff]  ;;  %v46_v38 = vunpack.c.h.bf16 %v34_v26  ;;  %v652_v48 = vld [vmem:[%s908_s1 + $0x50] sm:$0xff] }
   0x8   :  { %430 = vmatpush.bf16.msra.mxu2 %v664_v6  ;;  %v31_v15 = vld [vmem:[%s909_s0] sm:$0xff]  ;;  %v653_v31 = vld [vmem:[%s908_s1 + $0x58] sm:$0xff]  ;;  %v660_v50 = vld [vmem:[%s908_s1 + $0x90] sm:$0xff] }
   0x9   :  { %449 = vmatpush.bf16.msra.mxu3 %v672_v7  ;;  %v670_v16 = vld [vmem:[%s908_s1 + $0xe0] sm:$0xff]  ;;  %v39_v18 = vunpack.c.l.bf16 %v31_v15  ;;  %v40_v23 = vunpack.c.h.bf16 %v31_v15  ;;  %v661_v33 = vld [vmem:[%s908_s1 + $0x98] sm:$0xff]  ;;  %v668_v51 = vld [vmem:[%s908_s1 + $0xd0] sm:$0xff] }
   0xa   :  { %393 = vmatpush.bf16.msra.mxu0 %v647_v8  ;;  %v55_v19 = vld [vmem:[%s910_s2] sm:$0xf]  ;;  %v669_v34 = vld [vmem:[%s908_s1 + $0xd8] sm:$0xff]  ;;  %v643_v60 = vld [vmem:[%s908_s1 + $0x8] sm:$0xff] }
   0xb   :  { %412 = vmatpush.bf16.msra.mxu1 %v655_v9  ;;  %v779_v21 = vperm.slane %v55_v19, 0  ;;  %v81_v22 = vld [vmem:[%s911_s3] sm:$0xf]  ;;  %v790_v27 = vperm.slane %v55_v19, 1  ;;  %v798_v32 = vperm.slane %v55_v19, 2  ;;  %v818_v46 = vperm.slane %v55_v19, 3 }
   0xc   :  { %431 = vmatpush.bf16.msra.mxu2 %v663_v10  ;;  %v806_v35 = vperm.slane %v81_v22, 0  ;;  %v808_v36 = vperm.slane %v81_v22, 1  ;;  %v816_v45 = vperm.slane %v81_v22, 2  ;;  %v826_v49 = vperm.slane %v81_v22, 3  ;;  %v651_v61 = vld [vmem:[%s908_s1 + $0x48] sm:$0xff]  ;;  %v35_v8 = vld [vmem:[%s909_s0 + $0x20] sm:$0xff] }
   0xd   :  { %450 = vmatpush.bf16.msra.mxu3 %v671_v11  ;;  %v65_v39 = vmul.f32 %v779_v21, %v39_v18  ;;  %v69_v40 = vmul.f32 %v779_v21, %v43_v20  ;;  %v66_v41 = vmul.f32 %v790_v27, %v40_v23  ;;  %v70_v42 = vmul.f32 %v790_v27, %v44_v24  ;;  %v659_v0 = vld [vmem:[%s908_s1 + $0x88] sm:$0xff]  ;;  %v37_v9 = vld [vmem:[%s909_s0 + $0x30] sm:$0xff]  ;;  %v642_v10 = vld [vmem:[%s908_s1] sm:$0xff] }
   0xe   :  { %394 = vmatpush.bf16.msra.mxu0 %v646_v12  ;;  %v67_v43 = vmul.f32 %v798_v32, %v41_v28  ;;  %v71_v44 = vmul.f32 %v798_v32, %v45_v29  ;;  %v68_v52 = vmul.f32 %v818_v46, %v42_v37  ;;  %v72_v53 = vmul.f32 %v818_v46, %v46_v38  ;;  %v667_v1 = vld [vmem:[%s908_s1 + $0xc8] sm:$0xff]  ;;  %v650_v11 = vld [vmem:[%s908_s1 + $0x40] sm:$0xff]  ;;  %v38_v17 = vld [vmem:[%s909_s0 + $0x38] sm:$0xff] }
   0xf   :  { %413 = vmatpush.bf16.msra.mxu1 %v654_v13  ;;  %v91_v54 = vadd.f32 %v806_v35, %v65_v39  ;;  %v95_v55 = vadd.f32 %v806_v35, %v69_v40  ;;  %v92_v56 = vadd.f32 %v808_v36, %v66_v41  ;;  %v96_v57 = vadd.f32 %v808_v36, %v70_v42  ;;  %v658_v15 = vld [vmem:[%s908_s1 + $0x80] sm:$0xff] }
  0x10   :  { %432 = vmatpush.bf16.msra.mxu2 %v662_v14  ;;  %v93_v58 = vadd.f32 %v816_v45, %v67_v43  ;;  %v97_v59 = vadd.f32 %v816_v45, %v71_v44  ;;  %v94_v62 = vadd.f32 %v826_v49, %v68_v52  ;;  %v98_v63 = vadd.f32 %v826_v49, %v72_v53  ;;  %v36_v14 = vld [vmem:[%s909_s0 + $0x28] sm:$0xff] }
  0x11   :  { %451 = vmatpush.bf16.msra.mxu3 %v670_v16  ;;  %v107_v2 = vmax.f32 %v91_v54, 0.0  ;;  %v111_v3 = vmax.f32 %v95_v55, 0.0  ;;  %v108_v4 = vmax.f32 %v92_v56, 0.0  ;;  %v112_v5 = vmax.f32 %v96_v57, 0.0  ;;  %v666_v16 = vld [vmem:[%s908_s1 + $0xc0] sm:$0xff] }
  0x12   :  { %395 = vmatpush.bf16.msra.mxu0 %v645_v30  ;;  %v109_v6 = vmax.f32 %v93_v58, 0.0  ;;  %v113_v7 = vmax.f32 %v97_v59, 0.0  ;;  %v110_v12 = vmax.f32 %v94_v62, 0.0  ;;  %v114_v13 = vmax.f32 %v98_v63, 0.0 }
  0x13   :  { %414 = vmatpush.bf16.msra.mxu1 %v653_v31  ;;  %v123_v18 = vpack.c.bf16 %v111_v3, %v107_v2  ;;  %v124_v19 = vpack.c.bf16 %v112_v5, %v108_v4  ;;  %v47_v20 = vunpack.c.l.bf16 %v35_v8  ;;  %v51_v22 = vunpack.c.l.bf16 %v37_v9  ;;  %v685_v3 = vld [vmem:[%s912_s4] ss:$0 sm:$0xff] }
  0x14   :  { %433 = vmatpush.bf16.msra.mxu2 %v661_v33  ;;  %v125_v23 = vpack.c.bf16 %v113_v7, %v109_v6  ;;  %v48_v24 = vunpack.c.h.bf16 %v35_v8  ;;  %v52_v25 = vunpack.c.h.bf16 %v37_v9  ;;  %v49_v26 = vunpack.c.l.bf16 %v36_v14  ;;  %v686_v8 = vld [vmem:[%s913_s5] ss:$0 sm:$0xff] }
  0x15   :  { %452 = vmatpush.bf16.msra.mxu3 %v669_v34  ;;  %v126_v28 = vpack.c.bf16 %v114_v13, %v110_v12  ;;  %v53_v29 = vunpack.c.l.bf16 %v38_v17  ;;  %v50_v30 = vunpack.c.h.bf16 %v36_v14  ;;  %v54_v31 = vunpack.c.h.bf16 %v38_v17 }
  0x16   :  { %396 = vmatpush.bf16.msra.mxu0 %v644_v47  ;;  %v73_v33 = vmul.f32 %v779_v21, %v47_v20  ;;  %v77_v34 = vmul.f32 %v779_v21, %v51_v22  ;;  %v74_v37 = vmul.f32 %v790_v27, %v48_v24  ;;  %v78_v38 = vmul.f32 %v790_v27, %v52_v25 }
  0x17   :  { %415 = vmatpush.bf16.msra.mxu1 %v652_v48  ;;  %v75_v39 = vmul.f32 %v798_v32, %v49_v26  ;;  %v79_v40 = vmul.f32 %v798_v32, %v53_v29  ;;  %v76_v41 = vmul.f32 %v818_v46, %v50_v30  ;;  %v80_v42 = vmul.f32 %v818_v46, %v54_v31 }
  0x18   :  { %434 = vmatpush.bf16.msra.mxu2 %v660_v50  ;;  %v99_v43 = vadd.f32 %v806_v35, %v73_v33  ;;  %v103_v21 = vadd.f32 %v806_v35, %v77_v34  ;;  %v100_v44 = vadd.f32 %v808_v36, %v74_v37  ;;  %v104_v47 = vadd.f32 %v808_v36, %v78_v38 }
  0x19   :  { %453 = vmatpush.bf16.msra.mxu3 %v668_v51  ;;  %v101_v27 = vadd.f32 %v816_v45, %v75_v39  ;;  %v105_v48 = vadd.f32 %v816_v45, %v79_v40  ;;  %v102_v50 = vadd.f32 %v826_v49, %v76_v41  ;;  %v106_v32 = vadd.f32 %v826_v49, %v80_v42 }
  0x1a   :  { %397 = vmatpush.bf16.msra.mxu0 %v643_v60  ;;  %v115_v51 = vmax.f32 %v99_v43, 0.0  ;;  %v119_v52 = vmax.f32 %v103_v21, 0.0  ;;  %v116_v53 = vmax.f32 %v100_v44, 0.0  ;;  %v120_v46 = vmax.f32 %v104_v47, 0.0 }
  0x1b   :  { %416 = vmatpush.bf16.msra.mxu1 %v651_v61  ;;  %v117_v54 = vmax.f32 %v101_v27, 0.0  ;;  %v121_v55 = vmax.f32 %v105_v48, 0.0  ;;  %v118_v56 = vmax.f32 %v102_v50, 0.0  ;;  %v122_v35 = vmax.f32 %v106_v32, 0.0 }
  0x1c   :  { %435 = vmatpush.bf16.msra.mxu2 %v659_v0  ;;  %v127_v57 = vpack.c.bf16 %v119_v52, %v115_v51  ;;  %v128_v58 = vpack.c.bf16 %v120_v46, %v116_v53 }
  0x1d   :  { %454 = vmatpush.bf16.msra.mxu3 %v667_v1  ;;  %v129_v59 = vpack.c.bf16 %v121_v55, %v117_v54  ;;  %v130_v36 = vpack.c.bf16 %v122_v35, %v118_v56 }
  0x1e   :  { %398 = vmatpush.bf16.msra.mxu0 %v642_v10 }
  0x1f   :  { %417 = vmatpush.bf16.msra.mxu1 %v650_v11 }
  0x20   :  { %436 = vmatpush.bf16.msra.mxu2 %v658_v15 }
  0x21   :  { %455 = vmatpush.bf16.msra.mxu3 %v666_v16  ;;  %399 = vmatmul.bf16.vlgmr.msra.gmra.mxu0 %v123_v18 }
  0x22   :  { %418 = vmatmul.bf16.vlgmr.msra.gmra.mxu1 %v124_v19 }
  0x23   :  { %437 = vmatmul.bf16.vlgmr.msra.gmra.mxu2 %v125_v23 }
  0x24   :  { %456 = vmatmul.bf16.vlgmr.msra.gmra.mxu3 %v126_v28 }
  0x31   :  { %404 = vmatmul.bf16.gmra.mxu0 %v127_v57 }
  0x32   :  { %423 = vmatmul.bf16.gmra.mxu1 %v128_v58 }
  0x33   :  { %442 = vmatmul.bf16.gmra.mxu2 %v129_v59 }
  0x34   :  { %461 = vmatmul.bf16.gmra.mxu3 %v130_v36 }
  0x9e   :  { %v400_v45 = vpop.f32.mrf.mxu0 }
  0x9f   :  { %v419_v60 = vpop.f32.mrf.mxu1 }
  0xa0   :  { %v420_v61 = vadd.f32 %v419_v60, %v400_v45 }
  0xa6   :  { %v438_v49 = vpop.f32.mrf.mxu2  ;;  %v402_v0 = vpop.f32.mrf.mxu0 }
  0xa7   :  { %v457_v62 = vpop.f32.mrf.mxu3  ;;  %v439_v63 = vadd.f32 %v438_v49, %v420_v61  ;;  %v421_v1 = vpop.f32.mrf.mxu1 }
  0xa8   :  { %v422_v4 = vadd.f32 %v421_v1, %v402_v0 }
  0xa9   :  { %v458_v2 = vadd.f32 %v457_v62, %v439_v63 }
  0xab   :  { %v486_v7 = vmul.f32 %v685_v3, %v458_v2 }
  0xad   :  { %v494_v13 = vadd.f32 %v686_v8, %v486_v7 }
  0xae   :  { %v440_v5 = vpop.f32.mrf.mxu2  ;;  %v405_v10 = vpop.f32.mrf.mxu0 }
  0xaf   :  { %v459_v6 = vpop.f32.mrf.mxu3  ;;  %v441_v9 = vadd.f32 %v440_v5, %v422_v4  ;;  %v424_v11 = vpop.f32.mrf.mxu1  ;;  %v498_v19 = vmax.f32 %v494_v13, 0.0 }
  0xb0   :  { %v425_v15 = vadd.f32 %v424_v11, %v405_v10 }
  0xb1   :  { %v460_v12 = vadd.f32 %v459_v6, %v441_v9 }
  0xb3   :  { %v487_v14 = vmul.f32 %v685_v3, %v460_v12 }
  0xb5   :  { %v495_v16 = vadd.f32 %v686_v8, %v487_v14 }
  0xb6   :  { %v443_v17 = vpop.f32.mrf.mxu2  ;;  %v407_v24 = vpop.f32.mrf.mxu0 }
  0xb7   :  { %v462_v18 = vpop.f32.mrf.mxu3  ;;  %v499_v20 = vmax.f32 %v495_v16, 0.0  ;;  %v444_v22 = vadd.f32 %v443_v17, %v425_v15  ;;  %v426_v25 = vpop.f32.mrf.mxu1 }
  0xb8   :  { %v427_v28 = vadd.f32 %v426_v25, %v407_v24 }
  0xb9   :  { %v677_v23 = vpack.c.bf16 %v499_v20, %v498_v19  ;;  %v463_v26 = vadd.f32 %v462_v18, %v444_v22 }
  0xbb   :  { %678 = vst [vmem:[%s914_s6] sm:$0xff] %v677_v23   ;;  %v488_v30 = vmul.f32 %v685_v3, %v463_v26 }
  0xbd   :  { %v496_v37 = vadd.f32 %v686_v8, %v488_v30 }
  0xbe   :  { %v445_v29 = vpop.f32.mrf.mxu2 }
  0xbf   :  { %v446_v31 = vadd.f32 %v445_v29, %v427_v28  ;;  %v464_v33 = vpop.f32.mrf.mxu3  ;;  %v500_v40 = vmax.f32 %v496_v37, 0.0 }
  0xc1   :  { %v465_v34 = vadd.f32 %v464_v33, %v446_v31 }
  0xc3   :  { %v489_v38 = vmul.f32 %v685_v3, %v465_v34 }
  0xc5   :  { %v497_v39 = vadd.f32 %v686_v8, %v489_v38 }
  0xc7   :  { %v501_v41 = vmax.f32 %v497_v39, 0.0 }
  0xc9   :  { %v682_v42 = vpack.c.bf16 %v501_v41, %v500_v40 }
  0xcb   :  { %684 = vst [vmem:[%s914_s6 + $0x8] sm:$0xff] %v682_v42  }

// kernel: forward.159
= control target key start
LH: loop header
LB: loop body
LE: loop exit
PB: predicated region body
PF: predicated region fallthrough
CT: control target
= control target key end

     0   :  { %s1681_s1 = inlined_call_operand.vmem [shape: bf16[512,256], index: 1, kind: input, shape index: {}]   ;;  %s1682_s4 = inlined_call_operand.vmem [shape: f32[1,256], index: 4, kind: input, shape index: {}, may-alias: {4,5}]   ;;  %s1683_s5 = inlined_call_operand.vmem [shape: f32[1,256], index: 5, kind: input, shape index: {}, may-alias: {4,5}]   ;;  %s1684_s0 = inlined_call_operand.vmem [shape: bf16[32,512], index: 0, kind: input, shape index: {}]   ;;  %s1685_s2 = inlined_call_operand.vmem [shape: f32[1,512], index: 2, kind: input, shape index: {}]   ;;  %s1686_s3 = inlined_call_operand.vmem [shape: f32[1,512], index: 3, kind: input, shape index: {}]   ;;  %s1687_s6 = inlined_call_operand.vmem [shape: bf16[32,256], index: 6, kind: output, shape index: {}]  }
   0x1   :  { %v776_v0 = vld [vmem:[%s1681_s1 + $0x70] sm:$0xf]  ;;  %v989_v1 = vld [vmem:[%s1681_s1 + $0x74] sm:$0xf0]  ;;  %v768_v11 = vld [vmem:[%s1681_s1 + $0x60] sm:$0xf] }
   0x2   :  { %v840_v2 = vld [vmem:[%s1681_s1 + $0xf0] sm:$0xf]  ;;  %v777_v3 = vor.u32 %v989_v1, %v776_v0  ;;  %v1005_v4 = vld [vmem:[%s1681_s1 + $0xf4] sm:$0xf0]  ;;  %v987_v13 = vld [vmem:[%s1681_s1 + $0x64] sm:$0xf0] }
   0x3   :  { %v904_v5 = vld [vmem:[%s1681_s1 + $0x170] sm:$0xf]  ;;  %v1021_v6 = vld [vmem:[%s1681_s1 + $0x174] sm:$0xf0]  ;;  %v841_v7 = vor.u32 %v1005_v4, %v840_v2  ;;  %v832_v14 = vld [vmem:[%s1681_s1 + $0xe0] sm:$0xf]  ;;  %v769_v16 = vor.u32 %v987_v13, %v768_v11 }
   0x4   :  { %v905_v8 = vor.u32 %v1021_v6, %v904_v5  ;;  %v968_v9 = vld [vmem:[%s1681_s1 + $0x1f0] sm:$0xf]  ;;  %v1037_v10 = vld [vmem:[%s1681_s1 + $0x1f4] sm:$0xf0]  ;;  %527 = vmatpush.bf16.msra.mxu0 %v777_v3  ;;  %v1003_v15 = vld [vmem:[%s1681_s1 + $0xe4] sm:$0xf0] }
   0x5   :  { %v969_v12 = vor.u32 %v1037_v10, %v968_v9  ;;  %546 = vmatpush.bf16.msra.mxu1 %v841_v7  ;;  %v833_v17 = vor.u32 %v1003_v15, %v832_v14  ;;  %v896_v18 = vld [vmem:[%s1681_s1 + $0x160] sm:$0xf]  ;;  %v1019_v19 = vld [vmem:[%s1681_s1 + $0x164] sm:$0xf0]  ;;  %v760_v23 = vld [vmem:[%s1681_s1 + $0x50] sm:$0xf] }
   0x6   :  { %565 = vmatpush.bf16.msra.mxu2 %v905_v8  ;;  %v960_v20 = vld [vmem:[%s1681_s1 + $0x1e0] sm:$0xf]  ;;  %v897_v21 = vor.u32 %v1019_v19, %v896_v18  ;;  %v1035_v22 = vld [vmem:[%s1681_s1 + $0x1e4] sm:$0xf0]  ;;  %v985_v24 = vld [vmem:[%s1681_s1 + $0x54] sm:$0xf0] }
   0x7   :  { %584 = vmatpush.bf16.msra.mxu3 %v969_v12  ;;  %v961_v25 = vor.u32 %v1035_v22, %v960_v20  ;;  %v824_v26 = vld [vmem:[%s1681_s1 + $0xd0] sm:$0xf]  ;;  %v1001_v27 = vld [vmem:[%s1681_s1 + $0xd4] sm:$0xf0]  ;;  %v761_v29 = vor.u32 %v985_v24, %v760_v23  ;;  %v752_v35 = vld [vmem:[%s1681_s1 + $0x40] sm:$0xf] }
   0x8   :  { %v888_v28 = vld [vmem:[%s1681_s1 + $0x150] sm:$0xf]  ;;  %528 = vmatpush.bf16.msra.mxu0 %v769_v16  ;;  %v1017_v30 = vld [vmem:[%s1681_s1 + $0x154] sm:$0xf0]  ;;  %v825_v33 = vor.u32 %v1001_v27, %v824_v26  ;;  %v983_v36 = vld [vmem:[%s1681_s1 + $0x44] sm:$0xf0] }
   0x9   :  { %v952_v31 = vld [vmem:[%s1681_s1 + $0x1d0] sm:$0xf]  ;;  %v1033_v32 = vld [vmem:[%s1681_s1 + $0x1d4] sm:$0xf0]  ;;  %547 = vmatpush.bf16.msra.mxu1 %v833_v17  ;;  %v889_v34 = vor.u32 %v1017_v30, %v888_v28  ;;  %v816_v37 = vld [vmem:[%s1681_s1 + $0xc0] sm:$0xf]  ;;  %v753_v44 = vor.u32 %v983_v36, %v752_v35 }
   0xa   :  { %566 = vmatpush.bf16.msra.mxu2 %v897_v21  ;;  %v953_v38 = vor.u32 %v1033_v32, %v952_v31  ;;  %v999_v39 = vld [vmem:[%s1681_s1 + $0xc4] sm:$0xf0]  ;;  %v880_v40 = vld [vmem:[%s1681_s1 + $0x140] sm:$0xf]  ;;  %v744_v45 = vld [vmem:[%s1681_s1 + $0x30] sm:$0xf] }
   0xb   :  { %585 = vmatpush.bf16.msra.mxu3 %v961_v25  ;;  %v1015_v41 = vld [vmem:[%s1681_s1 + $0x144] sm:$0xf0]  ;;  %v944_v42 = vld [vmem:[%s1681_s1 + $0x1c0] sm:$0xf]  ;;  %v981_v46 = vld [vmem:[%s1681_s1 + $0x34] sm:$0xf0]  ;;  %v817_v47 = vor.u32 %v999_v39, %v816_v37 }
   0xc   :  { %v1031_v43 = vld [vmem:[%s1681_s1 + $0x1c4] sm:$0xf0]  ;;  %529 = vmatpush.bf16.msra.mxu0 %v761_v29  ;;  %v881_v48 = vor.u32 %v1015_v41, %v880_v40  ;;  %v808_v49 = vld [vmem:[%s1681_s1 + $0xb0] sm:$0xf]  ;;  %v997_v50 = vld [vmem:[%s1681_s1 + $0xb4] sm:$0xf0]  ;;  %v745_v61 = vor.u32 %v981_v46, %v744_v45 }
   0xd   :  { %548 = vmatpush.bf16.msra.mxu1 %v825_v33  ;;  %v872_v51 = vld [vmem:[%s1681_s1 + $0x130] sm:$0xf]  ;;  %v945_v52 = vor.u32 %v1031_v43, %v944_v42  ;;  %v1013_v53 = vld [vmem:[%s1681_s1 + $0x134] sm:$0xf0]  ;;  %v736_v56 = vld [vmem:[%s1681_s1 + $0x20] sm:$0xf]  ;;  %v809_v1 = vor.u32 %v997_v50, %v808_v49 }
   0xe   :  { %567 = vmatpush.bf16.msra.mxu2 %v889_v34  ;;  %v936_v54 = vld [vmem:[%s1681_s1 + $0x1b0] sm:$0xf]  ;;  %v1029_v55 = vld [vmem:[%s1681_s1 + $0x1b4] sm:$0xf0]  ;;  %v979_v57 = vld [vmem:[%s1681_s1 + $0x24] sm:$0xf0]  ;;  %v873_v2 = vor.u32 %v1013_v53, %v872_v51 }
   0xf   :  { %586 = vmatpush.bf16.msra.mxu3 %v953_v38  ;;  %v1202_v58 = vld [vmem:[%s1681_s1 + $0xa0] sm:$0xf]  ;;  %v995_v59 = vld [vmem:[%s1681_s1 + $0xa4] sm:$0xf0]  ;;  %v1224_v3 = vld [vmem:[%s1681_s1 + $0x10] sm:$0xf]  ;;  %v937_v6 = vor.u32 %v1029_v55, %v936_v54  ;;  %v737_v13 = vor.u32 %v979_v57, %v736_v56 }
  0x10   :  { %v864_v60 = vld [vmem:[%s1681_s1 + $0x120] sm:$0xf]  ;;  %530 = vmatpush.bf16.msra.mxu0 %v753_v44  ;;  %v1011_v62 = vld [vmem:[%s1681_s1 + $0x124] sm:$0xf0]  ;;  %v1229_v4 = vld [vmem:[%s1681_s1 + $0x14] sm:$0xf0]  ;;  %v801_v14 = vor.u32 %v995_v59, %v1202_v58 }
  0x11   :  { %v1216_v63 = vld [vmem:[%s1681_s1 + $0x1a0] sm:$0xf]  ;;  %v1027_v0 = vld [vmem:[%s1681_s1 + $0x1a4] sm:$0xf0]  ;;  %549 = vmatpush.bf16.msra.mxu1 %v817_v47  ;;  %v1234_v5 = vld [vmem:[%s1681_s1 + $0x90] sm:$0xf]  ;;  %v865_v15 = vor.u32 %v1011_v62, %v864_v60  ;;  %v729_v20 = vor.u32 %v1229_v4, %v1224_v3 }
  0x12   :  { %568 = vmatpush.bf16.msra.mxu2 %v881_v48  ;;  %v1239_v7 = vld [vmem:[%s1681_s1 + $0x94] sm:$0xf0]  ;;  %v1244_v8 = vld [vmem:[%s1681_s1 + $0x110] sm:$0xf]  ;;  %v1264_v12 = vld [vmem:[%s1681_s1] sm:$0xf]  ;;  %v929_v16 = vor.u32 %v1027_v0, %v1216_v63 }
  0x13   :  { %587 = vmatpush.bf16.msra.mxu3 %v945_v52  ;;  %v1249_v9 = vld [vmem:[%s1681_s1 + $0x114] sm:$0xf0]  ;;  %v1254_v10 = vld [vmem:[%s1681_s1 + $0x190] sm:$0xf]  ;;  %v1271_v17 = vld [vmem:[%s1681_s1 + $0x4] sm:$0xf0]  ;;  %v793_v21 = vor.u32 %v1239_v7, %v1234_v5 }
  0x14   :  { %v1259_v11 = vld [vmem:[%s1681_s1 + $0x194] sm:$0xf0]  ;;  %531 = vmatpush.bf16.msra.mxu0 %v745_v61  ;;  %v1276_v18 = vld [vmem:[%s1681_s1 + $0x80] sm:$0xf]  ;;  %v1281_v19 = vld [vmem:[%s1681_s1 + $0x84] sm:$0xf0]  ;;  %v857_v22 = vor.u32 %v1249_v9, %v1244_v8  ;;  %v721_v27 = vor.u32 %v1271_v17, %v1264_v12 }
  0x15   :  { %550 = vmatpush.bf16.msra.mxu1 %v809_v1  ;;  %v1292_v23 = vld [vmem:[%s1681_s1 + $0x100] sm:$0xf]  ;;  %v1297_v24 = vld [vmem:[%s1681_s1 + $0x104] sm:$0xf0]  ;;  %v921_v26 = vor.u32 %v1259_v11, %v1254_v10  ;;  %v785_v28 = vor.u32 %v1281_v19, %v1276_v18  ;;  %v37_v32 = vld [vmem:[%s1684_s0 + $0x10] sm:$0xff] }
  0x16   :  { %569 = vmatpush.bf16.msra.mxu2 %v873_v2  ;;  %v1302_v25 = vld [vmem:[%s1681_s1 + $0x180] sm:$0xf]  ;;  %v849_v29 = vor.u32 %v1297_v24, %v1292_v23  ;;  %v1315_v30 = vld [vmem:[%s1681_s1 + $0x184] sm:$0xf0]  ;;  %v47_v35 = vunpack.c.l.bf16 %v37_v32  ;;  %v48_v42 = vunpack.c.h.bf16 %v37_v32  ;;  %v38_v44 = vld [vmem:[%s1684_s0 + $0x18] sm:$0xff] }
  0x17   :  { %588 = vmatpush.bf16.msra.mxu3 %v937_v6  ;;  %v35_v31 = vld [vmem:[%s1684_s0] sm:$0xff]  ;;  %v913_v33 = vor.u32 %v1315_v30, %v1302_v25  ;;  %v36_v39 = vld [vmem:[%s1684_s0 + $0x8] sm:$0xff]  ;;  %v49_v47 = vunpack.c.l.bf16 %v38_v44  ;;  %v1020_v57 = vld [vmem:[%s1681_s1 + $0x174] sm:$0xf]  ;;  %v50_v5 = vunpack.c.h.bf16 %v38_v44 }
  0x18   :  { %v43_v34 = vunpack.c.l.bf16 %v35_v31  ;;  %v59_v36 = vld [vmem:[%s1685_s2] sm:$0xf]  ;;  %v44_v38 = vunpack.c.h.bf16 %v35_v31  ;;  %532 = vmatpush.bf16.msra.mxu0 %v737_v13  ;;  %v45_v46 = vunpack.c.l.bf16 %v36_v39  ;;  %v46_v56 = vunpack.c.h.bf16 %v36_v39  ;;  %v906_v58 = vld [vmem:[%s1681_s1 + $0x178] sm:$0xf0]  ;;  %v1368_v63 = vld [vmem:[%s1681_s1 + $0x74] sm:$0xf] }
  0x19   :  { %v85_v37 = vld [vmem:[%s1686_s3] sm:$0xf]  ;;  %v1334_v40 = vperm.slane %v59_v36, 0  ;;  %v1338_v43 = vperm.slane %v59_v36, 1  ;;  %551 = vmatpush.bf16.msra.mxu1 %v801_v14  ;;  %v1345_v48 = vperm.slane %v59_v36, 2  ;;  %v1383_v6 = vperm.slane %v59_v36, 3 }
  0x1a   :  { %v1336_v41 = vperm.slane %v85_v37, 0  ;;  %570 = vmatpush.bf16.msra.mxu2 %v865_v15  ;;  %v1343_v45 = vperm.slane %v85_v37, 1  ;;  %v1353_v55 = vperm.slane %v85_v37, 2  ;;  %v1373_v0 = vld [vmem:[%s1681_s1 + $0x78] sm:$0xf0]  ;;  %v1394_v9 = vld [vmem:[%s1684_s0 + $0x20] sm:$0xff] }
  0x1b   :  { %589 = vmatpush.bf16.msra.mxu3 %v929_v16  ;;  %v69_v49 = vmul.f32 %v1334_v40, %v43_v34  ;;  %v73_v50 = vmul.f32 %v1334_v40, %v47_v35  ;;  %v70_v51 = vmul.f32 %v1338_v43, %v44_v38  ;;  %v74_v52 = vmul.f32 %v1338_v43, %v48_v42  ;;  %v1004_v1 = vld [vmem:[%s1681_s1 + $0xf4] sm:$0xf]  ;;  %v842_v2 = vld [vmem:[%s1681_s1 + $0xf8] sm:$0xf0]  ;;  %v1018_v15 = vld [vmem:[%s1681_s1 + $0x164] sm:$0xf] }
  0x1c   :  { %v71_v53 = vmul.f32 %v1345_v48, %v45_v46  ;;  %v75_v54 = vmul.f32 %v1345_v48, %v49_v47  ;;  %533 = vmatpush.bf16.msra.mxu0 %v729_v20  ;;  %v1036_v7 = vld [vmem:[%s1681_s1 + $0x1f4] sm:$0xf]  ;;  %v970_v8 = vld [vmem:[%s1681_s1 + $0x1f8] sm:$0xf0]  ;;  %v898_v16 = vld [vmem:[%s1681_s1 + $0x168] sm:$0xf0]  ;;  %v76_v31 = vmul.f32 %v1383_v6, %v50_v5  ;;  %v909_v42 = vor.u32 %v1020_v57, %v906_v58 }
  0x1d   :  { %v95_v59 = vadd.f32 %v1336_v41, %v69_v49  ;;  %v99_v60 = vadd.f32 %v1336_v41, %v73_v50  ;;  %v96_v61 = vadd.f32 %v1343_v45, %v70_v51  ;;  %v100_v62 = vadd.f32 %v1343_v45, %v74_v52  ;;  %552 = vmatpush.bf16.msra.mxu1 %v793_v21  ;;  %v1412_v32 = vld [vmem:[%s1681_s1 + $0x68] sm:$0xf0]  ;;  %v1002_v34 = vld [vmem:[%s1681_s1 + $0xe4] sm:$0xf]  ;;  %v1438_v12 = vld [vmem:[%s1681_s1 + $0x154] sm:$0xf] }
  0x1e   :  { %571 = vmatpush.bf16.msra.mxu2 %v857_v22  ;;  %v97_v3 = vadd.f32 %v1353_v55, %v71_v53  ;;  %v101_v4 = vadd.f32 %v1353_v55, %v75_v54  ;;  %v72_v22 = vmul.f32 %v1383_v6, %v46_v56  ;;  %v834_v35 = vld [vmem:[%s1681_s1 + $0xe8] sm:$0xf0]  ;;  %v1427_v39 = vperm.slane %v85_v37, 3  ;;  %v1034_v44 = vld [vmem:[%s1681_s1 + $0x1e4] sm:$0xf]  ;;  %v41_v17 = vld [vmem:[%s1684_s0 + $0x30] sm:$0xff] }
  0x1f   :  { %590 = vmatpush.bf16.msra.mxu3 %v921_v26  ;;  %v111_v10 = vmax.f32 %v95_v59, 0.0  ;;  %v115_v11 = vmax.f32 %v99_v60, 0.0  ;;  %v112_v13 = vmax.f32 %v96_v61, 0.0  ;;  %v116_v14 = vmax.f32 %v100_v62, 0.0  ;;  %v1407_v26 = vld [vmem:[%s1681_s1 + $0x64] sm:$0xf] }
  0x20   :  { %v113_v20 = vmax.f32 %v97_v3, 0.0  ;;  %v117_v21 = vmax.f32 %v101_v4, 0.0  ;;  %534 = vmatpush.bf16.msra.mxu0 %v721_v27  ;;  %v962_v46 = vld [vmem:[%s1681_s1 + $0x1e8] sm:$0xf0]  ;;  %v781_v37 = vor.u32 %v1368_v63, %v1373_v0  ;;  %v845_v47 = vor.u32 %v1004_v1, %v842_v2  ;;  %v890_v49 = vld [vmem:[%s1681_s1 + $0x158] sm:$0xf0] }
  0x21   :  { %v1423_v36 = vpack.c.bf16 %v115_v11, %v111_v10  ;;  %v1425_v38 = vpack.c.bf16 %v116_v14, %v112_v13  ;;  %553 = vmatpush.bf16.msra.mxu1 %v785_v28  ;;  %v1459_v50 = vld [vmem:[%s1681_s1 + $0x54] sm:$0xf]  ;;  %v1464_v18 = vld [vmem:[%s1681_s1 + $0x58] sm:$0xf0]  ;;  %v98_v19 = vadd.f32 %v1427_v39, %v72_v22  ;;  %v102_v23 = vadd.f32 %v1427_v39, %v76_v31  ;;  %v1492_v53 = vld [vmem:[%s1681_s1 + $0x144] sm:$0xf] }
  0x22   :  { %572 = vmatpush.bf16.msra.mxu2 %v849_v29  ;;  %v1449_v27 = vpack.c.bf16 %v117_v21, %v113_v20  ;;  %v973_v24 = vor.u32 %v1036_v7, %v970_v8  ;;  %v1000_v28 = vld [vmem:[%s1681_s1 + $0xd4] sm:$0xf]  ;;  %v826_v29 = vld [vmem:[%s1681_s1 + $0xd8] sm:$0xf0]  ;;  %v51_v25 = vunpack.c.l.bf16 %v1394_v9  ;;  %v901_v30 = vor.u32 %v1018_v15, %v898_v16  ;;  %v1497_v54 = vld [vmem:[%s1681_s1 + $0x148] sm:$0xf0] }
  0x23   :  { %591 = vmatpush.bf16.msra.mxu3 %v913_v33  ;;  %v1480_v51 = vld [vmem:[%s1681_s1 + $0x1d4] sm:$0xf]  ;;  %535 = vmatmul.bf16.vlgmr.msra.gmra.mxu0 %v1423_v36  ;;  %v837_v33 = vor.u32 %v1002_v34, %v834_v35  ;;  %v1487_v52 = vld [vmem:[%s1681_s1 + $0x1d8] sm:$0xf0]  ;;  %v55_v56 = vunpack.c.l.bf16 %v41_v17  ;;  %v52_v57 = vunpack.c.h.bf16 %v1394_v9  ;;  %v114_v58 = vmax.f32 %v98_v19, 0.0  ;;  %v40_v3 = vld [vmem:[%s1684_s0 + $0x28] sm:$0xff] }
  0x24   :  { %554 = vmatmul.bf16.vlgmr.msra.gmra.mxu1 %v1425_v38  ;;  %v118_v59 = vmax.f32 %v102_v23, 0.0  ;;  %v773_v60 = vor.u32 %v1407_v26, %v1412_v32  ;;  %v1507_v61 = vld [vmem:[%s1681_s1 + $0xc4] sm:$0xf]  ;;  %603 = vmatpush.bf16.msrb.mxu0 %v781_v37  ;;  %v965_v62 = vor.u32 %v1034_v44, %v962_v46  ;;  %v893_v63 = vor.u32 %v1438_v12, %v890_v49  ;;  %v818_v1 = vld [vmem:[%s1681_s1 + $0xc8] sm:$0xf0]  ;;  %v42_v9 = vld [vmem:[%s1684_s0 + $0x38] sm:$0xff] }
  0x25   :  { %622 = vmatpush.bf16.msrb.mxu1 %v845_v47  ;;  %573 = vmatmul.bf16.vlgmr.msra.gmra.mxu2 %v1449_v27  ;;  %v765_v0 = vor.u32 %v1459_v50, %v1464_v18  ;;  %v56_v2 = vunpack.c.h.bf16 %v41_v17  ;;  %v829_v5 = vor.u32 %v1000_v28, %v826_v29  ;;  %v957_v7 = vor.u32 %v1480_v51, %v1487_v52  ;;  %v982_v22 = vld [vmem:[%s1681_s1 + $0x44] sm:$0xf]  ;;  %v754_v31 = vld [vmem:[%s1681_s1 + $0x48] sm:$0xf0]  ;;  %v1012_v12 = vld [vmem:[%s1681_s1 + $0x134] sm:$0xf] }
  0x26   :  { %641 = vmatpush.bf16.msrb.mxu2 %v909_v42  ;;  %v1518_v4 = vpack.c.bf16 %v118_v59, %v114_v58  ;;  %v885_v8 = vor.u32 %v1492_v53, %v1497_v54  ;;  %v821_v10 = vor.u32 %v1507_v61, %v818_v1  ;;  %v77_v11 = vmul.f32 %v1334_v40, %v51_v25  ;;  %v1030_v34 = vld [vmem:[%s1681_s1 + $0x1c4] sm:$0xf]  ;;  %v946_v35 = vld [vmem:[%s1681_s1 + $0x1c8] sm:$0xf0]  ;;  %v996_v23 = vld [vmem:[%s1681_s1 + $0xb4] sm:$0xf] }
  0x27   :  { %660 = vmatpush.bf16.msrb.mxu3 %v973_v24  ;;  %v81_v13 = vmul.f32 %v1334_v40, %v55_v56  ;;  %v78_v14 = vmul.f32 %v1338_v43, %v52_v57  ;;  %v82_v15 = vmul.f32 %v1338_v43, %v56_v2  ;;  %v53_v16 = vunpack.c.l.bf16 %v40_v3  ;;  %v810_v24 = vld [vmem:[%s1681_s1 + $0xb8] sm:$0xf0]  ;;  %v1028_v52 = vld [vmem:[%s1681_s1 + $0x1b4] sm:$0xf]  ;;  %v1010_v56 = vld [vmem:[%s1681_s1 + $0x124] sm:$0xf] }
  0x28   :  { %592 = vmatmul.bf16.vlgmr.msra.gmra.mxu3 %v1518_v4  ;;  %v57_v20 = vunpack.c.l.bf16 %v42_v9  ;;  %v54_v21 = vunpack.c.h.bf16 %v40_v3  ;;  %604 = vmatpush.bf16.msrb.mxu0 %v773_v60  ;;  %v103_v40 = vadd.f32 %v1336_v41, %v77_v11  ;;  %v58_v43 = vunpack.c.h.bf16 %v42_v9  ;;  %v746_v51 = vld [vmem:[%s1681_s1 + $0x38] sm:$0xf0]  ;;  %v866_v57 = vld [vmem:[%s1681_s1 + $0x128] sm:$0xf0]  ;;  %v978_v2 = vld [vmem:[%s1681_s1 + $0x24] sm:$0xf] }
  0x29   :  { %623 = vmatpush.bf16.msrb.mxu1 %v837_v33  ;;  %v107_v26 = vadd.f32 %v1336_v41, %v81_v13  ;;  %v104_v32 = vadd.f32 %v1343_v45, %v78_v14  ;;  %v108_v42 = vadd.f32 %v1343_v45, %v82_v15  ;;  %v79_v44 = vmul.f32 %v1345_v48, %v53_v16  ;;  %v874_v45 = vld [vmem:[%s1681_s1 + $0x138] sm:$0xf0]  ;;  %v992_v14 = vld [vmem:[%s1681_s1 + $0x94] sm:$0xf] }
  0x2a   :  { %642 = vmatpush.bf16.msrb.mxu2 %v901_v30  ;;  %v83_v46 = vmul.f32 %v1345_v48, %v57_v20  ;;  %v80_v41 = vmul.f32 %v1383_v6, %v54_v21  ;;  %v119_v17 = vmax.f32 %v103_v40, 0.0  ;;  %v84_v49 = vmul.f32 %v1383_v6, %v58_v43  ;;  %v858_v11 = vld [vmem:[%s1681_s1 + $0x118] sm:$0xf0]  ;;  %v976_v21 = vld [vmem:[%s1681_s1 + $0x14] sm:$0xf] }
  0x2b   :  { %661 = vmatpush.bf16.msrb.mxu3 %v965_v62  ;;  %v123_v37 = vmax.f32 %v107_v26, 0.0  ;;  %v120_v47 = vmax.f32 %v104_v32, 0.0  ;;  %v124_v50 = vmax.f32 %v108_v42, 0.0  ;;  %v105_v18 = vadd.f32 %v1353_v55, %v79_v44  ;;  %v994_v62 = vld [vmem:[%s1681_s1 + $0xa4] sm:$0xf] }
  0x2c   :  { %v109_v48 = vadd.f32 %v1353_v55, %v83_v46  ;;  %v106_v19 = vadd.f32 %v1427_v39, %v80_v41  ;;  %605 = vmatpush.bf16.msrb.mxu0 %v765_v0  ;;  %v757_v6 = vor.u32 %v982_v22, %v754_v31  ;;  %v949_v28 = vor.u32 %v1030_v34, %v946_v35  ;;  %v980_v55 = vld [vmem:[%s1681_s1 + $0x34] sm:$0xf]  ;;  %v794_v15 = vld [vmem:[%s1681_s1 + $0x98] sm:$0xf0]  ;;  %v1006_v43 = vld [vmem:[%s1681_s1 + $0x104] sm:$0xf] }
  0x2d   :  { %624 = vmatpush.bf16.msrb.mxu1 %v829_v5  ;;  %v110_v29 = vadd.f32 %v1427_v39, %v84_v49  ;;  %v121_v25 = vmax.f32 %v105_v18, 0.0  ;;  %v877_v33 = vor.u32 %v1012_v12, %v874_v45  ;;  %v938_v39 = vld [vmem:[%s1681_s1 + $0x1b8] sm:$0xf0]  ;;  %v1581_v53 = vpack.c.bf16 %v123_v37, %v119_v17  ;;  %v738_v5 = vld [vmem:[%s1681_s1 + $0x28] sm:$0xf0] }
  0x2e   :  { %643 = vmatpush.bf16.msrb.mxu2 %v893_v63  ;;  %v125_v30 = vmax.f32 %v109_v48, 0.0  ;;  %v813_v54 = vor.u32 %v996_v23, %v810_v24  ;;  %v1589_v58 = vpack.c.bf16 %v124_v50, %v120_v47  ;;  %v122_v60 = vmax.f32 %v106_v19, 0.0  ;;  %v802_v63 = vld [vmem:[%s1681_s1 + $0xa8] sm:$0xf0]  ;;  %v730_v31 = vld [vmem:[%s1681_s1 + $0x18] sm:$0xf0] }
  0x2f   :  { %662 = vmatpush.bf16.msrb.mxu3 %v957_v7  ;;  %v126_v61 = vmax.f32 %v110_v29, 0.0  ;;  %v749_v0 = vor.u32 %v980_v55, %v746_v51  ;;  %v941_v1 = vor.u32 %v1028_v52, %v938_v39  ;;  %v869_v3 = vor.u32 %v1010_v56, %v866_v57  ;;  %v1026_v7 = vld [vmem:[%s1681_s1 + $0x1a4] sm:$0xf]  ;;  %v1024_v40 = vld [vmem:[%s1681_s1 + $0x194] sm:$0xf] }
  0x30   :  { %v1591_v59 = vpack.c.bf16 %v125_v30, %v121_v25  ;;  %606 = vmatpush.bf16.msrb.mxu0 %v757_v6  ;;  %v805_v9 = vor.u32 %v994_v62, %v802_v63  ;;  %v741_v16 = vor.u32 %v978_v2, %v738_v5  ;;  %v922_v26 = vld [vmem:[%s1681_s1 + $0x198] sm:$0xf0]  ;;  %v797_v32 = vor.u32 %v992_v14, %v794_v15  ;;  %v850_v34 = vld [vmem:[%s1681_s1 + $0x108] sm:$0xf0]  ;;  %v990_v35 = vld [vmem:[%s1681_s1 + $0x84] sm:$0xf] }
  0x31   :  { %625 = vmatpush.bf16.msrb.mxu1 %v821_v10  ;;  %v1008_v10 = vld [vmem:[%s1681_s1 + $0x114] sm:$0xf]  ;;  %v134_v13 = vpack.c.bf16 %v126_v61, %v122_v60  ;;  %v786_v42 = vld [vmem:[%s1681_s1 + $0x88] sm:$0xf0]  ;;  %v733_v44 = vor.u32 %v976_v21, %v730_v31  ;;  %v925_v46 = vor.u32 %v1024_v40, %v922_v26  ;;  %v974_v41 = vld [vmem:[%s1681_s1 + $0x4] sm:$0xf]  ;;  %v853_v12 = vor.u32 %v1006_v43, %v850_v34 }
  0x32   :  { %644 = vmatpush.bf16.msrb.mxu2 %v885_v8  ;;  %v930_v8 = vld [vmem:[%s1681_s1 + $0x1a8] sm:$0xf0]  ;;  %v861_v22 = vor.u32 %v1008_v10, %v858_v11  ;;  %v1022_v37 = vld [vmem:[%s1681_s1 + $0x184] sm:$0xf]  ;;  %v789_v49 = vor.u32 %v990_v35, %v786_v42 }
  0x33   :  { %663 = vmatpush.bf16.msrb.mxu3 %v949_v28  ;;  %540 = vmatmul.bf16.gmra.mxu0 %v1581_v53  ;;  %v933_v20 = vor.u32 %v1026_v7, %v930_v8  ;;  %v722_v17 = vld [vmem:[%s1681_s1 + $0x8] sm:$0xf0] }
  0x34   :  { %559 = vmatmul.bf16.gmra.mxu1 %v1589_v58  ;;  %607 = vmatpush.bf16.msrb.mxu0 %v749_v0  ;;  %v914_v47 = vld [vmem:[%s1681_s1 + $0x188] sm:$0xf0]  ;;  %v725_v45 = vor.u32 %v974_v41, %v722_v17 }
  0x35   :  { %626 = vmatpush.bf16.msrb.mxu1 %v813_v54  ;;  %578 = vmatmul.bf16.gmra.mxu2 %v1591_v59  ;;  %v917_v50 = vor.u32 %v1022_v37, %v914_v47 }
  0x36   :  { %645 = vmatpush.bf16.msrb.mxu2 %v877_v33 }
  0x37   :  { %664 = vmatpush.bf16.msrb.mxu3 %v941_v1 }
  0x38   :  { %597 = vmatmul.bf16.gmra.mxu3 %v134_v13  ;;  %608 = vmatpush.bf16.msrb.mxu0 %v741_v16 }
  0x39   :  { %627 = vmatpush.bf16.msrb.mxu1 %v805_v9 }
  0x3a   :  { %646 = vmatpush.bf16.msrb.mxu2 %v869_v3 }
  0x3b   :  { %665 = vmatpush.bf16.msrb.mxu3 %v933_v20 }
  0x3c   :  { %609 = vmatpush.bf16.msrb.mxu0 %v733_v44 }
  0x3d   :  { %628 = vmatpush.bf16.msrb.mxu1 %v797_v32 }
  0x3e   :  { %647 = vmatpush.bf16.msrb.mxu2 %v861_v22 }
  0x3f   :  { %666 = vmatpush.bf16.msrb.mxu3 %v925_v46 }
  0x40   :  { %610 = vmatpush.bf16.msrb.mxu0 %v725_v45 }
  0x41   :  { %629 = vmatpush.bf16.msrb.mxu1 %v789_v49 }
  0x42   :  { %648 = vmatpush.bf16.msrb.mxu2 %v853_v12 }
  0x43   :  { %667 = vmatpush.bf16.msrb.mxu3 %v917_v50  ;;  %611 = vmatmul.bf16.vlgmr.msrb.gmra.mxu0 %v1423_v36 }
  0x44   :  { %630 = vmatmul.bf16.vlgmr.msrb.gmra.mxu1 %v1425_v38 }
  0x45   :  { %649 = vmatmul.bf16.vlgmr.msrb.gmra.mxu2 %v1449_v27 }
  0x48   :  { %668 = vmatmul.bf16.vlgmr.msrb.gmra.mxu3 %v1518_v4 }
  0x53   :  { %616 = vmatmul.bf16.gmra.mxu0 %v1581_v53 }
  0x54   :  { %635 = vmatmul.bf16.gmra.mxu1 %v1589_v58 }
  0x55   :  { %654 = vmatmul.bf16.gmra.mxu2 %v1591_v59 }
  0x58   :  { %673 = vmatmul.bf16.gmra.mxu3 %v134_v13 }
  0xa0   :  { %v536_v18 = vpop.f32.mrf.mxu0 }
  0xa1   :  { %v555_v48 = vpop.f32.mrf.mxu1 }
  0xa2   :  { %v556_v39 = vadd.f32 %v555_v48, %v536_v18 }
  0xa8   :  { %v574_v19 = vpop.f32.mrf.mxu2  ;;  %v538_v23 = vpop.f32.mrf.mxu0 }
  0xa9   :  { %v557_v24 = vpop.f32.mrf.mxu1  ;;  %v575_v54 = vadd.f32 %v574_v19, %v556_v39 }
  0xaa   :  { %v558_v63 = vadd.f32 %v557_v24, %v538_v23 }
  0xab   :  { %v593_v6 = vpop.f32.mrf.mxu3 }
  0xac   :  { %v594_v61 = vadd.f32 %v593_v6, %v575_v54 }
  0xb0   :  { %v576_v36 = vpop.f32.mrf.mxu2  ;;  %v541_v28 = vpop.f32.mrf.mxu0 }
  0xb1   :  { %v560_v38 = vpop.f32.mrf.mxu1  ;;  %v577_v2 = vadd.f32 %v576_v36, %v558_v63 }
  0xb2   :  { %v561_v11 = vadd.f32 %v560_v38, %v541_v28 }
  0xb3   :  { %v595_v29 = vpop.f32.mrf.mxu3 }
  0xb4   :  { %v596_v10 = vadd.f32 %v595_v29, %v577_v2 }
  0xb8   :  { %v579_v27 = vpop.f32.mrf.mxu2  ;;  %v543_v55 = vpop.f32.mrf.mxu0 }
  0xb9   :  { %v562_v4 = vpop.f32.mrf.mxu1  ;;  %v580_v16 = vadd.f32 %v579_v27, %v561_v11 }
  0xba   :  { %v563_v43 = vadd.f32 %v562_v4, %v543_v55 }
  0xbb   :  { %v598_v51 = vpop.f32.mrf.mxu3 }
  0xbc   :  { %v599_v31 = vadd.f32 %v598_v51, %v580_v16 }
  0xc0   :  { %v581_v25 = vpop.f32.mrf.mxu2  ;;  %v612_v30 = vpop.f32.mrf.mxu0 }
  0xc1   :  { %v631_v33 = vpop.f32.mrf.mxu1  ;;  %v582_v42 = vadd.f32 %v581_v25, %v563_v43 }
  0xc2   :  { %v632_v53 = vadd.f32 %v631_v33, %v612_v30 }
  0xc3   :  { %v600_v52 = vpop.f32.mrf.mxu3 }
  0xc4   :  { %v601_v12 = vadd.f32 %v600_v52, %v582_v42 }
  0xc8   :  { %v650_v56 = vpop.f32.mrf.mxu2  ;;  %v614_v58 = vpop.f32.mrf.mxu0 }
  0xc9   :  { %v651_v57 = vadd.f32 %v650_v56, %v632_v53  ;;  %v633_v59 = vpop.f32.mrf.mxu1 }
  0xca   :  { %v634_v1 = vadd.f32 %v633_v59, %v614_v58 }
  0xcb   :  { %v669_v60 = vpop.f32.mrf.mxu3 }
  0xcc   :  { %v670_v62 = vadd.f32 %v669_v60, %v651_v57 }
  0xce   :  { %v706_v0 = vpack.c.bf16 %v670_v62, %v594_v61 }
  0xd0   :  { %710 = vst [vmem:[%s1687_s6] sm:$0xff] %v706_v0  ;;  %v652_v3 = vpop.f32.mrf.mxu2  ;;  %v617_v7 = vpop.f32.mrf.mxu0 }
  0xd1   :  { %v653_v5 = vadd.f32 %v652_v3, %v634_v1  ;;  %v636_v8 = vpop.f32.mrf.mxu1 }
  0xd2   :  { %v637_v14 = vadd.f32 %v636_v8, %v617_v7 }
  0xd3   :  { %v671_v9 = vpop.f32.mrf.mxu3 }
  0xd4   :  { %v672_v13 = vadd.f32 %v671_v9, %v653_v5 }
  0xd6   :  { %v707_v15 = vpack.c.bf16 %v672_v13, %v596_v10 }
  0xd8   :  { %711 = vst [vmem:[%s1687_s6 + $0x8] sm:$0xff] %v707_v15  ;;  %v655_v20 = vpop.f32.mrf.mxu2  ;;  %v619_v26 = vpop.f32.mrf.mxu0 }
  0xd9   :  { %v656_v21 = vadd.f32 %v655_v20, %v637_v14  ;;  %v638_v32 = vpop.f32.mrf.mxu1 }
  0xda   :  { %v639_v35 = vadd.f32 %v638_v32, %v619_v26 }
  0xdb   :  { %v674_v22 = vpop.f32.mrf.mxu3 }
  0xdc   :  { %v675_v40 = vadd.f32 %v674_v22, %v656_v21 }
  0xde   :  { %v708_v34 = vpack.c.bf16 %v675_v40, %v599_v31 }
  0xe0   :  { %712 = vst [vmem:[%s1687_s6 + $0x10] sm:$0xff] %v708_v34  ;;  %v657_v44 = vpop.f32.mrf.mxu2 }
  0xe1   :  { %v658_v46 = vadd.f32 %v657_v44, %v639_v35 }
  0xe3   :  { %v676_v41 = vpop.f32.mrf.mxu3 }
  0xe4   :  { %v677_v17 = vadd.f32 %v676_v41, %v658_v46 }
  0xe6   :  { %v709_v37 = vpack.c.bf16 %v677_v17, %v601_v12 }
  0xe8   :  { %713 = vst [vmem:[%s1687_s6 + $0x18] sm:$0xff] %v709_v37 }

// kernel: forward.160
= control target key start
LH: loop header
LB: loop body
LE: loop exit
PB: predicated region body
PF: predicated region fallthrough
CT: control target
= control target key end

     0   :  { %s412_s1 = inlined_call_operand.vmem [shape: bf16[256,128], index: 1, kind: input, shape index: {}]   ;;  %s413_s0 = inlined_call_operand.vmem [shape: bf16[8,256], index: 0, kind: input, shape index: {}]   ;;  %s414_s2 = inlined_call_operand.vmem [shape: f32[1,256], index: 2, kind: input, shape index: {}]   ;;  %s415_s3 = inlined_call_operand.vmem [shape: f32[1,256], index: 3, kind: input, shape index: {}]   ;;  %s416_s4 = inlined_call_operand.vmem [shape: f32[1,128], index: 4, kind: input, shape index: {}]   ;;  %s417_s5 = inlined_call_operand.vmem [shape: f32[1,128], index: 5, kind: input, shape index: {}]   ;;  %s418_s6 = inlined_call_operand.vmem [shape: bf16[8,128], index: 6, kind: output, shape index: {}]  }
   0x1   :  { %v300_v0 = vld [vmem:[%s412_s1 + $0x38] sm:$0xff]  ;;  %v299_v2 = vld [vmem:[%s412_s1 + $0x30] sm:$0xff]  ;;  %v298_v4 = vld [vmem:[%s412_s1 + $0x28] sm:$0xff] }
   0x2   :  { %v308_v1 = vld [vmem:[%s412_s1 + $0x78] sm:$0xff]  ;;  %180 = vmatpush.bf16.msra.mxu0 %v300_v0  ;;  %v307_v3 = vld [vmem:[%s412_s1 + $0x70] sm:$0xff]  ;;  %v306_v5 = vld [vmem:[%s412_s1 + $0x68] sm:$0xff] }
   0x3   :  { %193 = vmatpush.bf16.msra.mxu1 %v308_v1  ;;  %v297_v6 = vld [vmem:[%s412_s1 + $0x20] sm:$0xff]  ;;  %v296_v14 = vld [vmem:[%s412_s1 + $0x18] sm:$0xff]  ;;  %v295_v21 = vld [vmem:[%s412_s1 + $0x10] sm:$0xff] }
   0x4   :  { %v305_v7 = vld [vmem:[%s412_s1 + $0x60] sm:$0xff]  ;;  %v304_v15 = vld [vmem:[%s412_s1 + $0x58] sm:$0xff]  ;;  %v303_v22 = vld [vmem:[%s412_s1 + $0x50] sm:$0xff] }
   0x5   :  { %v28_v8 = vld [vmem:[%s413_s0] sm:$0xff]  ;;  %v294_v25 = vld [vmem:[%s412_s1 + $0x8] sm:$0xff] }
   0x6   :  { %181 = vmatpush.bf16.msra.mxu0 %v299_v2  ;;  %v31_v9 = vld [vmem:[%s414_s2] sm:$0x3]  ;;  %v29_v10 = vunpack.c.l.bf16 %v28_v8  ;;  %v30_v12 = vunpack.c.h.bf16 %v28_v8  ;;  %v302_v26 = vld [vmem:[%s412_s1 + $0x48] sm:$0xff] }
   0x7   :  { %194 = vmatpush.bf16.msra.mxu1 %v307_v3  ;;  %v33_v11 = vperm.slane %v31_v9, 0  ;;  %v34_v13 = vperm.slane %v31_v9, 1  ;;  %v39_v16 = vld [vmem:[%s415_s3] sm:$0x3] }
   0x8   :  { %v41_v18 = vperm.slane %v39_v16, 0  ;;  %v42_v20 = vperm.slane %v39_v16, 1  ;;  %v293_v29 = vld [vmem:[%s412_s1] sm:$0xff] }
   0x9   :  { %v37_v17 = vmul.f32 %v33_v11, %v29_v10  ;;  %v38_v19 = vmul.f32 %v34_v13, %v30_v12  ;;  %v301_v30 = vld [vmem:[%s412_s1 + $0x40] sm:$0xff] }
   0xa   :  { %182 = vmatpush.bf16.msra.mxu0 %v298_v4  ;;  %v309_v33 = vld [vmem:[%s416_s4] ss:$0 sm:$0xff] }
   0xb   :  { %195 = vmatpush.bf16.msra.mxu1 %v306_v5  ;;  %v45_v23 = vadd.f32 %v41_v18, %v37_v17  ;;  %v46_v24 = vadd.f32 %v42_v20, %v38_v19  ;;  %v310_v37 = vld [vmem:[%s417_s5] ss:$0 sm:$0xff] }
   0xd   :  { %v47_v27 = vmax.f32 %v45_v23, 0.0  ;;  %v48_v28 = vmax.f32 %v46_v24, 0.0 }
   0xe   :  { %183 = vmatpush.bf16.msra.mxu0 %v297_v6 }
   0xf   :  { %196 = vmatpush.bf16.msra.mxu1 %v305_v7  ;;  %v49_v31 = vpack.c.bf16 %v47_v27, %v47_v27  ;;  %v50_v32 = vpack.c.bf16 %v48_v28, %v48_v28 }
  0x12   :  { %184 = vmatpush.bf16.msra.mxu0 %v296_v14 }
  0x13   :  { %197 = vmatpush.bf16.msra.mxu1 %v304_v15 }
  0x16   :  { %185 = vmatpush.bf16.msra.mxu0 %v295_v21 }
  0x17   :  { %198 = vmatpush.bf16.msra.mxu1 %v303_v22 }
  0x1a   :  { %186 = vmatpush.bf16.msra.mxu0 %v294_v25 }
  0x1b   :  { %199 = vmatpush.bf16.msra.mxu1 %v302_v26 }
  0x1e   :  { %187 = vmatpush.bf16.msra.mxu0 %v293_v29 }
  0x1f   :  { %200 = vmatpush.bf16.msra.mxu1 %v301_v30 }
  0x21   :  { %188 = vmatmul.bf16.vlgmr.msra.gmra.mxu0 %v49_v31 }
  0x22   :  { %201 = vmatmul.bf16.vlgmr.msra.gmra.mxu1 %v50_v32 }
  0x9e   :  { %v189_v34 = vpop.f32.mrf.mxu0 }
  0x9f   :  { %v202_v35 = vpop.f32.mrf.mxu1 }
  0xa0   :  { %v203_v36 = vadd.f32 %v202_v35, %v189_v34 }
  0xa2   :  { %v216_v38 = vmul.f32 %v309_v33, %v203_v36 }
  0xa4   :  { %v221_v39 = vadd.f32 %v310_v37, %v216_v38 }
  0xa6   :  { %v222_v40 = vmax.f32 %v221_v39, 0.0  ;;  %v191_v41 = vpop.f32.mrf.mxu0 }
  0xa7   :  { %v204_v42 = vpop.f32.mrf.mxu1 }
  0xa8   :  { %v223_v43 = vpack.c.bf16 %v222_v40, %v222_v40 }
  0xaa   :  { %224 = vst [vmem:[%s418_s6] sm:$0xf] %v223_v43 }

// kernel: forward.161
= control target key start
LH: loop header
LB: loop body
LE: loop exit
PB: predicated region body
PF: predicated region fallthrough
CT: control target
= control target key end

     0   :  { %s1004_s21 = smov 0   ;;  %s1006_s22 = smov 0   ;;  %s1076_s0 = inlined_call_operand.vmem [shape: bf16[8,1152], index: 0, kind: input, shape index: {}]   ;;  %s1077_s1 = inlined_call_operand.vmem [shape: bf16[1152,128], index: 1, kind: input, shape index: {}]   ;;  %s1078_s2 = inlined_call_operand.vmem [shape: f32[1,1152], index: 2, kind: input, shape index: {}, may-alias: {2,3}]   ;;  %s1079_s3 = inlined_call_operand.vmem [shape: f32[1,1152], index: 3, kind: input, shape index: {}, may-alias: {2,3}]   ;;  %s1080_s4 = inlined_call_operand.vmem [shape: f32[1,128], index: 4, kind: input, shape index: {}, may-alias: {4,5}]   ;;  %s1081_s5 = inlined_call_operand.vmem [shape: f32[1,128], index: 5, kind: input, shape index: {}, may-alias: {4,5}]   ;;  %s1082_s6 = inlined_call_operand.vmem [shape: bf16[8,128], index: 6, kind: output, shape index: {}]  }
   0x1   :  { %s1008_s23 = smov 0  }
   0x2 LB: > { %s28_s2 = sadd.s32 1, %s962_s22  ;;  %p791_p0 = scmp.ge.s32.totalorder %s966_s23, 1  ;;  %s966_s23 = sphi %s1008_s23, %s16_s23   ;;  %s962_s22 = sphi %s1006_s22, %s1084_s22   ;;  %s958_s21 = sphi %s1004_s21, %s1083_s21  }
   0x3   : > { %p29_p1 = scmp.ge.s32.totalorder %s28_s2, 3  ;;  %p292_p2 = scmp.lt.s32.totalorder %s966_s23, 4 }
   0x5   : > { %s1086_s2 = smov (%p29_p1, %s28_s2), 0  ;;  %p293_p3 = pnand %p791_p0, %p292_p2 }
   0x6   : > { %s350_s3 = smul.u32 (!%p293_p3), 3, %s958_s21  ;;  %p794_p6 = scmp.ne.s32.totalorder (!%p293_p3), %s958_s21, 0 }
   0x7   : > { %296 = sbr.rel (%p293_p3) target bundleno = 203 (0xcb), region = 44 }
   0x8   : > { %s360_s4 = smul.u32 (!%p293_p3), 48, %s958_s21  ;;  %p353_p4 = scmp.lt.s32.totalorder (!%p293_p3), %s350_s3, 8 }
   0xa   : > { %p361_p5 = scmp.lt.s32.totalorder (!%p293_p3), %s360_s4, 143 }
   0xc   : > { %s1088_s3 = smov (!%p353_p4, %s350_s3), 8  ;;  %s1090_s4 = smov (!%p361_p5, %s360_s4), 143 }
   0xd   : > { %s792_s5 = sshll.u32 %s1088_s3, 2  ;;  %s793_s27 = sshll.u32 %s1090_s4, 2 }
   0xe   : > { %s1029_s26 = scalar_lea.vmem %s1076_s0, %s792_s5  ;;  %s1034_s30 = scalar_lea.vmem %s1077_s1, %s793_s27 }
   0xf   : > { %395 = sbr.rel (%p794_p6) target bundleno = 22 (0x16), region = 48 }
  0x14   : > { %v968_v0 = vmov 0.0  }
  0x15   : > { %396 = vst [vmem:[#allocation2] sm:$0xff] %v968_v0 }
  0x16 PF: > { %v902_v1 = vld [vmem:[%s1034_s30 + $0x38] sm:$0xff]  ;;  %v901_v4 = vld [vmem:[%s1034_s30 + $0x30] sm:$0xff]  ;;  %v900_v7 = vld [vmem:[%s1034_s30 + $0x28] sm:$0xff]  ;;  %p891_p7 = scmp.ne.s32.totalorder %s958_s21, 2 }
  0x17   : > { %v910_v2 = vld [vmem:[%s1034_s30 + $0x78] sm:$0xff]  ;;  %603 = vmatpush.bf16.msra.mxu0 %v902_v1  ;;  %v909_v5 = vld [vmem:[%s1034_s30 + $0x70] sm:$0xff]  ;;  %v908_v8 = vld [vmem:[%s1034_s30 + $0x68] sm:$0xff] }
  0x18   : > { %v918_v3 = vld [vmem:[%s1034_s30 + $0xb8] sm:$0xff]  ;;  %616 = vmatpush.bf16.msra.mxu1 %v910_v2  ;;  %v917_v6 = vld [vmem:[%s1034_s30 + $0xb0] sm:$0xff]  ;;  %v916_v9 = vld [vmem:[%s1034_s30 + $0xa8] sm:$0xff] }
  0x19   : > { %629 = vmatpush.bf16.msra.mxu2 %v918_v3  ;;  %v899_v10 = vld [vmem:[%s1034_s30 + $0x20] sm:$0xff]  ;;  %v898_v13 = vld [vmem:[%s1034_s30 + $0x18] sm:$0xff]  ;;  %v897_v16 = vld [vmem:[%s1034_s30 + $0x10] sm:$0xff] }
  0x1a   : > { %v907_v11 = vld [vmem:[%s1034_s30 + $0x60] sm:$0xff]  ;;  %v906_v14 = vld [vmem:[%s1034_s30 + $0x58] sm:$0xff]  ;;  %v905_v17 = vld [vmem:[%s1034_s30 + $0x50] sm:$0xff] }
  0x1b   : > { %604 = vmatpush.bf16.msra.mxu0 %v901_v4  ;;  %v915_v12 = vld [vmem:[%s1034_s30 + $0xa0] sm:$0xff]  ;;  %v914_v15 = vld [vmem:[%s1034_s30 + $0x98] sm:$0xff]  ;;  %v913_v18 = vld [vmem:[%s1034_s30 + $0x90] sm:$0xff] }
  0x1c   : > { %617 = vmatpush.bf16.msra.mxu1 %v909_v5  ;;  %v896_v19 = vld [vmem:[%s1034_s30 + $0x8] sm:$0xff]  ;;  %v397_v21 = vld [vmem:[%s1029_s26] sm:$0xff] }
  0x1d   : > { %630 = vmatpush.bf16.msra.mxu2 %v917_v6  ;;  %v904_v20 = vld [vmem:[%s1034_s30 + $0x48] sm:$0xff]  ;;  %v450_v24 = vunpack.c.l.b16 %v397_v21  ;;  %v451_v25 = vunpack.c.h.b16 %v397_v21  ;;  %v895_v26 = vld [vmem:[%s1034_s30] sm:$0xff] }
  0x1e   : > { %v912_v22 = vld [vmem:[%s1034_s30 + $0x88] sm:$0xff]  ;;  %v903_v27 = vld [vmem:[%s1034_s30 + $0x40] sm:$0xff] }
  0x1f   : > { %605 = vmatpush.bf16.msra.mxu0 %v900_v7  ;;  %v398_v23 = vld [vmem:[%s1029_s26 + $0x8] sm:$0xf]  ;;  %v911_v29 = vld [vmem:[%s1034_s30 + $0x80] sm:$0xff]  ;;  %v453_v30 = vpack.c.b16 %v450_v24, %v450_v24  ;;  %v454_v31 = vpack.c.b16 %v451_v25, %v451_v25 }
  0x20   : > { %618 = vmatpush.bf16.msra.mxu1 %v908_v8  ;;  %v452_v28 = vunpack.c.l.b16 %v398_v23  ;;  %v399_v36 = vld [vmem:[#allocation2] sm:$0xff] }
  0x21   : > { %631 = vmatpush.bf16.msra.mxu2 %v916_v9 }
  0x22   : > { %v455_v32 = vpack.c.b16 %v452_v28, %v452_v28 }
  0x23   : > { %606 = vmatpush.bf16.msra.mxu0 %v899_v10 }
  0x24   : > { %619 = vmatpush.bf16.msra.mxu1 %v907_v11 }
  0x25   : > { %632 = vmatpush.bf16.msra.mxu2 %v915_v12 }
  0x27   : > { %607 = vmatpush.bf16.msra.mxu0 %v898_v13 }
  0x28   : > { %620 = vmatpush.bf16.msra.mxu1 %v906_v14 }
  0x29   : > { %633 = vmatpush.bf16.msra.mxu2 %v914_v15 }
  0x2b   : > { %608 = vmatpush.bf16.msra.mxu0 %v897_v16 }
  0x2c   : > { %621 = vmatpush.bf16.msra.mxu1 %v905_v17 }
  0x2d   : > { %634 = vmatpush.bf16.msra.mxu2 %v913_v18 }
  0x2f   : > { %609 = vmatpush.bf16.msra.mxu0 %v896_v19 }
  0x30   : > { %622 = vmatpush.bf16.msra.mxu1 %v904_v20 }
  0x31   : > { %635 = vmatpush.bf16.msra.mxu2 %v912_v22 }
  0x33   : > { %610 = vmatpush.bf16.msra.mxu0 %v895_v26 }
  0x34   : > { %623 = vmatpush.bf16.msra.mxu1 %v903_v27 }
  0x35   : > { %636 = vmatpush.bf16.msra.mxu2 %v911_v29 }
  0x36   : > { %611 = vmatmul.bf16.vlgmr.msra.gmra.mxu0 %v453_v30 }
  0x37   : > { %624 = vmatmul.bf16.vlgmr.msra.gmra.mxu1 %v454_v31 }
  0x38   : > { %637 = vmatmul.bf16.vlgmr.msra.gmra.mxu2 %v455_v32 }
  0xb3   : > { %v612_v33 = vpop.f32.mrf.mxu0 }
  0xb4   : > { %v625_v34 = vpop.f32.mrf.mxu1 }
  0xb5   : > { %v626_v35 = vadd.f32 %v625_v34, %v612_v33 }
  0xbb   : > { %v638_v37 = vpop.f32.mrf.mxu2  ;;  %v614_v39 = vpop.f32.mrf.mxu0 }
  0xbc   : > { %v639_v38 = vadd.f32 %v638_v37, %v626_v35  ;;  %v627_v40 = vpop.f32.mrf.mxu1 }
  0xbe   : > { %v642_v41 = vadd.f32 %v639_v38, %v399_v36 }
  0xbf   : > { %647 = sbr.rel (%p891_p7) target bundleno = 203 (0xcb), region = 52 }
  0xc0   : > { %643 = vst [vmem:[#allocation2] sm:$0xff] %v642_v41 }
  0xc3   : > { %v640_v42 = vpop.f32.mrf.mxu2 }
  0xc7   : > { %v648_v43 = vld [vmem:[#allocation2] sm:$0xff] }
  0xc8   : > { %v649_v44 = vpack.c.bf16 %v648_v43, %v648_v43 }
  0xca   : > { %650 = vst [vmem:[%s1082_s6] sm:$0xf] %v649_v44 }
  0xcb PF: > { %s16_s23 = sadd.s32 1, %s966_s23   ;;  %s1083_s21 = smov %s962_s22 }
  0xcc   : > { %p13_p8 = scmp.ge.s32.totalorder %s16_s23, 5   ;;  %s1084_s22 = smov %s1086_s2 }
  0xce   :  { %15 = sbr.rel (!%p13_p8) target bundleno = 2 (0x2), region = 97 }

// kernel: forward.162
= control target key start
LH: loop header
LB: loop body
LE: loop exit
PB: predicated region body
PF: predicated region fallthrough
CT: control target
= control target key end

     0   :  { %s566_s1 = inlined_call_operand.vmem [shape: bf16[384,128], index: 1, kind: input, shape index: {}]   ;;  %s567_s0 = inlined_call_operand.vmem [shape: bf16[8,384], index: 0, kind: input, shape index: {}]   ;;  %s568_s2 = inlined_call_operand.vmem [shape: f32[1,384], index: 2, kind: input, shape index: {}]   ;;  %s569_s3 = inlined_call_operand.vmem [shape: f32[1,384], index: 3, kind: input, shape index: {}]   ;;  %s570_s4 = inlined_call_operand.vmem [shape: f32[1,128], index: 4, kind: input, shape index: {}]   ;;  %s571_s5 = inlined_call_operand.vmem [shape: f32[1,128], index: 5, kind: input, shape index: {}]   ;;  %s572_s6 = inlined_call_operand.vmem [shape: bf16[8,128], index: 6, kind: output, shape index: {}]  }
   0x1   :  { %v419_v0 = vld [vmem:[%s566_s1 + $0x38] sm:$0xff]  ;;  %v418_v3 = vld [vmem:[%s566_s1 + $0x30] sm:$0xff]  ;;  %v417_v6 = vld [vmem:[%s566_s1 + $0x28] sm:$0xff] }
   0x2   :  { %v427_v1 = vld [vmem:[%s566_s1 + $0x78] sm:$0xff]  ;;  %254 = vmatpush.bf16.msra.mxu0 %v419_v0  ;;  %v426_v4 = vld [vmem:[%s566_s1 + $0x70] sm:$0xff]  ;;  %v425_v7 = vld [vmem:[%s566_s1 + $0x68] sm:$0xff] }
   0x3   :  { %v435_v2 = vld [vmem:[%s566_s1 + $0xb8] sm:$0xff]  ;;  %267 = vmatpush.bf16.msra.mxu1 %v427_v1  ;;  %v434_v5 = vld [vmem:[%s566_s1 + $0xb0] sm:$0xff]  ;;  %v433_v8 = vld [vmem:[%s566_s1 + $0xa8] sm:$0xff] }
   0x4   :  { %280 = vmatpush.bf16.msra.mxu2 %v435_v2  ;;  %v416_v9 = vld [vmem:[%s566_s1 + $0x20] sm:$0xff]  ;;  %v29_v14 = vld [vmem:[%s567_s0 + $0x8] sm:$0xf]  ;;  %v415_v19 = vld [vmem:[%s566_s1 + $0x18] sm:$0xff] }
   0x5   :  { %v424_v10 = vld [vmem:[%s566_s1 + $0x60] sm:$0xff]  ;;  %v423_v20 = vld [vmem:[%s566_s1 + $0x58] sm:$0xff]  ;;  %v32_v22 = vunpack.c.l.bf16 %v29_v14  ;;  %v414_v29 = vld [vmem:[%s566_s1 + $0x10] sm:$0xff] }
   0x6   :  { %255 = vmatpush.bf16.msra.mxu0 %v418_v3  ;;  %v28_v11 = vld [vmem:[%s567_s0] sm:$0xff]  ;;  %v431_v24 = vld [vmem:[%s566_s1 + $0x98] sm:$0xff]  ;;  %v422_v30 = vld [vmem:[%s566_s1 + $0x50] sm:$0xff] }
   0x7   :  { %268 = vmatpush.bf16.msra.mxu1 %v426_v4  ;;  %v33_v12 = vld [vmem:[%s568_s2] sm:$0x7]  ;;  %v30_v15 = vunpack.c.l.bf16 %v28_v11  ;;  %v31_v17 = vunpack.c.h.bf16 %v28_v11  ;;  %v430_v33 = vld [vmem:[%s566_s1 + $0x90] sm:$0xff]  ;;  %v413_v36 = vld [vmem:[%s566_s1 + $0x8] sm:$0xff] }
   0x8   :  { %281 = vmatpush.bf16.msra.mxu2 %v434_v5  ;;  %v432_v13 = vld [vmem:[%s566_s1 + $0xa0] sm:$0xff]  ;;  %v35_v16 = vperm.slane %v33_v12, 0  ;;  %v36_v18 = vperm.slane %v33_v12, 1  ;;  %v37_v23 = vperm.slane %v33_v12, 2  ;;  %v421_v37 = vld [vmem:[%s566_s1 + $0x48] sm:$0xff] }
   0x9   :  { %v44_v21 = vld [vmem:[%s569_s3] sm:$0x7]  ;;  %v429_v39 = vld [vmem:[%s566_s1 + $0x88] sm:$0xff] }
   0xa   :  { %256 = vmatpush.bf16.msra.mxu0 %v417_v6  ;;  %v41_v25 = vmul.f32 %v35_v16, %v30_v15  ;;  %v46_v26 = vperm.slane %v44_v21, 0  ;;  %v42_v27 = vmul.f32 %v36_v18, %v31_v17  ;;  %v47_v28 = vperm.slane %v44_v21, 1  ;;  %v412_v42 = vld [vmem:[%s566_s1] sm:$0xff] }
   0xb   :  { %269 = vmatpush.bf16.msra.mxu1 %v425_v7  ;;  %v43_v31 = vmul.f32 %v37_v23, %v32_v22  ;;  %v48_v32 = vperm.slane %v44_v21, 2  ;;  %v420_v43 = vld [vmem:[%s566_s1 + $0x40] sm:$0xff] }
   0xc   :  { %282 = vmatpush.bf16.msra.mxu2 %v433_v8  ;;  %v52_v34 = vadd.f32 %v46_v26, %v41_v25  ;;  %v53_v35 = vadd.f32 %v47_v28, %v42_v27  ;;  %v428_v45 = vld [vmem:[%s566_s1 + $0x80] sm:$0xff] }
   0xd   :  { %v54_v38 = vadd.f32 %v48_v32, %v43_v31  ;;  %v436_v52 = vld [vmem:[%s570_s4] ss:$0 sm:$0xff] }
   0xe   :  { %257 = vmatpush.bf16.msra.mxu0 %v416_v9  ;;  %v55_v40 = vmax.f32 %v52_v34, 0.0  ;;  %v56_v41 = vmax.f32 %v53_v35, 0.0  ;;  %v437_v55 = vld [vmem:[%s571_s5] ss:$0 sm:$0xff] }
   0xf   :  { %270 = vmatpush.bf16.msra.mxu1 %v424_v10  ;;  %v57_v44 = vmax.f32 %v54_v38, 0.0 }
  0x10   :  { %283 = vmatpush.bf16.msra.mxu2 %v432_v13  ;;  %v58_v46 = vpack.c.bf16 %v55_v40, %v55_v40  ;;  %v59_v47 = vpack.c.bf16 %v56_v41, %v56_v41 }
  0x11   :  { %v60_v48 = vpack.c.bf16 %v57_v44, %v57_v44 }
  0x12   :  { %258 = vmatpush.bf16.msra.mxu0 %v415_v19 }
  0x13   :  { %271 = vmatpush.bf16.msra.mxu1 %v423_v20 }
  0x14   :  { %284 = vmatpush.bf16.msra.mxu2 %v431_v24 }
  0x16   :  { %259 = vmatpush.bf16.msra.mxu0 %v414_v29 }
  0x17   :  { %272 = vmatpush.bf16.msra.mxu1 %v422_v30 }
  0x18   :  { %285 = vmatpush.bf16.msra.mxu2 %v430_v33 }
  0x1a   :  { %260 = vmatpush.bf16.msra.mxu0 %v413_v36 }
  0x1b   :  { %273 = vmatpush.bf16.msra.mxu1 %v421_v37 }
  0x1c   :  { %286 = vmatpush.bf16.msra.mxu2 %v429_v39 }
  0x1e   :  { %261 = vmatpush.bf16.msra.mxu0 %v412_v42 }
  0x1f   :  { %274 = vmatpush.bf16.msra.mxu1 %v420_v43 }
  0x20   :  { %287 = vmatpush.bf16.msra.mxu2 %v428_v45 }
  0x21   :  { %262 = vmatmul.bf16.vlgmr.msra.gmra.mxu0 %v58_v46 }
  0x22   :  { %275 = vmatmul.bf16.vlgmr.msra.gmra.mxu1 %v59_v47 }
  0x23   :  { %288 = vmatmul.bf16.vlgmr.msra.gmra.mxu2 %v60_v48 }
  0x9e   :  { %v263_v49 = vpop.f32.mrf.mxu0 }
  0x9f   :  { %v276_v50 = vpop.f32.mrf.mxu1 }
  0xa0   :  { %v277_v51 = vadd.f32 %v276_v50, %v263_v49 }
  0xa6   :  { %v289_v53 = vpop.f32.mrf.mxu2  ;;  %v265_v56 = vpop.f32.mrf.mxu0 }
  0xa7   :  { %v290_v54 = vadd.f32 %v289_v53, %v277_v51  ;;  %v278_v57 = vpop.f32.mrf.mxu1 }
  0xa9   :  { %v303_v58 = vmul.f32 %v436_v52, %v290_v54 }
  0xab   :  { %v308_v59 = vadd.f32 %v437_v55, %v303_v58 }
  0xad   :  { %v309_v60 = vmax.f32 %v308_v59, 0.0 }
  0xae   :  { %v291_v61 = vpop.f32.mrf.mxu2 }
  0xaf   :  { %v310_v62 = vpack.c.bf16 %v309_v60, %v309_v60 }
  0xb1   :  { %311 = vst [vmem:[%s572_s6] sm:$0xf] %v310_v62 }

// kernel: forward.170
= control target key start
LH: loop header
LB: loop body
LE: loop exit
PB: predicated region body
PF: predicated region fallthrough
CT: control target
= control target key end

     0   :  { %s716_s1 = inlined_call_operand.vmem [shape: bf16[512,128], index: 1, kind: input, shape index: {}]   ;;  %s717_s0 = inlined_call_operand.vmem [shape: bf16[8,512], index: 0, kind: input, shape index: {}]   ;;  %s718_s2 = inlined_call_operand.vmem [shape: f32[1,512], index: 2, kind: input, shape index: {}]   ;;  %s719_s3 = inlined_call_operand.vmem [shape: f32[1,512], index: 3, kind: input, shape index: {}]   ;;  %s720_s4 = inlined_call_operand.vmem [shape: f32[1,128], index: 4, kind: input, shape index: {}]   ;;  %s721_s5 = inlined_call_operand.vmem [shape: f32[1,128], index: 5, kind: input, shape index: {}]   ;;  %s722_s6 = inlined_call_operand.vmem [shape: bf16[8,128], index: 6, kind: output, shape index: {}]  }
   0x1   :  { %v537_v0 = vld [vmem:[%s716_s1 + $0x38] sm:$0xff]  ;;  %v536_v4 = vld [vmem:[%s716_s1 + $0x30] sm:$0xff]  ;;  %v535_v8 = vld [vmem:[%s716_s1 + $0x28] sm:$0xff] }
   0x2   :  { %v545_v1 = vld [vmem:[%s716_s1 + $0x78] sm:$0xff]  ;;  %327 = vmatpush.bf16.msra.mxu0 %v537_v0  ;;  %v544_v5 = vld [vmem:[%s716_s1 + $0x70] sm:$0xff]  ;;  %v543_v9 = vld [vmem:[%s716_s1 + $0x68] sm:$0xff] }
   0x3   :  { %v553_v2 = vld [vmem:[%s716_s1 + $0xb8] sm:$0xff]  ;;  %340 = vmatpush.bf16.msra.mxu1 %v545_v1  ;;  %v552_v6 = vld [vmem:[%s716_s1 + $0xb0] sm:$0xff]  ;;  %v551_v10 = vld [vmem:[%s716_s1 + $0xa8] sm:$0xff] }
   0x4   :  { %v561_v3 = vld [vmem:[%s716_s1 + $0xf8] sm:$0xff]  ;;  %353 = vmatpush.bf16.msra.mxu2 %v553_v2  ;;  %v560_v7 = vld [vmem:[%s716_s1 + $0xf0] sm:$0xff]  ;;  %v559_v11 = vld [vmem:[%s716_s1 + $0xe8] sm:$0xff] }
   0x5   :  { %366 = vmatpush.bf16.msra.mxu3 %v561_v3  ;;  %v534_v12 = vld [vmem:[%s716_s1 + $0x20] sm:$0xff]  ;;  %v29_v18 = vld [vmem:[%s717_s0 + $0x8] sm:$0xff]  ;;  %v533_v23 = vld [vmem:[%s716_s1 + $0x18] sm:$0xff] }
   0x6   :  { %328 = vmatpush.bf16.msra.mxu0 %v536_v4  ;;  %v542_v13 = vld [vmem:[%s716_s1 + $0x60] sm:$0xff]  ;;  %v541_v24 = vld [vmem:[%s716_s1 + $0x58] sm:$0xff]  ;;  %v32_v26 = vunpack.c.l.bf16 %v29_v18  ;;  %v33_v28 = vunpack.c.h.bf16 %v29_v18  ;;  %v532_v36 = vld [vmem:[%s716_s1 + $0x10] sm:$0xff] }
   0x7   :  { %341 = vmatpush.bf16.msra.mxu1 %v544_v5  ;;  %v550_v14 = vld [vmem:[%s716_s1 + $0xa0] sm:$0xff]  ;;  %v549_v30 = vld [vmem:[%s716_s1 + $0x98] sm:$0xff]  ;;  %v540_v37 = vld [vmem:[%s716_s1 + $0x50] sm:$0xff] }
   0x8   :  { %354 = vmatpush.bf16.msra.mxu2 %v552_v6  ;;  %v28_v15 = vld [vmem:[%s717_s0] sm:$0xff]  ;;  %v557_v31 = vld [vmem:[%s716_s1 + $0xd8] sm:$0xff]  ;;  %v548_v42 = vld [vmem:[%s716_s1 + $0x90] sm:$0xff] }
   0x9   :  { %367 = vmatpush.bf16.msra.mxu3 %v560_v7  ;;  %v558_v16 = vld [vmem:[%s716_s1 + $0xe0] sm:$0xff]  ;;  %v30_v19 = vunpack.c.l.bf16 %v28_v15  ;;  %v31_v21 = vunpack.c.h.bf16 %v28_v15  ;;  %v556_v43 = vld [vmem:[%s716_s1 + $0xd0] sm:$0xff]  ;;  %v531_v46 = vld [vmem:[%s716_s1 + $0x8] sm:$0xff] }
   0xa   :  { %329 = vmatpush.bf16.msra.mxu0 %v535_v8  ;;  %v34_v17 = vld [vmem:[%s718_s2] sm:$0xf]  ;;  %v539_v47 = vld [vmem:[%s716_s1 + $0x48] sm:$0xff] }
   0xb   :  { %342 = vmatpush.bf16.msra.mxu1 %v543_v9  ;;  %v36_v20 = vperm.slane %v34_v17, 0  ;;  %v37_v22 = vperm.slane %v34_v17, 1  ;;  %v48_v25 = vld [vmem:[%s719_s3] sm:$0xf]  ;;  %v38_v27 = vperm.slane %v34_v17, 2  ;;  %v39_v29 = vperm.slane %v34_v17, 3 }
   0xc   :  { %355 = vmatpush.bf16.msra.mxu2 %v551_v10  ;;  %v50_v33 = vperm.slane %v48_v25, 0  ;;  %v51_v35 = vperm.slane %v48_v25, 1  ;;  %v52_v39 = vperm.slane %v48_v25, 2  ;;  %v53_v41 = vperm.slane %v48_v25, 3  ;;  %v547_v50 = vld [vmem:[%s716_s1 + $0x88] sm:$0xff]  ;;  %v530_v54 = vld [vmem:[%s716_s1] sm:$0xff] }
   0xd   :  { %368 = vmatpush.bf16.msra.mxu3 %v559_v11  ;;  %v44_v32 = vmul.f32 %v36_v20, %v30_v19  ;;  %v45_v34 = vmul.f32 %v37_v22, %v31_v21  ;;  %v46_v38 = vmul.f32 %v38_v27, %v32_v26  ;;  %v47_v40 = vmul.f32 %v39_v29, %v33_v28  ;;  %v555_v51 = vld [vmem:[%s716_s1 + $0xc8] sm:$0xff]  ;;  %v538_v55 = vld [vmem:[%s716_s1 + $0x40] sm:$0xff] }
   0xe   :  { %330 = vmatpush.bf16.msra.mxu0 %v534_v12  ;;  %v546_v58 = vld [vmem:[%s716_s1 + $0x80] sm:$0xff] }
   0xf   :  { %343 = vmatpush.bf16.msra.mxu1 %v542_v13  ;;  %v58_v44 = vadd.f32 %v50_v33, %v44_v32  ;;  %v59_v45 = vadd.f32 %v51_v35, %v45_v34  ;;  %v60_v48 = vadd.f32 %v52_v39, %v46_v38  ;;  %v61_v49 = vadd.f32 %v53_v41, %v47_v40  ;;  %v554_v59 = vld [vmem:[%s716_s1 + $0xc0] sm:$0xff] }
  0x10   :  { %356 = vmatpush.bf16.msra.mxu2 %v550_v14  ;;  %v562_v6 = vld [vmem:[%s720_s4] ss:$0 sm:$0xff] }
  0x11   :  { %369 = vmatpush.bf16.msra.mxu3 %v558_v16  ;;  %v62_v52 = vmax.f32 %v58_v44, 0.0  ;;  %v63_v53 = vmax.f32 %v59_v45, 0.0  ;;  %v64_v56 = vmax.f32 %v60_v48, 0.0  ;;  %v65_v57 = vmax.f32 %v61_v49, 0.0  ;;  %v563_v10 = vld [vmem:[%s721_s5] ss:$0 sm:$0xff] }
  0x12   :  { %331 = vmatpush.bf16.msra.mxu0 %v533_v23 }
  0x13   :  { %344 = vmatpush.bf16.msra.mxu1 %v541_v24  ;;  %v66_v60 = vpack.c.bf16 %v62_v52, %v62_v52  ;;  %v67_v61 = vpack.c.bf16 %v63_v53, %v63_v53  ;;  %v68_v62 = vpack.c.bf16 %v64_v56, %v64_v56  ;;  %v69_v63 = vpack.c.bf16 %v65_v57, %v65_v57 }
  0x14   :  { %357 = vmatpush.bf16.msra.mxu2 %v549_v30 }
  0x15   :  { %370 = vmatpush.bf16.msra.mxu3 %v557_v31 }
  0x16   :  { %332 = vmatpush.bf16.msra.mxu0 %v532_v36 }
  0x17   :  { %345 = vmatpush.bf16.msra.mxu1 %v540_v37 }
  0x18   :  { %358 = vmatpush.bf16.msra.mxu2 %v548_v42 }
  0x19   :  { %371 = vmatpush.bf16.msra.mxu3 %v556_v43 }
  0x1a   :  { %333 = vmatpush.bf16.msra.mxu0 %v531_v46 }
  0x1b   :  { %346 = vmatpush.bf16.msra.mxu1 %v539_v47 }
  0x1c   :  { %359 = vmatpush.bf16.msra.mxu2 %v547_v50 }
  0x1d   :  { %372 = vmatpush.bf16.msra.mxu3 %v555_v51 }
  0x1e   :  { %334 = vmatpush.bf16.msra.mxu0 %v530_v54 }
  0x1f   :  { %347 = vmatpush.bf16.msra.mxu1 %v538_v55 }
  0x20   :  { %360 = vmatpush.bf16.msra.mxu2 %v546_v58 }
  0x21   :  { %373 = vmatpush.bf16.msra.mxu3 %v554_v59  ;;  %335 = vmatmul.bf16.vlgmr.msra.gmra.mxu0 %v66_v60 }
  0x22   :  { %348 = vmatmul.bf16.vlgmr.msra.gmra.mxu1 %v67_v61 }
  0x23   :  { %361 = vmatmul.bf16.vlgmr.msra.gmra.mxu2 %v68_v62 }
  0x24   :  { %374 = vmatmul.bf16.vlgmr.msra.gmra.mxu3 %v69_v63 }
  0x9e   :  { %v336_v0 = vpop.f32.mrf.mxu0 }
  0x9f   :  { %v349_v1 = vpop.f32.mrf.mxu1 }
  0xa0   :  { %v350_v2 = vadd.f32 %v349_v1, %v336_v0 }
  0xa6   :  { %v362_v3 = vpop.f32.mrf.mxu2  ;;  %v338_v7 = vpop.f32.mrf.mxu0 }
  0xa7   :  { %v375_v4 = vpop.f32.mrf.mxu3  ;;  %v363_v5 = vadd.f32 %v362_v3, %v350_v2  ;;  %v351_v8 = vpop.f32.mrf.mxu1 }
  0xa9   :  { %v376_v9 = vadd.f32 %v375_v4, %v363_v5 }
  0xab   :  { %v389_v11 = vmul.f32 %v562_v6, %v376_v9 }
  0xad   :  { %v394_v12 = vadd.f32 %v563_v10, %v389_v11 }
  0xae   :  { %v364_v13 = vpop.f32.mrf.mxu2 }
  0xaf   :  { %v377_v14 = vpop.f32.mrf.mxu3  ;;  %v395_v15 = vmax.f32 %v394_v12, 0.0 }
  0xb1   :  { %v396_v16 = vpack.c.bf16 %v395_v15, %v395_v15 }
  0xb3   :  { %397 = vst [vmem:[%s722_s6] sm:$0xf] %v396_v16 }

// kernel: forward.178
= control target key start
LH: loop header
LB: loop body
LE: loop exit
PB: predicated region body
PF: predicated region fallthrough
CT: control target
= control target key end

     0   :  { %s772_s21 = smov 0   ;;  %s774_s22 = smov 0   ;;  %s827_s0 = inlined_call_operand.vmem [shape: bf16[8,640], index: 0, kind: input, shape index: {}]   ;;  %s828_s1 = inlined_call_operand.vmem [shape: bf16[640,128], index: 1, kind: input, shape index: {}]   ;;  %s829_s2 = inlined_call_operand.vmem [shape: f32[1,640], index: 2, kind: input, shape index: {}]   ;;  %s830_s3 = inlined_call_operand.vmem [shape: f32[1,640], index: 3, kind: input, shape index: {}]   ;;  %s831_s4 = inlined_call_operand.vmem [shape: f32[1,128], index: 4, kind: input, shape index: {}]   ;;  %s832_s5 = inlined_call_operand.vmem [shape: f32[1,128], index: 5, kind: input, shape index: {}]   ;;  %s833_s6 = inlined_call_operand.vmem [shape: bf16[8,128], index: 6, kind: output, shape index: {}]  }
   0x1   :  { %s776_s23 = smov 0  }
   0x2 LB: > { %s28_s24 = sadd.s32 1, %s730_s22  ;;  %p634_p0 = scmp.ge.s32.totalorder %s734_s23, 1  ;;  %s734_s23 = sphi %s776_s23, %s16_s23   ;;  %s730_s22 = sphi %s774_s22, %s835_s22   ;;  %s726_s21 = sphi %s772_s21, %s834_s21  }
   0x3   : > { %p29_p1 = scmp.ge.s32.totalorder %s28_s24, 5  ;;  %p286_p2 = scmp.lt.s32.totalorder %s734_s23, 6 }
   0x5   : > { %s837_s24 = smov (%p29_p1, %s28_s24), 0  ;;  %p287_p3 = pnand %p634_p0, %p286_p2 }
   0x6   : > { %p343_p4 = scmp.lt.s32.totalorder (!%p287_p3), %s726_s21, 4  ;;  %s636_s25 = sshll.u32 (!%p287_p3), %s726_s21, 4 }
   0x7   : > { %290 = sbr.rel (%p287_p3) target bundleno = 197 (0xc5), region = 44  ;;  %p350_p5 = scmp.lt.s32.totalorder (!%p287_p3), %s636_s25, 79 }
   0x8   : > { %p638_p6 = scmp.ne.s32.totalorder (!%p287_p3), %s726_s21, 0 }
   0xc   : > { %s344_s26 = scalar_select %p343_p4, %s726_s21, 4 }
   0xd   : > { %s839_s25 = smov (!%p350_p5, %s636_s25), 79  ;;  %380 = sbr.rel (%p638_p6) target bundleno = 20 (0x14), region = 48 }
   0xe   : > { %s635_s27 = sshll.u32 %s344_s26, 2  ;;  %s360_s30 = scalar_lea.vmem %s829_s2, %s344_s26 }
   0xf   : > { %s348_s9 = scalar_lea.vmem %s827_s0, %s635_s27  ;;  %s637_s10 = sshll.u32 %s839_s25, 2 }
  0x10   : > { %s356_s13 = scalar_lea.vmem %s828_s1, %s637_s10  ;;  %s363_s16 = scalar_lea.vmem %s830_s3, %s344_s26 }
  0x12   : > { %v736_v0 = vmov 0.0  }
  0x13   : > { %381 = vst [vmem:[#allocation2] sm:$0xff] %v736_v0 }
  0x14 PF: > { %v682_v1 = vld [vmem:[%s356_s13 + $0x38] sm:$0xff]  ;;  %v681_v2 = vld [vmem:[%s356_s13 + $0x30] sm:$0xff]  ;;  %v680_v3 = vld [vmem:[%s356_s13 + $0x28] sm:$0xff]  ;;  %p671_p7 = scmp.ne.s32.totalorder %s726_s21, 4 }
  0x15   : > { %461 = vmatpush.bf16.msra.mxu0 %v682_v1  ;;  %v679_v4 = vld [vmem:[%s356_s13 + $0x20] sm:$0xff]  ;;  %v678_v8 = vld [vmem:[%s356_s13 + $0x18] sm:$0xff]  ;;  %v677_v11 = vld [vmem:[%s356_s13 + $0x10] sm:$0xff] }
  0x16   : > { %v382_v5 = vld [vmem:[%s348_s9] sm:$0xf]  ;;  %v676_v13 = vld [vmem:[%s356_s13 + $0x8] sm:$0xff] }
  0x17   : > { %v383_v6 = vunpack.c.l.bf16 %v382_v5  ;;  %v708_v7 = vld [vmem:[%s360_s30] ss:$0 sm:$0xff] }
  0x18   : > { %v709_v10 = vld [vmem:[%s363_s16] ss:$0 sm:$0xff] }
  0x19   : > { %462 = vmatpush.bf16.msra.mxu0 %v681_v2  ;;  %v388_v9 = vmul.f32 %v708_v7, %v383_v6  ;;  %v675_v15 = vld [vmem:[%s356_s13] sm:$0xff] }
  0x1a   : > { %v396_v17 = vld [vmem:[#allocation2] sm:$0xff] }
  0x1b   : > { %v393_v12 = vadd.f32 %v709_v10, %v388_v9 }
  0x1d   : > { %463 = vmatpush.bf16.msra.mxu0 %v680_v3  ;;  %v394_v14 = vmax.f32 %v393_v12, 0.0 }
  0x1f   : > { %v395_v16 = vpack.c.bf16 %v394_v14, %v394_v14 }
  0x21   : > { %464 = vmatpush.bf16.msra.mxu0 %v679_v4 }
  0x25   : > { %465 = vmatpush.bf16.msra.mxu0 %v678_v8 }
  0x29   : > { %466 = vmatpush.bf16.msra.mxu0 %v677_v11 }
  0x2d   : > { %467 = vmatpush.bf16.msra.mxu0 %v676_v13 }
  0x31   : > { %468 = vmatpush.bf16.msra.mxu0 %v675_v15 }
  0x34   : > { %469 = vmatmul.bf16.vlgmr.msra.gmra.mxu0 %v395_v16 }
  0xb1   : > { %v470_v18 = vpop.f32.mrf.mxu0 }
  0xb2   : > { %v474_v19 = vadd.f32 %v470_v18, %v396_v17 }
  0xb4   : > { %475 = vst [vmem:[#allocation2] sm:$0xff] %v474_v19 }
  0xb5   : > { %479 = sbr.rel (%p671_p7) target bundleno = 197 (0xc5), region = 52 }
  0xb9   : > { %v472_v20 = vpop.f32.mrf.mxu0 }
  0xba   : > { %v710_v22 = vld [vmem:[%s831_s4] ss:$0 sm:$0xff] }
  0xbb   : > { %v480_v21 = vld [vmem:[#allocation2] sm:$0xff] }
  0xbc   : > { %v711_v23 = vld [vmem:[%s832_s5] ss:$0 sm:$0xff]  ;;  %v485_v24 = vmul.f32 %v710_v22, %v480_v21 }
  0xbe   : > { %v490_v25 = vadd.f32 %v711_v23, %v485_v24 }
  0xc0   : > { %v491_v26 = vmax.f32 %v490_v25, 0.0 }
  0xc2   : > { %v492_v27 = vpack.c.bf16 %v491_v26, %v491_v26 }
  0xc4   : > { %493 = vst [vmem:[%s833_s6] sm:$0xf] %v492_v27 }
  0xc5 PF: > { %s16_s23 = sadd.s32 1, %s734_s23   ;;  %s834_s21 = smov %s730_s22 }
  0xc6   : > { %p13_p8 = scmp.ge.s32.totalorder %s16_s23, 7   ;;  %s835_s22 = smov %s837_s24 }
  0xc8   :  { %15 = sbr.rel (!%p13_p8) target bundleno = 2 (0x2), region = 97 }

// kernel: forward.186
= control target key start
LH: loop header
LB: loop body
LE: loop exit
PB: predicated region body
PF: predicated region fallthrough
CT: control target
= control target key end

     0   :  { %s1037_s21 = smov 0   ;;  %s1039_s22 = smov 0   ;;  %s1136_s0 = inlined_call_operand.vmem [shape: bf16[8,768], index: 0, kind: input, shape index: {}]   ;;  %s1137_s1 = inlined_call_operand.vmem [shape: bf16[768,128], index: 1, kind: input, shape index: {}]   ;;  %s1138_s2 = inlined_call_operand.vmem [shape: f32[1,768], index: 2, kind: input, shape index: {}]   ;;  %s1139_s3 = inlined_call_operand.vmem [shape: f32[1,768], index: 3, kind: input, shape index: {}]   ;;  %s1140_s4 = inlined_call_operand.vmem [shape: f32[1,128], index: 4, kind: input, shape index: {}]   ;;  %s1141_s5 = inlined_call_operand.vmem [shape: f32[1,128], index: 5, kind: input, shape index: {}]   ;;  %s1142_s6 = inlined_call_operand.vmem [shape: bf16[8,128], index: 6, kind: output, shape index: {}]  }
   0x1   :  { %s1041_s23 = smov 0  }
   0x2 LB: > { %s28_s24 = sadd.s32 1, %s995_s22  ;;  %p822_p0 = scmp.ge.s32.totalorder %s999_s23, 1  ;;  %s999_s23 = sphi %s1041_s23, %s16_s23   ;;  %s995_s22 = sphi %s1039_s22, %s1144_s22   ;;  %s991_s21 = sphi %s1037_s21, %s1143_s21  }
   0x3   : > { %p29_p1 = scmp.ge.s32.totalorder %s28_s24, 2  ;;  %p292_p2 = scmp.lt.s32.totalorder %s999_s23, 3 }
   0x5   : > { %s1146_s24 = smov (%p29_p1, %s28_s24), 0  ;;  %p293_p3 = pnand %p822_p0, %p292_p2 }
   0x6   : > { %s350_s25 = smul.u32 (!%p293_p3), 3, %s991_s21  ;;  %p825_p6 = scmp.ne.s32.totalorder (!%p293_p3), %s991_s21, 0 }
   0x7   : > { %296 = sbr.rel (%p293_p3) target bundleno = 210 (0xd2), region = 44 }
   0x8   : > { %s360_s26 = smul.u32 (!%p293_p3), 48, %s991_s21  ;;  %p353_p4 = scmp.lt.s32.totalorder (!%p293_p3), %s350_s25, 5 }
   0xa   : > { %p361_p5 = scmp.lt.s32.totalorder (!%p293_p3), %s360_s26, 95 }
   0xc   : > { %s1148_s25 = smov (!%p353_p4, %s350_s25), 5  ;;  %s1150_s26 = smov (!%p361_p5, %s360_s26), 95 }
   0xd   : > { %s823_s27 = sshll.u32 %s1148_s25, 2  ;;  %s372_s30 = scalar_lea.vmem %s1138_s2, %s1148_s25 }
   0xe   : > { %s1069_s9 = scalar_lea.vmem %s1136_s0, %s823_s27  ;;  %s824_s10 = sshll.u32 %s1150_s26, 2 }
   0xf   : > { %s1074_s13 = scalar_lea.vmem %s1137_s1, %s824_s10  ;;  %s377_s16 = scalar_lea.vmem %s1139_s3, %s1148_s25 }
  0x10   : > { %395 = sbr.rel (%p825_p6) target bundleno = 23 (0x17), region = 48 }
  0x15   : > { %v1001_v0 = vmov 0.0  }
  0x16   : > { %396 = vst [vmem:[#allocation2] sm:$0xff] %v1001_v0 }
  0x17 PF: > { %v933_v1 = vld [vmem:[%s1074_s13 + $0x38] sm:$0xff]  ;;  %v932_v4 = vld [vmem:[%s1074_s13 + $0x30] sm:$0xff]  ;;  %v931_v7 = vld [vmem:[%s1074_s13 + $0x28] sm:$0xff]  ;;  %p922_p7 = scmp.ne.s32.totalorder %s991_s21, 1 }
  0x18   : > { %v941_v2 = vld [vmem:[%s1074_s13 + $0x78] sm:$0xff]  ;;  %623 = vmatpush.bf16.msra.mxu0 %v933_v1  ;;  %v940_v5 = vld [vmem:[%s1074_s13 + $0x70] sm:$0xff]  ;;  %v939_v8 = vld [vmem:[%s1074_s13 + $0x68] sm:$0xff] }
  0x19   : > { %v949_v3 = vld [vmem:[%s1074_s13 + $0xb8] sm:$0xff]  ;;  %636 = vmatpush.bf16.msra.mxu1 %v941_v2  ;;  %v948_v6 = vld [vmem:[%s1074_s13 + $0xb0] sm:$0xff]  ;;  %v947_v9 = vld [vmem:[%s1074_s13 + $0xa8] sm:$0xff] }
  0x1a   : > { %649 = vmatpush.bf16.msra.mxu2 %v949_v3  ;;  %v930_v10 = vld [vmem:[%s1074_s13 + $0x20] sm:$0xff]  ;;  %v398_v15 = vld [vmem:[%s1069_s9 + $0x8] sm:$0xf]  ;;  %v929_v20 = vld [vmem:[%s1074_s13 + $0x18] sm:$0xff] }
  0x1b   : > { %v938_v11 = vld [vmem:[%s1074_s13 + $0x60] sm:$0xff]  ;;  %v937_v21 = vld [vmem:[%s1074_s13 + $0x58] sm:$0xff]  ;;  %v401_v23 = vunpack.c.l.bf16 %v398_v15  ;;  %v928_v30 = vld [vmem:[%s1074_s13 + $0x10] sm:$0xff] }
  0x1c   : > { %624 = vmatpush.bf16.msra.mxu0 %v932_v4  ;;  %v397_v12 = vld [vmem:[%s1069_s9] sm:$0xff]  ;;  %v945_v25 = vld [vmem:[%s1074_s13 + $0x98] sm:$0xff]  ;;  %v936_v31 = vld [vmem:[%s1074_s13 + $0x50] sm:$0xff] }
  0x1d   : > { %637 = vmatpush.bf16.msra.mxu1 %v940_v5  ;;  %v402_v13 = vld [vmem:[%s372_s30] sm:$0x7]  ;;  %v399_v16 = vunpack.c.l.bf16 %v397_v12  ;;  %v400_v18 = vunpack.c.h.bf16 %v397_v12  ;;  %v944_v34 = vld [vmem:[%s1074_s13 + $0x90] sm:$0xff]  ;;  %v927_v37 = vld [vmem:[%s1074_s13 + $0x8] sm:$0xff] }
  0x1e   : > { %650 = vmatpush.bf16.msra.mxu2 %v948_v6  ;;  %v946_v14 = vld [vmem:[%s1074_s13 + $0xa0] sm:$0xff]  ;;  %v404_v17 = vperm.slane %v402_v13, 0  ;;  %v405_v19 = vperm.slane %v402_v13, 1  ;;  %v406_v24 = vperm.slane %v402_v13, 2  ;;  %v935_v38 = vld [vmem:[%s1074_s13 + $0x48] sm:$0xff] }
  0x1f   : > { %v413_v22 = vld [vmem:[%s377_s16] sm:$0x7]  ;;  %v943_v40 = vld [vmem:[%s1074_s13 + $0x88] sm:$0xff] }
  0x20   : > { %625 = vmatpush.bf16.msra.mxu0 %v931_v7  ;;  %v410_v26 = vmul.f32 %v404_v17, %v399_v16  ;;  %v415_v27 = vperm.slane %v413_v22, 0  ;;  %v411_v28 = vmul.f32 %v405_v19, %v400_v18  ;;  %v416_v29 = vperm.slane %v413_v22, 1  ;;  %v926_v43 = vld [vmem:[%s1074_s13] sm:$0xff] }
  0x21   : > { %638 = vmatpush.bf16.msra.mxu1 %v939_v8  ;;  %v412_v32 = vmul.f32 %v406_v24, %v401_v23  ;;  %v417_v33 = vperm.slane %v413_v22, 2  ;;  %v934_v44 = vld [vmem:[%s1074_s13 + $0x40] sm:$0xff] }
  0x22   : > { %651 = vmatpush.bf16.msra.mxu2 %v947_v9  ;;  %v421_v35 = vadd.f32 %v415_v27, %v410_v26  ;;  %v422_v36 = vadd.f32 %v416_v29, %v411_v28  ;;  %v942_v46 = vld [vmem:[%s1074_s13 + $0x80] sm:$0xff] }
  0x23   : > { %v423_v39 = vadd.f32 %v417_v33, %v412_v32  ;;  %v430_v53 = vld [vmem:[#allocation2] sm:$0xff] }
  0x24   : > { %626 = vmatpush.bf16.msra.mxu0 %v930_v10  ;;  %v424_v41 = vmax.f32 %v421_v35, 0.0  ;;  %v425_v42 = vmax.f32 %v422_v36, 0.0 }
  0x25   : > { %639 = vmatpush.bf16.msra.mxu1 %v938_v11  ;;  %v426_v45 = vmax.f32 %v423_v39, 0.0 }
  0x26   : > { %652 = vmatpush.bf16.msra.mxu2 %v946_v14  ;;  %v427_v47 = vpack.c.bf16 %v424_v41, %v424_v41  ;;  %v428_v48 = vpack.c.bf16 %v425_v42, %v425_v42 }
  0x27   : > { %v429_v49 = vpack.c.bf16 %v426_v45, %v426_v45 }
  0x28   : > { %627 = vmatpush.bf16.msra.mxu0 %v929_v20 }
  0x29   : > { %640 = vmatpush.bf16.msra.mxu1 %v937_v21 }
  0x2a   : > { %653 = vmatpush.bf16.msra.mxu2 %v945_v25 }
  0x2c   : > { %628 = vmatpush.bf16.msra.mxu0 %v928_v30 }
  0x2d   : > { %641 = vmatpush.bf16.msra.mxu1 %v936_v31 }
  0x2e   : > { %654 = vmatpush.bf16.msra.mxu2 %v944_v34 }
  0x30   : > { %629 = vmatpush.bf16.msra.mxu0 %v927_v37 }
  0x31   : > { %642 = vmatpush.bf16.msra.mxu1 %v935_v38 }
  0x32   : > { %655 = vmatpush.bf16.msra.mxu2 %v943_v40 }
  0x34   : > { %630 = vmatpush.bf16.msra.mxu0 %v926_v43 }
  0x35   : > { %643 = vmatpush.bf16.msra.mxu1 %v934_v44 }
  0x36   : > { %656 = vmatpush.bf16.msra.mxu2 %v942_v46 }
  0x37   : > { %631 = vmatmul.bf16.vlgmr.msra.gmra.mxu0 %v427_v47 }
  0x38   : > { %644 = vmatmul.bf16.vlgmr.msra.gmra.mxu1 %v428_v48 }
  0x39   : > { %657 = vmatmul.bf16.vlgmr.msra.gmra.mxu2 %v429_v49 }
  0xb4   : > { %v632_v50 = vpop.f32.mrf.mxu0 }
  0xb5   : > { %v645_v51 = vpop.f32.mrf.mxu1 }
  0xb6   : > { %v646_v52 = vadd.f32 %v645_v51, %v632_v50 }
  0xbc   : > { %v658_v54 = vpop.f32.mrf.mxu2  ;;  %v634_v56 = vpop.f32.mrf.mxu0 }
  0xbd   : > { %v659_v55 = vadd.f32 %v658_v54, %v646_v52  ;;  %v647_v57 = vpop.f32.mrf.mxu1 }
  0xbf   : > { %v662_v58 = vadd.f32 %v659_v55, %v430_v53 }
  0xc0   : > { %667 = sbr.rel (%p922_p7) target bundleno = 210 (0xd2), region = 52 }
  0xc1   : > { %663 = vst [vmem:[#allocation2] sm:$0xff] %v662_v58 }
  0xc4   : > { %v660_v59 = vpop.f32.mrf.mxu2 }
  0xc5   : > { %v975_v61 = vld [vmem:[%s1140_s4] ss:$0 sm:$0xff] }
  0xc6   : > { %v976_v62 = vld [vmem:[%s1141_s5] ss:$0 sm:$0xff] }
  0xc8   : > { %v668_v60 = vld [vmem:[#allocation2] sm:$0xff] }
  0xc9   : > { %v673_v63 = vmul.f32 %v975_v61, %v668_v60 }
  0xcb   : > { %v678_v0 = vadd.f32 %v976_v62, %v673_v63 }
  0xcd   : > { %v679_v1 = vmax.f32 %v678_v0, 0.0 }
  0xcf   : > { %v680_v2 = vpack.c.bf16 %v679_v1, %v679_v1 }
  0xd1   : > { %681 = vst [vmem:[%s1142_s6] sm:$0xf] %v680_v2 }
  0xd2 PF: > { %s16_s23 = sadd.s32 1, %s999_s23   ;;  %s1143_s21 = smov %s995_s22 }
  0xd3   : > { %p13_p8 = scmp.ge.s32.totalorder %s16_s23, 4   ;;  %s1144_s22 = smov %s1146_s24 }
  0xd5   :  { %15 = sbr.rel (!%p13_p8) target bundleno = 2 (0x2), region = 97 }

// kernel: forward.194
= control target key start
LH: loop header
LB: loop body
LE: loop exit
PB: predicated region body
PF: predicated region fallthrough
CT: control target
= control target key end

     0   :  { %s772_s21 = smov 0   ;;  %s774_s22 = smov 0   ;;  %s827_s0 = inlined_call_operand.vmem [shape: bf16[8,896], index: 0, kind: input, shape index: {}]   ;;  %s828_s1 = inlined_call_operand.vmem [shape: bf16[896,128], index: 1, kind: input, shape index: {}]   ;;  %s829_s2 = inlined_call_operand.vmem [shape: f32[1,896], index: 2, kind: input, shape index: {}]   ;;  %s830_s3 = inlined_call_operand.vmem [shape: f32[1,896], index: 3, kind: input, shape index: {}]   ;;  %s831_s4 = inlined_call_operand.vmem [shape: f32[1,128], index: 4, kind: input, shape index: {}]   ;;  %s832_s5 = inlined_call_operand.vmem [shape: f32[1,128], index: 5, kind: input, shape index: {}]   ;;  %s833_s6 = inlined_call_operand.vmem [shape: bf16[8,128], index: 6, kind: output, shape index: {}]  }
   0x1   :  { %s776_s23 = smov 0  }
   0x2 LB: > { %s28_s24 = sadd.s32 1, %s730_s22  ;;  %p634_p0 = scmp.ge.s32.totalorder %s734_s23, 1  ;;  %s734_s23 = sphi %s776_s23, %s16_s23   ;;  %s730_s22 = sphi %s774_s22, %s835_s22   ;;  %s726_s21 = sphi %s772_s21, %s834_s21  }
   0x3   : > { %p29_p1 = scmp.ge.s32.totalorder %s28_s24, 7  ;;  %p286_p2 = scmp.lt.s32.totalorder %s734_s23, 8 }
   0x5   : > { %s837_s24 = smov (%p29_p1, %s28_s24), 0  ;;  %p287_p3 = pnand %p634_p0, %p286_p2 }
   0x6   : > { %p343_p4 = scmp.lt.s32.totalorder (!%p287_p3), %s726_s21, 6  ;;  %s636_s25 = sshll.u32 (!%p287_p3), %s726_s21, 4 }
   0x7   : > { %290 = sbr.rel (%p287_p3) target bundleno = 197 (0xc5), region = 44  ;;  %p350_p5 = scmp.lt.s32.totalorder (!%p287_p3), %s636_s25, 111 }
   0x8   : > { %p638_p6 = scmp.ne.s32.totalorder (!%p287_p3), %s726_s21, 0 }
   0xc   : > { %s344_s26 = scalar_select %p343_p4, %s726_s21, 6 }
   0xd   : > { %s839_s25 = smov (!%p350_p5, %s636_s25), 111  ;;  %380 = sbr.rel (%p638_p6) target bundleno = 20 (0x14), region = 48 }
   0xe   : > { %s635_s27 = sshll.u32 %s344_s26, 2  ;;  %s360_s30 = scalar_lea.vmem %s829_s2, %s344_s26 }
   0xf   : > { %s348_s9 = scalar_lea.vmem %s827_s0, %s635_s27  ;;  %s637_s10 = sshll.u32 %s839_s25, 2 }
  0x10   : > { %s356_s13 = scalar_lea.vmem %s828_s1, %s637_s10  ;;  %s363_s16 = scalar_lea.vmem %s830_s3, %s344_s26 }
  0x12   : > { %v736_v0 = vmov 0.0  }
  0x13   : > { %381 = vst [vmem:[#allocation2] sm:$0xff] %v736_v0 }
  0x14 PF: > { %v682_v1 = vld [vmem:[%s356_s13 + $0x38] sm:$0xff]  ;;  %v681_v2 = vld [vmem:[%s356_s13 + $0x30] sm:$0xff]  ;;  %v680_v3 = vld [vmem:[%s356_s13 + $0x28] sm:$0xff]  ;;  %p671_p7 = scmp.ne.s32.totalorder %s726_s21, 6 }
  0x15   : > { %461 = vmatpush.bf16.msra.mxu0 %v682_v1  ;;  %v679_v4 = vld [vmem:[%s356_s13 + $0x20] sm:$0xff]  ;;  %v678_v8 = vld [vmem:[%s356_s13 + $0x18] sm:$0xff]  ;;  %v677_v11 = vld [vmem:[%s356_s13 + $0x10] sm:$0xff] }
  0x16   : > { %v382_v5 = vld [vmem:[%s348_s9] sm:$0xf]  ;;  %v676_v13 = vld [vmem:[%s356_s13 + $0x8] sm:$0xff] }
  0x17   : > { %v383_v6 = vunpack.c.l.bf16 %v382_v5  ;;  %v708_v7 = vld [vmem:[%s360_s30] ss:$0 sm:$0xff] }
  0x18   : > { %v709_v10 = vld [vmem:[%s363_s16] ss:$0 sm:$0xff] }
  0x19   : > { %462 = vmatpush.bf16.msra.mxu0 %v681_v2  ;;  %v388_v9 = vmul.f32 %v708_v7, %v383_v6  ;;  %v675_v15 = vld [vmem:[%s356_s13] sm:$0xff] }
  0x1a   : > { %v396_v17 = vld [vmem:[#allocation2] sm:$0xff] }
  0x1b   : > { %v393_v12 = vadd.f32 %v709_v10, %v388_v9 }
  0x1d   : > { %463 = vmatpush.bf16.msra.mxu0 %v680_v3  ;;  %v394_v14 = vmax.f32 %v393_v12, 0.0 }
  0x1f   : > { %v395_v16 = vpack.c.bf16 %v394_v14, %v394_v14 }
  0x21   : > { %464 = vmatpush.bf16.msra.mxu0 %v679_v4 }
  0x25   : > { %465 = vmatpush.bf16.msra.mxu0 %v678_v8 }
  0x29   : > { %466 = vmatpush.bf16.msra.mxu0 %v677_v11 }
  0x2d   : > { %467 = vmatpush.bf16.msra.mxu0 %v676_v13 }
  0x31   : > { %468 = vmatpush.bf16.msra.mxu0 %v675_v15 }
  0x34   : > { %469 = vmatmul.bf16.vlgmr.msra.gmra.mxu0 %v395_v16 }
  0xb1   : > { %v470_v18 = vpop.f32.mrf.mxu0 }
  0xb2   : > { %v474_v19 = vadd.f32 %v470_v18, %v396_v17 }
  0xb4   : > { %475 = vst [vmem:[#allocation2] sm:$0xff] %v474_v19 }
  0xb5   : > { %479 = sbr.rel (%p671_p7) target bundleno = 197 (0xc5), region = 52 }
  0xb9   : > { %v472_v20 = vpop.f32.mrf.mxu0 }
  0xba   : > { %v710_v22 = vld [vmem:[%s831_s4] ss:$0 sm:$0xff] }
  0xbb   : > { %v480_v21 = vld [vmem:[#allocation2] sm:$0xff] }
  0xbc   : > { %v711_v23 = vld [vmem:[%s832_s5] ss:$0 sm:$0xff]  ;;  %v485_v24 = vmul.f32 %v710_v22, %v480_v21 }
  0xbe   : > { %v490_v25 = vadd.f32 %v711_v23, %v485_v24 }
  0xc0   : > { %v491_v26 = vmax.f32 %v490_v25, 0.0 }
  0xc2   : > { %v492_v27 = vpack.c.bf16 %v491_v26, %v491_v26 }
  0xc4   : > { %493 = vst [vmem:[%s833_s6] sm:$0xf] %v492_v27 }
  0xc5 PF: > { %s16_s23 = sadd.s32 1, %s734_s23   ;;  %s834_s21 = smov %s730_s22 }
  0xc6   : > { %p13_p8 = scmp.ge.s32.totalorder %s16_s23, 9   ;;  %s835_s22 = smov %s837_s24 }
  0xc8   :  { %15 = sbr.rel (!%p13_p8) target bundleno = 2 (0x2), region = 97 }

// kernel: forward.202
= control target key start
LH: loop header
LB: loop body
LE: loop exit
PB: predicated region body
PF: predicated region fallthrough
CT: control target
= control target key end

     0   :  { %s1167_s21 = smov 0   ;;  %s1169_s22 = smov 0   ;;  %s1274_s0 = inlined_call_operand.vmem [shape: bf16[8,1024], index: 0, kind: input, shape index: {}]   ;;  %s1275_s1 = inlined_call_operand.vmem [shape: bf16[1024,128], index: 1, kind: input, shape index: {}]   ;;  %s1276_s2 = inlined_call_operand.vmem [shape: f32[1,1024], index: 2, kind: input, shape index: {}]   ;;  %s1277_s3 = inlined_call_operand.vmem [shape: f32[1,1024], index: 3, kind: input, shape index: {}]   ;;  %s1278_s4 = inlined_call_operand.vmem [shape: f32[1,128], index: 4, kind: input, shape index: {}]   ;;  %s1279_s5 = inlined_call_operand.vmem [shape: f32[1,128], index: 5, kind: input, shape index: {}]   ;;  %s1280_s6 = inlined_call_operand.vmem [shape: bf16[8,128], index: 6, kind: output, shape index: {}]  }
   0x1   :  { %s1171_s23 = smov 0  }
   0x2 LB: > { %s28_s24 = sadd.s32 1, %s1125_s22  ;;  %p908_p0 = scmp.ge.s32.totalorder %s1129_s23, 1  ;;  %s1129_s23 = sphi %s1171_s23, %s16_s23   ;;  %s1125_s22 = sphi %s1169_s22, %s1282_s22   ;;  %s1121_s21 = sphi %s1167_s21, %s1281_s21  }
   0x3   : > { %p29_p1 = scmp.ge.s32.totalorder %s28_s24, 2  ;;  %p292_p2 = scmp.lt.s32.totalorder %s1129_s23, 3 }
   0x5   : > { %s1284_s24 = smov (%p29_p1, %s28_s24), 0  ;;  %p293_p3 = pnand %p908_p0, %p292_p2 }
   0x6   : > { %s909_s25 = sshll.u32 (!%p293_p3), %s1121_s21, 2  ;;  %s911_s26 = sshll.u32 (!%p293_p3), %s1121_s21, 6 }
   0x7   : > { %296 = sbr.rel (%p293_p3) target bundleno = 212 (0xd4), region = 44  ;;  %p353_p4 = scmp.lt.s32.totalorder (!%p293_p3), %s909_s25, 7 }
   0x8   : > { %p361_p5 = scmp.lt.s32.totalorder (!%p293_p3), %s911_s26, 127  ;;  %p915_p6 = scmp.ne.s32.totalorder (!%p293_p3), %s1121_s21, 0 }
   0xc   : > { %s1286_s25 = smov (!%p353_p4, %s909_s25), 7  ;;  %s1288_s26 = smov (!%p361_p5, %s911_s26), 127 }
   0xd   : > { %s910_s27 = sshll.u32 %s1286_s25, 2  ;;  %s372_s30 = scalar_lea.vmem %s1276_s2, %s1286_s25 }
   0xe   : > { %s1199_s9 = scalar_lea.vmem %s1274_s0, %s910_s27  ;;  %s912_s10 = sshll.u32 %s1288_s26, 2 }
   0xf   : > { %s1204_s13 = scalar_lea.vmem %s1275_s1, %s912_s10  ;;  %s377_s16 = scalar_lea.vmem %s1277_s3, %s1286_s25 }
  0x10   : > { %395 = sbr.rel (%p915_p6) target bundleno = 23 (0x17), region = 48 }
  0x15   : > { %v1131_v0 = vmov 0.0  }
  0x16   : > { %396 = vst [vmem:[#allocation2] sm:$0xff] %v1131_v0 }
  0x17 PF: > { %v1055_v1 = vld [vmem:[%s1204_s13 + $0x38] sm:$0xff]  ;;  %v1054_v5 = vld [vmem:[%s1204_s13 + $0x30] sm:$0xff]  ;;  %v1053_v9 = vld [vmem:[%s1204_s13 + $0x28] sm:$0xff]  ;;  %p1044_p7 = scmp.ne.s32.totalorder %s1121_s21, 1 }
  0x18   : > { %v1063_v2 = vld [vmem:[%s1204_s13 + $0x78] sm:$0xff]  ;;  %696 = vmatpush.bf16.msra.mxu0 %v1055_v1  ;;  %v1062_v6 = vld [vmem:[%s1204_s13 + $0x70] sm:$0xff]  ;;  %v1061_v10 = vld [vmem:[%s1204_s13 + $0x68] sm:$0xff] }
  0x19   : > { %v1071_v3 = vld [vmem:[%s1204_s13 + $0xb8] sm:$0xff]  ;;  %709 = vmatpush.bf16.msra.mxu1 %v1063_v2  ;;  %v1070_v7 = vld [vmem:[%s1204_s13 + $0xb0] sm:$0xff]  ;;  %v1069_v11 = vld [vmem:[%s1204_s13 + $0xa8] sm:$0xff] }
  0x1a   : > { %v1079_v4 = vld [vmem:[%s1204_s13 + $0xf8] sm:$0xff]  ;;  %722 = vmatpush.bf16.msra.mxu2 %v1071_v3  ;;  %v1078_v8 = vld [vmem:[%s1204_s13 + $0xf0] sm:$0xff]  ;;  %v1077_v12 = vld [vmem:[%s1204_s13 + $0xe8] sm:$0xff] }
  0x1b   : > { %735 = vmatpush.bf16.msra.mxu3 %v1079_v4  ;;  %v1052_v13 = vld [vmem:[%s1204_s13 + $0x20] sm:$0xff]  ;;  %v398_v19 = vld [vmem:[%s1199_s9 + $0x8] sm:$0xff]  ;;  %v1051_v24 = vld [vmem:[%s1204_s13 + $0x18] sm:$0xff] }
  0x1c   : > { %697 = vmatpush.bf16.msra.mxu0 %v1054_v5  ;;  %v1060_v14 = vld [vmem:[%s1204_s13 + $0x60] sm:$0xff]  ;;  %v1059_v25 = vld [vmem:[%s1204_s13 + $0x58] sm:$0xff]  ;;  %v401_v27 = vunpack.c.l.bf16 %v398_v19  ;;  %v402_v29 = vunpack.c.h.bf16 %v398_v19  ;;  %v1050_v37 = vld [vmem:[%s1204_s13 + $0x10] sm:$0xff] }
  0x1d   : > { %710 = vmatpush.bf16.msra.mxu1 %v1062_v6  ;;  %v1068_v15 = vld [vmem:[%s1204_s13 + $0xa0] sm:$0xff]  ;;  %v1067_v31 = vld [vmem:[%s1204_s13 + $0x98] sm:$0xff]  ;;  %v1058_v38 = vld [vmem:[%s1204_s13 + $0x50] sm:$0xff] }
  0x1e   : > { %723 = vmatpush.bf16.msra.mxu2 %v1070_v7  ;;  %v397_v16 = vld [vmem:[%s1199_s9] sm:$0xff]  ;;  %v1075_v32 = vld [vmem:[%s1204_s13 + $0xd8] sm:$0xff]  ;;  %v1066_v43 = vld [vmem:[%s1204_s13 + $0x90] sm:$0xff] }
  0x1f   : > { %736 = vmatpush.bf16.msra.mxu3 %v1078_v8  ;;  %v1076_v17 = vld [vmem:[%s1204_s13 + $0xe0] sm:$0xff]  ;;  %v399_v20 = vunpack.c.l.bf16 %v397_v16  ;;  %v400_v22 = vunpack.c.h.bf16 %v397_v16  ;;  %v1074_v44 = vld [vmem:[%s1204_s13 + $0xd0] sm:$0xff]  ;;  %v1049_v47 = vld [vmem:[%s1204_s13 + $0x8] sm:$0xff] }
  0x20   : > { %698 = vmatpush.bf16.msra.mxu0 %v1053_v9  ;;  %v403_v18 = vld [vmem:[%s372_s30] sm:$0xf]  ;;  %v1057_v48 = vld [vmem:[%s1204_s13 + $0x48] sm:$0xff] }
  0x21   : > { %711 = vmatpush.bf16.msra.mxu1 %v1061_v10  ;;  %v405_v21 = vperm.slane %v403_v18, 0  ;;  %v406_v23 = vperm.slane %v403_v18, 1  ;;  %v417_v26 = vld [vmem:[%s377_s16] sm:$0xf]  ;;  %v407_v28 = vperm.slane %v403_v18, 2  ;;  %v408_v30 = vperm.slane %v403_v18, 3 }
  0x22   : > { %724 = vmatpush.bf16.msra.mxu2 %v1069_v11  ;;  %v419_v34 = vperm.slane %v417_v26, 0  ;;  %v420_v36 = vperm.slane %v417_v26, 1  ;;  %v421_v40 = vperm.slane %v417_v26, 2  ;;  %v422_v42 = vperm.slane %v417_v26, 3  ;;  %v1065_v51 = vld [vmem:[%s1204_s13 + $0x88] sm:$0xff]  ;;  %v1048_v55 = vld [vmem:[%s1204_s13] sm:$0xff] }
  0x23   : > { %737 = vmatpush.bf16.msra.mxu3 %v1077_v12  ;;  %v413_v33 = vmul.f32 %v405_v21, %v399_v20  ;;  %v414_v35 = vmul.f32 %v406_v23, %v400_v22  ;;  %v415_v39 = vmul.f32 %v407_v28, %v401_v27  ;;  %v416_v41 = vmul.f32 %v408_v30, %v402_v29  ;;  %v1073_v52 = vld [vmem:[%s1204_s13 + $0xc8] sm:$0xff]  ;;  %v1056_v56 = vld [vmem:[%s1204_s13 + $0x40] sm:$0xff] }
  0x24   : > { %699 = vmatpush.bf16.msra.mxu0 %v1052_v13  ;;  %v1064_v59 = vld [vmem:[%s1204_s13 + $0x80] sm:$0xff] }
  0x25   : > { %712 = vmatpush.bf16.msra.mxu1 %v1060_v14  ;;  %v427_v45 = vadd.f32 %v419_v34, %v413_v33  ;;  %v428_v46 = vadd.f32 %v420_v36, %v414_v35  ;;  %v429_v49 = vadd.f32 %v421_v40, %v415_v39  ;;  %v430_v50 = vadd.f32 %v422_v42, %v416_v41  ;;  %v1072_v60 = vld [vmem:[%s1204_s13 + $0xc0] sm:$0xff] }
  0x26   : > { %725 = vmatpush.bf16.msra.mxu2 %v1068_v15  ;;  %v439_v9 = vld [vmem:[#allocation2] sm:$0xff] }
  0x27   : > { %738 = vmatpush.bf16.msra.mxu3 %v1076_v17  ;;  %v431_v53 = vmax.f32 %v427_v45, 0.0  ;;  %v432_v54 = vmax.f32 %v428_v46, 0.0  ;;  %v433_v57 = vmax.f32 %v429_v49, 0.0  ;;  %v434_v58 = vmax.f32 %v430_v50, 0.0 }
  0x28   : > { %700 = vmatpush.bf16.msra.mxu0 %v1051_v24 }
  0x29   : > { %713 = vmatpush.bf16.msra.mxu1 %v1059_v25  ;;  %v435_v61 = vpack.c.bf16 %v431_v53, %v431_v53  ;;  %v436_v62 = vpack.c.bf16 %v432_v54, %v432_v54  ;;  %v437_v63 = vpack.c.bf16 %v433_v57, %v433_v57  ;;  %v438_v0 = vpack.c.bf16 %v434_v58, %v434_v58 }
  0x2a   : > { %726 = vmatpush.bf16.msra.mxu2 %v1067_v31 }
  0x2b   : > { %739 = vmatpush.bf16.msra.mxu3 %v1075_v32 }
  0x2c   : > { %701 = vmatpush.bf16.msra.mxu0 %v1050_v37 }
  0x2d   : > { %714 = vmatpush.bf16.msra.mxu1 %v1058_v38 }
  0x2e   : > { %727 = vmatpush.bf16.msra.mxu2 %v1066_v43 }
  0x2f   : > { %740 = vmatpush.bf16.msra.mxu3 %v1074_v44 }
  0x30   : > { %702 = vmatpush.bf16.msra.mxu0 %v1049_v47 }
  0x31   : > { %715 = vmatpush.bf16.msra.mxu1 %v1057_v48 }
  0x32   : > { %728 = vmatpush.bf16.msra.mxu2 %v1065_v51 }
  0x33   : > { %741 = vmatpush.bf16.msra.mxu3 %v1073_v52 }
  0x34   : > { %703 = vmatpush.bf16.msra.mxu0 %v1048_v55 }
  0x35   : > { %716 = vmatpush.bf16.msra.mxu1 %v1056_v56 }
  0x36   : > { %729 = vmatpush.bf16.msra.mxu2 %v1064_v59 }
  0x37   : > { %742 = vmatpush.bf16.msra.mxu3 %v1072_v60  ;;  %704 = vmatmul.bf16.vlgmr.msra.gmra.mxu0 %v435_v61 }
  0x38   : > { %717 = vmatmul.bf16.vlgmr.msra.gmra.mxu1 %v436_v62 }
  0x39   : > { %730 = vmatmul.bf16.vlgmr.msra.gmra.mxu2 %v437_v63 }
  0x3a   : > { %743 = vmatmul.bf16.vlgmr.msra.gmra.mxu3 %v438_v0 }
  0xb4   : > { %v705_v1 = vpop.f32.mrf.mxu0 }
  0xb5   : > { %v718_v2 = vpop.f32.mrf.mxu1 }
  0xb6   : > { %v719_v3 = vadd.f32 %v718_v2, %v705_v1 }
  0xbc   : > { %v731_v4 = vpop.f32.mrf.mxu2  ;;  %v707_v7 = vpop.f32.mrf.mxu0 }
  0xbd   : > { %v744_v5 = vpop.f32.mrf.mxu3  ;;  %v732_v6 = vadd.f32 %v731_v4, %v719_v3  ;;  %v720_v8 = vpop.f32.mrf.mxu1 }
  0xbf   : > { %v745_v10 = vadd.f32 %v744_v5, %v732_v6 }
  0xc1   : > { %v748_v11 = vadd.f32 %v745_v10, %v439_v9  ;;  %753 = sbr.rel (%p1044_p7) target bundleno = 212 (0xd4), region = 52 }
  0xc3   : > { %749 = vst [vmem:[#allocation2] sm:$0xff] %v748_v11 }
  0xc4   : > { %v733_v12 = vpop.f32.mrf.mxu2 }
  0xc5   : > { %v746_v13 = vpop.f32.mrf.mxu3 }
  0xc6   : > { %v1105_v15 = vld [vmem:[%s1278_s4] ss:$0 sm:$0xff] }
  0xc7   : > { %v1106_v16 = vld [vmem:[%s1279_s5] ss:$0 sm:$0xff] }
  0xca   : > { %v754_v14 = vld [vmem:[#allocation2] sm:$0xff] }
  0xcb   : > { %v759_v17 = vmul.f32 %v1105_v15, %v754_v14 }
  0xcd   : > { %v764_v18 = vadd.f32 %v1106_v16, %v759_v17 }
  0xcf   : > { %v765_v19 = vmax.f32 %v764_v18, 0.0 }
  0xd1   : > { %v766_v20 = vpack.c.bf16 %v765_v19, %v765_v19 }
  0xd3   : > { %767 = vst [vmem:[%s1280_s6] sm:$0xf] %v766_v20 }
  0xd4 PF: > { %s16_s23 = sadd.s32 1, %s1129_s23   ;;  %s1281_s21 = smov %s1125_s22 }
  0xd5   : > { %p13_p8 = scmp.ge.s32.totalorder %s16_s23, 4   ;;  %s1282_s22 = smov %s1284_s24 }
  0xd7   :  { %15 = sbr.rel (!%p13_p8) target bundleno = 2 (0x2), region = 97 }

// kernel: forward.208
= control target key start
LH: loop header
LB: loop body
LE: loop exit
PB: predicated region body
PF: predicated region fallthrough
CT: control target
= control target key end

     0   :  { %s1880_s21 = smov 0   ;;  %s1882_s22 = smov 0   ;;  %s2286_s0 = inlined_call_operand.vmem [shape: bf16[8,1024], index: 0, kind: input, shape index: {}]   ;;  %s2287_s1 = inlined_call_operand.vmem [shape: bf16[1024,512], index: 1, kind: input, shape index: {}]   ;;  %s2288_s2 = inlined_call_operand.vmem [shape: f32[1,1024], index: 2, kind: input, shape index: {}]   ;;  %s2289_s3 = inlined_call_operand.vmem [shape: f32[1,1024], index: 3, kind: input, shape index: {}]   ;;  %s2290_s4 = inlined_call_operand.vmem [shape: f32[1,512], index: 4, kind: input, shape index: {}, may-alias: {4,5}]   ;;  %s2291_s5 = inlined_call_operand.vmem [shape: f32[1,512], index: 5, kind: input, shape index: {}, may-alias: {4,5}]   ;;  %s2292_s6 = inlined_call_operand.vmem [shape: bf16[8,512], index: 6, kind: output, shape index: {}]  }
   0x1   :  { %s1884_s23 = smov 0   ;;  %s1886_s24 = smov 0  }
   0x2   :  { %s1888_s25 = smov 0   ;;  %s1890_s26 = smov 0  }
   0x3   :  { %s1892_s27 = smov 0  }
   0x4 LB: > { %s28_s4 = sadd.s32 1, %s1834_s25  ;;  %s31_s5 = sadd.s32 1, %s1838_s26  ;;  %s1842_s27 = sphi %s1892_s27, %s16_s27   ;;  %s1838_s26 = sphi %s1890_s26, %s2298_s26   ;;  %s1834_s25 = sphi %s1888_s25, %s2297_s25   ;;  %s1830_s24 = sphi %s1886_s24, %s2296_s24   ;;  %s1826_s23 = sphi %s1884_s23, %s2295_s23   ;;  %s1822_s22 = sphi %s1882_s22, %s2294_s22   ;;  %s1818_s21 = sphi %s1880_s21, %s2293_s21  }
   0x5   : > { %p29_p0 = scmp.ge.s32.totalorder %s28_s4, 2  ;;  %p79_p1 = scmp.ne.s32.totalorder %s1822_s22, %s1818_s21 }
   0x6   : > { %p80_p2 = scmp.eq.s32.totalorder %s1842_s27, 0  ;;  %s72_s7 = sadd.s32 1, %s1822_s22 }
   0x7   : > { %s2300_s4 = smov (%p29_p0, %s28_s4), 0  ;;  %s2302_s5 = smov (!%p29_p0, %s31_s5), %s1838_s26 }
   0x8   : > { %p81_p3 = por %p80_p2, %p79_p1  ;;  %p33_p4 = scmp.ge.s32.totalorder %s2302_s5, 2 }
   0x9   : > { %s67_s28 = ssub.s32 %s1834_s25, %s2300_s4  ;;  %p1392_p6 = scmp.ge.s32.totalorder %s1842_s27, 4 }
   0xa   : > { %s2304_s5 = smov (%p33_p4, %s2302_s5), 0 }
   0xb   : > { %s68_s29 = ssub.s32 %s1838_s26, %s2304_s5  ;;  %237 = sbr.rel (%p1392_p6) target bundleno = 87 (0x57), region = 16 }
   0xc   : > { %s69_s30 = sor.u32 %s68_s29, %s67_s28 }
   0xd   : > { %p70_p5 = scmp.eq.s32.totalorder %s69_s30, 0 }
   0xf   : > { %s1931_s8 = scalar_select %p70_p5, %s1822_s22, %s72_s7  }
  0x10   : > { %253 = sbr.rel (!%p81_p3) target bundleno = 87 (0x57), region = 24  ;;  %s255_s9 = sand.u32 (%p81_p3), 1, %s1822_s22  }
  0x11   : > { %s1395_s10 = sshll.u32 (%p81_p3), %s1838_s26, 1  ;;  %s1393_s11 = sshll.u32 (%p81_p3), %s255_s9, 9 }
  0x12   : > { %s1666_s12 = sshll.u32 (%p81_p3), %s1834_s25, 8  ;;  %s1945_s18 = scalar_lea.vmem (%p81_p3), [#allocation3], %s1393_s11 }
  0x13   : > { %s261_s13 = sadd.s32 (%p81_p3), %s1666_s12, %s1395_s10 }
  0x14   : > { %s1397_s14 = sshll.u32 (%p81_p3), %s261_s13, 2 }
  0x15   : > { %s1940_s17 = scalar_lea.vmem %s2287_s1, %s1397_s14 }
  0x16   : > { %v418_v0 = vld [vmem:[%s1940_s17] sm:$0xff]  ;;  %v420_v1 = vld [vmem:[%s1940_s17 + $0x10] sm:$0xff] }
  0x17   : > { %v422_v2 = vld [vmem:[%s1940_s17 + $0x20] sm:$0xff]  ;;  %419 = vst [vmem:[%s1945_s18] sm:$0xff] %v418_v0  ;;  %v424_v3 = vld [vmem:[%s1940_s17 + $0x30] sm:$0xff] }
  0x18   : > { %421 = vst [vmem:[%s1945_s18 + $0x8] sm:$0xff] %v420_v1  ;;  %v426_v4 = vld [vmem:[%s1940_s17 + $0x40] sm:$0xff]  ;;  %v428_v5 = vld [vmem:[%s1940_s17 + $0x50] sm:$0xff] }
  0x19   : > { %423 = vst [vmem:[%s1945_s18 + $0x10] sm:$0xff] %v422_v2  ;;  %v430_v6 = vld [vmem:[%s1940_s17 + $0x60] sm:$0xff]  ;;  %v432_v7 = vld [vmem:[%s1940_s17 + $0x70] sm:$0xff] }
  0x1a   : > { %425 = vst [vmem:[%s1945_s18 + $0x18] sm:$0xff] %v424_v3  ;;  %v434_v8 = vld [vmem:[%s1940_s17 + $0x80] sm:$0xff]  ;;  %v436_v9 = vld [vmem:[%s1940_s17 + $0x90] sm:$0xff] }
  0x1b   : > { %427 = vst [vmem:[%s1945_s18 + $0x20] sm:$0xff] %v426_v4  ;;  %v438_v10 = vld [vmem:[%s1940_s17 + $0xa0] sm:$0xff]  ;;  %v440_v11 = vld [vmem:[%s1940_s17 + $0xb0] sm:$0xff] }
  0x1c   : > { %429 = vst [vmem:[%s1945_s18 + $0x28] sm:$0xff] %v428_v5  ;;  %v442_v12 = vld [vmem:[%s1940_s17 + $0xc0] sm:$0xff]  ;;  %v444_v13 = vld [vmem:[%s1940_s17 + $0xd0] sm:$0xff] }
  0x1d   : > { %431 = vst [vmem:[%s1945_s18 + $0x30] sm:$0xff] %v430_v6  ;;  %v446_v14 = vld [vmem:[%s1940_s17 + $0xe0] sm:$0xff]  ;;  %v448_v15 = vld [vmem:[%s1940_s17 + $0xf0] sm:$0xff] }
  0x1e   : > { %433 = vst [vmem:[%s1945_s18 + $0x38] sm:$0xff] %v432_v7  ;;  %v450_v16 = vld [vmem:[%s1940_s17 + $0x100] sm:$0xff]  ;;  %v452_v17 = vld [vmem:[%s1940_s17 + $0x110] sm:$0xff] }
  0x1f   : > { %435 = vst [vmem:[%s1945_s18 + $0x40] sm:$0xff] %v434_v8  ;;  %v454_v18 = vld [vmem:[%s1940_s17 + $0x120] sm:$0xff]  ;;  %v456_v19 = vld [vmem:[%s1940_s17 + $0x130] sm:$0xff] }
  0x20   : > { %437 = vst [vmem:[%s1945_s18 + $0x48] sm:$0xff] %v436_v9  ;;  %v458_v20 = vld [vmem:[%s1940_s17 + $0x140] sm:$0xff]  ;;  %v460_v21 = vld [vmem:[%s1940_s17 + $0x150] sm:$0xff] }
  0x21   : > { %439 = vst [vmem:[%s1945_s18 + $0x50] sm:$0xff] %v438_v10  ;;  %v462_v22 = vld [vmem:[%s1940_s17 + $0x160] sm:$0xff]  ;;  %v464_v23 = vld [vmem:[%s1940_s17 + $0x170] sm:$0xff] }
  0x22   : > { %441 = vst [vmem:[%s1945_s18 + $0x58] sm:$0xff] %v440_v11  ;;  %v466_v24 = vld [vmem:[%s1940_s17 + $0x180] sm:$0xff]  ;;  %v468_v25 = vld [vmem:[%s1940_s17 + $0x190] sm:$0xff] }
  0x23   : > { %443 = vst [vmem:[%s1945_s18 + $0x60] sm:$0xff] %v442_v12  ;;  %v470_v26 = vld [vmem:[%s1940_s17 + $0x1a0] sm:$0xff]  ;;  %v472_v27 = vld [vmem:[%s1940_s17 + $0x1b0] sm:$0xff] }
  0x24   : > { %445 = vst [vmem:[%s1945_s18 + $0x68] sm:$0xff] %v444_v13  ;;  %v474_v28 = vld [vmem:[%s1940_s17 + $0x1c0] sm:$0xff]  ;;  %v476_v29 = vld [vmem:[%s1940_s17 + $0x1d0] sm:$0xff] }
  0x25   : > { %447 = vst [vmem:[%s1945_s18 + $0x70] sm:$0xff] %v446_v14  ;;  %v478_v30 = vld [vmem:[%s1940_s17 + $0x1e0] sm:$0xff]  ;;  %v480_v31 = vld [vmem:[%s1940_s17 + $0x1f0] sm:$0xff] }
  0x26   : > { %449 = vst [vmem:[%s1945_s18 + $0x78] sm:$0xff] %v448_v15  ;;  %v482_v32 = vld [vmem:[%s1940_s17 + $0x200] sm:$0xff]  ;;  %v484_v33 = vld [vmem:[%s1940_s17 + $0x210] sm:$0xff] }
  0x27   : > { %451 = vst [vmem:[%s1945_s18 + $0x80] sm:$0xff] %v450_v16  ;;  %v486_v34 = vld [vmem:[%s1940_s17 + $0x220] sm:$0xff]  ;;  %v488_v35 = vld [vmem:[%s1940_s17 + $0x230] sm:$0xff] }
  0x28   : > { %453 = vst [vmem:[%s1945_s18 + $0x88] sm:$0xff] %v452_v17  ;;  %v490_v36 = vld [vmem:[%s1940_s17 + $0x240] sm:$0xff]  ;;  %v492_v37 = vld [vmem:[%s1940_s17 + $0x250] sm:$0xff] }
  0x29   : > { %455 = vst [vmem:[%s1945_s18 + $0x90] sm:$0xff] %v454_v18  ;;  %v494_v38 = vld [vmem:[%s1940_s17 + $0x260] sm:$0xff]  ;;  %v496_v39 = vld [vmem:[%s1940_s17 + $0x270] sm:$0xff] }
  0x2a   : > { %457 = vst [vmem:[%s1945_s18 + $0x98] sm:$0xff] %v456_v19  ;;  %v498_v40 = vld [vmem:[%s1940_s17 + $0x280] sm:$0xff]  ;;  %v500_v41 = vld [vmem:[%s1940_s17 + $0x290] sm:$0xff] }
  0x2b   : > { %459 = vst [vmem:[%s1945_s18 + $0xa0] sm:$0xff] %v458_v20  ;;  %v502_v42 = vld [vmem:[%s1940_s17 + $0x2a0] sm:$0xff]  ;;  %v504_v43 = vld [vmem:[%s1940_s17 + $0x2b0] sm:$0xff] }
  0x2c   : > { %461 = vst [vmem:[%s1945_s18 + $0xa8] sm:$0xff] %v460_v21  ;;  %v506_v44 = vld [vmem:[%s1940_s17 + $0x2c0] sm:$0xff]  ;;  %v508_v45 = vld [vmem:[%s1940_s17 + $0x2d0] sm:$0xff] }
  0x2d   : > { %463 = vst [vmem:[%s1945_s18 + $0xb0] sm:$0xff] %v462_v22  ;;  %v510_v46 = vld [vmem:[%s1940_s17 + $0x2e0] sm:$0xff]  ;;  %v512_v47 = vld [vmem:[%s1940_s17 + $0x2f0] sm:$0xff] }
  0x2e   : > { %465 = vst [vmem:[%s1945_s18 + $0xb8] sm:$0xff] %v464_v23  ;;  %v514_v48 = vld [vmem:[%s1940_s17 + $0x300] sm:$0xff]  ;;  %v516_v49 = vld [vmem:[%s1940_s17 + $0x310] sm:$0xff] }
  0x2f   : > { %467 = vst [vmem:[%s1945_s18 + $0xc0] sm:$0xff] %v466_v24  ;;  %v518_v50 = vld [vmem:[%s1940_s17 + $0x320] sm:$0xff]  ;;  %v520_v51 = vld [vmem:[%s1940_s17 + $0x330] sm:$0xff] }
  0x30   : > { %469 = vst [vmem:[%s1945_s18 + $0xc8] sm:$0xff] %v468_v25  ;;  %v522_v52 = vld [vmem:[%s1940_s17 + $0x340] sm:$0xff]  ;;  %v524_v53 = vld [vmem:[%s1940_s17 + $0x350] sm:$0xff] }
  0x31   : > { %471 = vst [vmem:[%s1945_s18 + $0xd0] sm:$0xff] %v470_v26  ;;  %v526_v54 = vld [vmem:[%s1940_s17 + $0x360] sm:$0xff]  ;;  %v528_v55 = vld [vmem:[%s1940_s17 + $0x370] sm:$0xff] }
  0x32   : > { %473 = vst [vmem:[%s1945_s18 + $0xd8] sm:$0xff] %v472_v27  ;;  %v530_v56 = vld [vmem:[%s1940_s17 + $0x380] sm:$0xff]  ;;  %v532_v57 = vld [vmem:[%s1940_s17 + $0x390] sm:$0xff] }
  0x33   : > { %475 = vst [vmem:[%s1945_s18 + $0xe0] sm:$0xff] %v474_v28  ;;  %v534_v58 = vld [vmem:[%s1940_s17 + $0x3a0] sm:$0xff]  ;;  %v536_v59 = vld [vmem:[%s1940_s17 + $0x3b0] sm:$0xff] }
  0x34   : > { %477 = vst [vmem:[%s1945_s18 + $0xe8] sm:$0xff] %v476_v29  ;;  %v538_v60 = vld [vmem:[%s1940_s17 + $0x3c0] sm:$0xff]  ;;  %v540_v61 = vld [vmem:[%s1940_s17 + $0x3d0] sm:$0xff] }
  0x35   : > { %479 = vst [vmem:[%s1945_s18 + $0xf0] sm:$0xff] %v478_v30  ;;  %v542_v62 = vld [vmem:[%s1940_s17 + $0x3e0] sm:$0xff]  ;;  %v544_v63 = vld [vmem:[%s1940_s17 + $0x3f0] sm:$0xff] }
  0x36   : > { %481 = vst [vmem:[%s1945_s18 + $0xf8] sm:$0xff] %v480_v31 }
  0x37   : > { %483 = vst [vmem:[%s1945_s18 + $0x100] sm:$0xff] %v482_v32 }
  0x38   : > { %485 = vst [vmem:[%s1945_s18 + $0x108] sm:$0xff] %v484_v33 }
  0x39   : > { %487 = vst [vmem:[%s1945_s18 + $0x110] sm:$0xff] %v486_v34 }
  0x3a   : > { %489 = vst [vmem:[%s1945_s18 + $0x118] sm:$0xff] %v488_v35 }
  0x3b   : > { %491 = vst [vmem:[%s1945_s18 + $0x120] sm:$0xff] %v490_v36 }
  0x3c   : > { %493 = vst [vmem:[%s1945_s18 + $0x128] sm:$0xff] %v492_v37 }
  0x3d   : > { %495 = vst [vmem:[%s1945_s18 + $0x130] sm:$0xff] %v494_v38 }
  0x3e   : > { %497 = vst [vmem:[%s1945_s18 + $0x138] sm:$0xff] %v496_v39 }
  0x3f   : > { %499 = vst [vmem:[%s1945_s18 + $0x140] sm:$0xff] %v498_v40 }
  0x40   : > { %501 = vst [vmem:[%s1945_s18 + $0x148] sm:$0xff] %v500_v41 }
  0x41   : > { %503 = vst [vmem:[%s1945_s18 + $0x150] sm:$0xff] %v502_v42 }
  0x42   : > { %505 = vst [vmem:[%s1945_s18 + $0x158] sm:$0xff] %v504_v43 }
  0x43   : > { %507 = vst [vmem:[%s1945_s18 + $0x160] sm:$0xff] %v506_v44 }
  0x44   : > { %509 = vst [vmem:[%s1945_s18 + $0x168] sm:$0xff] %v508_v45 }
  0x45   : > { %511 = vst [vmem:[%s1945_s18 + $0x170] sm:$0xff] %v510_v46 }
  0x46   : > { %513 = vst [vmem:[%s1945_s18 + $0x178] sm:$0xff] %v512_v47 }
  0x47   : > { %515 = vst [vmem:[%s1945_s18 + $0x180] sm:$0xff] %v514_v48 }
  0x48   : > { %517 = vst [vmem:[%s1945_s18 + $0x188] sm:$0xff] %v516_v49 }
  0x49   : > { %519 = vst [vmem:[%s1945_s18 + $0x190] sm:$0xff] %v518_v50 }
  0x4a   : > { %521 = vst [vmem:[%s1945_s18 + $0x198] sm:$0xff] %v520_v51 }
  0x4b   : > { %523 = vst [vmem:[%s1945_s18 + $0x1a0] sm:$0xff] %v522_v52 }
  0x4c   : > { %525 = vst [vmem:[%s1945_s18 + $0x1a8] sm:$0xff] %v524_v53 }
  0x4d   : > { %527 = vst [vmem:[%s1945_s18 + $0x1b0] sm:$0xff] %v526_v54 }
  0x4e   : > { %529 = vst [vmem:[%s1945_s18 + $0x1b8] sm:$0xff] %v528_v55 }
  0x4f   : > { %531 = vst [vmem:[%s1945_s18 + $0x1c0] sm:$0xff] %v530_v56 }
  0x50   : > { %533 = vst [vmem:[%s1945_s18 + $0x1c8] sm:$0xff] %v532_v57 }
  0x51   : > { %535 = vst [vmem:[%s1945_s18 + $0x1d0] sm:$0xff] %v534_v58 }
  0x52   : > { %537 = vst [vmem:[%s1945_s18 + $0x1d8] sm:$0xff] %v536_v59 }
  0x53   : > { %539 = vst [vmem:[%s1945_s18 + $0x1e0] sm:$0xff] %v538_v60 }
  0x54   : > { %541 = vst [vmem:[%s1945_s18 + $0x1e8] sm:$0xff] %v540_v61 }
  0x55   : > { %543 = vst [vmem:[%s1945_s18 + $0x1f0] sm:$0xff] %v542_v62 }
  0x56   : > { %545 = vst [vmem:[%s1945_s18 + $0x1f8] sm:$0xff] %v544_v63 }
  0x57 PF: > { %p1398_p7 = scmp.ge.s32.totalorder %s1842_s27, 1  ;;  %p582_p8 = scmp.lt.s32.totalorder %s1842_s27, 5 }
  0x59   : > { %p583_p9 = pnand %p1398_p7, %p582_p8 }
  0x5a   : > { %s589_s19 = sand.u32 (!%p583_p9), 1, %s1818_s21   ;;  %s1400_s20 = sshll.u32 (!%p583_p9), %s1826_s23, 2 }
  0x5b   : > { %586 = sbr.rel (%p583_p9) target bundleno = 324 (0x144), region = 78  ;;  %s1399_s28 = sshll.u32 (!%p583_p9), %s589_s19, 9 }
  0x5c   : > { %p650_p10 = scmp.lt.s32.totalorder (!%p583_p9), %s1400_s20, 7  ;;  %s1404_s29 = sshll.u32 (!%p583_p9), %s1830_s24, 1 }
  0x5d   : > { %p682_p11 = scmp.lt.s32.totalorder (!%p583_p9), %s1404_s29, 3  ;;  %s2098_s19 = scalar_lea.vmem (!%p583_p9), [#allocation3], %s1399_s28 }
  0x5e   : > { %p1406_p12 = scmp.ne.s32.totalorder (!%p583_p9), %s1826_s23, 0 }
  0x60   : > { %s2306_s20 = smov (!%p650_p10, %s1400_s20), 7  ;;  %s2308_s29 = smov (!%p682_p11, %s1404_s29), 3 }
  0x61   : > { %s1401_s30 = sshll.u32 %s2306_s20, 2  ;;  %s662_s10 = scalar_lea.vmem %s2288_s2, %s2306_s20 }
  0x62   : > { %s2087_s13 = scalar_lea.vmem %s2286_s0, %s1401_s30  ;;  %s667_s24 = scalar_lea.vmem %s2289_s3, %s2306_s20 }
  0x63   : > { %s1405_s15 = sshll.u32 %s2308_s29, 2  ;;  %692 = sbr.rel (%p1406_p12) target bundleno = 107 (0x6b), region = 86 }
  0x64   : > { %s2096_s18 = scalar_lea.vmem %s2292_s6, %s1405_s15 }
  0x68   : > { %v1844_v0 = vmov 0.0  }
  0x69   : > { %693 = vst [vmem:[#allocation2] sm:$0xff] %v1844_v0 }
  0x6a   : > { %694 = vst [vmem:[#allocation2 + $0x8] sm:$0xff] %v1844_v0 }
  0x6b PF: > { %v1465_v1 = vld [vmem:[%s2098_s19 + $0x70] sm:$0xf]  ;;  %v1682_v2 = vld [vmem:[%s2098_s19 + $0x74] sm:$0xf0]  ;;  %v1457_v12 = vld [vmem:[%s2098_s19 + $0x60] sm:$0xf] }
  0x6c   : > { %v1529_v3 = vld [vmem:[%s2098_s19 + $0xf0] sm:$0xf]  ;;  %v1466_v4 = vor.u32 %v1682_v2, %v1465_v1  ;;  %v1698_v5 = vld [vmem:[%s2098_s19 + $0xf4] sm:$0xf0]  ;;  %v1680_v14 = vld [vmem:[%s2098_s19 + $0x64] sm:$0xf0] }
  0x6d   : > { %v1593_v6 = vld [vmem:[%s2098_s19 + $0x170] sm:$0xf]  ;;  %v1714_v7 = vld [vmem:[%s2098_s19 + $0x174] sm:$0xf0]  ;;  %v1530_v8 = vor.u32 %v1698_v5, %v1529_v3  ;;  %v1521_v15 = vld [vmem:[%s2098_s19 + $0xe0] sm:$0xf]  ;;  %v1458_v17 = vor.u32 %v1680_v14, %v1457_v12 }
  0x6e   : > { %v1594_v9 = vor.u32 %v1714_v7, %v1593_v6  ;;  %v1657_v10 = vld [vmem:[%s2098_s19 + $0x1f0] sm:$0xf]  ;;  %v1730_v11 = vld [vmem:[%s2098_s19 + $0x1f4] sm:$0xf0]  ;;  %1123 = vmatpush.bf16.msra.mxu0 %v1466_v4  ;;  %v1696_v16 = vld [vmem:[%s2098_s19 + $0xe4] sm:$0xf0] }
  0x6f   : > { %v1658_v13 = vor.u32 %v1730_v11, %v1657_v10  ;;  %1136 = vmatpush.bf16.msra.mxu1 %v1530_v8  ;;  %v1522_v18 = vor.u32 %v1696_v16, %v1521_v15  ;;  %v1585_v19 = vld [vmem:[%s2098_s19 + $0x160] sm:$0xf]  ;;  %v1712_v20 = vld [vmem:[%s2098_s19 + $0x164] sm:$0xf0]  ;;  %v1449_v24 = vld [vmem:[%s2098_s19 + $0x50] sm:$0xf] }
  0x70   : > { %1149 = vmatpush.bf16.msra.mxu2 %v1594_v9  ;;  %v1649_v21 = vld [vmem:[%s2098_s19 + $0x1e0] sm:$0xf]  ;;  %v1586_v22 = vor.u32 %v1712_v20, %v1585_v19  ;;  %v1728_v23 = vld [vmem:[%s2098_s19 + $0x1e4] sm:$0xf0]  ;;  %v1678_v25 = vld [vmem:[%s2098_s19 + $0x54] sm:$0xf0] }
  0x71   : > { %1162 = vmatpush.bf16.msra.mxu3 %v1658_v13  ;;  %v1650_v26 = vor.u32 %v1728_v23, %v1649_v21  ;;  %v1513_v27 = vld [vmem:[%s2098_s19 + $0xd0] sm:$0xf]  ;;  %v1694_v28 = vld [vmem:[%s2098_s19 + $0xd4] sm:$0xf0]  ;;  %v1450_v30 = vor.u32 %v1678_v25, %v1449_v24  ;;  %v1441_v36 = vld [vmem:[%s2098_s19 + $0x40] sm:$0xf] }
  0x72   : > { %v1577_v29 = vld [vmem:[%s2098_s19 + $0x150] sm:$0xf]  ;;  %1124 = vmatpush.bf16.msra.mxu0 %v1458_v17  ;;  %v1710_v31 = vld [vmem:[%s2098_s19 + $0x154] sm:$0xf0]  ;;  %v1514_v34 = vor.u32 %v1694_v28, %v1513_v27  ;;  %v1676_v37 = vld [vmem:[%s2098_s19 + $0x44] sm:$0xf0] }
  0x73   : > { %v1641_v32 = vld [vmem:[%s2098_s19 + $0x1d0] sm:$0xf]  ;;  %v1726_v33 = vld [vmem:[%s2098_s19 + $0x1d4] sm:$0xf0]  ;;  %1137 = vmatpush.bf16.msra.mxu1 %v1522_v18  ;;  %v1578_v35 = vor.u32 %v1710_v31, %v1577_v29  ;;  %v1505_v38 = vld [vmem:[%s2098_s19 + $0xc0] sm:$0xf]  ;;  %v1442_v45 = vor.u32 %v1676_v37, %v1441_v36 }
  0x74   : > { %1150 = vmatpush.bf16.msra.mxu2 %v1586_v22  ;;  %v1642_v39 = vor.u32 %v1726_v33, %v1641_v32  ;;  %v1692_v40 = vld [vmem:[%s2098_s19 + $0xc4] sm:$0xf0]  ;;  %v1569_v41 = vld [vmem:[%s2098_s19 + $0x140] sm:$0xf]  ;;  %v1433_v48 = vld [vmem:[%s2098_s19 + $0x30] sm:$0xf] }
  0x75   : > { %1163 = vmatpush.bf16.msra.mxu3 %v1650_v26  ;;  %v1708_v42 = vld [vmem:[%s2098_s19 + $0x144] sm:$0xf0]  ;;  %v1633_v43 = vld [vmem:[%s2098_s19 + $0x1c0] sm:$0xf]  ;;  %v1506_v46 = vor.u32 %v1692_v40, %v1505_v38  ;;  %v1674_v49 = vld [vmem:[%s2098_s19 + $0x34] sm:$0xf0] }
  0x76   : > { %v1724_v44 = vld [vmem:[%s2098_s19 + $0x1c4] sm:$0xf0]  ;;  %1125 = vmatpush.bf16.msra.mxu0 %v1450_v30  ;;  %v1570_v47 = vor.u32 %v1708_v42, %v1569_v41  ;;  %v1497_v50 = vld [vmem:[%s2098_s19 + $0xb0] sm:$0xf]  ;;  %v1690_v52 = vld [vmem:[%s2098_s19 + $0xb4] sm:$0xf0]  ;;  %v1434_v57 = vor.u32 %v1674_v49, %v1433_v48 }
  0x77   : > { %1138 = vmatpush.bf16.msra.mxu1 %v1514_v34  ;;  %v1634_v51 = vor.u32 %v1724_v44, %v1633_v43  ;;  %v1561_v53 = vld [vmem:[%s2098_s19 + $0x130] sm:$0xf]  ;;  %v1706_v54 = vld [vmem:[%s2098_s19 + $0x134] sm:$0xf0]  ;;  %v1498_v58 = vor.u32 %v1690_v52, %v1497_v50  ;;  %v1425_v60 = vld [vmem:[%s2098_s19 + $0x20] sm:$0xf] }
  0x78   : > { %1151 = vmatpush.bf16.msra.mxu2 %v1578_v35  ;;  %v1625_v55 = vld [vmem:[%s2098_s19 + $0x1b0] sm:$0xf]  ;;  %v1722_v56 = vld [vmem:[%s2098_s19 + $0x1b4] sm:$0xf0]  ;;  %v1562_v59 = vor.u32 %v1706_v54, %v1561_v53  ;;  %v1672_v61 = vld [vmem:[%s2098_s19 + $0x24] sm:$0xf0] }
  0x79   : > { %1164 = vmatpush.bf16.msra.mxu3 %v1642_v39  ;;  %v1489_v62 = vld [vmem:[%s2098_s19 + $0xa0] sm:$0xf]  ;;  %v1626_v63 = vor.u32 %v1722_v56, %v1625_v55  ;;  %v1688_v0 = vld [vmem:[%s2098_s19 + $0xa4] sm:$0xf0]  ;;  %v1426_v5 = vor.u32 %v1672_v61, %v1425_v60  ;;  %v1417_v6 = vld [vmem:[%s2098_s19 + $0x10] sm:$0xf] }
  0x7a   : > { %1126 = vmatpush.bf16.msra.mxu0 %v1442_v45  ;;  %v1553_v1 = vld [vmem:[%s2098_s19 + $0x120] sm:$0xf]  ;;  %v1704_v2 = vld [vmem:[%s2098_s19 + $0x124] sm:$0xf0]  ;;  %v1670_v7 = vld [vmem:[%s2098_s19 + $0x14] sm:$0xf0]  ;;  %v1490_v8 = vor.u32 %v1688_v0, %v1489_v62 }
  0x7b   : > { %1139 = vmatpush.bf16.msra.mxu1 %v1506_v46  ;;  %v1617_v3 = vld [vmem:[%s2098_s19 + $0x1a0] sm:$0xf]  ;;  %v1720_v4 = vld [vmem:[%s2098_s19 + $0x1a4] sm:$0xf0]  ;;  %v1554_v9 = vor.u32 %v1704_v2, %v1553_v1  ;;  %v1481_v10 = vld [vmem:[%s2098_s19 + $0x90] sm:$0xf]  ;;  %v1418_v20 = vor.u32 %v1670_v7, %v1417_v6 }
  0x7c   : > { %1152 = vmatpush.bf16.msra.mxu2 %v1570_v47  ;;  %v1686_v11 = vld [vmem:[%s2098_s19 + $0x94] sm:$0xf0]  ;;  %v1545_v12 = vld [vmem:[%s2098_s19 + $0x110] sm:$0xf]  ;;  %v1618_v13 = vor.u32 %v1720_v4, %v1617_v3  ;;  %v1409_v17 = vld [vmem:[%s2098_s19] sm:$0xf] }
  0x7d   : > { %1165 = vmatpush.bf16.msra.mxu3 %v1634_v51  ;;  %v1702_v14 = vld [vmem:[%s2098_s19 + $0x114] sm:$0xf0]  ;;  %v1609_v15 = vld [vmem:[%s2098_s19 + $0x190] sm:$0xf]  ;;  %v1668_v18 = vld [vmem:[%s2098_s19 + $0x4] sm:$0xf0]  ;;  %v1482_v24 = vor.u32 %v1686_v11, %v1481_v10 }
  0x7e   : > { %1127 = vmatpush.bf16.msra.mxu0 %v1434_v57  ;;  %v1718_v16 = vld [vmem:[%s2098_s19 + $0x194] sm:$0xf0]  ;;  %v1473_v19 = vld [vmem:[%s2098_s19 + $0x80] sm:$0xf]  ;;  %v1684_v21 = vld [vmem:[%s2098_s19 + $0x84] sm:$0xf0]  ;;  %v1546_v25 = vor.u32 %v1702_v14, %v1545_v12  ;;  %v1410_v33 = vor.u32 %v1668_v18, %v1409_v17 }
  0x7f   : > { %1140 = vmatpush.bf16.msra.mxu1 %v1498_v58  ;;  %v1537_v22 = vld [vmem:[%s2098_s19 + $0x100] sm:$0xf]  ;;  %v1700_v23 = vld [vmem:[%s2098_s19 + $0x104] sm:$0xf0]  ;;  %v1681_v28 = vld [vmem:[%s2098_s19 + $0x74] sm:$0xf]  ;;  %v1610_v29 = vor.u32 %v1718_v16, %v1609_v15  ;;  %v1474_v37 = vor.u32 %v1684_v21, %v1473_v19 }
  0x80   : > { %1153 = vmatpush.bf16.msra.mxu2 %v1562_v59  ;;  %v1601_v26 = vld [vmem:[%s2098_s19 + $0x180] sm:$0xf]  ;;  %v1716_v27 = vld [vmem:[%s2098_s19 + $0x184] sm:$0xf0]  ;;  %v1467_v30 = vld [vmem:[%s2098_s19 + $0x78] sm:$0xf0]  ;;  %v1538_v38 = vor.u32 %v1700_v23, %v1537_v22 }
  0x81   : > { %1166 = vmatpush.bf16.msra.mxu3 %v1626_v63  ;;  %v1697_v31 = vld [vmem:[%s2098_s19 + $0xf4] sm:$0xf]  ;;  %v1531_v32 = vld [vmem:[%s2098_s19 + $0xf8] sm:$0xf0]  ;;  %v701_v41 = vld [vmem:[%s662_s10] sm:$0xf]  ;;  %v1602_v49 = vor.u32 %v1716_v27, %v1601_v26  ;;  %v1470_v50 = vor.u32 %v1681_v28, %v1467_v30 }
  0x82   : > { %1128 = vmatpush.bf16.msra.mxu0 %v1426_v5  ;;  %v1713_v34 = vld [vmem:[%s2098_s19 + $0x174] sm:$0xf]  ;;  %v1595_v35 = vld [vmem:[%s2098_s19 + $0x178] sm:$0xf0]  ;;  %v2183_v42 = vld [vmem:[%s667_s24] sm:$0xf]  ;;  %v1534_v53 = vor.u32 %v1697_v31, %v1531_v32 }
  0x83   : > { %1141 = vmatpush.bf16.msra.mxu1 %v1490_v8  ;;  %v696_v36 = vld [vmem:[%s2087_s13 + $0x8] sm:$0xff]  ;;  %v1729_v39 = vld [vmem:[%s2098_s19 + $0x1f4] sm:$0xf]  ;;  %v705_v45 = vperm.slane %v701_v41, 2  ;;  %v719_v46 = vperm.slane %v2183_v42, 2  ;;  %v706_v47 = vperm.slane %v701_v41, 3  ;;  %v1598_v54 = vor.u32 %v1713_v34, %v1595_v35 }
  0x84   : > { %1154 = vmatpush.bf16.msra.mxu2 %v1554_v9  ;;  %v699_v40 = vunpack.c.l.bf16 %v696_v36  ;;  %v700_v43 = vunpack.c.h.bf16 %v696_v36  ;;  %v1659_v44 = vld [vmem:[%s2098_s19 + $0x1f8] sm:$0xf0]  ;;  %v720_v48 = vperm.slane %v2183_v42, 3  ;;  %v1679_v51 = vld [vmem:[%s2098_s19 + $0x64] sm:$0xf]  ;;  %v695_v62 = vld [vmem:[%s2087_s13] sm:$0xff] }
  0x85   : > { %1167 = vmatpush.bf16.msra.mxu3 %v1618_v13  ;;  %v1459_v52 = vld [vmem:[%s2098_s19 + $0x68] sm:$0xf0]  ;;  %v1695_v55 = vld [vmem:[%s2098_s19 + $0xe4] sm:$0xf]  ;;  %v1662_v60 = vor.u32 %v1729_v39, %v1659_v44  ;;  %v703_v63 = vperm.slane %v701_v41, 0  ;;  %v717_v0 = vperm.slane %v2183_v42, 0  ;;  %v697_v5 = vunpack.c.l.bf16 %v695_v62 }
  0x86   : > { %1129 = vmatpush.bf16.msra.mxu0 %v1418_v20  ;;  %v1523_v56 = vld [vmem:[%s2098_s19 + $0xe8] sm:$0xf0]  ;;  %v1711_v57 = vld [vmem:[%s2098_s19 + $0x164] sm:$0xf]  ;;  %v713_v58 = vmul.f32 %v705_v45, %v699_v40  ;;  %v714_v59 = vmul.f32 %v706_v47, %v700_v43  ;;  %v698_v6 = vunpack.c.h.bf16 %v695_v62  ;;  %v1462_v7 = vor.u32 %v1679_v51, %v1459_v52  ;;  %v1677_v9 = vld [vmem:[%s2098_s19 + $0x54] sm:$0xf] }
  0x87   : > { %1142 = vmatpush.bf16.msra.mxu1 %v1482_v24  ;;  %v1587_v61 = vld [vmem:[%s2098_s19 + $0x168] sm:$0xf0]  ;;  %v1727_v1 = vld [vmem:[%s2098_s19 + $0x1e4] sm:$0xf]  ;;  %v1526_v8 = vor.u32 %v1695_v55, %v1523_v56  ;;  %v704_v10 = vperm.slane %v701_v41, 1  ;;  %v718_v11 = vperm.slane %v2183_v42, 1  ;;  %v711_v17 = vmul.f32 %v703_v63, %v697_v5 }
  0x88   : > { %1155 = vmatpush.bf16.msra.mxu2 %v1546_v25  ;;  %v1651_v2 = vld [vmem:[%s2098_s19 + $0x1e8] sm:$0xf0]  ;;  %v727_v3 = vadd.f32 %v719_v46, %v713_v58  ;;  %v728_v4 = vadd.f32 %v720_v48, %v714_v59  ;;  %v1590_v12 = vor.u32 %v1711_v57, %v1587_v61  ;;  %v1451_v15 = vld [vmem:[%s2098_s19 + $0x58] sm:$0xf0]  ;;  %v1693_v16 = vld [vmem:[%s2098_s19 + $0xd4] sm:$0xf] }
  0x89   : > { %1168 = vmatpush.bf16.msra.mxu3 %v1610_v29  ;;  %v1654_v18 = vor.u32 %v1727_v1, %v1651_v2  ;;  %v1515_v19 = vld [vmem:[%s2098_s19 + $0xd8] sm:$0xf0]  ;;  %v1709_v20 = vld [vmem:[%s2098_s19 + $0x154] sm:$0xf]  ;;  %v712_v22 = vmul.f32 %v704_v10, %v698_v6  ;;  %v725_v27 = vadd.f32 %v717_v0, %v711_v17  ;;  %v1454_v28 = vor.u32 %v1677_v9, %v1451_v15  ;;  %v1675_v30 = vld [vmem:[%s2098_s19 + $0x44] sm:$0xf] }
  0x8a   : > { %1130 = vmatpush.bf16.msra.mxu0 %v1410_v33  ;;  %v731_v13 = vmax.f32 %v727_v3, 0.0  ;;  %v732_v14 = vmax.f32 %v728_v4, 0.0  ;;  %v1579_v21 = vld [vmem:[%s2098_s19 + $0x158] sm:$0xf0]  ;;  %v1725_v25 = vld [vmem:[%s2098_s19 + $0x1d4] sm:$0xf]  ;;  %v1518_v32 = vor.u32 %v1693_v16, %v1515_v19 }
  0x8b   : > { %1143 = vmatpush.bf16.msra.mxu1 %v1474_v37  ;;  %v1643_v26 = vld [vmem:[%s2098_s19 + $0x1d8] sm:$0xf0]  ;;  %v726_v29 = vadd.f32 %v718_v11, %v712_v22  ;;  %v1443_v31 = vld [vmem:[%s2098_s19 + $0x48] sm:$0xf0]  ;;  %v1582_v33 = vor.u32 %v1709_v20, %v1579_v21  ;;  %v729_v34 = vmax.f32 %v725_v27, 0.0  ;;  %p1663_p13 = scmp.ne.s32.totalorder %s1826_s23, 1 }
  0x8c   : > { %1156 = vmatpush.bf16.msra.mxu2 %v1538_v38  ;;  %v2205_v23 = vpack.c.bf16 %v731_v13, %v731_v13  ;;  %v2207_v24 = vpack.c.bf16 %v732_v14, %v732_v14  ;;  %v1691_v35 = vld [vmem:[%s2098_s19 + $0xc4] sm:$0xf]  ;;  %v1507_v36 = vld [vmem:[%s2098_s19 + $0xc8] sm:$0xf0]  ;;  %v1646_v37 = vor.u32 %v1725_v25, %v1643_v26  ;;  %v1446_v45 = vor.u32 %v1675_v30, %v1443_v31  ;;  %v1673_v48 = vld [vmem:[%s2098_s19 + $0x34] sm:$0xf] }
  0x8d   : > { %1169 = vmatpush.bf16.msra.mxu3 %v1602_v49  ;;  %v730_v38 = vmax.f32 %v726_v29, 0.0  ;;  %v1707_v39 = vld [vmem:[%s2098_s19 + $0x144] sm:$0xf]  ;;  %v1571_v40 = vld [vmem:[%s2098_s19 + $0x148] sm:$0xf0]  ;;  %v2219_v41 = vpack.c.bf16 %v729_v34, %v729_v34  ;;  %v1510_v46 = vor.u32 %v1691_v35, %v1507_v36 }
  0x8e   : > { %1175 = vmatpush.bf16.msrb.mxu0 %v1470_v50  ;;  %v1723_v42 = vld [vmem:[%s2098_s19 + $0x1c4] sm:$0xf]  ;;  %v1635_v43 = vld [vmem:[%s2098_s19 + $0x1c8] sm:$0xf0]  ;;  %v1574_v47 = vor.u32 %v1707_v39, %v1571_v40  ;;  %v1435_v49 = vld [vmem:[%s2098_s19 + $0x38] sm:$0xf0] }
  0x8f   : > { %1188 = vmatpush.bf16.msrb.mxu1 %v1534_v53  ;;  %1157 = vmatmul.bf16.vlgmr.msra.gmra.mxu2 %v2205_v23  ;;  %v2223_v44 = vpack.c.bf16 %v730_v38, %v730_v38  ;;  %v1689_v50 = vld [vmem:[%s2098_s19 + $0xb4] sm:$0xf]  ;;  %v1638_v51 = vor.u32 %v1723_v42, %v1635_v43  ;;  %v1499_v52 = vld [vmem:[%s2098_s19 + $0xb8] sm:$0xf0]  ;;  %v1438_v57 = vor.u32 %v1673_v48, %v1435_v49  ;;  %v1427_v61 = vld [vmem:[%s2098_s19 + $0x28] sm:$0xf0] }
  0x90   : > { %1201 = vmatpush.bf16.msrb.mxu2 %v1598_v54  ;;  %1170 = vmatmul.bf16.vlgmr.msra.gmra.mxu3 %v2207_v24  ;;  %v1705_v53 = vld [vmem:[%s2098_s19 + $0x134] sm:$0xf]  ;;  %v1563_v54 = vld [vmem:[%s2098_s19 + $0x138] sm:$0xf0]  ;;  %v1502_v58 = vor.u32 %v1689_v50, %v1499_v52  ;;  %v1687_v62 = vld [vmem:[%s2098_s19 + $0xa4] sm:$0xf] }
  0x91   : > { %1214 = vmatpush.bf16.msrb.mxu3 %v1662_v60  ;;  %1131 = vmatmul.bf16.vlgmr.msra.gmra.mxu0 %v2219_v41  ;;  %v1721_v55 = vld [vmem:[%s2098_s19 + $0x1b4] sm:$0xf]  ;;  %v1627_v56 = vld [vmem:[%s2098_s19 + $0x1b8] sm:$0xf0]  ;;  %v1566_v59 = vor.u32 %v1705_v53, %v1563_v54  ;;  %v1671_v60 = vld [vmem:[%s2098_s19 + $0x24] sm:$0xf] }
  0x92   : > { %1176 = vmatpush.bf16.msrb.mxu0 %v1462_v7  ;;  %1144 = vmatmul.bf16.vlgmr.msra.gmra.mxu1 %v2223_v44  ;;  %v1630_v63 = vor.u32 %v1721_v55, %v1627_v56  ;;  %v1491_v0 = vld [vmem:[%s2098_s19 + $0xa8] sm:$0xf0]  ;;  %v1703_v1 = vld [vmem:[%s2098_s19 + $0x124] sm:$0xf]  ;;  %v1430_v5 = vor.u32 %v1671_v60, %v1427_v61  ;;  %v1419_v9 = vld [vmem:[%s2098_s19 + $0x18] sm:$0xf0] }
  0x93   : > { %1189 = vmatpush.bf16.msrb.mxu1 %v1526_v8  ;;  %v1555_v2 = vld [vmem:[%s2098_s19 + $0x128] sm:$0xf0]  ;;  %v1719_v3 = vld [vmem:[%s2098_s19 + $0x1a4] sm:$0xf]  ;;  %v1494_v6 = vor.u32 %v1687_v62, %v1491_v0  ;;  %v1669_v8 = vld [vmem:[%s2098_s19 + $0x14] sm:$0xf] }
  0x94   : > { %1202 = vmatpush.bf16.msrb.mxu2 %v1590_v12  ;;  %v1619_v4 = vld [vmem:[%s2098_s19 + $0x1a8] sm:$0xf0]  ;;  %v1558_v7 = vor.u32 %v1703_v1, %v1555_v2  ;;  %v1685_v10 = vld [vmem:[%s2098_s19 + $0x94] sm:$0xf]  ;;  %v1483_v12 = vld [vmem:[%s2098_s19 + $0x98] sm:$0xf0]  ;;  %v1422_v17 = vor.u32 %v1669_v8, %v1419_v9 }
  0x95   : > { %1215 = vmatpush.bf16.msrb.mxu3 %v1654_v18  ;;  %v1622_v11 = vor.u32 %v1719_v3, %v1619_v4  ;;  %v1701_v13 = vld [vmem:[%s2098_s19 + $0x114] sm:$0xf]  ;;  %v1547_v14 = vld [vmem:[%s2098_s19 + $0x118] sm:$0xf0]  ;;  %v1486_v18 = vor.u32 %v1685_v10, %v1483_v12  ;;  %v1667_v20 = vld [vmem:[%s2098_s19 + $0x4] sm:$0xf] }
  0x96   : > { %1177 = vmatpush.bf16.msrb.mxu0 %v1454_v28  ;;  %v1717_v15 = vld [vmem:[%s2098_s19 + $0x194] sm:$0xf]  ;;  %v1611_v16 = vld [vmem:[%s2098_s19 + $0x198] sm:$0xf0]  ;;  %v1550_v19 = vor.u32 %v1701_v13, %v1547_v14  ;;  %v1411_v21 = vld [vmem:[%s2098_s19 + $0x8] sm:$0xf0] }
  0x97   : > { %1190 = vmatpush.bf16.msrb.mxu1 %v1518_v32  ;;  %v1683_v22 = vld [vmem:[%s2098_s19 + $0x84] sm:$0xf]  ;;  %v1614_v25 = vor.u32 %v1717_v15, %v1611_v16  ;;  %v1475_v26 = vld [vmem:[%s2098_s19 + $0x88] sm:$0xf0]  ;;  %v1414_v31 = vor.u32 %v1667_v20, %v1411_v21  ;;  %v737_v42 = vld [vmem:[#allocation2] sm:$0xff] }
  0x98   : > { %1203 = vmatpush.bf16.msrb.mxu2 %v1582_v33  ;;  %v1699_v27 = vld [vmem:[%s2098_s19 + $0x104] sm:$0xf]  ;;  %v1539_v28 = vld [vmem:[%s2098_s19 + $0x108] sm:$0xf0]  ;;  %v1478_v32 = vor.u32 %v1683_v22, %v1475_v26  ;;  %v738_v53 = vld [vmem:[#allocation2 + $0x8] sm:$0xff] }
  0x99   : > { %1216 = vmatpush.bf16.msrb.mxu3 %v1646_v37  ;;  %v1715_v29 = vld [vmem:[%s2098_s19 + $0x184] sm:$0xf]  ;;  %v1603_v30 = vld [vmem:[%s2098_s19 + $0x188] sm:$0xf0]  ;;  %v1542_v33 = vor.u32 %v1699_v27, %v1539_v28 }
  0x9a   : > { %1178 = vmatpush.bf16.msrb.mxu0 %v1446_v45  ;;  %v1606_v34 = vor.u32 %v1715_v29, %v1603_v30 }
  0x9b   : > { %1191 = vmatpush.bf16.msrb.mxu1 %v1510_v46 }
  0x9c   : > { %1204 = vmatpush.bf16.msrb.mxu2 %v1574_v47 }
  0x9d   : > { %1217 = vmatpush.bf16.msrb.mxu3 %v1638_v51 }
  0x9e   : > { %1179 = vmatpush.bf16.msrb.mxu0 %v1438_v57 }
  0x9f   : > { %1192 = vmatpush.bf16.msrb.mxu1 %v1502_v58 }
  0xa0   : > { %1205 = vmatpush.bf16.msrb.mxu2 %v1566_v59 }
  0xa1   : > { %1218 = vmatpush.bf16.msrb.mxu3 %v1630_v63 }
  0xa2   : > { %1180 = vmatpush.bf16.msrb.mxu0 %v1430_v5 }
  0xa3   : > { %1193 = vmatpush.bf16.msrb.mxu1 %v1494_v6 }
  0xa4   : > { %1206 = vmatpush.bf16.msrb.mxu2 %v1558_v7 }
  0xa5   : > { %1219 = vmatpush.bf16.msrb.mxu3 %v1622_v11 }
  0xa6   : > { %1181 = vmatpush.bf16.msrb.mxu0 %v1422_v17 }
  0xa7   : > { %1194 = vmatpush.bf16.msrb.mxu1 %v1486_v18 }
  0xa8   : > { %1207 = vmatpush.bf16.msrb.mxu2 %v1550_v19 }
  0xa9   : > { %1220 = vmatpush.bf16.msrb.mxu3 %v1614_v25 }
  0xaa   : > { %1182 = vmatpush.bf16.msrb.mxu0 %v1414_v31 }
  0xab   : > { %1195 = vmatpush.bf16.msrb.mxu1 %v1478_v32 }
  0xac   : > { %1208 = vmatpush.bf16.msrb.mxu2 %v1542_v33 }
  0xad   : > { %1221 = vmatpush.bf16.msrb.mxu3 %v1606_v34  ;;  %1183 = vmatmul.bf16.vlgmr.msrb.gmra.mxu0 %v2219_v41 }
  0xae   : > { %1196 = vmatmul.bf16.vlgmr.msrb.gmra.mxu1 %v2223_v44 }
  0xaf   : > { %1209 = vmatmul.bf16.vlgmr.msrb.gmra.mxu2 %v2205_v23 }
  0xb0   : > { %1222 = vmatmul.bf16.vlgmr.msrb.gmra.mxu3 %v2207_v24 }
 0x10e   : > { %v1132_v35 = vpop.f32.mrf.mxu0 }
 0x10f   : > { %v1145_v36 = vpop.f32.mrf.mxu1 }
 0x110   : > { %v1146_v37 = vadd.f32 %v1145_v36, %v1132_v35 }
 0x112   : > { %v1158_v38 = vpop.f32.mrf.mxu2 }
 0x113   : > { %v1171_v39 = vpop.f32.mrf.mxu3  ;;  %v1159_v40 = vadd.f32 %v1158_v38, %v1146_v37 }
 0x115   : > { %v1172_v43 = vadd.f32 %v1171_v39, %v1159_v40 }
 0x116   : > { %v1134_v46 = vpop.f32.mrf.mxu0 }
 0x117   : > { %v1227_v45 = vadd.f32 %v1172_v43, %v737_v42  ;;  %v1147_v47 = vpop.f32.mrf.mxu1 }
 0x119   : > { %1229 = vst [vmem:[#allocation2] sm:$0xff] %v1227_v45 }
 0x11a   : > { %v1160_v48 = vpop.f32.mrf.mxu2 }
 0x11b   : > { %v1173_v41 = vpop.f32.mrf.mxu3 }
 0x12a   : > { %v1184_v49 = vpop.f32.mrf.mxu0 }
 0x12b   : > { %v1197_v44 = vpop.f32.mrf.mxu1 }
 0x12c   : > { %v1198_v50 = vadd.f32 %v1197_v44, %v1184_v49 }
 0x132   : > { %v1210_v23 = vpop.f32.mrf.mxu2  ;;  %v1186_v52 = vpop.f32.mrf.mxu0 }
 0x133   : > { %v1211_v51 = vadd.f32 %v1210_v23, %v1198_v50  ;;  %v1223_v24 = vpop.f32.mrf.mxu3  ;;  %v1199_v54 = vpop.f32.mrf.mxu1 }
 0x135   : > { %v1224_v55 = vadd.f32 %v1223_v24, %v1211_v51 }
 0x137   : > { %v1228_v56 = vadd.f32 %v1224_v55, %v738_v53  ;;  %1234 = sbr.rel (%p1663_p13) target bundleno = 324 (0x144), region = 90 }
 0x139   : > { %1230 = vst [vmem:[#allocation2 + $0x8] sm:$0xff] %v1228_v56 }
 0x13a   : > { %v1212_v57 = vpop.f32.mrf.mxu2 }
 0x13b   : > { %v1225_v58 = vpop.f32.mrf.mxu3 }
 0x13c   : > { %v1235_v59 = vld [vmem:[#allocation2] sm:$0xff] }
 0x140   : > { %v1236_v60 = vld [vmem:[#allocation2 + $0x8] sm:$0xff] }
 0x141   : > { %v1237_v61 = vpack.c.bf16 %v1236_v60, %v1235_v59 }
 0x143   : > { %1238 = vst [vmem:[%s2096_s18] sm:$0xff] %v1237_v61 }
 0x144 PF: > { %s16_s27 = sadd.s32 1, %s1842_s27   ;;  %s2293_s21 = smov %s1822_s22 }
 0x145   : > { %p13_p0 = scmp.ge.s32.totalorder %s16_s27, 6   ;;  %s2294_s22 = smov %s1931_s8 }
 0x146   : > { %s2295_s23 = smov %s1834_s25  ;;  %s2296_s24 = smov %s1838_s26 }
 0x147   : > { %s2297_s25 = smov %s2300_s4  ;;  %s2298_s26 = smov %s2304_s5 }
 0x148   :  { %15 = sbr.rel (!%p13_p0) target bundleno = 4 (0x4), region = 140 }

// kernel: forward.241
= control target key start
LH: loop header
LB: loop body
LE: loop exit
PB: predicated region body
PF: predicated region fallthrough
CT: control target
= control target key end

     0   :  { %vm292_vm0 = vcmask 1041409   ;;  %s3224_s0 = inlined_call_operand.vmem [shape: bf16[2,1,1024], index: 0, kind: input, shape index: {}]   ;;  %s3225_s1 = inlined_call_operand.vmem [shape: f32[1,1024], index: 1, kind: input, shape index: {}]   ;;  %s3226_s2 = inlined_call_operand.vmem [shape: f32[1,1024], index: 2, kind: input, shape index: {}]   ;;  %s3227_s3 = inlined_call_operand.vmem [shape: bf16[1024,256], index: 3, kind: input, shape index: {}]   ;;  %s3228_s4 = inlined_call_operand.vmem [shape: f32[1,256], index: 4, kind: input, shape index: {}]   ;;  %s3229_s5 = inlined_call_operand.vmem [shape: bf16[256,128], index: 5, kind: input, shape index: {}]   ;;  %s3230_s6 = inlined_call_operand.vmem [shape: f32[1,128], index: 6, kind: input, shape index: {}]   ;;  %s3231_s7 = inlined_call_operand.hbm [shape: f32[2,128], index: 7, kind: output, shape index: {}]  }
   0x1   :  { %v1423_v0 = vld [vmem:[%s3227_s3 + $0x70] sm:$0xf]  ;;  %v1956_v1 = vld [vmem:[%s3227_s3 + $0x74] sm:$0xf0]  ;;  %v1415_v11 = vld [vmem:[%s3227_s3 + $0x60] sm:$0xf] }
   0x2   :  { %v1487_v2 = vld [vmem:[%s3227_s3 + $0xf0] sm:$0xf]  ;;  %v1424_v3 = vor.u32 %v1956_v1, %v1423_v0  ;;  %v1972_v4 = vld [vmem:[%s3227_s3 + $0xf4] sm:$0xf0]  ;;  %v1954_v13 = vld [vmem:[%s3227_s3 + $0x64] sm:$0xf0] }
   0x3   :  { %v1551_v5 = vld [vmem:[%s3227_s3 + $0x170] sm:$0xf]  ;;  %v1988_v6 = vld [vmem:[%s3227_s3 + $0x174] sm:$0xf0]  ;;  %v1488_v7 = vor.u32 %v1972_v4, %v1487_v2  ;;  %v1479_v14 = vld [vmem:[%s3227_s3 + $0xe0] sm:$0xf]  ;;  %v1416_v16 = vor.u32 %v1954_v13, %v1415_v11 }
   0x4   :  { %v1552_v8 = vor.u32 %v1988_v6, %v1551_v5  ;;  %v1615_v9 = vld [vmem:[%s3227_s3 + $0x1f0] sm:$0xf]  ;;  %v2004_v10 = vld [vmem:[%s3227_s3 + $0x1f4] sm:$0xf0]  ;;  %964 = vmatpush.bf16.msra.mxu0 %v1424_v3  ;;  %v1970_v15 = vld [vmem:[%s3227_s3 + $0xe4] sm:$0xf0] }
   0x5   :  { %v1616_v12 = vor.u32 %v2004_v10, %v1615_v9  ;;  %977 = vmatpush.bf16.msra.mxu1 %v1488_v7  ;;  %v1480_v17 = vor.u32 %v1970_v15, %v1479_v14  ;;  %v1543_v18 = vld [vmem:[%s3227_s3 + $0x160] sm:$0xf]  ;;  %v1986_v19 = vld [vmem:[%s3227_s3 + $0x164] sm:$0xf0]  ;;  %v1407_v23 = vld [vmem:[%s3227_s3 + $0x50] sm:$0xf] }
   0x6   :  { %990 = vmatpush.bf16.msra.mxu2 %v1552_v8  ;;  %v1607_v20 = vld [vmem:[%s3227_s3 + $0x1e0] sm:$0xf]  ;;  %v1544_v21 = vor.u32 %v1986_v19, %v1543_v18  ;;  %v2002_v22 = vld [vmem:[%s3227_s3 + $0x1e4] sm:$0xf0]  ;;  %v1952_v24 = vld [vmem:[%s3227_s3 + $0x54] sm:$0xf0] }
   0x7   :  { %1003 = vmatpush.bf16.msra.mxu3 %v1616_v12  ;;  %v1608_v25 = vor.u32 %v2002_v22, %v1607_v20  ;;  %v1471_v26 = vld [vmem:[%s3227_s3 + $0xd0] sm:$0xf]  ;;  %v1968_v27 = vld [vmem:[%s3227_s3 + $0xd4] sm:$0xf0]  ;;  %v1408_v29 = vor.u32 %v1952_v24, %v1407_v23  ;;  %v1399_v35 = vld [vmem:[%s3227_s3 + $0x40] sm:$0xf] }
   0x8   :  { %v1535_v28 = vld [vmem:[%s3227_s3 + $0x150] sm:$0xf]  ;;  %965 = vmatpush.bf16.msra.mxu0 %v1416_v16  ;;  %v1984_v30 = vld [vmem:[%s3227_s3 + $0x154] sm:$0xf0]  ;;  %v1472_v33 = vor.u32 %v1968_v27, %v1471_v26  ;;  %v1950_v36 = vld [vmem:[%s3227_s3 + $0x44] sm:$0xf0] }
   0x9   :  { %v1599_v31 = vld [vmem:[%s3227_s3 + $0x1d0] sm:$0xf]  ;;  %v2000_v32 = vld [vmem:[%s3227_s3 + $0x1d4] sm:$0xf0]  ;;  %978 = vmatpush.bf16.msra.mxu1 %v1480_v17  ;;  %v1536_v34 = vor.u32 %v1984_v30, %v1535_v28  ;;  %v1463_v37 = vld [vmem:[%s3227_s3 + $0xc0] sm:$0xf]  ;;  %v1400_v44 = vor.u32 %v1950_v36, %v1399_v35 }
   0xa   :  { %991 = vmatpush.bf16.msra.mxu2 %v1544_v21  ;;  %v1600_v38 = vor.u32 %v2000_v32, %v1599_v31  ;;  %v1966_v39 = vld [vmem:[%s3227_s3 + $0xc4] sm:$0xf0]  ;;  %v1527_v40 = vld [vmem:[%s3227_s3 + $0x140] sm:$0xf]  ;;  %v1391_v47 = vld [vmem:[%s3227_s3 + $0x30] sm:$0xf] }
   0xb   :  { %1004 = vmatpush.bf16.msra.mxu3 %v1608_v25  ;;  %v1982_v41 = vld [vmem:[%s3227_s3 + $0x144] sm:$0xf0]  ;;  %v1591_v42 = vld [vmem:[%s3227_s3 + $0x1c0] sm:$0xf]  ;;  %v1464_v45 = vor.u32 %v1966_v39, %v1463_v37  ;;  %v1948_v48 = vld [vmem:[%s3227_s3 + $0x34] sm:$0xf0] }
   0xc   :  { %v1998_v43 = vld [vmem:[%s3227_s3 + $0x1c4] sm:$0xf0]  ;;  %966 = vmatpush.bf16.msra.mxu0 %v1408_v29  ;;  %v1528_v46 = vor.u32 %v1982_v41, %v1527_v40  ;;  %v1455_v49 = vld [vmem:[%s3227_s3 + $0xb0] sm:$0xf]  ;;  %v1964_v51 = vld [vmem:[%s3227_s3 + $0xb4] sm:$0xf0]  ;;  %v1392_v56 = vor.u32 %v1948_v48, %v1391_v47 }
   0xd   :  { %979 = vmatpush.bf16.msra.mxu1 %v1472_v33  ;;  %v1592_v50 = vor.u32 %v1998_v43, %v1591_v42  ;;  %v1519_v52 = vld [vmem:[%s3227_s3 + $0x130] sm:$0xf]  ;;  %v1980_v53 = vld [vmem:[%s3227_s3 + $0x134] sm:$0xf0]  ;;  %v1456_v57 = vor.u32 %v1964_v51, %v1455_v49  ;;  %v1383_v59 = vld [vmem:[%s3227_s3 + $0x20] sm:$0xf] }
   0xe   :  { %992 = vmatpush.bf16.msra.mxu2 %v1536_v34  ;;  %v1583_v54 = vld [vmem:[%s3227_s3 + $0x1b0] sm:$0xf]  ;;  %v1996_v55 = vld [vmem:[%s3227_s3 + $0x1b4] sm:$0xf0]  ;;  %v1520_v58 = vor.u32 %v1980_v53, %v1519_v52  ;;  %v1946_v60 = vld [vmem:[%s3227_s3 + $0x24] sm:$0xf0] }
   0xf   :  { %1005 = vmatpush.bf16.msra.mxu3 %v1600_v38  ;;  %v1447_v61 = vld [vmem:[%s3227_s3 + $0xa0] sm:$0xf]  ;;  %v1584_v62 = vor.u32 %v1996_v55, %v1583_v54  ;;  %v1962_v63 = vld [vmem:[%s3227_s3 + $0xa4] sm:$0xf0]  ;;  %v1384_v4 = vor.u32 %v1946_v60, %v1383_v59  ;;  %v1375_v7 = vld [vmem:[%s3227_s3 + $0x10] sm:$0xf] }
  0x10   :  { %967 = vmatpush.bf16.msra.mxu0 %v1400_v44  ;;  %v1511_v0 = vld [vmem:[%s3227_s3 + $0x120] sm:$0xf]  ;;  %v1978_v1 = vld [vmem:[%s3227_s3 + $0x124] sm:$0xf0]  ;;  %v1448_v5 = vor.u32 %v1962_v63, %v1447_v61  ;;  %v1944_v8 = vld [vmem:[%s3227_s3 + $0x14] sm:$0xf0] }
  0x11   :  { %980 = vmatpush.bf16.msra.mxu1 %v1464_v45  ;;  %v1575_v2 = vld [vmem:[%s3227_s3 + $0x1a0] sm:$0xf]  ;;  %v1994_v3 = vld [vmem:[%s3227_s3 + $0x1a4] sm:$0xf0]  ;;  %v1512_v6 = vor.u32 %v1978_v1, %v1511_v0  ;;  %v1439_v9 = vld [vmem:[%s3227_s3 + $0x90] sm:$0xf]  ;;  %v1376_v16 = vor.u32 %v1944_v8, %v1375_v7 }
  0x12   :  { %993 = vmatpush.bf16.msra.mxu2 %v1528_v46  ;;  %v1576_v10 = vor.u32 %v1994_v3, %v1575_v2  ;;  %v1960_v11 = vld [vmem:[%s3227_s3 + $0x94] sm:$0xf0]  ;;  %v1503_v12 = vld [vmem:[%s3227_s3 + $0x110] sm:$0xf]  ;;  %v1367_v17 = vld [vmem:[%s3227_s3] sm:$0xf] }
  0x13   :  { %1006 = vmatpush.bf16.msra.mxu3 %v1592_v50  ;;  %v1976_v13 = vld [vmem:[%s3227_s3 + $0x114] sm:$0xf0]  ;;  %v1567_v14 = vld [vmem:[%s3227_s3 + $0x190] sm:$0xf]  ;;  %v1942_v18 = vld [vmem:[%s3227_s3 + $0x4] sm:$0xf0]  ;;  %v1440_v20 = vor.u32 %v1960_v11, %v1439_v9 }
  0x14   :  { %968 = vmatpush.bf16.msra.mxu0 %v1392_v56  ;;  %v1992_v15 = vld [vmem:[%s3227_s3 + $0x194] sm:$0xf0]  ;;  %v1431_v19 = vld [vmem:[%s3227_s3 + $0x80] sm:$0xf]  ;;  %v1504_v21 = vor.u32 %v1976_v13, %v1503_v12  ;;  %v1958_v22 = vld [vmem:[%s3227_s3 + $0x84] sm:$0xf0]  ;;  %v1368_v32 = vor.u32 %v1942_v18, %v1367_v17 }
  0x15   :  { %981 = vmatpush.bf16.msra.mxu1 %v1456_v57  ;;  %v1495_v23 = vld [vmem:[%s3227_s3 + $0x100] sm:$0xf]  ;;  %v1974_v24 = vld [vmem:[%s3227_s3 + $0x104] sm:$0xf0]  ;;  %v1568_v25 = vor.u32 %v1992_v15, %v1567_v14  ;;  %v1679_v28 = vld [vmem:[%s3227_s3 + $0x270] sm:$0xf]  ;;  %v1432_v36 = vor.u32 %v1958_v22, %v1431_v19 }
  0x16   :  { %994 = vmatpush.bf16.msra.mxu2 %v1520_v58  ;;  %v1559_v26 = vld [vmem:[%s3227_s3 + $0x180] sm:$0xf]  ;;  %v1990_v27 = vld [vmem:[%s3227_s3 + $0x184] sm:$0xf0]  ;;  %v2020_v29 = vld [vmem:[%s3227_s3 + $0x274] sm:$0xf0]  ;;  %v1496_v37 = vor.u32 %v1974_v24, %v1495_v23 }
  0x17   :  { %1007 = vmatpush.bf16.msra.mxu3 %v1584_v62  ;;  %v1743_v30 = vld [vmem:[%s3227_s3 + $0x2f0] sm:$0xf]  ;;  %v2036_v31 = vld [vmem:[%s3227_s3 + $0x2f4] sm:$0xf0]  ;;  %v1671_v39 = vld [vmem:[%s3227_s3 + $0x260] sm:$0xf]  ;;  %v1560_v41 = vor.u32 %v1990_v27, %v1559_v26  ;;  %v1680_v42 = vor.u32 %v2020_v29, %v1679_v28 }
  0x18   :  { %969 = vmatpush.bf16.msra.mxu0 %v1384_v4  ;;  %v1807_v33 = vld [vmem:[%s3227_s3 + $0x370] sm:$0xf]  ;;  %v2052_v34 = vld [vmem:[%s3227_s3 + $0x374] sm:$0xf0]  ;;  %v2018_v40 = vld [vmem:[%s3227_s3 + $0x264] sm:$0xf0]  ;;  %v1744_v47 = vor.u32 %v2036_v31, %v1743_v30 }
  0x19   :  { %982 = vmatpush.bf16.msra.mxu1 %v1448_v5  ;;  %v1871_v35 = vld [vmem:[%s3227_s3 + $0x3f0] sm:$0xf]  ;;  %v2068_v38 = vld [vmem:[%s3227_s3 + $0x3f4] sm:$0xf0]  ;;  %v1735_v43 = vld [vmem:[%s3227_s3 + $0x2e0] sm:$0xf]  ;;  %v1808_v48 = vor.u32 %v2052_v34, %v1807_v33  ;;  %v1672_v58 = vor.u32 %v2018_v40, %v1671_v39 }
  0x1a   :  { %995 = vmatpush.bf16.msra.mxu2 %v1512_v6  ;;  %v2034_v44 = vld [vmem:[%s3227_s3 + $0x2e4] sm:$0xf0]  ;;  %v1799_v45 = vld [vmem:[%s3227_s3 + $0x360] sm:$0xf]  ;;  %v2409_v51 = vld [vmem:[%s3227_s3 + $0x250] sm:$0xf]  ;;  %v1872_v52 = vor.u32 %v2068_v38, %v1871_v35 }
  0x1b   :  { %1008 = vmatpush.bf16.msra.mxu3 %v1576_v10  ;;  %v2050_v46 = vld [vmem:[%s3227_s3 + $0x364] sm:$0xf0]  ;;  %v2399_v49 = vld [vmem:[%s3227_s3 + $0x3e0] sm:$0xf]  ;;  %v2414_v53 = vld [vmem:[%s3227_s3 + $0x254] sm:$0xf0]  ;;  %v1736_v63 = vor.u32 %v2034_v44, %v1735_v43 }
  0x1c   :  { %970 = vmatpush.bf16.msra.mxu0 %v1376_v16  ;;  %v2404_v50 = vld [vmem:[%s3227_s3 + $0x3e4] sm:$0xf0]  ;;  %v2419_v54 = vld [vmem:[%s3227_s3 + $0x2d0] sm:$0xf]  ;;  %v2424_v55 = vld [vmem:[%s3227_s3 + $0x2d4] sm:$0xf0]  ;;  %v1800_v0 = vor.u32 %v2050_v46, %v1799_v45  ;;  %v1664_v10 = vor.u32 %v2414_v53, %v2409_v51 }
  0x1d   :  { %983 = vmatpush.bf16.msra.mxu1 %v1440_v20  ;;  %v2429_v56 = vld [vmem:[%s3227_s3 + $0x350] sm:$0xf]  ;;  %v2434_v57 = vld [vmem:[%s3227_s3 + $0x354] sm:$0xf0]  ;;  %v2449_v61 = vld [vmem:[%s3224_s0] sm:$0xff]  ;;  %v1864_v9 = vor.u32 %v2404_v50, %v2399_v49  ;;  %v1728_v17 = vor.u32 %v2424_v55, %v2419_v54 }
  0x1e   :  { %996 = vmatpush.bf16.msra.mxu2 %v1504_v21  ;;  %v2439_v59 = vld [vmem:[%s3227_s3 + $0x3d0] sm:$0xf]  ;;  %v2444_v60 = vld [vmem:[%s3227_s3 + $0x3d4] sm:$0xf0]  ;;  %v2454_v62 = vld [vmem:[%s3224_s0 + $0x8] sm:$0xff]  ;;  %v29_v18 = vunpack.c.l.bf16 %v2449_v61  ;;  %v1792_v24 = vor.u32 %v2434_v57, %v2429_v56 }
  0x1f   :  { %1009 = vmatpush.bf16.msra.mxu3 %v1568_v25  ;;  %v2459_v1 = vld [vmem:[%s3227_s3 + $0x240] sm:$0xf]  ;;  %v2464_v2 = vld [vmem:[%s3227_s3 + $0x244] sm:$0xf0]  ;;  %v2119_v7 = vmov 857870592   ;;  %v31_v19 = vunpack.c.l.bf16 %v2454_v62  ;;  %v30_v25 = vunpack.c.h.bf16 %v2449_v61  ;;  %v32_v26 = vunpack.c.h.bf16 %v2454_v62 }
  0x20   :  { %971 = vmatpush.bf16.msra.mxu0 %v1368_v32  ;;  %v2469_v3 = vld [vmem:[%s3227_s3 + $0x2c0] sm:$0xf]  ;;  %v2474_v4 = vld [vmem:[%s3227_s3 + $0x2c4] sm:$0xf0]  ;;  %v36_v8 = vunpack.c.l.s4 %v2119_v7  ;;  %v2120_v14 = vmov 2003195204   ;;  %v1856_v31 = vor.u32 %v2444_v60, %v2439_v59  ;;  %v1656_v38 = vor.u32 %v2464_v2, %v2459_v1 }
  0x21   :  { %984 = vmatpush.bf16.msra.mxu1 %v1432_v36  ;;  %v2479_v5 = vld [vmem:[%s3227_s3 + $0x340] sm:$0xf]  ;;  %v2484_v6 = vld [vmem:[%s3227_s3 + $0x344] sm:$0xf0]  ;;  %v40_v15 = vunpack.c.l.s4 %v2120_v14  ;;  %v2513_v21 = vld [vmem:[%s3227_s3 + $0x230] sm:$0xf]  ;;  %v1720_v39 = vor.u32 %v2474_v4, %v2469_v3 }
  0x22   :  { %997 = vmatpush.bf16.msra.mxu2 %v1496_v37  ;;  %v2493_v11 = vld [vmem:[%s3227_s3 + $0x3c0] sm:$0xf]  ;;  %v2498_v12 = vld [vmem:[%s3227_s3 + $0x3c4] sm:$0xf0]  ;;  %v37_v20 = vunpack.c.0.s8 %v36_v8  ;;  %v2518_v22 = vld [vmem:[%s3227_s3 + $0x234] sm:$0xf0]  ;;  %v1784_v40 = vor.u32 %v2484_v6, %v2479_v5 }
  0x23   :  { %1010 = vmatpush.bf16.msra.mxu3 %v1560_v41  ;;  %v33_v13 = vld [vmem:[%s3225_s1] sm:$0xff]  ;;  %v2523_v23 = vld [vmem:[%s3227_s3 + $0x2b0] sm:$0xf]  ;;  %v41_v27 = vunpack.c.0.s8 %v40_v15  ;;  %v2532_v28 = vld [vmem:[%s3227_s3 + $0x2b4] sm:$0xf0]  ;;  %v1848_v45 = vor.u32 %v2498_v12, %v2493_v11 }
  0x24   :  { %1016 = vmatpush.bf16.msrb.mxu0 %v1680_v42  ;;  %v49_v16 = vld [vmem:[%s3226_s2] sm:$0xff]  ;;  %v2537_v29 = vld [vmem:[%s3227_s3 + $0x330] sm:$0xf]  ;;  %v2542_v30 = vld [vmem:[%s3227_s3 + $0x334] sm:$0xf0]  ;;  %v38_v32 = vperm.slane %v33_v13, %v37_v20  ;;  %v1712_v53 = vor.u32 %v2532_v28, %v2523_v23 }
  0x25   :  { %1029 = vmatpush.bf16.msrb.mxu1 %v1744_v47  ;;  %v54_v33 = vperm.slane %v49_v16, %v37_v20  ;;  %v2549_v34 = vld [vmem:[%s3227_s3 + $0x3b0] sm:$0xf]  ;;  %v2554_v35 = vld [vmem:[%s3227_s3 + $0x3b4] sm:$0xf0]  ;;  %v2559_v36 = vld [vmem:[%s3227_s3 + $0x220] sm:$0xf]  ;;  %v42_v41 = vperm.slane %v33_v13, %v41_v27  ;;  %v1776_v61 = vor.u32 %v2542_v30, %v2537_v29 }
  0x26   :  { %1042 = vmatpush.bf16.msrb.mxu2 %v1808_v48  ;;  %v2564_v37 = vld [vmem:[%s3227_s3 + $0x224] sm:$0xf0]  ;;  %v2575_v42 = vld [vmem:[%s3227_s3 + $0x2a0] sm:$0xf]  ;;  %v45_v46 = vmul.f32 %v38_v32, %v29_v18  ;;  %v47_v47 = vmul.f32 %v38_v32, %v31_v19  ;;  %v1648_v48 = vor.u32 %v2518_v22, %v2513_v21  ;;  %v2611_v54 = vld [vmem:[%s3227_s3 + $0x210] sm:$0xf]  ;;  %v1840_v1 = vor.u32 %v2554_v35, %v2549_v34 }
  0x27   :  { %1055 = vmatpush.bf16.msrb.mxu3 %v1872_v52  ;;  %v2580_v43 = vld [vmem:[%s3227_s3 + $0x2a4] sm:$0xf0]  ;;  %v2585_v44 = vld [vmem:[%s3227_s3 + $0x320] sm:$0xf]  ;;  %v58_v52 = vperm.slane %v49_v16, %v41_v27  ;;  %v2616_v55 = vld [vmem:[%s3227_s3 + $0x214] sm:$0xf0]  ;;  %v46_v57 = vmul.f32 %v42_v41, %v30_v25  ;;  %v1640_v2 = vor.u32 %v2564_v37, %v2559_v36 }
  0x28   :  { %1017 = vmatpush.bf16.msrb.mxu0 %v1672_v58  ;;  %v2594_v49 = vld [vmem:[%s3227_s3 + $0x324] sm:$0xf0]  ;;  %v2599_v50 = vld [vmem:[%s3227_s3 + $0x3a0] sm:$0xf]  ;;  %v2621_v56 = vld [vmem:[%s3227_s3 + $0x290] sm:$0xf]  ;;  %v48_v58 = vmul.f32 %v42_v41, %v32_v26  ;;  %v61_v59 = vadd.f32 %v54_v33, %v45_v46  ;;  %v63_v60 = vadd.f32 %v54_v33, %v47_v47  ;;  %v1704_v3 = vor.u32 %v2580_v43, %v2575_v42 }
  0x29   :  { %1030 = vmatpush.bf16.msrb.mxu1 %v1736_v63  ;;  %v2604_v51 = vld [vmem:[%s3227_s3 + $0x3a4] sm:$0xf0]  ;;  %v2628_v62 = vld [vmem:[%s3227_s3 + $0x294] sm:$0xf0]  ;;  %v2633_v63 = vld [vmem:[%s3227_s3 + $0x310] sm:$0xf]  ;;  %v1768_v4 = vor.u32 %v2594_v49, %v2585_v44  ;;  %v1632_v8 = vor.u32 %v2616_v55, %v2611_v54  ;;  %v62_v11 = vadd.f32 %v58_v52, %v46_v57 }
  0x2a   :  { %1043 = vmatpush.bf16.msrb.mxu2 %v1800_v0  ;;  %v2638_v0 = vld [vmem:[%s3227_s3 + $0x314] sm:$0xf0]  ;;  %v65_v5 = vmax.f32 %v61_v59, 0.0  ;;  %v67_v6 = vmax.f32 %v63_v60, 0.0  ;;  %v1832_v7 = vor.u32 %v2604_v51, %v2599_v50  ;;  %v64_v12 = vadd.f32 %v58_v52, %v48_v58  ;;  %v2659_v25 = vld [vmem:[%s3227_s3 + $0x390] sm:$0xf] }
  0x2b   :  { %1056 = vmatpush.bf16.msrb.mxu3 %v1864_v9  ;;  %v1696_v9 = vor.u32 %v2628_v62, %v2621_v56  ;;  %v2664_v26 = vld [vmem:[%s3227_s3 + $0x394] sm:$0xf0]  ;;  %v2674_v32 = vld [vmem:[%s3227_s3 + $0x204] sm:$0xf0]  ;;  %v2679_v33 = vld [vmem:[%s3227_s3 + $0x280] sm:$0xf] }
  0x2c   :  { %1018 = vmatpush.bf16.msrb.mxu0 %v1664_v10  ;;  %v1760_v10 = vor.u32 %v2638_v0, %v2633_v63  ;;  %v79_v13 = vperm.slane %v65_v5, 4  ;;  %v87_v14 = vperm.slane %v67_v6, 4  ;;  %v77_v15 = vperm.slane %v65_v5, 0  ;;  %v2709_v60 = vld [vmem:[%s3227_s3 + $0x380] sm:$0xf] }
  0x2d   :  { %1031 = vmatpush.bf16.msrb.mxu1 %v1728_v17  ;;  %v85_v16 = vperm.slane %v67_v6, 0  ;;  %v80_v17 = vperm.slane %v65_v5, 6  ;;  %v88_v18 = vperm.slane %v67_v6, 6  ;;  %v78_v19 = vperm.slane %v65_v5, 2  ;;  %v1489_v50 = vld [vmem:[%s3227_s3 + $0xf8] sm:$0xf0] }
  0x2e   :  { %1044 = vmatpush.bf16.msrb.mxu2 %v1792_v24  ;;  %v86_v20 = vperm.slane %v67_v6, 2  ;;  %v111_v21 = vpack.c.bf16 %v79_v13, %v79_v13  ;;  %v119_v22 = vpack.c.bf16 %v87_v14, %v87_v14  ;;  %v109_v23 = vpack.c.bf16 %v77_v15, %v77_v15  ;;  %v1955_v13 = vld [vmem:[%s3227_s3 + $0x74] sm:$0xf]  ;;  %v1953_v54 = vld [vmem:[%s3227_s3 + $0x64] sm:$0xf] }
  0x2f   :  { %1057 = vmatpush.bf16.msrb.mxu3 %v1856_v31  ;;  %v117_v24 = vpack.c.bf16 %v85_v16, %v85_v16  ;;  %v112_v27 = vpack.c.bf16 %v80_v17, %v80_v17  ;;  %v120_v28 = vpack.c.bf16 %v88_v18, %v88_v18  ;;  %v110_v29 = vpack.c.bf16 %v78_v19, %v78_v19  ;;  %v2669_v31 = vld [vmem:[%s3227_s3 + $0x200] sm:$0xf]  ;;  %v1987_v51 = vld [vmem:[%s3227_s3 + $0x174] sm:$0xf]  ;;  %v1553_v17 = vld [vmem:[%s3227_s3 + $0x178] sm:$0xf0] }
  0x30   :  { %1019 = vmatpush.bf16.msrb.mxu0 %v1656_v38  ;;  %v118_v30 = vpack.c.bf16 %v86_v20, %v86_v20  ;;  %v277_v34 = vunpack.c.l.b16 %v111_v21  ;;  %v285_v35 = vunpack.c.l.b16 %v119_v22  ;;  %v275_v36 = vunpack.c.l.b16 %v109_v23  ;;  %v2684_v38 = vld [vmem:[%s3227_s3 + $0x284] sm:$0xf0]  ;;  %v2003_v23 = vld [vmem:[%s3227_s3 + $0x1f4] sm:$0xf]  ;;  %v1969_v63 = vld [vmem:[%s3227_s3 + $0xe4] sm:$0xf] }
  0x31   :  { %1032 = vmatpush.bf16.msrb.mxu1 %v1720_v39  ;;  %v283_v37 = vunpack.c.l.b16 %v117_v24  ;;  %v2689_v39 = vld [vmem:[%s3227_s3 + $0x300] sm:$0xf]  ;;  %v278_v41 = vunpack.c.l.b16 %v112_v27  ;;  %v286_v42 = vunpack.c.l.b16 %v120_v28  ;;  %v276_v43 = vunpack.c.l.b16 %v110_v29  ;;  %v1617_v24 = vld [vmem:[%s3227_s3 + $0x1f8] sm:$0xf0]  ;;  %v1481_v0 = vld [vmem:[%s3227_s3 + $0xe8] sm:$0xf0] }
  0x32   :  { %1045 = vmatpush.bf16.msrb.mxu2 %v1784_v40  ;;  %v2694_v40 = vld [vmem:[%s3227_s3 + $0x304] sm:$0xf0]  ;;  %v284_v44 = vunpack.c.l.b16 %v118_v30  ;;  %v1824_v47 = vor.u32 %v2664_v26, %v2659_v25  ;;  %v1556_v55 = vor.u32 %v1987_v51, %v1553_v17  ;;  %v1620_v56 = vor.u32 %v2003_v23, %v1617_v24  ;;  %v1537_v51 = vld [vmem:[%s3227_s3 + $0x158] sm:$0xf0] }
  0x33   :  { %1058 = vmatpush.bf16.msrb.mxu3 %v1848_v45  ;;  %v296_v45 = vrot.slane %v285_v35, 7  ;;  %v291_v46 = vrot.slane %v283_v37, 7  ;;  %v298_v49 = vrot.slane %v286_v42, 7  ;;  %v1752_v57 = vor.u32 %v2694_v40, %v2689_v39  ;;  %v1951_v40 = vld [vmem:[%s3227_s3 + $0x54] sm:$0xf] }
  0x34   :  { %1020 = vmatpush.bf16.msrb.mxu0 %v1648_v48  ;;  %v1624_v48 = vor.u32 %v2674_v32, %v2669_v31  ;;  %v294_v52 = vrot.slane %v284_v44, 7  ;;  %v1985_v44 = vld [vmem:[%s3227_s3 + $0x164] sm:$0xf] }
  0x35   :  { %1033 = vmatpush.bf16.msrb.mxu1 %v1712_v53  ;;  %v1688_v53 = vor.u32 %v2684_v38, %v2679_v33  ;;  %v297_v58 = vsel %vm292_vm0, %v296_v45, %v277_v34  ;;  %v293_v59 = vsel %vm292_vm0, %v291_v46, %v275_v36  ;;  %v1545_v45 = vld [vmem:[%s3227_s3 + $0x168] sm:$0xf0]  ;;  %v1484_v33 = vor.u32 %v1969_v63, %v1481_v0  ;;  %v1585_v63 = vld [vmem:[%s3227_s3 + $0x1b8] sm:$0xf0] }
  0x36   :  { %1046 = vmatpush.bf16.msrb.mxu2 %v1776_v61  ;;  %v2714_v61 = vld [vmem:[%s3227_s3 + $0x384] sm:$0xf0]  ;;  %v2718_v5 = vpack.c.b16 %v297_v58, %v297_v58  ;;  %v2720_v6 = vpack.c.b16 %v293_v59, %v293_v59  ;;  %v1609_v58 = vld [vmem:[%s3227_s3 + $0x1e8] sm:$0xf0]  ;;  %v1548_v38 = vor.u32 %v1985_v44, %v1545_v45 }
  0x37   :  { %1059 = vmatpush.bf16.msrb.mxu3 %v1840_v1  ;;  %v66_v1 = vmax.f32 %v62_v11, 0.0  ;;  %v1425_v11 = vld [vmem:[%s3227_s3 + $0x78] sm:$0xf0]  ;;  %v1816_v22 = vor.u32 %v2714_v61, %v2709_v60 }
  0x38   :  { %1021 = vmatpush.bf16.msrb.mxu0 %v1640_v2  ;;  %v2716_v2 = vmax.f32 %v64_v12, 0.0  ;;  %v1971_v12 = vld [vmem:[%s3227_s3 + $0xf4] sm:$0xf]  ;;  %998 = vmatmul.bf16.vlgmr.msra.gmra.mxu2 %v2718_v5  ;;  %v1428_v35 = vor.u32 %v1955_v13, %v1425_v11 }
  0x39   :  { %1034 = vmatpush.bf16.msrb.mxu1 %v1704_v3  ;;  %v299_v3 = vsel %vm292_vm0, %v298_v49, %v278_v41  ;;  %972 = vmatmul.bf16.vlgmr.msra.gmra.mxu0 %v2720_v6  ;;  %v81_v18 = vperm.slane %v66_v1, 0  ;;  %v84_v20 = vperm.slane %v66_v1, 6  ;;  %v82_v27 = vperm.slane %v66_v1, 2  ;;  %v1983_v13 = vld [vmem:[%s3227_s3 + $0x154] sm:$0xf] }
  0x3a   :  { %1047 = vmatpush.bf16.msrb.mxu2 %v1768_v4  ;;  %v295_v4 = vsel %vm292_vm0, %v294_v52, %v276_v43  ;;  %v2736_v14 = vpack.c.b16 %v299_v3, %v299_v3  ;;  %v91_v16 = vperm.slane %v2716_v2, 4  ;;  %v89_v19 = vperm.slane %v2716_v2, 0  ;;  %v2001_v52 = vld [vmem:[%s3227_s3 + $0x1e4] sm:$0xf]  ;;  %v1967_v3 = vld [vmem:[%s3227_s3 + $0xd4] sm:$0xf] }
  0x3b   :  { %1060 = vmatpush.bf16.msrb.mxu3 %v1832_v7  ;;  %v2738_v15 = vpack.c.b16 %v295_v4, %v295_v4  ;;  %v83_v7 = vperm.slane %v66_v1, 4  ;;  %v92_v21 = vperm.slane %v2716_v2, 6  ;;  %v113_v28 = vpack.c.bf16 %v81_v18, %v81_v18  ;;  %v1473_v4 = vld [vmem:[%s3227_s3 + $0xd8] sm:$0xf0] }
  0x3c   :  { %1011 = vmatmul.bf16.vlgmr.msra.gmra.mxu3 %v2736_v14  ;;  %v123_v26 = vpack.c.bf16 %v91_v16, %v91_v16  ;;  %1022 = vmatpush.bf16.msrb.mxu0 %v1632_v8  ;;  %v121_v29 = vpack.c.bf16 %v89_v19, %v89_v19  ;;  %v116_v30 = vpack.c.bf16 %v84_v20, %v84_v20  ;;  %v90_v34 = vperm.slane %v2716_v2, 2  ;;  %v1601_v16 = vld [vmem:[%s3227_s3 + $0x1d8] sm:$0xf0] }
  0x3d   :  { %985 = vmatmul.bf16.vlgmr.msra.gmra.mxu1 %v2738_v15  ;;  %v115_v25 = vpack.c.bf16 %v83_v7, %v83_v7  ;;  %v1492_v36 = vor.u32 %v1971_v12, %v1489_v50  ;;  %v124_v41 = vpack.c.bf16 %v92_v21, %v92_v21  ;;  %v279_v42 = vunpack.c.l.b16 %v113_v28  ;;  %v1999_v7 = vld [vmem:[%s3227_s3 + $0x1d4] sm:$0xf]  ;;  %v1949_v21 = vld [vmem:[%s3227_s3 + $0x44] sm:$0xf]  ;;  %v1529_v28 = vld [vmem:[%s3227_s3 + $0x148] sm:$0xf0] }
  0x3e   :  { %1035 = vmatpush.bf16.msrb.mxu1 %v1696_v9  ;;  %1048 = vmatpush.bf16.msrb.mxu2 %v1760_v10  ;;  %v289_v37 = vunpack.c.l.b16 %v123_v26  ;;  %v287_v8 = vunpack.c.l.b16 %v121_v29  ;;  %v1417_v9 = vld [vmem:[%s3227_s3 + $0x68] sm:$0xf0]  ;;  %v114_v46 = vpack.c.bf16 %v82_v27, %v82_v27  ;;  %v282_v49 = vunpack.c.l.b16 %v116_v30  ;;  %v1981_v27 = vld [vmem:[%s3227_s3 + $0x144] sm:$0xf] }
  0x3f   :  { %1061 = vmatpush.bf16.msrb.mxu3 %v1824_v47  ;;  %v281_v62 = vunpack.c.l.b16 %v115_v25  ;;  %v290_v43 = vunpack.c.l.b16 %v124_v41  ;;  %v122_v59 = vpack.c.bf16 %v90_v34, %v90_v34  ;;  %v1420_v32 = vor.u32 %v1953_v54, %v1417_v9  ;;  %v1965_v25 = vld [vmem:[%s3227_s3 + $0xc4] sm:$0xf]  ;;  %v1465_v26 = vld [vmem:[%s3227_s3 + $0xc8] sm:$0xf0]  ;;  %v1995_v9 = vld [vmem:[%s3227_s3 + $0x1b4] sm:$0xf] }
  0x40   :  { %v304_v10 = vrot.slane %v289_v37, 7  ;;  %1023 = vmatpush.bf16.msrb.mxu0 %v1624_v48  ;;  %v300_v47 = vrot.slane %v287_v8, 7  ;;  %v280_v48 = vunpack.c.l.b16 %v114_v46  ;;  %v1612_v1 = vor.u32 %v2001_v52, %v1609_v58  ;;  %v1997_v29 = vld [vmem:[%s3227_s3 + $0x1c4] sm:$0xf]  ;;  %v1593_v30 = vld [vmem:[%s3227_s3 + $0x1c8] sm:$0xf0] }
  0x41   :  { %v306_v31 = vrot.slane %v290_v43, 7  ;;  %v1476_v20 = vor.u32 %v1967_v3, %v1473_v4  ;;  %v1540_v23 = vor.u32 %v1983_v13, %v1537_v51  ;;  %v1604_v24 = vor.u32 %v1999_v7, %v1601_v16  ;;  %v1393_v37 = vld [vmem:[%s3227_s3 + $0x38] sm:$0xf0]  ;;  %v1385_v43 = vld [vmem:[%s3227_s3 + $0x28] sm:$0xf0] }
  0x42   :  { %1036 = vmatpush.bf16.msrb.mxu1 %v1688_v53  ;;  %1049 = vmatpush.bf16.msrb.mxu2 %v1752_v57  ;;  %v288_v53 = vunpack.c.l.b16 %v122_v59  ;;  %v305_v60 = vsel %vm292_vm0, %v304_v10, %v281_v62  ;;  %v301_v61 = vsel %vm292_vm0, %v300_v47, %v279_v42  ;;  %v1409_v57 = vld [vmem:[%s3227_s3 + $0x58] sm:$0xf0]  ;;  %v1532_v41 = vor.u32 %v1981_v27, %v1529_v28  ;;  %v1979_v62 = vld [vmem:[%s3227_s3 + $0x134] sm:$0xf]  ;;  %v1945_v42 = vld [vmem:[%s3227_s3 + $0x24] sm:$0xf] }
  0x43   :  { %1062 = vmatpush.bf16.msrb.mxu3 %v1816_v22  ;;  %v307_v2 = vsel %vm292_vm0, %v306_v31, %v282_v49  ;;  %v2825_v11 = vpack.c.b16 %v305_v60, %v305_v60  ;;  %v2827_v12 = vpack.c.b16 %v301_v61, %v301_v61  ;;  %v1412_v19 = vor.u32 %v1951_v40, %v1409_v57  ;;  %v1401_v22 = vld [vmem:[%s3227_s3 + $0x48] sm:$0xf0]  ;;  %v1521_v8 = vld [vmem:[%s3227_s3 + $0x138] sm:$0xf0]  ;;  %v1961_v46 = vld [vmem:[%s3227_s3 + $0xa4] sm:$0xf] }
  0x44   :  { %1068 = vmatpush.bf16.msra.mxu0 %v1428_v35  ;;  %v302_v39 = vrot.slane %v288_v53, 7  ;;  %v2839_v17 = vpack.c.b16 %v307_v2, %v307_v2  ;;  %v1404_v34 = vor.u32 %v1949_v21, %v1401_v22  ;;  %v1468_v35 = vor.u32 %v1965_v25, %v1465_v26  ;;  %v1449_v47 = vld [vmem:[%s3227_s3 + $0xa8] sm:$0xf0]  ;;  %v1977_v49 = vld [vmem:[%s3227_s3 + $0x124] sm:$0xf] }
  0x45   :  { %v1596_v54 = vor.u32 %v1997_v29, %v1593_v30  ;;  %v1524_v44 = vor.u32 %v1979_v62, %v1521_v8  ;;  %v1588_v45 = vor.u32 %v1995_v9, %v1585_v63  ;;  %v1513_v52 = vld [vmem:[%s3227_s3 + $0x128] sm:$0xf0]  ;;  %v1993_v58 = vld [vmem:[%s3227_s3 + $0x1a4] sm:$0xf]  ;;  %v1388_v31 = vor.u32 %v1945_v42, %v1385_v43  ;;  %v1959_v60 = vld [vmem:[%s3227_s3 + $0x94] sm:$0xf] }
  0x46   :  { %1081 = vmatpush.bf16.msra.mxu1 %v1492_v36  ;;  %1094 = vmatpush.bf16.msra.mxu2 %v1556_v55  ;;  %v303_v50 = vsel %vm292_vm0, %v302_v39, %v280_v48  ;;  %v1947_v36 = vld [vmem:[%s3227_s3 + $0x34] sm:$0xf]  ;;  %v1577_v59 = vld [vmem:[%s3227_s3 + $0x1a8] sm:$0xf0]  ;;  %v1516_v48 = vor.u32 %v1977_v49, %v1513_v52  ;;  %v1441_v61 = vld [vmem:[%s3227_s3 + $0x98] sm:$0xf0] }
  0x47   :  { %1107 = vmatpush.bf16.msra.mxu3 %v1620_v56  ;;  %v2841_v18 = vpack.c.b16 %v303_v50, %v303_v50  ;;  %v1963_v55 = vld [vmem:[%s3227_s3 + $0xb4] sm:$0xf]  ;;  %v1457_v56 = vld [vmem:[%s3227_s3 + $0xb8] sm:$0xf0]  ;;  %v1396_v0 = vor.u32 %v1947_v36, %v1393_v37  ;;  %v1580_v53 = vor.u32 %v1993_v58, %v1577_v59  ;;  %v1941_v57 = vld [vmem:[%s3227_s3 + $0x4] sm:$0xf]  ;;  %v1444_v50 = vor.u32 %v1959_v60, %v1441_v61 }
  0x48   :  { %1069 = vmatpush.bf16.msra.mxu0 %v1420_v32  ;;  %1050 = vmatmul.bf16.vlgmr.msrb.gmra.mxu2 %v2825_v11  ;;  %v1460_v10 = vor.u32 %v1963_v55, %v1457_v56  ;;  %v1452_v32 = vor.u32 %v1961_v46, %v1449_v47  ;;  %v1505_v2 = vld [vmem:[%s3227_s3 + $0x118] sm:$0xf0]  ;;  %v1991_v39 = vld [vmem:[%s3227_s3 + $0x194] sm:$0xf]  ;;  %v1369_v3 = vld [vmem:[%s3227_s3 + $0x8] sm:$0xf0] }
  0x49   :  { %1024 = vmatmul.bf16.vlgmr.msrb.gmra.mxu0 %v2827_v12  ;;  %v1569_v40 = vld [vmem:[%s3227_s3 + $0x198] sm:$0xf0]  ;;  %v1957_v4 = vld [vmem:[%s3227_s3 + $0x84] sm:$0xf]  ;;  %v1433_v51 = vld [vmem:[%s3227_s3 + $0x88] sm:$0xf0] }
  0x4a   :  { %1082 = vmatpush.bf16.msra.mxu1 %v1484_v33  ;;  %1095 = vmatpush.bf16.msra.mxu2 %v1548_v38  ;;  %v1943_v33 = vld [vmem:[%s3227_s3 + $0x14] sm:$0xf]  ;;  %v1377_v38 = vld [vmem:[%s3227_s3 + $0x18] sm:$0xf0]  ;;  %v1973_v7 = vld [vmem:[%s3227_s3 + $0x104] sm:$0xf] }
  0x4b   :  { %1108 = vmatpush.bf16.msra.mxu3 %v1612_v1  ;;  %v1975_v1 = vld [vmem:[%s3227_s3 + $0x114] sm:$0xf]  ;;  %v1380_v13 = vor.u32 %v1943_v33, %v1377_v38  ;;  %v1497_v16 = vld [vmem:[%s3227_s3 + $0x108] sm:$0xf0]  ;;  %v1989_v21 = vld [vmem:[%s3227_s3 + $0x184] sm:$0xf] }
  0x4c   :  { %1063 = vmatmul.bf16.vlgmr.msrb.gmra.mxu3 %v2839_v17  ;;  %1070 = vmatpush.bf16.msra.mxu0 %v1412_v19  ;;  %v1508_v19 = vor.u32 %v1975_v1, %v1505_v2 }
  0x4d   :  { %1037 = vmatmul.bf16.vlgmr.msrb.gmra.mxu1 %v2841_v18 }
  0x4e   :  { %1083 = vmatpush.bf16.msra.mxu1 %v1476_v20  ;;  %1096 = vmatpush.bf16.msra.mxu2 %v1540_v23  ;;  %v1572_v20 = vor.u32 %v1991_v39, %v1569_v40 }
  0x4f   :  { %1109 = vmatpush.bf16.msra.mxu3 %v1604_v24 }
  0x50   :  { %1071 = vmatpush.bf16.msra.mxu0 %v1404_v34 }
  0x52   :  { %1084 = vmatpush.bf16.msra.mxu1 %v1468_v35  ;;  %1097 = vmatpush.bf16.msra.mxu2 %v1532_v41 }
  0x53   :  { %1110 = vmatpush.bf16.msra.mxu3 %v1596_v54 }
  0x54   :  { %1072 = vmatpush.bf16.msra.mxu0 %v1396_v0 }
  0x56   :  { %1085 = vmatpush.bf16.msra.mxu1 %v1460_v10  ;;  %1098 = vmatpush.bf16.msra.mxu2 %v1524_v44 }
  0x57   :  { %1111 = vmatpush.bf16.msra.mxu3 %v1588_v45 }
  0x58   :  { %1073 = vmatpush.bf16.msra.mxu0 %v1388_v31 }
  0x5a   :  { %1086 = vmatpush.bf16.msra.mxu1 %v1452_v32  ;;  %1099 = vmatpush.bf16.msra.mxu2 %v1516_v48 }
  0x5b   :  { %1112 = vmatpush.bf16.msra.mxu3 %v1580_v53 }
  0x5c   :  { %12 = vsyncpa [#allocation3], 0  ;;  %v1561_v22 = vld [vmem:[%s3227_s3 + $0x188] sm:$0xf0]  ;;  %v2019_v23 = vld [vmem:[%s3227_s3 + $0x274] sm:$0xf]  ;;  %1074 = vmatpush.bf16.msra.mxu0 %v1380_v13  ;;  %v1372_v28 = vor.u32 %v1941_v57, %v1369_v3  ;;  %v1436_v29 = vor.u32 %v1957_v4, %v1433_v51  ;;  %v1500_v36 = vor.u32 %v1973_v7, %v1497_v16 }
  0x5d   :  { %v1681_v24 = vld [vmem:[%s3227_s3 + $0x278] sm:$0xf0]  ;;  %v2035_v25 = vld [vmem:[%s3227_s3 + $0x2f4] sm:$0xf]  ;;  %v1564_v37 = vor.u32 %v1989_v21, %v1561_v22  ;;  %v2017_v55 = vld [vmem:[%s3227_s3 + $0x264] sm:$0xf] }
  0x5e   :  { %v1745_v26 = vld [vmem:[%s3227_s3 + $0x2f8] sm:$0xf0]  ;;  %v2051_v27 = vld [vmem:[%s3227_s3 + $0x374] sm:$0xf]  ;;  %1087 = vmatpush.bf16.msra.mxu1 %v1444_v50  ;;  %1100 = vmatpush.bf16.msra.mxu2 %v1508_v19  ;;  %v1684_v41 = vor.u32 %v2019_v23, %v1681_v24  ;;  %v1673_v56 = vld [vmem:[%s3227_s3 + $0x268] sm:$0xf0] }
  0x5f   :  { %v1809_v30 = vld [vmem:[%s3227_s3 + $0x378] sm:$0xf0]  ;;  %v2067_v34 = vld [vmem:[%s3227_s3 + $0x3f4] sm:$0xf]  ;;  %1113 = vmatpush.bf16.msra.mxu3 %v1572_v20  ;;  %v1748_v54 = vor.u32 %v2035_v25, %v1745_v26  ;;  %v2033_v9 = vld [vmem:[%s3227_s3 + $0x2e4] sm:$0xf]  ;;  %v1676_v44 = vor.u32 %v2017_v55, %v1673_v56 }
  0x60   :  { %v1873_v35 = vld [vmem:[%s3227_s3 + $0x3f8] sm:$0xf0]  ;;  %v1812_v62 = vor.u32 %v2051_v27, %v1809_v30  ;;  %v1737_v63 = vld [vmem:[%s3227_s3 + $0x2e8] sm:$0xf0]  ;;  %v2049_v0 = vld [vmem:[%s3227_s3 + $0x364] sm:$0xf]  ;;  %1075 = vmatpush.bf16.msra.mxu0 %v1372_v28 }
  0x61   :  { %v1876_v8 = vor.u32 %v2067_v34, %v1873_v35  ;;  %v1801_v10 = vld [vmem:[%s3227_s3 + $0x368] sm:$0xf0]  ;;  %v2065_v42 = vld [vmem:[%s3227_s3 + $0x3e4] sm:$0xf]  ;;  %v1740_v45 = vor.u32 %v2033_v9, %v1737_v63  ;;  %v2015_v46 = vld [vmem:[%s3227_s3 + $0x254] sm:$0xf] }
  0x62   :  { %1088 = vmatpush.bf16.msra.mxu1 %v1436_v29  ;;  %v1865_v43 = vld [vmem:[%s3227_s3 + $0x3e8] sm:$0xf0]  ;;  %1101 = vmatpush.bf16.msra.mxu2 %v1500_v36  ;;  %v1665_v47 = vld [vmem:[%s3227_s3 + $0x258] sm:$0xf0]  ;;  %v1804_v49 = vor.u32 %v2049_v0, %v1801_v10  ;;  %v2031_v58 = vld [vmem:[%s3227_s3 + $0x2d4] sm:$0xf] }
  0x63   :  { %1114 = vmatpush.bf16.msra.mxu3 %v1564_v37  ;;  %v1868_v52 = vor.u32 %v2065_v42, %v1865_v43  ;;  %v1729_v59 = vld [vmem:[%s3227_s3 + $0x2d8] sm:$0xf0]  ;;  %v2047_v31 = vld [vmem:[%s3227_s3 + $0x354] sm:$0xf]  ;;  %1076 = vmatmul.bf16.vlgmr.msra.gmra.mxu0 %v2720_v6  ;;  %v2013_v53 = vld [vmem:[%s3227_s3 + $0x244] sm:$0xf] }
  0x64   :  { %1120 = vmatpush.bf16.msrb.mxu0 %v1684_v41  ;;  %v1793_v32 = vld [vmem:[%s3227_s3 + $0x358] sm:$0xf0]  ;;  %v2063_v33 = vld [vmem:[%s3227_s3 + $0x3d4] sm:$0xf]  ;;  %v1732_v48 = vor.u32 %v2031_v58, %v1729_v59  ;;  %v1657_v60 = vld [vmem:[%s3227_s3 + $0x248] sm:$0xf0] }
  0x65   :  { %1102 = vmatmul.bf16.vlgmr.msra.gmra.mxu2 %v2718_v5  ;;  %v1857_v38 = vld [vmem:[%s3227_s3 + $0x3d8] sm:$0xf0]  ;;  %1089 = vmatmul.bf16.vlgmr.msra.gmra.mxu1 %v2738_v15  ;;  %v1668_v5 = vor.u32 %v2015_v46, %v1665_v47  ;;  %v1796_v61 = vor.u32 %v2047_v31, %v1793_v32  ;;  %v1721_v15 = vld [vmem:[%s3227_s3 + $0x2c8] sm:$0xf0]  ;;  %v2045_v1 = vld [vmem:[%s3227_s3 + $0x344] sm:$0xf]  ;;  %v1660_v57 = vor.u32 %v2013_v53, %v1657_v60 }
  0x66   :  { %1133 = vmatpush.bf16.msrb.mxu1 %v1748_v54  ;;  %1146 = vmatpush.bf16.msrb.mxu2 %v1812_v62  ;;  %v1860_v6 = vor.u32 %v2063_v33, %v1857_v38  ;;  %v1785_v2 = vld [vmem:[%s3227_s3 + $0x348] sm:$0xf0]  ;;  %v2061_v39 = vld [vmem:[%s3227_s3 + $0x3c4] sm:$0xf]  ;;  %v2011_v4 = vld [vmem:[%s3227_s3 + $0x234] sm:$0xf] }
  0x67   :  { %1159 = vmatpush.bf16.msrb.mxu3 %v1876_v8  ;;  %v1849_v40 = vld [vmem:[%s3227_s3 + $0x3c8] sm:$0xf0]  ;;  %v1649_v13 = vld [vmem:[%s3227_s3 + $0x238] sm:$0xf0]  ;;  %v1788_v50 = vor.u32 %v2045_v1, %v1785_v2  ;;  %v2027_v7 = vld [vmem:[%s3227_s3 + $0x2b4] sm:$0xf] }
  0x68   :  { %1115 = vmatmul.bf16.vlgmr.msra.gmra.mxu3 %v2736_v14  ;;  %1121 = vmatpush.bf16.msrb.mxu0 %v1676_v44  ;;  %v2029_v14 = vld [vmem:[%s3227_s3 + $0x2c4] sm:$0xf]  ;;  %v1852_v51 = vor.u32 %v2061_v39, %v1849_v40  ;;  %v1713_v16 = vld [vmem:[%s3227_s3 + $0x2b8] sm:$0xf0]  ;;  %v2043_v19 = vld [vmem:[%s3227_s3 + $0x334] sm:$0xf]  ;;  %v1652_v23 = vor.u32 %v2011_v4, %v1649_v13 }
  0x69   :  { %v1724_v3 = vor.u32 %v2029_v14, %v1721_v15  ;;  %v1777_v20 = vld [vmem:[%s3227_s3 + $0x338] sm:$0xf0]  ;;  %v2059_v21 = vld [vmem:[%s3227_s3 + $0x3b4] sm:$0xf]  ;;  %v1716_v24 = vor.u32 %v2027_v7, %v1713_v16  ;;  %v2009_v25 = vld [vmem:[%s3227_s3 + $0x224] sm:$0xf] }
  0x6a   :  { %1134 = vmatpush.bf16.msrb.mxu1 %v1740_v45  ;;  %1147 = vmatpush.bf16.msrb.mxu2 %v1804_v49  ;;  %v1841_v22 = vld [vmem:[%s3227_s3 + $0x3b8] sm:$0xf0]  ;;  %v1641_v26 = vld [vmem:[%s3227_s3 + $0x228] sm:$0xf0]  ;;  %v1780_v27 = vor.u32 %v2043_v19, %v1777_v20  ;;  %v2025_v29 = vld [vmem:[%s3227_s3 + $0x2a4] sm:$0xf] }
  0x6b   :  { %1160 = vmatpush.bf16.msrb.mxu3 %v1868_v52  ;;  %v1844_v28 = vor.u32 %v2059_v21, %v1841_v22  ;;  %v1705_v30 = vld [vmem:[%s3227_s3 + $0x2a8] sm:$0xf0]  ;;  %v2041_v34 = vld [vmem:[%s3227_s3 + $0x324] sm:$0xf]  ;;  %v1644_v41 = vor.u32 %v2009_v25, %v1641_v26  ;;  %v2007_v55 = vld [vmem:[%s3227_s3 + $0x214] sm:$0xf] }
  0x6c   :  { %1122 = vmatpush.bf16.msrb.mxu0 %v1668_v5  ;;  %v1769_v35 = vld [vmem:[%s3227_s3 + $0x328] sm:$0xf0]  ;;  %v2057_v36 = vld [vmem:[%s3227_s3 + $0x3a4] sm:$0xf]  ;;  %v1708_v54 = vor.u32 %v2025_v29, %v1705_v30  ;;  %v1633_v56 = vld [vmem:[%s3227_s3 + $0x218] sm:$0xf0] }
  0x6d   :  { %v1833_v37 = vld [vmem:[%s3227_s3 + $0x3a8] sm:$0xf0]  ;;  %v1772_v62 = vor.u32 %v2041_v34, %v1769_v35  ;;  %v2023_v9 = vld [vmem:[%s3227_s3 + $0x294] sm:$0xf]  ;;  %v1697_v63 = vld [vmem:[%s3227_s3 + $0x298] sm:$0xf0]  ;;  %v1636_v44 = vor.u32 %v2007_v55, %v1633_v56 }
  0x6e   :  { %1135 = vmatpush.bf16.msrb.mxu1 %v1732_v48  ;;  %1148 = vmatpush.bf16.msrb.mxu2 %v1796_v61  ;;  %v1836_v8 = vor.u32 %v2057_v36, %v1833_v37  ;;  %v2039_v0 = vld [vmem:[%s3227_s3 + $0x314] sm:$0xf]  ;;  %v1761_v10 = vld [vmem:[%s3227_s3 + $0x318] sm:$0xf0]  ;;  %v1700_v45 = vor.u32 %v2023_v9, %v1697_v63  ;;  %v2005_v46 = vld [vmem:[%s3227_s3 + $0x204] sm:$0xf] }
  0x6f   :  { %1161 = vmatpush.bf16.msrb.mxu3 %v1860_v6  ;;  %v2055_v42 = vld [vmem:[%s3227_s3 + $0x394] sm:$0xf]  ;;  %v1825_v43 = vld [vmem:[%s3227_s3 + $0x398] sm:$0xf0]  ;;  %v1625_v47 = vld [vmem:[%s3227_s3 + $0x208] sm:$0xf0]  ;;  %v1764_v49 = vor.u32 %v2039_v0, %v1761_v10 }
  0x70   :  { %1123 = vmatpush.bf16.msrb.mxu0 %v1660_v57  ;;  %v1828_v52 = vor.u32 %v2055_v42, %v1825_v43  ;;  %v2021_v58 = vld [vmem:[%s3227_s3 + $0x284] sm:$0xf]  ;;  %v1689_v59 = vld [vmem:[%s3227_s3 + $0x288] sm:$0xf0]  ;;  %v1628_v5 = vor.u32 %v2005_v46, %v1625_v47  ;;  %v2076_v61 = vld [vmem:[%s3229_s5 + $0x38] sm:$0xff]  ;;  %vm1334_vm1 = vcmask 1041408  }
  0x71   :  { %v2037_v31 = vld [vmem:[%s3227_s3 + $0x304] sm:$0xf]  ;;  %v1753_v32 = vld [vmem:[%s3227_s3 + $0x308] sm:$0xf0]  ;;  %v1692_v48 = vor.u32 %v2021_v58, %v1689_v59  ;;  %v2075_v6 = vld [vmem:[%s3229_s5 + $0x30] sm:$0xff]  ;;  %s2121_s27 = smov [#allocation2]  }
  0x72   :  { %1136 = vmatpush.bf16.msrb.mxu1 %v1724_v3  ;;  %1149 = vmatpush.bf16.msrb.mxu2 %v1788_v50  ;;  %v2053_v33 = vld [vmem:[%s3227_s3 + $0x384] sm:$0xf]  ;;  %v1817_v38 = vld [vmem:[%s3227_s3 + $0x388] sm:$0xf0]  ;;  %v1756_v53 = vor.u32 %v2037_v31, %v1753_v32  ;;  %v253_v15 = vld [vmem:[%s3228_s4] sm:$0x3] }
  0x73   :  { %1162 = vmatpush.bf16.msrb.mxu3 %v1852_v51  ;;  %v1820_v60 = vor.u32 %v2053_v33, %v1817_v38  ;;  %v2074_v14 = vld [vmem:[%s3229_s5 + $0x28] sm:$0xff]  ;;  %v2069_v1 = vld [vmem:[%s3229_s5] sm:$0xff]  ;;  %v255_v2 = vperm.slane %v253_v15, 0  ;;  %v2084_v25 = vld [vmem:[%s3229_s5 + $0x78] sm:$0xff]  ;;  %v256_v46 = vperm.slane %v253_v15, 1  ;;  %s1356_s30 = sshll.u32 %s3231_s7, 4  ;;  %s1357_s30 = int_to_ptr.hbm [resolvable:$true] %s1356_s30 }
  0x74   :  { %1124 = vmatpush.bf16.msrb.mxu0 %v1652_v23  ;;  %v2083_v26 = vld [vmem:[%s3229_s5 + $0x70] sm:$0xff]  ;;  %v2082_v36 = vld [vmem:[%s3229_s5 + $0x68] sm:$0xff] }
  0x75   :  { %v2079_v9 = vld [vmem:[%s3229_s5 + $0x50] sm:$0xff]  ;;  %v2078_v10 = vld [vmem:[%s3229_s5 + $0x48] sm:$0xff] }
  0x76   :  { %1137 = vmatpush.bf16.msrb.mxu1 %v1716_v24  ;;  %1150 = vmatpush.bf16.msrb.mxu2 %v1780_v27 }
  0x77   :  { %1163 = vmatpush.bf16.msrb.mxu3 %v1844_v28 }
  0x78   :  { %1125 = vmatpush.bf16.msrb.mxu0 %v1644_v41 }
  0x7a   :  { %1138 = vmatpush.bf16.msrb.mxu1 %v1708_v54  ;;  %1151 = vmatpush.bf16.msrb.mxu2 %v1772_v62  ;;  %v2081_v54 = vld [vmem:[%s3229_s5 + $0x60] sm:$0xff]  ;;  %v2080_v62 = vld [vmem:[%s3229_s5 + $0x58] sm:$0xff] }
  0x7b   :  { %1164 = vmatpush.bf16.msrb.mxu3 %v1836_v8 }
  0x7c   :  { %1126 = vmatpush.bf16.msrb.mxu0 %v1636_v44 }
  0x7e   :  { %1139 = vmatpush.bf16.msrb.mxu1 %v1700_v45  ;;  %1152 = vmatpush.bf16.msrb.mxu2 %v1764_v49  ;;  %v2077_v45 = vld [vmem:[%s3229_s5 + $0x40] sm:$0xff] }
  0x7f   :  { %1165 = vmatpush.bf16.msrb.mxu3 %v1828_v52 }
  0x80   :  { %1127 = vmatpush.bf16.msrb.mxu0 %v1628_v5 }
  0x82   :  { %1140 = vmatpush.bf16.msrb.mxu1 %v1692_v48  ;;  %1153 = vmatpush.bf16.msrb.mxu2 %v1756_v53 }
  0x83   :  { %1166 = vmatpush.bf16.msrb.mxu3 %v1820_v60  ;;  %1128 = vmatmul.bf16.vlgmr.msrb.gmra.mxu0 %v2827_v12  ;;  %v2073_v12 = vld [vmem:[%s3229_s5 + $0x20] sm:$0xff] }
  0x84   :  { %1308 = vmatpush.bf16.msra.mxu0 %v2076_v61 }
  0x85   :  { %1141 = vmatmul.bf16.vlgmr.msrb.gmra.mxu1 %v2841_v18  ;;  %1154 = vmatmul.bf16.vlgmr.msrb.gmra.mxu2 %v2825_v11  ;;  %v2072_v11 = vld [vmem:[%s3229_s5 + $0x18] sm:$0xff]  ;;  %v2070_v18 = vld [vmem:[%s3229_s5 + $0x8] sm:$0xff] }
  0x86   :  { %1167 = vmatmul.bf16.vlgmr.msrb.gmra.mxu3 %v2839_v17  ;;  %v2071_v17 = vld [vmem:[%s3229_s5 + $0x10] sm:$0xff]  ;;  %1321 = vmatpush.bf16.msra.mxu1 %v2084_v25 }
  0x88   :  { %1309 = vmatpush.bf16.msra.mxu0 %v2075_v6 }
  0x8a   :  { %1322 = vmatpush.bf16.msra.mxu1 %v2083_v26 }
  0x8c   :  { %1310 = vmatpush.bf16.msra.mxu0 %v2074_v14 }
  0x8e   :  { %1323 = vmatpush.bf16.msra.mxu1 %v2082_v36 }
  0x90   :  { %1311 = vmatpush.bf16.msra.mxu0 %v2073_v12 }
  0x92   :  { %1324 = vmatpush.bf16.msra.mxu1 %v2081_v54 }
  0x94   :  { %1312 = vmatpush.bf16.msra.mxu0 %v2072_v11 }
  0x96   :  { %1325 = vmatpush.bf16.msra.mxu1 %v2080_v62 }
  0x98   :  { %1313 = vmatpush.bf16.msra.mxu0 %v2071_v17 }
  0x9a   :  { %1326 = vmatpush.bf16.msra.mxu1 %v2079_v9 }
  0x9c   :  { %1314 = vmatpush.bf16.msra.mxu0 %v2070_v18 }
  0x9e   :  { %1327 = vmatpush.bf16.msra.mxu1 %v2078_v10 }
  0xa0   :  { %1315 = vmatpush.bf16.msra.mxu0 %v2069_v1 }
  0xa2   :  { %1328 = vmatpush.bf16.msra.mxu1 %v2077_v45 }
  0xb6   :  { %v973_v39 = vpop.f32.mrf.mxu0 }
  0xb7   :  { %v974_v40 = vadd.f32 %v973_v39, %v255_v2  ;;  %v2088_v2 = vld [vmem:[%s3230_s6] ss:$0 sm:$0xff]  ;;  %s1354_s6 = sshll.u32 %s2121_s27, 4  ;;  %s1355_s6 = int_to_ptr.vmem [resolvable:$true] %s1354_s6 }
  0xba   :  { %v986_v57 = vpop.f32.mrf.mxu1 }
  0xbb   :  { %v987_v3 = vadd.f32 %v986_v57, %v974_v40  ;;  %v999_v4 = vpop.f32.mrf.mxu2 }
  0xbd   :  { %v1000_v51 = vadd.f32 %v999_v4, %v987_v3 }
  0xbe   :  { %v975_v50 = vpop.f32.mrf.mxu0 }
  0xbf   :  { %v1012_v13 = vpop.f32.mrf.mxu3 }
  0xc0   :  { %v1013_v16 = vadd.f32 %v1012_v13, %v1000_v51 }
  0xc2   :  { %v988_v7 = vpop.f32.mrf.mxu1 }
  0xc3   :  { %v1001_v19 = vpop.f32.mrf.mxu2 }
  0xc6   :  { %v1025_v21 = vpop.f32.mrf.mxu0 }
  0xc7   :  { %v1014_v20 = vpop.f32.mrf.mxu3  ;;  %v1026_v22 = vadd.f32 %v1025_v21, %v1013_v16 }
  0xca   :  { %v1038_v23 = vpop.f32.mrf.mxu1 }
  0xcb   :  { %v1039_v24 = vadd.f32 %v1038_v23, %v1026_v22  ;;  %v1051_v27 = vpop.f32.mrf.mxu2 }
  0xcd   :  { %v1052_v28 = vadd.f32 %v1051_v27, %v1039_v24 }
  0xce   :  { %v1027_v30 = vpop.f32.mrf.mxu0 }
  0xcf   :  { %v1064_v29 = vpop.f32.mrf.mxu3 }
  0xd0   :  { %v1065_v34 = vadd.f32 %v1064_v29, %v1052_v28 }
  0xd2   :  { %v1040_v35 = vpop.f32.mrf.mxu1  ;;  %v1172_v37 = vmax.f32 %v1065_v34, 0.0 }
  0xd3   :  { %v1053_v55 = vpop.f32.mrf.mxu2 }
  0xd4   :  { %v1174_v41 = vpack.c.bf16 %v1172_v37, %v1172_v37 }
  0xd6   :  { %1316 = vmatmul.bf16.vlgmr.msra.gmra.mxu0 %v1174_v41 }
  0xd7   :  { %v1066_v56 = vpop.f32.mrf.mxu3 }
  0xe0   :  { %v1077_v8 = vpop.f32.mrf.mxu0 }
  0xe1   :  { %v1078_v52 = vadd.f32 %v1077_v8, %v256_v46 }
  0xe2   :  { %v1090_v63 = vpop.f32.mrf.mxu1 }
  0xe3   :  { %v1091_v58 = vadd.f32 %v1090_v63, %v1078_v52 }
  0xe8   :  { %v1103_v0 = vpop.f32.mrf.mxu2  ;;  %v1079_v43 = vpop.f32.mrf.mxu0 }
  0xe9   :  { %v1104_v59 = vadd.f32 %v1103_v0, %v1091_v58 }
  0xea   :  { %v1092_v44 = vpop.f32.mrf.mxu1 }
  0xeb   :  { %v1116_v42 = vpop.f32.mrf.mxu3 }
  0xec   :  { %v1117_v31 = vadd.f32 %v1116_v42, %v1104_v59 }
  0xf0   :  { %v1105_v47 = vpop.f32.mrf.mxu2 }
  0xf3   :  { %v1118_v49 = vpop.f32.mrf.mxu3 }
 0x100   :  { %v1129_v32 = vpop.f32.mrf.mxu0 }
 0x101   :  { %v1130_v38 = vadd.f32 %v1129_v32, %v1117_v31 }
 0x102   :  { %v1142_v33 = vpop.f32.mrf.mxu1 }
 0x103   :  { %v1143_v5 = vadd.f32 %v1142_v33, %v1130_v38 }
 0x108   :  { %v1155_v48 = vpop.f32.mrf.mxu2  ;;  %v1131_v61 = vpop.f32.mrf.mxu0 }
 0x109   :  { %v1168_v53 = vpop.f32.mrf.mxu3  ;;  %v1156_v60 = vadd.f32 %v1155_v48, %v1143_v5 }
 0x10a   :  { %v1144_v6 = vpop.f32.mrf.mxu1 }
 0x10b   :  { %v1169_v14 = vadd.f32 %v1168_v53, %v1156_v60 }
 0x10d   :  { %v1173_v12 = vmax.f32 %v1169_v14, 0.0 }
 0x10f   :  { %v1175_v11 = vpack.c.bf16 %v1173_v12, %v1173_v12 }
 0x110   :  { %v1157_v17 = vpop.f32.mrf.mxu2 }
 0x111   :  { %v1170_v18 = vpop.f32.mrf.mxu3  ;;  %1329 = vmatmul.bf16.vlgmr.msra.gmra.mxu1 %v1175_v11 }
 0x153   :  { %v1317_v15 = vpop.f32.mrf.mxu0 }
 0x154   :  { %v1318_v39 = vadd.f32 %v2088_v2, %v1317_v15 }
 0x15b   :  { %v1319_v1 = vpop.f32.mrf.mxu0 }
 0x18e   :  { %v1330_v40 = vpop.f32.mrf.mxu1 }
 0x18f   :  { %v1331_v57 = vadd.f32 %v1330_v40, %v1318_v39 }
 0x191   :  { %v1335_v3 = vsel %vm1334_vm1, %v1331_v57, -inf }
 0x192   :  { %1336 = vmax.xlane.f32.xlu0 %v1335_v3 }
 0x196   :  { %v1332_v4 = vpop.f32.mrf.mxu1 }
 0x205   :  { %v1337_v13 = vpop.xlane.xlu0 %1336 }
 0x206   :  { %v1338_v50 = vsub.f32 %v1331_v57, %v1337_v13 }
 0x208   :  { %v1339_v51 = vmul.f32 1.442695, %v1338_v50 }
 0x20a   :  { %2089 = vpow2.f32 %v1339_v51 }
 0x210   :  { %v2090_v7 = vpop.eup %2089 }
 0x211   :  { %v1341_v16 = vsel %vm1334_vm1, %v2090_v7, 0.0 }
 0x212   :  { %1342 = vadd.xlane.f32.xlu0 %v1341_v16 }
 0x285   :  { %v1343_v19 = vpop.xlane.xlu0 %1342 }
 0x286   :  { %2091 = vlog2.f32 %v1343_v19 }
 0x28c   :  { %v2092_v20 = vpop.eup %2091 }
 0x28d   :  { %v1345_v21 = vmul.f32 0.6931472, %v2092_v20 }
 0x28f   :  { %v1346_v22 = vadd.f32 %v1345_v21, %v1337_v13 }
 0x291   :  { %v1347_v23 = vsub.f32 %v1331_v57, %v1346_v22 }
 0x293   :  { %1348 = vst [vmem:[#allocation2] sm:$0x3] %v1347_v23 }
 0x294   :  { %1359 = dma.vmem_to_hbm [thread:$0]  %s1355_s6, 32, %s1357_s30, [#allocation3]  }
 0x295   :  { %2117 = dma.done.wait [#allocation3], 32  }
 0x296   :  { %2118 = vsyncadd [#allocation3], 4294967264 }
 0x297   :  { %1364 = vsyncpa [#allocation3], 1 }

</bundles_post_ra>
